<compile_context>
chip_gen: v5e
topology: v5e:2x2
jax: 0.10.0
libtpu: 0.0.40
codegen_flags: <defaults>
</compile_context>

<pallas_src>
import math

import jax
import jax.numpy as jnp
from jax.experimental import pallas as pl
from jax.experimental.pallas import tpu as pltpu


# ----------------------------------------------------------------------------
# Fused kernel (built per static config: num_layers, T, B, H)
# ----------------------------------------------------------------------------
def _make_fused_kernel(num_layers, T, B, H):
    H3 = 3 * H
    H6 = 6 * H

    def gru_gates(gx, gh, b_hn, h):
        """One GRU cell update for one direction.

        gx : (B, 3H) f32  precomputed x-projection, columns [r | z | n],
                          with b_ih and (for r, z) b_hh already folded in.
        gh : (B, 3H) f32  h-projection (no biases).
        b_hn : (1, H) f32 the n-gate b_hh (must stay inside r * (...)).
        """
        r = jax.nn.sigmoid(gx[:, 0:H] + gh[:, 0:H])
        z = jax.nn.sigmoid(gx[:, H:2 * H] + gh[:, H:2 * H])
        n = jnp.tanh(gx[:, 2 * H:H3] + r * (gh[:, 2 * H:H3] + b_hn))
        return (1.0 - z) * n + z * h

    def kernel(*refs):
        # ---- unpack refs -----------------------------------------------------
        idx = 0
        x_ref = refs[idx]; idx += 1
        w_ih0_ref = refs[idx]; idx += 1                 # (D0, 6H)      bf16
        if num_layers > 1:
            w_ih_rest_ref = refs[idx]; idx += 1         # (L-1, 2H, 6H) bf16
        w_hh_ref = refs[idx]; idx += 1                  # (L, 2H, 6H)   bf16 block-diag
        b_gx_ref = refs[idx]; idx += 1                  # (L, 1, 6H)    f32
        b_hn_ref = refs[idx]; idx += 1                  # (L, 1, 2H)    f32
        w1_ref, b1_ref, w2_ref, b2_ref = refs[idx:idx + 4]; idx += 4
        out_ref = refs[idx]

        # ---- helpers ---------------------------------------------------------
        def input_proj(layer, in_f, in_b):
            """Batched input projection for BOTH directions of one layer.

            layer 0 : in_f = flattened input (B*T, D0) bf16, in_b unused.
            layer>0 : in_f / in_b = previous layer's fwd / bwd output
                      sequences, (B*T, H) bf16 each (no concat needed).
            Returns gx (B, T, 6H) f32 with b_ih (+ b_hh for r,z) folded in.
            """
            if layer == 0:
                gx = jnp.dot(in_f, w_ih0_ref[...],
                             preferred_element_type=jnp.float32)
            else:
                w = w_ih_rest_ref[layer - 1]            # (2H, 6H) bf16
                gx = (jnp.dot(in_f, w[0:H, :],
                              preferred_element_type=jnp.float32)
                      + jnp.dot(in_b, w[H:2 * H, :],
                                preferred_element_type=jnp.float32))
            return gx.reshape(B, T, H6) + b_gx_ref[layer]

        def run_layer_full(layer, in_f, in_b):
            """Bidirectional layer producing the full output sequence."""
            gx = input_proj(layer, in_f, in_b)          # (B, T, 6H) f32
            w_hh = w_hh_ref[layer]                      # (2H, 6H) bf16 block-diag
            b_hn_f = b_hn_ref[layer][:, 0:H]
            b_hn_b = b_hn_ref[layer][:, H:2 * H]

            h_f = jnp.zeros((B, H), jnp.float32)
            h_b = jnp.zeros((B, H), jnp.float32)
            outs_f = [None] * T
            outs_b = [None] * T
            for t in range(T):                          # static unrolled loop
                tb = T - 1 - t                          # in-kernel time reversal
                if t == 0:
                    gh = jnp.zeros((B, H6), jnp.float32)   # h == 0 -> skip matmul
                else:
                    h_cat = jnp.concatenate([h_f, h_b],
                                            axis=-1).astype(jnp.bfloat16)
                    gh = jnp.dot(h_cat, w_hh,
                                 preferred_element_type=jnp.float32)
                h_f = gru_gates(gx[:, t, 0:H3], gh[:, 0:H3], b_hn_f, h_f)
                h_b = gru_gates(gx[:, tb, H3:H6], gh[:, H3:H6], b_hn_b, h_b)
                outs_f[t] = h_f
                outs_b[tb] = h_b

            out_f = jnp.stack(outs_f, axis=1).reshape(B * T, H)
            out_b = jnp.stack(outs_b, axis=1).reshape(B * T, H)
            return out_f.astype(jnp.bfloat16), out_b.astype(jnp.bfloat16)

        def run_layer_last(layer, in_f, in_b):
            """Last layer: only out[:, -1, :] is needed downstream."""
            gx = input_proj(layer, in_f, in_b)          # (B, T, 6H) f32
            w_hh_f = w_hh_ref[layer][0:H, 0:H3]         # forward block (H, 3H)
            b_hn_f = b_hn_ref[layer][:, 0:H]
            b_hn_b = b_hn_ref[layer][:, H:2 * H]

            h_f = jnp.zeros((B, H), jnp.float32)
            for t in range(T):
                if t == 0:
                    gh = jnp.zeros((B, H3), jnp.float32)
                else:
                    gh = jnp.dot(h_f.astype(jnp.bfloat16), w_hh_f,
                                 preferred_element_type=jnp.float32)
                h_f = gru_gates(gx[:, t, 0:H3], gh, b_hn_f, h_f)

            # Reverse-direction output at position T-1 == ONE step from h = 0;
            # since h = 0 the recurrent matmul is identically zero -> skip it.
            h_b = gru_gates(gx[:, T - 1, H3:H6],
                            jnp.zeros((B, H3), jnp.float32), b_hn_b,
                            jnp.zeros((B, H), jnp.float32))
            return jnp.concatenate([h_f, h_b], axis=-1)   # (B, 2H) f32

        # ---- forward pass ----------------------------------------------------
        D0 = x_ref.shape[-1]
        x_flat = x_ref[...].reshape(B * T, D0).astype(jnp.bfloat16)

        if num_layers == 1:
            last = run_layer_last(0, x_flat, None)
        else:
            seq_f, seq_b = run_layer_full(0, x_flat, None)
            for l in range(1, num_layers - 1):
                seq_f, seq_b = run_layer_full(l, seq_f, seq_b)
            last = run_layer_last(num_layers - 1, seq_f, seq_b)

        # FC head: Linear(2H->128) -> ReLU -> (Dropout = id in eval) -> Linear(128->C)
        h1 = jnp.dot(last.astype(jnp.bfloat16), w1_ref[...],
                     preferred_element_type=jnp.float32) + b1_ref[...]
        h1 = jnp.maximum(h1, 0.0)
        out_ref[...] = (jnp.dot(h1.astype(jnp.bfloat16), w2_ref[...],
                                preferred_element_type=jnp.float32)
                        + b2_ref[...])

    return kernel


# ----------------------------------------------------------------------------
# Wrapper
# ----------------------------------------------------------------------------
def audio_emotion_net_forward(x_btd, params):
    """x_btd: (B, T, input_size) batch-first, like the PyTorch module."""
    x_btd = x_btd.astype(jnp.float32)
    B, T, _ = x_btd.shape
    num_layers = params["w_hh_bd"].shape[0]
    H = params["w_hh_bd"].shape[1] // 2
    num_classes = params["b2"].shape[-1]

    flat = [x_btd, params["w_ih0"]]
    if num_layers > 1:
        flat.append(params["w_ih_rest"])
    flat += [params["w_hh_bd"], params["b_gx"], params["b_hn"],
             params["w1_t"], params["b1"], params["w2_t"], params["b2"]]

    vmem = pl.BlockSpec(memory_space=pltpu.MemorySpace.VMEM)
    kernel = _make_fused_kernel(num_layers, T, B, H)
    return pl.pallas_call(
        kernel,
        out_shape=jax.ShapeDtypeStruct((B, num_classes), jnp.float32),
        in_specs=[vmem] * len(flat),
        out_specs=vmem,
    )(*flat)


# ----------------------------------------------------------------------------
# Parameter initialization (PyTorch-style uniform), packed kernel-ready:
#   w_ih0     : (D0, 6H)          [fwd r|z|n | bwd r|z|n], pre-transposed, bf16
#   w_ih_rest : (L-1, 2H, 6H)     rows 0..H-1 multiply fwd feats, H..2H-1 bwd
#   w_hh_bd   : (L, 2H, 6H)       block-diagonal [W_hh_fwd^T, W_hh_bwd^T], bf16
#   b_gx      : (L, 1, 6H)        b_ih + [b_hr, b_hz, 0]   (per direction)
#   b_hn      : (L, 1, 2H)        n-gate b_hh              (per direction)
# When importing a real PyTorch checkpoint, split (W_ir|W_iz|W_in) in r,z,n order.
# ----------------------------------------------------------------------------
def init_params(key, input_size, hidden_size, num_layers, num_classes,
                fc_hidden=128):
    H = hidden_size
    k_gru = 1.0 / math.sqrt(H)

    def uni(k, shape, bound):
        return jax.random.uniform(k, shape, jnp.float32, -bound, bound)

    w_ih_layers, w_hh_bd, b_gx, b_hn = [], [], [], []
    for layer in range(num_layers):
        d_in = input_size if layer == 0 else 2 * H
        ih_dirs, hh_blocks, bgx_dirs, bhn_dirs = [], [], [], []
        for _direction in range(2):                     # 0 = fwd, 1 = bwd
            key, k0, k1, k2, k3 = jax.random.split(key, 5)
            w_ih = uni(k0, (3 * H, d_in), k_gru)        # PyTorch layout, rows r|z|n
            w_hh = uni(k1, (3 * H, H), k_gru)
            b_ih = uni(k2, (3 * H,), k_gru)
            b_hh = uni(k3, (3 * H,), k_gru)
            ih_dirs.append(w_ih.T)                      # (d_in, 3H)
            hh_blocks.append(w_hh.T)                    # (H, 3H)
            bgx_dirs.append(b_ih + jnp.concatenate(
                [b_hh[:H], b_hh[H:2 * H], jnp.zeros((H,), jnp.float32)]))
            bhn_dirs.append(b_hh[2 * H:])
        w_ih_layers.append(jnp.concatenate(ih_dirs, axis=1))        # (d_in, 6H)
        bd = jnp.zeros((2 * H, 6 * H), jnp.float32)
        bd = bd.at[:H, :3 * H].set(hh_blocks[0])
        bd = bd.at[H:, 3 * H:].set(hh_blocks[1])
        w_hh_bd.append(bd)
        b_gx.append(jnp.concatenate(bgx_dirs)[None, :])             # (1, 6H)
        b_hn.append(jnp.concatenate(bhn_dirs)[None, :])             # (1, 2H)

    params = dict(
        w_ih0=w_ih_layers[0].astype(jnp.bfloat16),
        w_hh_bd=jnp.stack(w_hh_bd).astype(jnp.bfloat16),
        b_gx=jnp.stack(b_gx),
        b_hn=jnp.stack(b_hn),
    )
    if num_layers > 1:
        params["w_ih_rest"] = jnp.stack(w_ih_layers[1:]).astype(jnp.bfloat16)

    k_fc1 = 1.0 / math.sqrt(2 * H)
    k_fc2 = 1.0 / math.sqrt(fc_hidden)
    key, k0, k1, k2, k3 = jax.random.split(key, 5)
    params.update(
        w1_t=uni(k0, (2 * H, fc_hidden), k_fc1).astype(jnp.bfloat16),
        b1=uni(k1, (1, fc_hidden), k_fc1),
        w2_t=uni(k2, (fc_hidden, num_classes), k_fc2).astype(jnp.bfloat16),
        b2=uni(k3, (1, num_classes), k_fc2),
    )
    return params


# ----------------------------------------------------------------------------
if __name__ == "__main__":
    # Small shapes consistent with the module's forward pass.
    B, T = 2, 8
    INPUT_SIZE = 32
    HIDDEN_SIZE = 32
    NUM_LAYERS = 3
    NUM_CLASSES = 2

    key = jax.random.PRNGKey(0)
    key_x, key_p = jax.random.split(key)
    x = jax.random.normal(key_x, (B, T, INPUT_SIZE), jnp.float32)
    params = init_params(key_p, INPUT_SIZE, HIDDEN_SIZE, NUM_LAYERS,
                         NUM_CLASSES)

    logits = audio_emotion_net_forward(x, params)
    logits = jax.block_until_ready(logits)
    assert logits.shape == (B, NUM_CLASSES)
    assert logits.dtype == jnp.float32
    print("KERNEL_OK")
</pallas_src>

<mosaic_0001>
module attributes {stable_mosaic.version = 11 : i64} {
  func.func @kernel(%arg0: memref<2x8x32xf32, #tpu.memory_space<vmem>>, %arg1: memref<32x192xbf16, #tpu.memory_space<vmem>>, %arg2: memref<2x64x192xbf16, #tpu.memory_space<vmem>>, %arg3: memref<3x64x192xbf16, #tpu.memory_space<vmem>>, %arg4: memref<3x1x192xf32, #tpu.memory_space<vmem>>, %arg5: memref<3x1x64xf32, #tpu.memory_space<vmem>>, %arg6: memref<64x128xbf16, #tpu.memory_space<vmem>>, %arg7: memref<1x128xf32, #tpu.memory_space<vmem>>, %arg8: memref<128x2xbf16, #tpu.memory_space<vmem>>, %arg9: memref<1x2xf32, #tpu.memory_space<vmem>>, %arg10: memref<2x2xf32, #tpu.memory_space<vmem>>) attributes {dimension_semantics = [], scalar_prefetch = 0 : i64, scratch_operands = 0 : i64, tpu.core_type = #tpu.core_type<tc>} {
    %c0 = arith.constant 0 : index
    %c0_0 = arith.constant 0 : index
    %c0_1 = arith.constant 0 : index
    %0 = vector.load %arg0[%c0, %c0_0, %c0_1] : memref<2x8x32xf32, #tpu.memory_space<vmem>>, vector<2x8x32xf32>
    %1 = vector.shape_cast %0 : vector<2x8x32xf32> to vector<16x32xf32>
    %2 = arith.truncf %1 : vector<16x32xf32> to vector<16x32xbf16>
    %c0_2 = arith.constant 0 : index
    %c0_3 = arith.constant 0 : index
    %3 = vector.load %arg1[%c0_2, %c0_3] : memref<32x192xbf16, #tpu.memory_space<vmem>>, vector<32x192xbf16>
    %cst = arith.constant dense<0.000000e+00> : vector<16x192xf32>
    %4 = tpu.matmul %2, %3, %cst {dimension_numbers = #tpu.dot_dimension_numbers<[1], [0], [0], [1], [0, 0, 1, 1], [], []>} : vector<16x32xbf16>, vector<32x192xbf16>, vector<16x192xf32> -> vector<16x192xf32>
    %5 = vector.shape_cast %4 : vector<16x192xf32> to vector<2x8x192xf32>
    %c0_4 = arith.constant 0 : index
    %c0_5 = arith.constant 0 : index
    %c0_6 = arith.constant 0 : index
    %6 = vector.load %arg4[%c0_4, %c0_5, %c0_6] : memref<3x1x192xf32, #tpu.memory_space<vmem>>, vector<1x1x192xf32>
    %7 = vector.shape_cast %6 : vector<1x1x192xf32> to vector<1x192xf32>
    %8 = vector.shape_cast %7 : vector<1x192xf32> to vector<1x1x192xf32>
    %9 = vector.broadcast %8 : vector<1x1x192xf32> to vector<2x8x192xf32>
    %10 = arith.addf %5, %9 : vector<2x8x192xf32>
    %c0_7 = arith.constant 0 : index
    %c0_8 = arith.constant 0 : index
    %c0_9 = arith.constant 0 : index
    %11 = vector.load %arg3[%c0_7, %c0_8, %c0_9] : memref<3x64x192xbf16, #tpu.memory_space<vmem>>, vector<1x64x192xbf16>
    %12 = vector.shape_cast %11 : vector<1x64x192xbf16> to vector<64x192xbf16>
    %c0_10 = arith.constant 0 : index
    %c0_11 = arith.constant 0 : index
    %c0_12 = arith.constant 0 : index
    %13 = vector.load %arg5[%c0_10, %c0_11, %c0_12] : memref<3x1x64xf32, #tpu.memory_space<vmem>>, vector<1x1x64xf32>
    %14 = vector.shape_cast %13 : vector<1x1x64xf32> to vector<1x64xf32>
    %15 = vector.extract_strided_slice %14 {offsets = [0, 0], sizes = [1, 32], strides = [1, 1]} : vector<1x64xf32> to vector<1x32xf32>
    %c0_13 = arith.constant 0 : index
    %c0_14 = arith.constant 0 : index
    %c0_15 = arith.constant 0 : index
    %16 = vector.load %arg5[%c0_13, %c0_14, %c0_15] : memref<3x1x64xf32, #tpu.memory_space<vmem>>, vector<1x1x64xf32>
    %17 = vector.shape_cast %16 : vector<1x1x64xf32> to vector<1x64xf32>
    %18 = vector.extract_strided_slice %17 {offsets = [0, 32], sizes = [1, 32], strides = [1, 1]} : vector<1x64xf32> to vector<1x32xf32>
    %cst_16 = arith.constant 0.000000e+00 : f32
    %19 = vector.broadcast %cst_16 : f32 to vector<2x32xf32>
    %cst_17 = arith.constant 0.000000e+00 : f32
    %20 = vector.broadcast %cst_17 : f32 to vector<2x32xf32>
    %cst_18 = arith.constant 0.000000e+00 : f32
    %21 = vector.broadcast %cst_18 : f32 to vector<2x192xf32>
    %22 = vector.extract_strided_slice %10 {offsets = [0, 0, 0], sizes = [2, 1, 96], strides = [1, 1, 1]} : vector<2x8x192xf32> to vector<2x1x96xf32>
    %23 = vector.shape_cast %22 : vector<2x1x96xf32> to vector<2x96xf32>
    %24 = vector.extract_strided_slice %21 {offsets = [0, 0], sizes = [2, 96], strides = [1, 1]} : vector<2x192xf32> to vector<2x96xf32>
    %25 = vector.extract_strided_slice %23 {offsets = [0, 0], sizes = [2, 32], strides = [1, 1]} : vector<2x96xf32> to vector<2x32xf32>
    %26 = vector.extract_strided_slice %24 {offsets = [0, 0], sizes = [2, 32], strides = [1, 1]} : vector<2x96xf32> to vector<2x32xf32>
    %27 = arith.addf %25, %26 : vector<2x32xf32>
    %28 = arith.negf %27 : vector<2x32xf32>
    %29 = math.exp %28 : vector<2x32xf32>
    %cst_19 = arith.constant 1.000000e+00 : f32
    %30 = vector.broadcast %cst_19 : f32 to vector<2x32xf32>
    %31 = arith.addf %30, %29 : vector<2x32xf32>
    %32 = arith.divf %30, %31 : vector<2x32xf32>
    %33 = vector.extract_strided_slice %23 {offsets = [0, 32], sizes = [2, 32], strides = [1, 1]} : vector<2x96xf32> to vector<2x32xf32>
    %34 = vector.extract_strided_slice %24 {offsets = [0, 32], sizes = [2, 32], strides = [1, 1]} : vector<2x96xf32> to vector<2x32xf32>
    %35 = arith.addf %33, %34 : vector<2x32xf32>
    %36 = arith.negf %35 : vector<2x32xf32>
    %37 = math.exp %36 : vector<2x32xf32>
    %cst_20 = arith.constant 1.000000e+00 : f32
    %38 = vector.broadcast %cst_20 : f32 to vector<2x32xf32>
    %39 = arith.addf %38, %37 : vector<2x32xf32>
    %40 = arith.divf %38, %39 : vector<2x32xf32>
    %41 = vector.extract_strided_slice %23 {offsets = [0, 64], sizes = [2, 32], strides = [1, 1]} : vector<2x96xf32> to vector<2x32xf32>
    %42 = vector.extract_strided_slice %24 {offsets = [0, 64], sizes = [2, 32], strides = [1, 1]} : vector<2x96xf32> to vector<2x32xf32>
    %43 = vector.broadcast %15 : vector<1x32xf32> to vector<2x32xf32>
    %44 = arith.addf %42, %43 : vector<2x32xf32>
    %45 = arith.mulf %32, %44 : vector<2x32xf32>
    %46 = arith.addf %41, %45 : vector<2x32xf32>
    %47 = math.tanh %46 : vector<2x32xf32>
    %cst_21 = arith.constant 1.000000e+00 : f32
    %48 = vector.broadcast %cst_21 : f32 to vector<2x32xf32>
    %49 = arith.subf %48, %40 : vector<2x32xf32>
    %50 = arith.mulf %49, %47 : vector<2x32xf32>
    %51 = arith.mulf %40, %19 : vector<2x32xf32>
    %52 = arith.addf %50, %51 : vector<2x32xf32>
    %53 = vector.extract_strided_slice %10 {offsets = [0, 7, 96], sizes = [2, 1, 96], strides = [1, 1, 1]} : vector<2x8x192xf32> to vector<2x1x96xf32>
    %54 = vector.shape_cast %53 : vector<2x1x96xf32> to vector<2x96xf32>
    %55 = vector.extract_strided_slice %21 {offsets = [0, 96], sizes = [2, 96], strides = [1, 1]} : vector<2x192xf32> to vector<2x96xf32>
    %56 = vector.extract_strided_slice %54 {offsets = [0, 0], sizes = [2, 32], strides = [1, 1]} : vector<2x96xf32> to vector<2x32xf32>
    %57 = vector.extract_strided_slice %55 {offsets = [0, 0], sizes = [2, 32], strides = [1, 1]} : vector<2x96xf32> to vector<2x32xf32>
    %58 = arith.addf %56, %57 : vector<2x32xf32>
    %59 = arith.negf %58 : vector<2x32xf32>
    %60 = math.exp %59 : vector<2x32xf32>
    %cst_22 = arith.constant 1.000000e+00 : f32
    %61 = vector.broadcast %cst_22 : f32 to vector<2x32xf32>
    %62 = arith.addf %61, %60 : vector<2x32xf32>
    %63 = arith.divf %61, %62 : vector<2x32xf32>
    %64 = vector.extract_strided_slice %54 {offsets = [0, 32], sizes = [2, 32], strides = [1, 1]} : vector<2x96xf32> to vector<2x32xf32>
    %65 = vector.extract_strided_slice %55 {offsets = [0, 32], sizes = [2, 32], strides = [1, 1]} : vector<2x96xf32> to vector<2x32xf32>
    %66 = arith.addf %64, %65 : vector<2x32xf32>
    %67 = arith.negf %66 : vector<2x32xf32>
    %68 = math.exp %67 : vector<2x32xf32>
    %cst_23 = arith.constant 1.000000e+00 : f32
    %69 = vector.broadcast %cst_23 : f32 to vector<2x32xf32>
    %70 = arith.addf %69, %68 : vector<2x32xf32>
    %71 = arith.divf %69, %70 : vector<2x32xf32>
    %72 = vector.extract_strided_slice %54 {offsets = [0, 64], sizes = [2, 32], strides = [1, 1]} : vector<2x96xf32> to vector<2x32xf32>
    %73 = vector.extract_strided_slice %55 {offsets = [0, 64], sizes = [2, 32], strides = [1, 1]} : vector<2x96xf32> to vector<2x32xf32>
    %74 = vector.broadcast %18 : vector<1x32xf32> to vector<2x32xf32>
    %75 = arith.addf %73, %74 : vector<2x32xf32>
    %76 = arith.mulf %63, %75 : vector<2x32xf32>
    %77 = arith.addf %72, %76 : vector<2x32xf32>
    %78 = math.tanh %77 : vector<2x32xf32>
    %cst_24 = arith.constant 1.000000e+00 : f32
    %79 = vector.broadcast %cst_24 : f32 to vector<2x32xf32>
    %80 = arith.subf %79, %71 : vector<2x32xf32>
    %81 = arith.mulf %80, %78 : vector<2x32xf32>
    %82 = arith.mulf %71, %20 : vector<2x32xf32>
    %83 = arith.addf %81, %82 : vector<2x32xf32>
    %84 = tpu.concatenate %52, %83 in 1 : vector<2x32xf32>, vector<2x32xf32> -> vector<2x64xf32>
    %85 = arith.truncf %84 : vector<2x64xf32> to vector<2x64xbf16>
    %cst_25 = arith.constant dense<0.000000e+00> : vector<2x192xf32>
    %86 = tpu.matmul %85, %12, %cst_25 {dimension_numbers = #tpu.dot_dimension_numbers<[1], [0], [0], [1], [0, 0, 1, 1], [], []>} : vector<2x64xbf16>, vector<64x192xbf16>, vector<2x192xf32> -> vector<2x192xf32>
    %87 = vector.extract_strided_slice %10 {offsets = [0, 1, 0], sizes = [2, 1, 96], strides = [1, 1, 1]} : vector<2x8x192xf32> to vector<2x1x96xf32>
    %88 = vector.shape_cast %87 : vector<2x1x96xf32> to vector<2x96xf32>
    %89 = vector.extract_strided_slice %86 {offsets = [0, 0], sizes = [2, 96], strides = [1, 1]} : vector<2x192xf32> to vector<2x96xf32>
    %90 = vector.extract_strided_slice %88 {offsets = [0, 0], sizes = [2, 32], strides = [1, 1]} : vector<2x96xf32> to vector<2x32xf32>
    %91 = vector.extract_strided_slice %89 {offsets = [0, 0], sizes = [2, 32], strides = [1, 1]} : vector<2x96xf32> to vector<2x32xf32>
    %92 = arith.addf %90, %91 : vector<2x32xf32>
    %93 = arith.negf %92 : vector<2x32xf32>
    %94 = math.exp %93 : vector<2x32xf32>
    %cst_26 = arith.constant 1.000000e+00 : f32
    %95 = vector.broadcast %cst_26 : f32 to vector<2x32xf32>
    %96 = arith.addf %95, %94 : vector<2x32xf32>
    %97 = arith.divf %95, %96 : vector<2x32xf32>
    %98 = vector.extract_strided_slice %88 {offsets = [0, 32], sizes = [2, 32], strides = [1, 1]} : vector<2x96xf32> to vector<2x32xf32>
    %99 = vector.extract_strided_slice %89 {offsets = [0, 32], sizes = [2, 32], strides = [1, 1]} : vector<2x96xf32> to vector<2x32xf32>
    %100 = arith.addf %98, %99 : vector<2x32xf32>
    %101 = arith.negf %100 : vector<2x32xf32>
    %102 = math.exp %101 : vector<2x32xf32>
    %cst_27 = arith.constant 1.000000e+00 : f32
    %103 = vector.broadcast %cst_27 : f32 to vector<2x32xf32>
    %104 = arith.addf %103, %102 : vector<2x32xf32>
    %105 = arith.divf %103, %104 : vector<2x32xf32>
    %106 = vector.extract_strided_slice %88 {offsets = [0, 64], sizes = [2, 32], strides = [1, 1]} : vector<2x96xf32> to vector<2x32xf32>
    %107 = vector.extract_strided_slice %89 {offsets = [0, 64], sizes = [2, 32], strides = [1, 1]} : vector<2x96xf32> to vector<2x32xf32>
    %108 = vector.broadcast %15 : vector<1x32xf32> to vector<2x32xf32>
    %109 = arith.addf %107, %108 : vector<2x32xf32>
    %110 = arith.mulf %97, %109 : vector<2x32xf32>
    %111 = arith.addf %106, %110 : vector<2x32xf32>
    %112 = math.tanh %111 : vector<2x32xf32>
    %cst_28 = arith.constant 1.000000e+00 : f32
    %113 = vector.broadcast %cst_28 : f32 to vector<2x32xf32>
    %114 = arith.subf %113, %105 : vector<2x32xf32>
    %115 = arith.mulf %114, %112 : vector<2x32xf32>
    %116 = arith.mulf %105, %52 : vector<2x32xf32>
    %117 = arith.addf %115, %116 : vector<2x32xf32>
    %118 = vector.extract_strided_slice %10 {offsets = [0, 6, 96], sizes = [2, 1, 96], strides = [1, 1, 1]} : vector<2x8x192xf32> to vector<2x1x96xf32>
    %119 = vector.shape_cast %118 : vector<2x1x96xf32> to vector<2x96xf32>
    %120 = vector.extract_strided_slice %86 {offsets = [0, 96], sizes = [2, 96], strides = [1, 1]} : vector<2x192xf32> to vector<2x96xf32>
    %121 = vector.extract_strided_slice %119 {offsets = [0, 0], sizes = [2, 32], strides = [1, 1]} : vector<2x96xf32> to vector<2x32xf32>
    %122 = vector.extract_strided_slice %120 {offsets = [0, 0], sizes = [2, 32], strides = [1, 1]} : vector<2x96xf32> to vector<2x32xf32>
    %123 = arith.addf %121, %122 : vector<2x32xf32>
    %124 = arith.negf %123 : vector<2x32xf32>
    %125 = math.exp %124 : vector<2x32xf32>
    %cst_29 = arith.constant 1.000000e+00 : f32
    %126 = vector.broadcast %cst_29 : f32 to vector<2x32xf32>
    %127 = arith.addf %126, %125 : vector<2x32xf32>
    %128 = arith.divf %126, %127 : vector<2x32xf32>
    %129 = vector.extract_strided_slice %119 {offsets = [0, 32], sizes = [2, 32], strides = [1, 1]} : vector<2x96xf32> to vector<2x32xf32>
    %130 = vector.extract_strided_slice %120 {offsets = [0, 32], sizes = [2, 32], strides = [1, 1]} : vector<2x96xf32> to vector<2x32xf32>
    %131 = arith.addf %129, %130 : vector<2x32xf32>
    %132 = arith.negf %131 : vector<2x32xf32>
    %133 = math.exp %132 : vector<2x32xf32>
    %cst_30 = arith.constant 1.000000e+00 : f32
    %134 = vector.broadcast %cst_30 : f32 to vector<2x32xf32>
    %135 = arith.addf %134, %133 : vector<2x32xf32>
    %136 = arith.divf %134, %135 : vector<2x32xf32>
    %137 = vector.extract_strided_slice %119 {offsets = [0, 64], sizes = [2, 32], strides = [1, 1]} : vector<2x96xf32> to vector<2x32xf32>
    %138 = vector.extract_strided_slice %120 {offsets = [0, 64], sizes = [2, 32], strides = [1, 1]} : vector<2x96xf32> to vector<2x32xf32>
    %139 = vector.broadcast %18 : vector<1x32xf32> to vector<2x32xf32>
    %140 = arith.addf %138, %139 : vector<2x32xf32>
    %141 = arith.mulf %128, %140 : vector<2x32xf32>
    %142 = arith.addf %137, %141 : vector<2x32xf32>
    %143 = math.tanh %142 : vector<2x32xf32>
    %cst_31 = arith.constant 1.000000e+00 : f32
    %144 = vector.broadcast %cst_31 : f32 to vector<2x32xf32>
    %145 = arith.subf %144, %136 : vector<2x32xf32>
    %146 = arith.mulf %145, %143 : vector<2x32xf32>
    %147 = arith.mulf %136, %83 : vector<2x32xf32>
    %148 = arith.addf %146, %147 : vector<2x32xf32>
    %149 = tpu.concatenate %117, %148 in 1 : vector<2x32xf32>, vector<2x32xf32> -> vector<2x64xf32>
    %150 = arith.truncf %149 : vector<2x64xf32> to vector<2x64xbf16>
    %cst_32 = arith.constant dense<0.000000e+00> : vector<2x192xf32>
    %151 = tpu.matmul %150, %12, %cst_32 {dimension_numbers = #tpu.dot_dimension_numbers<[1], [0], [0], [1], [0, 0, 1, 1], [], []>} : vector<2x64xbf16>, vector<64x192xbf16>, vector<2x192xf32> -> vector<2x192xf32>
    %152 = vector.extract_strided_slice %10 {offsets = [0, 2, 0], sizes = [2, 1, 96], strides = [1, 1, 1]} : vector<2x8x192xf32> to vector<2x1x96xf32>
    %153 = vector.shape_cast %152 : vector<2x1x96xf32> to vector<2x96xf32>
    %154 = vector.extract_strided_slice %151 {offsets = [0, 0], sizes = [2, 96], strides = [1, 1]} : vector<2x192xf32> to vector<2x96xf32>
    %155 = vector.extract_strided_slice %153 {offsets = [0, 0], sizes = [2, 32], strides = [1, 1]} : vector<2x96xf32> to vector<2x32xf32>
    %156 = vector.extract_strided_slice %154 {offsets = [0, 0], sizes = [2, 32], strides = [1, 1]} : vector<2x96xf32> to vector<2x32xf32>
    %157 = arith.addf %155, %156 : vector<2x32xf32>
    %158 = arith.negf %157 : vector<2x32xf32>
    %159 = math.exp %158 : vector<2x32xf32>
    %cst_33 = arith.constant 1.000000e+00 : f32
    %160 = vector.broadcast %cst_33 : f32 to vector<2x32xf32>
    %161 = arith.addf %160, %159 : vector<2x32xf32>
    %162 = arith.divf %160, %161 : vector<2x32xf32>
    %163 = vector.extract_strided_slice %153 {offsets = [0, 32], sizes = [2, 32], strides = [1, 1]} : vector<2x96xf32> to vector<2x32xf32>
    %164 = vector.extract_strided_slice %154 {offsets = [0, 32], sizes = [2, 32], strides = [1, 1]} : vector<2x96xf32> to vector<2x32xf32>
    %165 = arith.addf %163, %164 : vector<2x32xf32>
    %166 = arith.negf %165 : vector<2x32xf32>
    %167 = math.exp %166 : vector<2x32xf32>
    %cst_34 = arith.constant 1.000000e+00 : f32
    %168 = vector.broadcast %cst_34 : f32 to vector<2x32xf32>
    %169 = arith.addf %168, %167 : vector<2x32xf32>
    %170 = arith.divf %168, %169 : vector<2x32xf32>
    %171 = vector.extract_strided_slice %153 {offsets = [0, 64], sizes = [2, 32], strides = [1, 1]} : vector<2x96xf32> to vector<2x32xf32>
    %172 = vector.extract_strided_slice %154 {offsets = [0, 64], sizes = [2, 32], strides = [1, 1]} : vector<2x96xf32> to vector<2x32xf32>
    %173 = vector.broadcast %15 : vector<1x32xf32> to vector<2x32xf32>
    %174 = arith.addf %172, %173 : vector<2x32xf32>
    %175 = arith.mulf %162, %174 : vector<2x32xf32>
    %176 = arith.addf %171, %175 : vector<2x32xf32>
    %177 = math.tanh %176 : vector<2x32xf32>
    %cst_35 = arith.constant 1.000000e+00 : f32
    %178 = vector.broadcast %cst_35 : f32 to vector<2x32xf32>
    %179 = arith.subf %178, %170 : vector<2x32xf32>
    %180 = arith.mulf %179, %177 : vector<2x32xf32>
    %181 = arith.mulf %170, %117 : vector<2x32xf32>
    %182 = arith.addf %180, %181 : vector<2x32xf32>
    %183 = vector.extract_strided_slice %10 {offsets = [0, 5, 96], sizes = [2, 1, 96], strides = [1, 1, 1]} : vector<2x8x192xf32> to vector<2x1x96xf32>
    %184 = vector.shape_cast %183 : vector<2x1x96xf32> to vector<2x96xf32>
    %185 = vector.extract_strided_slice %151 {offsets = [0, 96], sizes = [2, 96], strides = [1, 1]} : vector<2x192xf32> to vector<2x96xf32>
    %186 = vector.extract_strided_slice %184 {offsets = [0, 0], sizes = [2, 32], strides = [1, 1]} : vector<2x96xf32> to vector<2x32xf32>
    %187 = vector.extract_strided_slice %185 {offsets = [0, 0], sizes = [2, 32], strides = [1, 1]} : vector<2x96xf32> to vector<2x32xf32>
    %188 = arith.addf %186, %187 : vector<2x32xf32>
    %189 = arith.negf %188 : vector<2x32xf32>
    %190 = math.exp %189 : vector<2x32xf32>
    %cst_36 = arith.constant 1.000000e+00 : f32
    %191 = vector.broadcast %cst_36 : f32 to vector<2x32xf32>
    %192 = arith.addf %191, %190 : vector<2x32xf32>
    %193 = arith.divf %191, %192 : vector<2x32xf32>
    %194 = vector.extract_strided_slice %184 {offsets = [0, 32], sizes = [2, 32], strides = [1, 1]} : vector<2x96xf32> to vector<2x32xf32>
    %195 = vector.extract_strided_slice %185 {offsets = [0, 32], sizes = [2, 32], strides = [1, 1]} : vector<2x96xf32> to vector<2x32xf32>
    %196 = arith.addf %194, %195 : vector<2x32xf32>
    %197 = arith.negf %196 : vector<2x32xf32>
    %198 = math.exp %197 : vector<2x32xf32>
    %cst_37 = arith.constant 1.000000e+00 : f32
    %199 = vector.broadcast %cst_37 : f32 to vector<2x32xf32>
    %200 = arith.addf %199, %198 : vector<2x32xf32>
    %201 = arith.divf %199, %200 : vector<2x32xf32>
    %202 = vector.extract_strided_slice %184 {offsets = [0, 64], sizes = [2, 32], strides = [1, 1]} : vector<2x96xf32> to vector<2x32xf32>
    %203 = vector.extract_strided_slice %185 {offsets = [0, 64], sizes = [2, 32], strides = [1, 1]} : vector<2x96xf32> to vector<2x32xf32>
    %204 = vector.broadcast %18 : vector<1x32xf32> to vector<2x32xf32>
    %205 = arith.addf %203, %204 : vector<2x32xf32>
    %206 = arith.mulf %193, %205 : vector<2x32xf32>
    %207 = arith.addf %202, %206 : vector<2x32xf32>
    %208 = math.tanh %207 : vector<2x32xf32>
    %cst_38 = arith.constant 1.000000e+00 : f32
    %209 = vector.broadcast %cst_38 : f32 to vector<2x32xf32>
    %210 = arith.subf %209, %201 : vector<2x32xf32>
    %211 = arith.mulf %210, %208 : vector<2x32xf32>
    %212 = arith.mulf %201, %148 : vector<2x32xf32>
    %213 = arith.addf %211, %212 : vector<2x32xf32>
    %214 = tpu.concatenate %182, %213 in 1 : vector<2x32xf32>, vector<2x32xf32> -> vector<2x64xf32>
    %215 = arith.truncf %214 : vector<2x64xf32> to vector<2x64xbf16>
    %cst_39 = arith.constant dense<0.000000e+00> : vector<2x192xf32>
    %216 = tpu.matmul %215, %12, %cst_39 {dimension_numbers = #tpu.dot_dimension_numbers<[1], [0], [0], [1], [0, 0, 1, 1], [], []>} : vector<2x64xbf16>, vector<64x192xbf16>, vector<2x192xf32> -> vector<2x192xf32>
    %217 = vector.extract_strided_slice %10 {offsets = [0, 3, 0], sizes = [2, 1, 96], strides = [1, 1, 1]} : vector<2x8x192xf32> to vector<2x1x96xf32>
    %218 = vector.shape_cast %217 : vector<2x1x96xf32> to vector<2x96xf32>
    %219 = vector.extract_strided_slice %216 {offsets = [0, 0], sizes = [2, 96], strides = [1, 1]} : vector<2x192xf32> to vector<2x96xf32>
    %220 = vector.extract_strided_slice %218 {offsets = [0, 0], sizes = [2, 32], strides = [1, 1]} : vector<2x96xf32> to vector<2x32xf32>
    %221 = vector.extract_strided_slice %219 {offsets = [0, 0], sizes = [2, 32], strides = [1, 1]} : vector<2x96xf32> to vector<2x32xf32>
    %222 = arith.addf %220, %221 : vector<2x32xf32>
    %223 = arith.negf %222 : vector<2x32xf32>
    %224 = math.exp %223 : vector<2x32xf32>
    %cst_40 = arith.constant 1.000000e+00 : f32
    %225 = vector.broadcast %cst_40 : f32 to vector<2x32xf32>
    %226 = arith.addf %225, %224 : vector<2x32xf32>
    %227 = arith.divf %225, %226 : vector<2x32xf32>
    %228 = vector.extract_strided_slice %218 {offsets = [0, 32], sizes = [2, 32], strides = [1, 1]} : vector<2x96xf32> to vector<2x32xf32>
    %229 = vector.extract_strided_slice %219 {offsets = [0, 32], sizes = [2, 32], strides = [1, 1]} : vector<2x96xf32> to vector<2x32xf32>
    %230 = arith.addf %228, %229 : vector<2x32xf32>
    %231 = arith.negf %230 : vector<2x32xf32>
    %232 = math.exp %231 : vector<2x32xf32>
    %cst_41 = arith.constant 1.000000e+00 : f32
    %233 = vector.broadcast %cst_41 : f32 to vector<2x32xf32>
    %234 = arith.addf %233, %232 : vector<2x32xf32>
    %235 = arith.divf %233, %234 : vector<2x32xf32>
    %236 = vector.extract_strided_slice %218 {offsets = [0, 64], sizes = [2, 32], strides = [1, 1]} : vector<2x96xf32> to vector<2x32xf32>
    %237 = vector.extract_strided_slice %219 {offsets = [0, 64], sizes = [2, 32], strides = [1, 1]} : vector<2x96xf32> to vector<2x32xf32>
    %238 = vector.broadcast %15 : vector<1x32xf32> to vector<2x32xf32>
    %239 = arith.addf %237, %238 : vector<2x32xf32>
    %240 = arith.mulf %227, %239 : vector<2x32xf32>
    %241 = arith.addf %236, %240 : vector<2x32xf32>
    %242 = math.tanh %241 : vector<2x32xf32>
    %cst_42 = arith.constant 1.000000e+00 : f32
    %243 = vector.broadcast %cst_42 : f32 to vector<2x32xf32>
    %244 = arith.subf %243, %235 : vector<2x32xf32>
    %245 = arith.mulf %244, %242 : vector<2x32xf32>
    %246 = arith.mulf %235, %182 : vector<2x32xf32>
    %247 = arith.addf %245, %246 : vector<2x32xf32>
    %248 = vector.extract_strided_slice %10 {offsets = [0, 4, 96], sizes = [2, 1, 96], strides = [1, 1, 1]} : vector<2x8x192xf32> to vector<2x1x96xf32>
    %249 = vector.shape_cast %248 : vector<2x1x96xf32> to vector<2x96xf32>
    %250 = vector.extract_strided_slice %216 {offsets = [0, 96], sizes = [2, 96], strides = [1, 1]} : vector<2x192xf32> to vector<2x96xf32>
    %251 = vector.extract_strided_slice %249 {offsets = [0, 0], sizes = [2, 32], strides = [1, 1]} : vector<2x96xf32> to vector<2x32xf32>
    %252 = vector.extract_strided_slice %250 {offsets = [0, 0], sizes = [2, 32], strides = [1, 1]} : vector<2x96xf32> to vector<2x32xf32>
    %253 = arith.addf %251, %252 : vector<2x32xf32>
    %254 = arith.negf %253 : vector<2x32xf32>
    %255 = math.exp %254 : vector<2x32xf32>
    %cst_43 = arith.constant 1.000000e+00 : f32
    %256 = vector.broadcast %cst_43 : f32 to vector<2x32xf32>
    %257 = arith.addf %256, %255 : vector<2x32xf32>
    %258 = arith.divf %256, %257 : vector<2x32xf32>
    %259 = vector.extract_strided_slice %249 {offsets = [0, 32], sizes = [2, 32], strides = [1, 1]} : vector<2x96xf32> to vector<2x32xf32>
    %260 = vector.extract_strided_slice %250 {offsets = [0, 32], sizes = [2, 32], strides = [1, 1]} : vector<2x96xf32> to vector<2x32xf32>
    %261 = arith.addf %259, %260 : vector<2x32xf32>
    %262 = arith.negf %261 : vector<2x32xf32>
    %263 = math.exp %262 : vector<2x32xf32>
    %cst_44 = arith.constant 1.000000e+00 : f32
    %264 = vector.broadcast %cst_44 : f32 to vector<2x32xf32>
    %265 = arith.addf %264, %263 : vector<2x32xf32>
    %266 = arith.divf %264, %265 : vector<2x32xf32>
    %267 = vector.extract_strided_slice %249 {offsets = [0, 64], sizes = [2, 32], strides = [1, 1]} : vector<2x96xf32> to vector<2x32xf32>
    %268 = vector.extract_strided_slice %250 {offsets = [0, 64], sizes = [2, 32], strides = [1, 1]} : vector<2x96xf32> to vector<2x32xf32>
    %269 = vector.broadcast %18 : vector<1x32xf32> to vector<2x32xf32>
    %270 = arith.addf %268, %269 : vector<2x32xf32>
    %271 = arith.mulf %258, %270 : vector<2x32xf32>
    %272 = arith.addf %267, %271 : vector<2x32xf32>
    %273 = math.tanh %272 : vector<2x32xf32>
    %cst_45 = arith.constant 1.000000e+00 : f32
    %274 = vector.broadcast %cst_45 : f32 to vector<2x32xf32>
    %275 = arith.subf %274, %266 : vector<2x32xf32>
    %276 = arith.mulf %275, %273 : vector<2x32xf32>
    %277 = arith.mulf %266, %213 : vector<2x32xf32>
    %278 = arith.addf %276, %277 : vector<2x32xf32>
    %279 = tpu.concatenate %247, %278 in 1 : vector<2x32xf32>, vector<2x32xf32> -> vector<2x64xf32>
    %280 = arith.truncf %279 : vector<2x64xf32> to vector<2x64xbf16>
    %cst_46 = arith.constant dense<0.000000e+00> : vector<2x192xf32>
    %281 = tpu.matmul %280, %12, %cst_46 {dimension_numbers = #tpu.dot_dimension_numbers<[1], [0], [0], [1], [0, 0, 1, 1], [], []>} : vector<2x64xbf16>, vector<64x192xbf16>, vector<2x192xf32> -> vector<2x192xf32>
    %282 = vector.extract_strided_slice %10 {offsets = [0, 4, 0], sizes = [2, 1, 96], strides = [1, 1, 1]} : vector<2x8x192xf32> to vector<2x1x96xf32>
    %283 = vector.shape_cast %282 : vector<2x1x96xf32> to vector<2x96xf32>
    %284 = vector.extract_strided_slice %281 {offsets = [0, 0], sizes = [2, 96], strides = [1, 1]} : vector<2x192xf32> to vector<2x96xf32>
    %285 = vector.extract_strided_slice %283 {offsets = [0, 0], sizes = [2, 32], strides = [1, 1]} : vector<2x96xf32> to vector<2x32xf32>
    %286 = vector.extract_strided_slice %284 {offsets = [0, 0], sizes = [2, 32], strides = [1, 1]} : vector<2x96xf32> to vector<2x32xf32>
    %287 = arith.addf %285, %286 : vector<2x32xf32>
    %288 = arith.negf %287 : vector<2x32xf32>
    %289 = math.exp %288 : vector<2x32xf32>
    %cst_47 = arith.constant 1.000000e+00 : f32
    %290 = vector.broadcast %cst_47 : f32 to vector<2x32xf32>
    %291 = arith.addf %290, %289 : vector<2x32xf32>
    %292 = arith.divf %290, %291 : vector<2x32xf32>
    %293 = vector.extract_strided_slice %283 {offsets = [0, 32], sizes = [2, 32], strides = [1, 1]} : vector<2x96xf32> to vector<2x32xf32>
    %294 = vector.extract_strided_slice %284 {offsets = [0, 32], sizes = [2, 32], strides = [1, 1]} : vector<2x96xf32> to vector<2x32xf32>
    %295 = arith.addf %293, %294 : vector<2x32xf32>
    %296 = arith.negf %295 : vector<2x32xf32>
    %297 = math.exp %296 : vector<2x32xf32>
    %cst_48 = arith.constant 1.000000e+00 : f32
    %298 = vector.broadcast %cst_48 : f32 to vector<2x32xf32>
    %299 = arith.addf %298, %297 : vector<2x32xf32>
    %300 = arith.divf %298, %299 : vector<2x32xf32>
    %301 = vector.extract_strided_slice %283 {offsets = [0, 64], sizes = [2, 32], strides = [1, 1]} : vector<2x96xf32> to vector<2x32xf32>
    %302 = vector.extract_strided_slice %284 {offsets = [0, 64], sizes = [2, 32], strides = [1, 1]} : vector<2x96xf32> to vector<2x32xf32>
    %303 = vector.broadcast %15 : vector<1x32xf32> to vector<2x32xf32>
    %304 = arith.addf %302, %303 : vector<2x32xf32>
    %305 = arith.mulf %292, %304 : vector<2x32xf32>
    %306 = arith.addf %301, %305 : vector<2x32xf32>
    %307 = math.tanh %306 : vector<2x32xf32>
    %cst_49 = arith.constant 1.000000e+00 : f32
    %308 = vector.broadcast %cst_49 : f32 to vector<2x32xf32>
    %309 = arith.subf %308, %300 : vector<2x32xf32>
    %310 = arith.mulf %309, %307 : vector<2x32xf32>
    %311 = arith.mulf %300, %247 : vector<2x32xf32>
    %312 = arith.addf %310, %311 : vector<2x32xf32>
    %313 = vector.extract_strided_slice %10 {offsets = [0, 3, 96], sizes = [2, 1, 96], strides = [1, 1, 1]} : vector<2x8x192xf32> to vector<2x1x96xf32>
    %314 = vector.shape_cast %313 : vector<2x1x96xf32> to vector<2x96xf32>
    %315 = vector.extract_strided_slice %281 {offsets = [0, 96], sizes = [2, 96], strides = [1, 1]} : vector<2x192xf32> to vector<2x96xf32>
    %316 = vector.extract_strided_slice %314 {offsets = [0, 0], sizes = [2, 32], strides = [1, 1]} : vector<2x96xf32> to vector<2x32xf32>
    %317 = vector.extract_strided_slice %315 {offsets = [0, 0], sizes = [2, 32], strides = [1, 1]} : vector<2x96xf32> to vector<2x32xf32>
    %318 = arith.addf %316, %317 : vector<2x32xf32>
    %319 = arith.negf %318 : vector<2x32xf32>
    %320 = math.exp %319 : vector<2x32xf32>
    %cst_50 = arith.constant 1.000000e+00 : f32
    %321 = vector.broadcast %cst_50 : f32 to vector<2x32xf32>
    %322 = arith.addf %321, %320 : vector<2x32xf32>
    %323 = arith.divf %321, %322 : vector<2x32xf32>
    %324 = vector.extract_strided_slice %314 {offsets = [0, 32], sizes = [2, 32], strides = [1, 1]} : vector<2x96xf32> to vector<2x32xf32>
    %325 = vector.extract_strided_slice %315 {offsets = [0, 32], sizes = [2, 32], strides = [1, 1]} : vector<2x96xf32> to vector<2x32xf32>
    %326 = arith.addf %324, %325 : vector<2x32xf32>
    %327 = arith.negf %326 : vector<2x32xf32>
    %328 = math.exp %327 : vector<2x32xf32>
    %cst_51 = arith.constant 1.000000e+00 : f32
    %329 = vector.broadcast %cst_51 : f32 to vector<2x32xf32>
    %330 = arith.addf %329, %328 : vector<2x32xf32>
    %331 = arith.divf %329, %330 : vector<2x32xf32>
    %332 = vector.extract_strided_slice %314 {offsets = [0, 64], sizes = [2, 32], strides = [1, 1]} : vector<2x96xf32> to vector<2x32xf32>
    %333 = vector.extract_strided_slice %315 {offsets = [0, 64], sizes = [2, 32], strides = [1, 1]} : vector<2x96xf32> to vector<2x32xf32>
    %334 = vector.broadcast %18 : vector<1x32xf32> to vector<2x32xf32>
    %335 = arith.addf %333, %334 : vector<2x32xf32>
    %336 = arith.mulf %323, %335 : vector<2x32xf32>
    %337 = arith.addf %332, %336 : vector<2x32xf32>
    %338 = math.tanh %337 : vector<2x32xf32>
    %cst_52 = arith.constant 1.000000e+00 : f32
    %339 = vector.broadcast %cst_52 : f32 to vector<2x32xf32>
    %340 = arith.subf %339, %331 : vector<2x32xf32>
    %341 = arith.mulf %340, %338 : vector<2x32xf32>
    %342 = arith.mulf %331, %278 : vector<2x32xf32>
    %343 = arith.addf %341, %342 : vector<2x32xf32>
    %344 = tpu.concatenate %312, %343 in 1 : vector<2x32xf32>, vector<2x32xf32> -> vector<2x64xf32>
    %345 = arith.truncf %344 : vector<2x64xf32> to vector<2x64xbf16>
    %cst_53 = arith.constant dense<0.000000e+00> : vector<2x192xf32>
    %346 = tpu.matmul %345, %12, %cst_53 {dimension_numbers = #tpu.dot_dimension_numbers<[1], [0], [0], [1], [0, 0, 1, 1], [], []>} : vector<2x64xbf16>, vector<64x192xbf16>, vector<2x192xf32> -> vector<2x192xf32>
    %347 = vector.extract_strided_slice %10 {offsets = [0, 5, 0], sizes = [2, 1, 96], strides = [1, 1, 1]} : vector<2x8x192xf32> to vector<2x1x96xf32>
    %348 = vector.shape_cast %347 : vector<2x1x96xf32> to vector<2x96xf32>
    %349 = vector.extract_strided_slice %346 {offsets = [0, 0], sizes = [2, 96], strides = [1, 1]} : vector<2x192xf32> to vector<2x96xf32>
    %350 = vector.extract_strided_slice %348 {offsets = [0, 0], sizes = [2, 32], strides = [1, 1]} : vector<2x96xf32> to vector<2x32xf32>
    %351 = vector.extract_strided_slice %349 {offsets = [0, 0], sizes = [2, 32], strides = [1, 1]} : vector<2x96xf32> to vector<2x32xf32>
    %352 = arith.addf %350, %351 : vector<2x32xf32>
    %353 = arith.negf %352 : vector<2x32xf32>
    %354 = math.exp %353 : vector<2x32xf32>
    %cst_54 = arith.constant 1.000000e+00 : f32
    %355 = vector.broadcast %cst_54 : f32 to vector<2x32xf32>
    %356 = arith.addf %355, %354 : vector<2x32xf32>
    %357 = arith.divf %355, %356 : vector<2x32xf32>
    %358 = vector.extract_strided_slice %348 {offsets = [0, 32], sizes = [2, 32], strides = [1, 1]} : vector<2x96xf32> to vector<2x32xf32>
    %359 = vector.extract_strided_slice %349 {offsets = [0, 32], sizes = [2, 32], strides = [1, 1]} : vector<2x96xf32> to vector<2x32xf32>
    %360 = arith.addf %358, %359 : vector<2x32xf32>
    %361 = arith.negf %360 : vector<2x32xf32>
    %362 = math.exp %361 : vector<2x32xf32>
    %cst_55 = arith.constant 1.000000e+00 : f32
    %363 = vector.broadcast %cst_55 : f32 to vector<2x32xf32>
    %364 = arith.addf %363, %362 : vector<2x32xf32>
    %365 = arith.divf %363, %364 : vector<2x32xf32>
    %366 = vector.extract_strided_slice %348 {offsets = [0, 64], sizes = [2, 32], strides = [1, 1]} : vector<2x96xf32> to vector<2x32xf32>
    %367 = vector.extract_strided_slice %349 {offsets = [0, 64], sizes = [2, 32], strides = [1, 1]} : vector<2x96xf32> to vector<2x32xf32>
    %368 = vector.broadcast %15 : vector<1x32xf32> to vector<2x32xf32>
    %369 = arith.addf %367, %368 : vector<2x32xf32>
    %370 = arith.mulf %357, %369 : vector<2x32xf32>
    %371 = arith.addf %366, %370 : vector<2x32xf32>
    %372 = math.tanh %371 : vector<2x32xf32>
    %cst_56 = arith.constant 1.000000e+00 : f32
    %373 = vector.broadcast %cst_56 : f32 to vector<2x32xf32>
    %374 = arith.subf %373, %365 : vector<2x32xf32>
    %375 = arith.mulf %374, %372 : vector<2x32xf32>
    %376 = arith.mulf %365, %312 : vector<2x32xf32>
    %377 = arith.addf %375, %376 : vector<2x32xf32>
    %378 = vector.extract_strided_slice %10 {offsets = [0, 2, 96], sizes = [2, 1, 96], strides = [1, 1, 1]} : vector<2x8x192xf32> to vector<2x1x96xf32>
    %379 = vector.shape_cast %378 : vector<2x1x96xf32> to vector<2x96xf32>
    %380 = vector.extract_strided_slice %346 {offsets = [0, 96], sizes = [2, 96], strides = [1, 1]} : vector<2x192xf32> to vector<2x96xf32>
    %381 = vector.extract_strided_slice %379 {offsets = [0, 0], sizes = [2, 32], strides = [1, 1]} : vector<2x96xf32> to vector<2x32xf32>
    %382 = vector.extract_strided_slice %380 {offsets = [0, 0], sizes = [2, 32], strides = [1, 1]} : vector<2x96xf32> to vector<2x32xf32>
    %383 = arith.addf %381, %382 : vector<2x32xf32>
    %384 = arith.negf %383 : vector<2x32xf32>
    %385 = math.exp %384 : vector<2x32xf32>
    %cst_57 = arith.constant 1.000000e+00 : f32
    %386 = vector.broadcast %cst_57 : f32 to vector<2x32xf32>
    %387 = arith.addf %386, %385 : vector<2x32xf32>
    %388 = arith.divf %386, %387 : vector<2x32xf32>
    %389 = vector.extract_strided_slice %379 {offsets = [0, 32], sizes = [2, 32], strides = [1, 1]} : vector<2x96xf32> to vector<2x32xf32>
    %390 = vector.extract_strided_slice %380 {offsets = [0, 32], sizes = [2, 32], strides = [1, 1]} : vector<2x96xf32> to vector<2x32xf32>
    %391 = arith.addf %389, %390 : vector<2x32xf32>
    %392 = arith.negf %391 : vector<2x32xf32>
    %393 = math.exp %392 : vector<2x32xf32>
    %cst_58 = arith.constant 1.000000e+00 : f32
    %394 = vector.broadcast %cst_58 : f32 to vector<2x32xf32>
    %395 = arith.addf %394, %393 : vector<2x32xf32>
    %396 = arith.divf %394, %395 : vector<2x32xf32>
    %397 = vector.extract_strided_slice %379 {offsets = [0, 64], sizes = [2, 32], strides = [1, 1]} : vector<2x96xf32> to vector<2x32xf32>
    %398 = vector.extract_strided_slice %380 {offsets = [0, 64], sizes = [2, 32], strides = [1, 1]} : vector<2x96xf32> to vector<2x32xf32>
    %399 = vector.broadcast %18 : vector<1x32xf32> to vector<2x32xf32>
    %400 = arith.addf %398, %399 : vector<2x32xf32>
    %401 = arith.mulf %388, %400 : vector<2x32xf32>
    %402 = arith.addf %397, %401 : vector<2x32xf32>
    %403 = math.tanh %402 : vector<2x32xf32>
    %cst_59 = arith.constant 1.000000e+00 : f32
    %404 = vector.broadcast %cst_59 : f32 to vector<2x32xf32>
    %405 = arith.subf %404, %396 : vector<2x32xf32>
    %406 = arith.mulf %405, %403 : vector<2x32xf32>
    %407 = arith.mulf %396, %343 : vector<2x32xf32>
    %408 = arith.addf %406, %407 : vector<2x32xf32>
    %409 = tpu.concatenate %377, %408 in 1 : vector<2x32xf32>, vector<2x32xf32> -> vector<2x64xf32>
    %410 = arith.truncf %409 : vector<2x64xf32> to vector<2x64xbf16>
    %cst_60 = arith.constant dense<0.000000e+00> : vector<2x192xf32>
    %411 = tpu.matmul %410, %12, %cst_60 {dimension_numbers = #tpu.dot_dimension_numbers<[1], [0], [0], [1], [0, 0, 1, 1], [], []>} : vector<2x64xbf16>, vector<64x192xbf16>, vector<2x192xf32> -> vector<2x192xf32>
    %412 = vector.extract_strided_slice %10 {offsets = [0, 6, 0], sizes = [2, 1, 96], strides = [1, 1, 1]} : vector<2x8x192xf32> to vector<2x1x96xf32>
    %413 = vector.shape_cast %412 : vector<2x1x96xf32> to vector<2x96xf32>
    %414 = vector.extract_strided_slice %411 {offsets = [0, 0], sizes = [2, 96], strides = [1, 1]} : vector<2x192xf32> to vector<2x96xf32>
    %415 = vector.extract_strided_slice %413 {offsets = [0, 0], sizes = [2, 32], strides = [1, 1]} : vector<2x96xf32> to vector<2x32xf32>
    %416 = vector.extract_strided_slice %414 {offsets = [0, 0], sizes = [2, 32], strides = [1, 1]} : vector<2x96xf32> to vector<2x32xf32>
    %417 = arith.addf %415, %416 : vector<2x32xf32>
    %418 = arith.negf %417 : vector<2x32xf32>
    %419 = math.exp %418 : vector<2x32xf32>
    %cst_61 = arith.constant 1.000000e+00 : f32
    %420 = vector.broadcast %cst_61 : f32 to vector<2x32xf32>
    %421 = arith.addf %420, %419 : vector<2x32xf32>
    %422 = arith.divf %420, %421 : vector<2x32xf32>
    %423 = vector.extract_strided_slice %413 {offsets = [0, 32], sizes = [2, 32], strides = [1, 1]} : vector<2x96xf32> to vector<2x32xf32>
    %424 = vector.extract_strided_slice %414 {offsets = [0, 32], sizes = [2, 32], strides = [1, 1]} : vector<2x96xf32> to vector<2x32xf32>
    %425 = arith.addf %423, %424 : vector<2x32xf32>
    %426 = arith.negf %425 : vector<2x32xf32>
    %427 = math.exp %426 : vector<2x32xf32>
    %cst_62 = arith.constant 1.000000e+00 : f32
    %428 = vector.broadcast %cst_62 : f32 to vector<2x32xf32>
    %429 = arith.addf %428, %427 : vector<2x32xf32>
    %430 = arith.divf %428, %429 : vector<2x32xf32>
    %431 = vector.extract_strided_slice %413 {offsets = [0, 64], sizes = [2, 32], strides = [1, 1]} : vector<2x96xf32> to vector<2x32xf32>
    %432 = vector.extract_strided_slice %414 {offsets = [0, 64], sizes = [2, 32], strides = [1, 1]} : vector<2x96xf32> to vector<2x32xf32>
    %433 = vector.broadcast %15 : vector<1x32xf32> to vector<2x32xf32>
    %434 = arith.addf %432, %433 : vector<2x32xf32>
    %435 = arith.mulf %422, %434 : vector<2x32xf32>
    %436 = arith.addf %431, %435 : vector<2x32xf32>
    %437 = math.tanh %436 : vector<2x32xf32>
    %cst_63 = arith.constant 1.000000e+00 : f32
    %438 = vector.broadcast %cst_63 : f32 to vector<2x32xf32>
    %439 = arith.subf %438, %430 : vector<2x32xf32>
    %440 = arith.mulf %439, %437 : vector<2x32xf32>
    %441 = arith.mulf %430, %377 : vector<2x32xf32>
    %442 = arith.addf %440, %441 : vector<2x32xf32>
    %443 = vector.extract_strided_slice %10 {offsets = [0, 1, 96], sizes = [2, 1, 96], strides = [1, 1, 1]} : vector<2x8x192xf32> to vector<2x1x96xf32>
    %444 = vector.shape_cast %443 : vector<2x1x96xf32> to vector<2x96xf32>
    %445 = vector.extract_strided_slice %411 {offsets = [0, 96], sizes = [2, 96], strides = [1, 1]} : vector<2x192xf32> to vector<2x96xf32>
    %446 = vector.extract_strided_slice %444 {offsets = [0, 0], sizes = [2, 32], strides = [1, 1]} : vector<2x96xf32> to vector<2x32xf32>
    %447 = vector.extract_strided_slice %445 {offsets = [0, 0], sizes = [2, 32], strides = [1, 1]} : vector<2x96xf32> to vector<2x32xf32>
    %448 = arith.addf %446, %447 : vector<2x32xf32>
    %449 = arith.negf %448 : vector<2x32xf32>
    %450 = math.exp %449 : vector<2x32xf32>
    %cst_64 = arith.constant 1.000000e+00 : f32
    %451 = vector.broadcast %cst_64 : f32 to vector<2x32xf32>
    %452 = arith.addf %451, %450 : vector<2x32xf32>
    %453 = arith.divf %451, %452 : vector<2x32xf32>
    %454 = vector.extract_strided_slice %444 {offsets = [0, 32], sizes = [2, 32], strides = [1, 1]} : vector<2x96xf32> to vector<2x32xf32>
    %455 = vector.extract_strided_slice %445 {offsets = [0, 32], sizes = [2, 32], strides = [1, 1]} : vector<2x96xf32> to vector<2x32xf32>
    %456 = arith.addf %454, %455 : vector<2x32xf32>
    %457 = arith.negf %456 : vector<2x32xf32>
    %458 = math.exp %457 : vector<2x32xf32>
    %cst_65 = arith.constant 1.000000e+00 : f32
    %459 = vector.broadcast %cst_65 : f32 to vector<2x32xf32>
    %460 = arith.addf %459, %458 : vector<2x32xf32>
    %461 = arith.divf %459, %460 : vector<2x32xf32>
    %462 = vector.extract_strided_slice %444 {offsets = [0, 64], sizes = [2, 32], strides = [1, 1]} : vector<2x96xf32> to vector<2x32xf32>
    %463 = vector.extract_strided_slice %445 {offsets = [0, 64], sizes = [2, 32], strides = [1, 1]} : vector<2x96xf32> to vector<2x32xf32>
    %464 = vector.broadcast %18 : vector<1x32xf32> to vector<2x32xf32>
    %465 = arith.addf %463, %464 : vector<2x32xf32>
    %466 = arith.mulf %453, %465 : vector<2x32xf32>
    %467 = arith.addf %462, %466 : vector<2x32xf32>
    %468 = math.tanh %467 : vector<2x32xf32>
    %cst_66 = arith.constant 1.000000e+00 : f32
    %469 = vector.broadcast %cst_66 : f32 to vector<2x32xf32>
    %470 = arith.subf %469, %461 : vector<2x32xf32>
    %471 = arith.mulf %470, %468 : vector<2x32xf32>
    %472 = arith.mulf %461, %408 : vector<2x32xf32>
    %473 = arith.addf %471, %472 : vector<2x32xf32>
    %474 = tpu.concatenate %442, %473 in 1 : vector<2x32xf32>, vector<2x32xf32> -> vector<2x64xf32>
    %475 = arith.truncf %474 : vector<2x64xf32> to vector<2x64xbf16>
    %cst_67 = arith.constant dense<0.000000e+00> : vector<2x192xf32>
    %476 = tpu.matmul %475, %12, %cst_67 {dimension_numbers = #tpu.dot_dimension_numbers<[1], [0], [0], [1], [0, 0, 1, 1], [], []>} : vector<2x64xbf16>, vector<64x192xbf16>, vector<2x192xf32> -> vector<2x192xf32>
    %477 = vector.extract_strided_slice %10 {offsets = [0, 7, 0], sizes = [2, 1, 96], strides = [1, 1, 1]} : vector<2x8x192xf32> to vector<2x1x96xf32>
    %478 = vector.shape_cast %477 : vector<2x1x96xf32> to vector<2x96xf32>
    %479 = vector.extract_strided_slice %476 {offsets = [0, 0], sizes = [2, 96], strides = [1, 1]} : vector<2x192xf32> to vector<2x96xf32>
    %480 = vector.extract_strided_slice %478 {offsets = [0, 0], sizes = [2, 32], strides = [1, 1]} : vector<2x96xf32> to vector<2x32xf32>
    %481 = vector.extract_strided_slice %479 {offsets = [0, 0], sizes = [2, 32], strides = [1, 1]} : vector<2x96xf32> to vector<2x32xf32>
    %482 = arith.addf %480, %481 : vector<2x32xf32>
    %483 = arith.negf %482 : vector<2x32xf32>
    %484 = math.exp %483 : vector<2x32xf32>
    %cst_68 = arith.constant 1.000000e+00 : f32
    %485 = vector.broadcast %cst_68 : f32 to vector<2x32xf32>
    %486 = arith.addf %485, %484 : vector<2x32xf32>
    %487 = arith.divf %485, %486 : vector<2x32xf32>
    %488 = vector.extract_strided_slice %478 {offsets = [0, 32], sizes = [2, 32], strides = [1, 1]} : vector<2x96xf32> to vector<2x32xf32>
    %489 = vector.extract_strided_slice %479 {offsets = [0, 32], sizes = [2, 32], strides = [1, 1]} : vector<2x96xf32> to vector<2x32xf32>
    %490 = arith.addf %488, %489 : vector<2x32xf32>
    %491 = arith.negf %490 : vector<2x32xf32>
    %492 = math.exp %491 : vector<2x32xf32>
    %cst_69 = arith.constant 1.000000e+00 : f32
    %493 = vector.broadcast %cst_69 : f32 to vector<2x32xf32>
    %494 = arith.addf %493, %492 : vector<2x32xf32>
    %495 = arith.divf %493, %494 : vector<2x32xf32>
    %496 = vector.extract_strided_slice %478 {offsets = [0, 64], sizes = [2, 32], strides = [1, 1]} : vector<2x96xf32> to vector<2x32xf32>
    %497 = vector.extract_strided_slice %479 {offsets = [0, 64], sizes = [2, 32], strides = [1, 1]} : vector<2x96xf32> to vector<2x32xf32>
    %498 = vector.broadcast %15 : vector<1x32xf32> to vector<2x32xf32>
    %499 = arith.addf %497, %498 : vector<2x32xf32>
    %500 = arith.mulf %487, %499 : vector<2x32xf32>
    %501 = arith.addf %496, %500 : vector<2x32xf32>
    %502 = math.tanh %501 : vector<2x32xf32>
    %cst_70 = arith.constant 1.000000e+00 : f32
    %503 = vector.broadcast %cst_70 : f32 to vector<2x32xf32>
    %504 = arith.subf %503, %495 : vector<2x32xf32>
    %505 = arith.mulf %504, %502 : vector<2x32xf32>
    %506 = arith.mulf %495, %442 : vector<2x32xf32>
    %507 = arith.addf %505, %506 : vector<2x32xf32>
    %508 = vector.extract_strided_slice %10 {offsets = [0, 0, 96], sizes = [2, 1, 96], strides = [1, 1, 1]} : vector<2x8x192xf32> to vector<2x1x96xf32>
    %509 = vector.shape_cast %508 : vector<2x1x96xf32> to vector<2x96xf32>
    %510 = vector.extract_strided_slice %476 {offsets = [0, 96], sizes = [2, 96], strides = [1, 1]} : vector<2x192xf32> to vector<2x96xf32>
    %511 = vector.extract_strided_slice %509 {offsets = [0, 0], sizes = [2, 32], strides = [1, 1]} : vector<2x96xf32> to vector<2x32xf32>
    %512 = vector.extract_strided_slice %510 {offsets = [0, 0], sizes = [2, 32], strides = [1, 1]} : vector<2x96xf32> to vector<2x32xf32>
    %513 = arith.addf %511, %512 : vector<2x32xf32>
    %514 = arith.negf %513 : vector<2x32xf32>
    %515 = math.exp %514 : vector<2x32xf32>
    %cst_71 = arith.constant 1.000000e+00 : f32
    %516 = vector.broadcast %cst_71 : f32 to vector<2x32xf32>
    %517 = arith.addf %516, %515 : vector<2x32xf32>
    %518 = arith.divf %516, %517 : vector<2x32xf32>
    %519 = vector.extract_strided_slice %509 {offsets = [0, 32], sizes = [2, 32], strides = [1, 1]} : vector<2x96xf32> to vector<2x32xf32>
    %520 = vector.extract_strided_slice %510 {offsets = [0, 32], sizes = [2, 32], strides = [1, 1]} : vector<2x96xf32> to vector<2x32xf32>
    %521 = arith.addf %519, %520 : vector<2x32xf32>
    %522 = arith.negf %521 : vector<2x32xf32>
    %523 = math.exp %522 : vector<2x32xf32>
    %cst_72 = arith.constant 1.000000e+00 : f32
    %524 = vector.broadcast %cst_72 : f32 to vector<2x32xf32>
    %525 = arith.addf %524, %523 : vector<2x32xf32>
    %526 = arith.divf %524, %525 : vector<2x32xf32>
    %527 = vector.extract_strided_slice %509 {offsets = [0, 64], sizes = [2, 32], strides = [1, 1]} : vector<2x96xf32> to vector<2x32xf32>
    %528 = vector.extract_strided_slice %510 {offsets = [0, 64], sizes = [2, 32], strides = [1, 1]} : vector<2x96xf32> to vector<2x32xf32>
    %529 = vector.broadcast %18 : vector<1x32xf32> to vector<2x32xf32>
    %530 = arith.addf %528, %529 : vector<2x32xf32>
    %531 = arith.mulf %518, %530 : vector<2x32xf32>
    %532 = arith.addf %527, %531 : vector<2x32xf32>
    %533 = math.tanh %532 : vector<2x32xf32>
    %cst_73 = arith.constant 1.000000e+00 : f32
    %534 = vector.broadcast %cst_73 : f32 to vector<2x32xf32>
    %535 = arith.subf %534, %526 : vector<2x32xf32>
    %536 = arith.mulf %535, %533 : vector<2x32xf32>
    %537 = arith.mulf %526, %473 : vector<2x32xf32>
    %538 = arith.addf %536, %537 : vector<2x32xf32>
    %539 = vector.shape_cast %52 : vector<2x32xf32> to vector<2x1x32xf32>
    %540 = vector.shape_cast %117 : vector<2x32xf32> to vector<2x1x32xf32>
    %541 = vector.shape_cast %182 : vector<2x32xf32> to vector<2x1x32xf32>
    %542 = vector.shape_cast %247 : vector<2x32xf32> to vector<2x1x32xf32>
    %543 = vector.shape_cast %312 : vector<2x32xf32> to vector<2x1x32xf32>
    %544 = vector.shape_cast %377 : vector<2x32xf32> to vector<2x1x32xf32>
    %545 = vector.shape_cast %442 : vector<2x32xf32> to vector<2x1x32xf32>
    %546 = vector.shape_cast %507 : vector<2x32xf32> to vector<2x1x32xf32>
    %547 = tpu.concatenate %539, %540, %541, %542, %543, %544, %545, %546 in 1 : vector<2x1x32xf32>, vector<2x1x32xf32>, vector<2x1x32xf32>, vector<2x1x32xf32>, vector<2x1x32xf32>, vector<2x1x32xf32>, vector<2x1x32xf32>, vector<2x1x32xf32> -> vector<2x8x32xf32>
    %548 = vector.shape_cast %547 : vector<2x8x32xf32> to vector<16x32xf32>
    %549 = vector.shape_cast %538 : vector<2x32xf32> to vector<2x1x32xf32>
    %550 = vector.shape_cast %473 : vector<2x32xf32> to vector<2x1x32xf32>
    %551 = vector.shape_cast %408 : vector<2x32xf32> to vector<2x1x32xf32>
    %552 = vector.shape_cast %343 : vector<2x32xf32> to vector<2x1x32xf32>
    %553 = vector.shape_cast %278 : vector<2x32xf32> to vector<2x1x32xf32>
    %554 = vector.shape_cast %213 : vector<2x32xf32> to vector<2x1x32xf32>
    %555 = vector.shape_cast %148 : vector<2x32xf32> to vector<2x1x32xf32>
    %556 = vector.shape_cast %83 : vector<2x32xf32> to vector<2x1x32xf32>
    %557 = tpu.concatenate %549, %550, %551, %552, %553, %554, %555, %556 in 1 : vector<2x1x32xf32>, vector<2x1x32xf32>, vector<2x1x32xf32>, vector<2x1x32xf32>, vector<2x1x32xf32>, vector<2x1x32xf32>, vector<2x1x32xf32>, vector<2x1x32xf32> -> vector<2x8x32xf32>
    %558 = vector.shape_cast %557 : vector<2x8x32xf32> to vector<16x32xf32>
    %559 = arith.truncf %548 : vector<16x32xf32> to vector<16x32xbf16>
    %560 = arith.truncf %558 : vector<16x32xf32> to vector<16x32xbf16>
    %c0_74 = arith.constant 0 : index
    %c0_75 = arith.constant 0 : index
    %c0_76 = arith.constant 0 : index
    %561 = vector.load %arg2[%c0_74, %c0_75, %c0_76] : memref<2x64x192xbf16, #tpu.memory_space<vmem>>, vector<1x64x192xbf16>
    %562 = vector.shape_cast %561 : vector<1x64x192xbf16> to vector<64x192xbf16>
    %563 = vector.extract_strided_slice %562 {offsets = [0, 0], sizes = [32, 192], strides = [1, 1]} : vector<64x192xbf16> to vector<32x192xbf16>
    %cst_77 = arith.constant dense<0.000000e+00> : vector<16x192xf32>
    %564 = tpu.matmul %559, %563, %cst_77 {dimension_numbers = #tpu.dot_dimension_numbers<[1], [0], [0], [1], [0, 0, 1, 1], [], []>} : vector<16x32xbf16>, vector<32x192xbf16>, vector<16x192xf32> -> vector<16x192xf32>
    %565 = vector.extract_strided_slice %562 {offsets = [32, 0], sizes = [32, 192], strides = [1, 1]} : vector<64x192xbf16> to vector<32x192xbf16>
    %cst_78 = arith.constant dense<0.000000e+00> : vector<16x192xf32>
    %566 = tpu.matmul %560, %565, %cst_78 {dimension_numbers = #tpu.dot_dimension_numbers<[1], [0], [0], [1], [0, 0, 1, 1], [], []>} : vector<16x32xbf16>, vector<32x192xbf16>, vector<16x192xf32> -> vector<16x192xf32>
    %567 = arith.addf %564, %566 : vector<16x192xf32>
    %568 = vector.shape_cast %567 : vector<16x192xf32> to vector<2x8x192xf32>
    %c1 = arith.constant 1 : index
    %c0_79 = arith.constant 0 : index
    %c0_80 = arith.constant 0 : index
    %569 = vector.load %arg4[%c1, %c0_79, %c0_80] : memref<3x1x192xf32, #tpu.memory_space<vmem>>, vector<1x1x192xf32>
    %570 = vector.shape_cast %569 : vector<1x1x192xf32> to vector<1x192xf32>
    %571 = vector.shape_cast %570 : vector<1x192xf32> to vector<1x1x192xf32>
    %572 = vector.broadcast %571 : vector<1x1x192xf32> to vector<2x8x192xf32>
    %573 = arith.addf %568, %572 : vector<2x8x192xf32>
    %c1_81 = arith.constant 1 : index
    %c0_82 = arith.constant 0 : index
    %c0_83 = arith.constant 0 : index
    %574 = vector.load %arg3[%c1_81, %c0_82, %c0_83] : memref<3x64x192xbf16, #tpu.memory_space<vmem>>, vector<1x64x192xbf16>
    %575 = vector.shape_cast %574 : vector<1x64x192xbf16> to vector<64x192xbf16>
    %c1_84 = arith.constant 1 : index
    %c0_85 = arith.constant 0 : index
    %c0_86 = arith.constant 0 : index
    %576 = vector.load %arg5[%c1_84, %c0_85, %c0_86] : memref<3x1x64xf32, #tpu.memory_space<vmem>>, vector<1x1x64xf32>
    %577 = vector.shape_cast %576 : vector<1x1x64xf32> to vector<1x64xf32>
    %578 = vector.extract_strided_slice %577 {offsets = [0, 0], sizes = [1, 32], strides = [1, 1]} : vector<1x64xf32> to vector<1x32xf32>
    %c1_87 = arith.constant 1 : index
    %c0_88 = arith.constant 0 : index
    %c0_89 = arith.constant 0 : index
    %579 = vector.load %arg5[%c1_87, %c0_88, %c0_89] : memref<3x1x64xf32, #tpu.memory_space<vmem>>, vector<1x1x64xf32>
    %580 = vector.shape_cast %579 : vector<1x1x64xf32> to vector<1x64xf32>
    %581 = vector.extract_strided_slice %580 {offsets = [0, 32], sizes = [1, 32], strides = [1, 1]} : vector<1x64xf32> to vector<1x32xf32>
    %cst_90 = arith.constant 0.000000e+00 : f32
    %582 = vector.broadcast %cst_90 : f32 to vector<2x32xf32>
    %cst_91 = arith.constant 0.000000e+00 : f32
    %583 = vector.broadcast %cst_91 : f32 to vector<2x32xf32>
    %cst_92 = arith.constant 0.000000e+00 : f32
    %584 = vector.broadcast %cst_92 : f32 to vector<2x192xf32>
    %585 = vector.extract_strided_slice %573 {offsets = [0, 0, 0], sizes = [2, 1, 96], strides = [1, 1, 1]} : vector<2x8x192xf32> to vector<2x1x96xf32>
    %586 = vector.shape_cast %585 : vector<2x1x96xf32> to vector<2x96xf32>
    %587 = vector.extract_strided_slice %584 {offsets = [0, 0], sizes = [2, 96], strides = [1, 1]} : vector<2x192xf32> to vector<2x96xf32>
    %588 = vector.extract_strided_slice %586 {offsets = [0, 0], sizes = [2, 32], strides = [1, 1]} : vector<2x96xf32> to vector<2x32xf32>
    %589 = vector.extract_strided_slice %587 {offsets = [0, 0], sizes = [2, 32], strides = [1, 1]} : vector<2x96xf32> to vector<2x32xf32>
    %590 = arith.addf %588, %589 : vector<2x32xf32>
    %591 = arith.negf %590 : vector<2x32xf32>
    %592 = math.exp %591 : vector<2x32xf32>
    %cst_93 = arith.constant 1.000000e+00 : f32
    %593 = vector.broadcast %cst_93 : f32 to vector<2x32xf32>
    %594 = arith.addf %593, %592 : vector<2x32xf32>
    %595 = arith.divf %593, %594 : vector<2x32xf32>
    %596 = vector.extract_strided_slice %586 {offsets = [0, 32], sizes = [2, 32], strides = [1, 1]} : vector<2x96xf32> to vector<2x32xf32>
    %597 = vector.extract_strided_slice %587 {offsets = [0, 32], sizes = [2, 32], strides = [1, 1]} : vector<2x96xf32> to vector<2x32xf32>
    %598 = arith.addf %596, %597 : vector<2x32xf32>
    %599 = arith.negf %598 : vector<2x32xf32>
    %600 = math.exp %599 : vector<2x32xf32>
    %cst_94 = arith.constant 1.000000e+00 : f32
    %601 = vector.broadcast %cst_94 : f32 to vector<2x32xf32>
    %602 = arith.addf %601, %600 : vector<2x32xf32>
    %603 = arith.divf %601, %602 : vector<2x32xf32>
    %604 = vector.extract_strided_slice %586 {offsets = [0, 64], sizes = [2, 32], strides = [1, 1]} : vector<2x96xf32> to vector<2x32xf32>
    %605 = vector.extract_strided_slice %587 {offsets = [0, 64], sizes = [2, 32], strides = [1, 1]} : vector<2x96xf32> to vector<2x32xf32>
    %606 = vector.broadcast %578 : vector<1x32xf32> to vector<2x32xf32>
    %607 = arith.addf %605, %606 : vector<2x32xf32>
    %608 = arith.mulf %595, %607 : vector<2x32xf32>
    %609 = arith.addf %604, %608 : vector<2x32xf32>
    %610 = math.tanh %609 : vector<2x32xf32>
    %cst_95 = arith.constant 1.000000e+00 : f32
    %611 = vector.broadcast %cst_95 : f32 to vector<2x32xf32>
    %612 = arith.subf %611, %603 : vector<2x32xf32>
    %613 = arith.mulf %612, %610 : vector<2x32xf32>
    %614 = arith.mulf %603, %582 : vector<2x32xf32>
    %615 = arith.addf %613, %614 : vector<2x32xf32>
    %616 = vector.extract_strided_slice %573 {offsets = [0, 7, 96], sizes = [2, 1, 96], strides = [1, 1, 1]} : vector<2x8x192xf32> to vector<2x1x96xf32>
    %617 = vector.shape_cast %616 : vector<2x1x96xf32> to vector<2x96xf32>
    %618 = vector.extract_strided_slice %584 {offsets = [0, 96], sizes = [2, 96], strides = [1, 1]} : vector<2x192xf32> to vector<2x96xf32>
    %619 = vector.extract_strided_slice %617 {offsets = [0, 0], sizes = [2, 32], strides = [1, 1]} : vector<2x96xf32> to vector<2x32xf32>
    %620 = vector.extract_strided_slice %618 {offsets = [0, 0], sizes = [2, 32], strides = [1, 1]} : vector<2x96xf32> to vector<2x32xf32>
    %621 = arith.addf %619, %620 : vector<2x32xf32>
    %622 = arith.negf %621 : vector<2x32xf32>
    %623 = math.exp %622 : vector<2x32xf32>
    %cst_96 = arith.constant 1.000000e+00 : f32
    %624 = vector.broadcast %cst_96 : f32 to vector<2x32xf32>
    %625 = arith.addf %624, %623 : vector<2x32xf32>
    %626 = arith.divf %624, %625 : vector<2x32xf32>
    %627 = vector.extract_strided_slice %617 {offsets = [0, 32], sizes = [2, 32], strides = [1, 1]} : vector<2x96xf32> to vector<2x32xf32>
    %628 = vector.extract_strided_slice %618 {offsets = [0, 32], sizes = [2, 32], strides = [1, 1]} : vector<2x96xf32> to vector<2x32xf32>
    %629 = arith.addf %627, %628 : vector<2x32xf32>
    %630 = arith.negf %629 : vector<2x32xf32>
    %631 = math.exp %630 : vector<2x32xf32>
    %cst_97 = arith.constant 1.000000e+00 : f32
    %632 = vector.broadcast %cst_97 : f32 to vector<2x32xf32>
    %633 = arith.addf %632, %631 : vector<2x32xf32>
    %634 = arith.divf %632, %633 : vector<2x32xf32>
    %635 = vector.extract_strided_slice %617 {offsets = [0, 64], sizes = [2, 32], strides = [1, 1]} : vector<2x96xf32> to vector<2x32xf32>
    %636 = vector.extract_strided_slice %618 {offsets = [0, 64], sizes = [2, 32], strides = [1, 1]} : vector<2x96xf32> to vector<2x32xf32>
    %637 = vector.broadcast %581 : vector<1x32xf32> to vector<2x32xf32>
    %638 = arith.addf %636, %637 : vector<2x32xf32>
    %639 = arith.mulf %626, %638 : vector<2x32xf32>
    %640 = arith.addf %635, %639 : vector<2x32xf32>
    %641 = math.tanh %640 : vector<2x32xf32>
    %cst_98 = arith.constant 1.000000e+00 : f32
    %642 = vector.broadcast %cst_98 : f32 to vector<2x32xf32>
    %643 = arith.subf %642, %634 : vector<2x32xf32>
    %644 = arith.mulf %643, %641 : vector<2x32xf32>
    %645 = arith.mulf %634, %583 : vector<2x32xf32>
    %646 = arith.addf %644, %645 : vector<2x32xf32>
    %647 = tpu.concatenate %615, %646 in 1 : vector<2x32xf32>, vector<2x32xf32> -> vector<2x64xf32>
    %648 = arith.truncf %647 : vector<2x64xf32> to vector<2x64xbf16>
    %cst_99 = arith.constant dense<0.000000e+00> : vector<2x192xf32>
    %649 = tpu.matmul %648, %575, %cst_99 {dimension_numbers = #tpu.dot_dimension_numbers<[1], [0], [0], [1], [0, 0, 1, 1], [], []>} : vector<2x64xbf16>, vector<64x192xbf16>, vector<2x192xf32> -> vector<2x192xf32>
    %650 = vector.extract_strided_slice %573 {offsets = [0, 1, 0], sizes = [2, 1, 96], strides = [1, 1, 1]} : vector<2x8x192xf32> to vector<2x1x96xf32>
    %651 = vector.shape_cast %650 : vector<2x1x96xf32> to vector<2x96xf32>
    %652 = vector.extract_strided_slice %649 {offsets = [0, 0], sizes = [2, 96], strides = [1, 1]} : vector<2x192xf32> to vector<2x96xf32>
    %653 = vector.extract_strided_slice %651 {offsets = [0, 0], sizes = [2, 32], strides = [1, 1]} : vector<2x96xf32> to vector<2x32xf32>
    %654 = vector.extract_strided_slice %652 {offsets = [0, 0], sizes = [2, 32], strides = [1, 1]} : vector<2x96xf32> to vector<2x32xf32>
    %655 = arith.addf %653, %654 : vector<2x32xf32>
    %656 = arith.negf %655 : vector<2x32xf32>
    %657 = math.exp %656 : vector<2x32xf32>
    %cst_100 = arith.constant 1.000000e+00 : f32
    %658 = vector.broadcast %cst_100 : f32 to vector<2x32xf32>
    %659 = arith.addf %658, %657 : vector<2x32xf32>
    %660 = arith.divf %658, %659 : vector<2x32xf32>
    %661 = vector.extract_strided_slice %651 {offsets = [0, 32], sizes = [2, 32], strides = [1, 1]} : vector<2x96xf32> to vector<2x32xf32>
    %662 = vector.extract_strided_slice %652 {offsets = [0, 32], sizes = [2, 32], strides = [1, 1]} : vector<2x96xf32> to vector<2x32xf32>
    %663 = arith.addf %661, %662 : vector<2x32xf32>
    %664 = arith.negf %663 : vector<2x32xf32>
    %665 = math.exp %664 : vector<2x32xf32>
    %cst_101 = arith.constant 1.000000e+00 : f32
    %666 = vector.broadcast %cst_101 : f32 to vector<2x32xf32>
    %667 = arith.addf %666, %665 : vector<2x32xf32>
    %668 = arith.divf %666, %667 : vector<2x32xf32>
    %669 = vector.extract_strided_slice %651 {offsets = [0, 64], sizes = [2, 32], strides = [1, 1]} : vector<2x96xf32> to vector<2x32xf32>
    %670 = vector.extract_strided_slice %652 {offsets = [0, 64], sizes = [2, 32], strides = [1, 1]} : vector<2x96xf32> to vector<2x32xf32>
    %671 = vector.broadcast %578 : vector<1x32xf32> to vector<2x32xf32>
    %672 = arith.addf %670, %671 : vector<2x32xf32>
    %673 = arith.mulf %660, %672 : vector<2x32xf32>
    %674 = arith.addf %669, %673 : vector<2x32xf32>
    %675 = math.tanh %674 : vector<2x32xf32>
    %cst_102 = arith.constant 1.000000e+00 : f32
    %676 = vector.broadcast %cst_102 : f32 to vector<2x32xf32>
    %677 = arith.subf %676, %668 : vector<2x32xf32>
    %678 = arith.mulf %677, %675 : vector<2x32xf32>
    %679 = arith.mulf %668, %615 : vector<2x32xf32>
    %680 = arith.addf %678, %679 : vector<2x32xf32>
    %681 = vector.extract_strided_slice %573 {offsets = [0, 6, 96], sizes = [2, 1, 96], strides = [1, 1, 1]} : vector<2x8x192xf32> to vector<2x1x96xf32>
    %682 = vector.shape_cast %681 : vector<2x1x96xf32> to vector<2x96xf32>
    %683 = vector.extract_strided_slice %649 {offsets = [0, 96], sizes = [2, 96], strides = [1, 1]} : vector<2x192xf32> to vector<2x96xf32>
    %684 = vector.extract_strided_slice %682 {offsets = [0, 0], sizes = [2, 32], strides = [1, 1]} : vector<2x96xf32> to vector<2x32xf32>
    %685 = vector.extract_strided_slice %683 {offsets = [0, 0], sizes = [2, 32], strides = [1, 1]} : vector<2x96xf32> to vector<2x32xf32>
    %686 = arith.addf %684, %685 : vector<2x32xf32>
    %687 = arith.negf %686 : vector<2x32xf32>
    %688 = math.exp %687 : vector<2x32xf32>
    %cst_103 = arith.constant 1.000000e+00 : f32
    %689 = vector.broadcast %cst_103 : f32 to vector<2x32xf32>
    %690 = arith.addf %689, %688 : vector<2x32xf32>
    %691 = arith.divf %689, %690 : vector<2x32xf32>
    %692 = vector.extract_strided_slice %682 {offsets = [0, 32], sizes = [2, 32], strides = [1, 1]} : vector<2x96xf32> to vector<2x32xf32>
    %693 = vector.extract_strided_slice %683 {offsets = [0, 32], sizes = [2, 32], strides = [1, 1]} : vector<2x96xf32> to vector<2x32xf32>
    %694 = arith.addf %692, %693 : vector<2x32xf32>
    %695 = arith.negf %694 : vector<2x32xf32>
    %696 = math.exp %695 : vector<2x32xf32>
    %cst_104 = arith.constant 1.000000e+00 : f32
    %697 = vector.broadcast %cst_104 : f32 to vector<2x32xf32>
    %698 = arith.addf %697, %696 : vector<2x32xf32>
    %699 = arith.divf %697, %698 : vector<2x32xf32>
    %700 = vector.extract_strided_slice %682 {offsets = [0, 64], sizes = [2, 32], strides = [1, 1]} : vector<2x96xf32> to vector<2x32xf32>
    %701 = vector.extract_strided_slice %683 {offsets = [0, 64], sizes = [2, 32], strides = [1, 1]} : vector<2x96xf32> to vector<2x32xf32>
    %702 = vector.broadcast %581 : vector<1x32xf32> to vector<2x32xf32>
    %703 = arith.addf %701, %702 : vector<2x32xf32>
    %704 = arith.mulf %691, %703 : vector<2x32xf32>
    %705 = arith.addf %700, %704 : vector<2x32xf32>
    %706 = math.tanh %705 : vector<2x32xf32>
    %cst_105 = arith.constant 1.000000e+00 : f32
    %707 = vector.broadcast %cst_105 : f32 to vector<2x32xf32>
    %708 = arith.subf %707, %699 : vector<2x32xf32>
    %709 = arith.mulf %708, %706 : vector<2x32xf32>
    %710 = arith.mulf %699, %646 : vector<2x32xf32>
    %711 = arith.addf %709, %710 : vector<2x32xf32>
    %712 = tpu.concatenate %680, %711 in 1 : vector<2x32xf32>, vector<2x32xf32> -> vector<2x64xf32>
    %713 = arith.truncf %712 : vector<2x64xf32> to vector<2x64xbf16>
    %cst_106 = arith.constant dense<0.000000e+00> : vector<2x192xf32>
    %714 = tpu.matmul %713, %575, %cst_106 {dimension_numbers = #tpu.dot_dimension_numbers<[1], [0], [0], [1], [0, 0, 1, 1], [], []>} : vector<2x64xbf16>, vector<64x192xbf16>, vector<2x192xf32> -> vector<2x192xf32>
    %715 = vector.extract_strided_slice %573 {offsets = [0, 2, 0], sizes = [2, 1, 96], strides = [1, 1, 1]} : vector<2x8x192xf32> to vector<2x1x96xf32>
    %716 = vector.shape_cast %715 : vector<2x1x96xf32> to vector<2x96xf32>
    %717 = vector.extract_strided_slice %714 {offsets = [0, 0], sizes = [2, 96], strides = [1, 1]} : vector<2x192xf32> to vector<2x96xf32>
    %718 = vector.extract_strided_slice %716 {offsets = [0, 0], sizes = [2, 32], strides = [1, 1]} : vector<2x96xf32> to vector<2x32xf32>
    %719 = vector.extract_strided_slice %717 {offsets = [0, 0], sizes = [2, 32], strides = [1, 1]} : vector<2x96xf32> to vector<2x32xf32>
    %720 = arith.addf %718, %719 : vector<2x32xf32>
    %721 = arith.negf %720 : vector<2x32xf32>
    %722 = math.exp %721 : vector<2x32xf32>
    %cst_107 = arith.constant 1.000000e+00 : f32
    %723 = vector.broadcast %cst_107 : f32 to vector<2x32xf32>
    %724 = arith.addf %723, %722 : vector<2x32xf32>
    %725 = arith.divf %723, %724 : vector<2x32xf32>
    %726 = vector.extract_strided_slice %716 {offsets = [0, 32], sizes = [2, 32], strides = [1, 1]} : vector<2x96xf32> to vector<2x32xf32>
    %727 = vector.extract_strided_slice %717 {offsets = [0, 32], sizes = [2, 32], strides = [1, 1]} : vector<2x96xf32> to vector<2x32xf32>
    %728 = arith.addf %726, %727 : vector<2x32xf32>
    %729 = arith.negf %728 : vector<2x32xf32>
    %730 = math.exp %729 : vector<2x32xf32>
    %cst_108 = arith.constant 1.000000e+00 : f32
    %731 = vector.broadcast %cst_108 : f32 to vector<2x32xf32>
    %732 = arith.addf %731, %730 : vector<2x32xf32>
    %733 = arith.divf %731, %732 : vector<2x32xf32>
    %734 = vector.extract_strided_slice %716 {offsets = [0, 64], sizes = [2, 32], strides = [1, 1]} : vector<2x96xf32> to vector<2x32xf32>
    %735 = vector.extract_strided_slice %717 {offsets = [0, 64], sizes = [2, 32], strides = [1, 1]} : vector<2x96xf32> to vector<2x32xf32>
    %736 = vector.broadcast %578 : vector<1x32xf32> to vector<2x32xf32>
    %737 = arith.addf %735, %736 : vector<2x32xf32>
    %738 = arith.mulf %725, %737 : vector<2x32xf32>
    %739 = arith.addf %734, %738 : vector<2x32xf32>
    %740 = math.tanh %739 : vector<2x32xf32>
    %cst_109 = arith.constant 1.000000e+00 : f32
    %741 = vector.broadcast %cst_109 : f32 to vector<2x32xf32>
    %742 = arith.subf %741, %733 : vector<2x32xf32>
    %743 = arith.mulf %742, %740 : vector<2x32xf32>
    %744 = arith.mulf %733, %680 : vector<2x32xf32>
    %745 = arith.addf %743, %744 : vector<2x32xf32>
    %746 = vector.extract_strided_slice %573 {offsets = [0, 5, 96], sizes = [2, 1, 96], strides = [1, 1, 1]} : vector<2x8x192xf32> to vector<2x1x96xf32>
    %747 = vector.shape_cast %746 : vector<2x1x96xf32> to vector<2x96xf32>
    %748 = vector.extract_strided_slice %714 {offsets = [0, 96], sizes = [2, 96], strides = [1, 1]} : vector<2x192xf32> to vector<2x96xf32>
    %749 = vector.extract_strided_slice %747 {offsets = [0, 0], sizes = [2, 32], strides = [1, 1]} : vector<2x96xf32> to vector<2x32xf32>
    %750 = vector.extract_strided_slice %748 {offsets = [0, 0], sizes = [2, 32], strides = [1, 1]} : vector<2x96xf32> to vector<2x32xf32>
    %751 = arith.addf %749, %750 : vector<2x32xf32>
    %752 = arith.negf %751 : vector<2x32xf32>
    %753 = math.exp %752 : vector<2x32xf32>
    %cst_110 = arith.constant 1.000000e+00 : f32
    %754 = vector.broadcast %cst_110 : f32 to vector<2x32xf32>
    %755 = arith.addf %754, %753 : vector<2x32xf32>
    %756 = arith.divf %754, %755 : vector<2x32xf32>
    %757 = vector.extract_strided_slice %747 {offsets = [0, 32], sizes = [2, 32], strides = [1, 1]} : vector<2x96xf32> to vector<2x32xf32>
    %758 = vector.extract_strided_slice %748 {offsets = [0, 32], sizes = [2, 32], strides = [1, 1]} : vector<2x96xf32> to vector<2x32xf32>
    %759 = arith.addf %757, %758 : vector<2x32xf32>
    %760 = arith.negf %759 : vector<2x32xf32>
    %761 = math.exp %760 : vector<2x32xf32>
    %cst_111 = arith.constant 1.000000e+00 : f32
    %762 = vector.broadcast %cst_111 : f32 to vector<2x32xf32>
    %763 = arith.addf %762, %761 : vector<2x32xf32>
    %764 = arith.divf %762, %763 : vector<2x32xf32>
    %765 = vector.extract_strided_slice %747 {offsets = [0, 64], sizes = [2, 32], strides = [1, 1]} : vector<2x96xf32> to vector<2x32xf32>
    %766 = vector.extract_strided_slice %748 {offsets = [0, 64], sizes = [2, 32], strides = [1, 1]} : vector<2x96xf32> to vector<2x32xf32>
    %767 = vector.broadcast %581 : vector<1x32xf32> to vector<2x32xf32>
    %768 = arith.addf %766, %767 : vector<2x32xf32>
    %769 = arith.mulf %756, %768 : vector<2x32xf32>
    %770 = arith.addf %765, %769 : vector<2x32xf32>
    %771 = math.tanh %770 : vector<2x32xf32>
    %cst_112 = arith.constant 1.000000e+00 : f32
    %772 = vector.broadcast %cst_112 : f32 to vector<2x32xf32>
    %773 = arith.subf %772, %764 : vector<2x32xf32>
    %774 = arith.mulf %773, %771 : vector<2x32xf32>
    %775 = arith.mulf %764, %711 : vector<2x32xf32>
    %776 = arith.addf %774, %775 : vector<2x32xf32>
    %777 = tpu.concatenate %745, %776 in 1 : vector<2x32xf32>, vector<2x32xf32> -> vector<2x64xf32>
    %778 = arith.truncf %777 : vector<2x64xf32> to vector<2x64xbf16>
    %cst_113 = arith.constant dense<0.000000e+00> : vector<2x192xf32>
    %779 = tpu.matmul %778, %575, %cst_113 {dimension_numbers = #tpu.dot_dimension_numbers<[1], [0], [0], [1], [0, 0, 1, 1], [], []>} : vector<2x64xbf16>, vector<64x192xbf16>, vector<2x192xf32> -> vector<2x192xf32>
    %780 = vector.extract_strided_slice %573 {offsets = [0, 3, 0], sizes = [2, 1, 96], strides = [1, 1, 1]} : vector<2x8x192xf32> to vector<2x1x96xf32>
    %781 = vector.shape_cast %780 : vector<2x1x96xf32> to vector<2x96xf32>
    %782 = vector.extract_strided_slice %779 {offsets = [0, 0], sizes = [2, 96], strides = [1, 1]} : vector<2x192xf32> to vector<2x96xf32>
    %783 = vector.extract_strided_slice %781 {offsets = [0, 0], sizes = [2, 32], strides = [1, 1]} : vector<2x96xf32> to vector<2x32xf32>
    %784 = vector.extract_strided_slice %782 {offsets = [0, 0], sizes = [2, 32], strides = [1, 1]} : vector<2x96xf32> to vector<2x32xf32>
    %785 = arith.addf %783, %784 : vector<2x32xf32>
    %786 = arith.negf %785 : vector<2x32xf32>
    %787 = math.exp %786 : vector<2x32xf32>
    %cst_114 = arith.constant 1.000000e+00 : f32
    %788 = vector.broadcast %cst_114 : f32 to vector<2x32xf32>
    %789 = arith.addf %788, %787 : vector<2x32xf32>
    %790 = arith.divf %788, %789 : vector<2x32xf32>
    %791 = vector.extract_strided_slice %781 {offsets = [0, 32], sizes = [2, 32], strides = [1, 1]} : vector<2x96xf32> to vector<2x32xf32>
    %792 = vector.extract_strided_slice %782 {offsets = [0, 32], sizes = [2, 32], strides = [1, 1]} : vector<2x96xf32> to vector<2x32xf32>
    %793 = arith.addf %791, %792 : vector<2x32xf32>
    %794 = arith.negf %793 : vector<2x32xf32>
    %795 = math.exp %794 : vector<2x32xf32>
    %cst_115 = arith.constant 1.000000e+00 : f32
    %796 = vector.broadcast %cst_115 : f32 to vector<2x32xf32>
    %797 = arith.addf %796, %795 : vector<2x32xf32>
    %798 = arith.divf %796, %797 : vector<2x32xf32>
    %799 = vector.extract_strided_slice %781 {offsets = [0, 64], sizes = [2, 32], strides = [1, 1]} : vector<2x96xf32> to vector<2x32xf32>
    %800 = vector.extract_strided_slice %782 {offsets = [0, 64], sizes = [2, 32], strides = [1, 1]} : vector<2x96xf32> to vector<2x32xf32>
    %801 = vector.broadcast %578 : vector<1x32xf32> to vector<2x32xf32>
    %802 = arith.addf %800, %801 : vector<2x32xf32>
    %803 = arith.mulf %790, %802 : vector<2x32xf32>
    %804 = arith.addf %799, %803 : vector<2x32xf32>
    %805 = math.tanh %804 : vector<2x32xf32>
    %cst_116 = arith.constant 1.000000e+00 : f32
    %806 = vector.broadcast %cst_116 : f32 to vector<2x32xf32>
    %807 = arith.subf %806, %798 : vector<2x32xf32>
    %808 = arith.mulf %807, %805 : vector<2x32xf32>
    %809 = arith.mulf %798, %745 : vector<2x32xf32>
    %810 = arith.addf %808, %809 : vector<2x32xf32>
    %811 = vector.extract_strided_slice %573 {offsets = [0, 4, 96], sizes = [2, 1, 96], strides = [1, 1, 1]} : vector<2x8x192xf32> to vector<2x1x96xf32>
    %812 = vector.shape_cast %811 : vector<2x1x96xf32> to vector<2x96xf32>
    %813 = vector.extract_strided_slice %779 {offsets = [0, 96], sizes = [2, 96], strides = [1, 1]} : vector<2x192xf32> to vector<2x96xf32>
    %814 = vector.extract_strided_slice %812 {offsets = [0, 0], sizes = [2, 32], strides = [1, 1]} : vector<2x96xf32> to vector<2x32xf32>
    %815 = vector.extract_strided_slice %813 {offsets = [0, 0], sizes = [2, 32], strides = [1, 1]} : vector<2x96xf32> to vector<2x32xf32>
    %816 = arith.addf %814, %815 : vector<2x32xf32>
    %817 = arith.negf %816 : vector<2x32xf32>
    %818 = math.exp %817 : vector<2x32xf32>
    %cst_117 = arith.constant 1.000000e+00 : f32
    %819 = vector.broadcast %cst_117 : f32 to vector<2x32xf32>
    %820 = arith.addf %819, %818 : vector<2x32xf32>
    %821 = arith.divf %819, %820 : vector<2x32xf32>
    %822 = vector.extract_strided_slice %812 {offsets = [0, 32], sizes = [2, 32], strides = [1, 1]} : vector<2x96xf32> to vector<2x32xf32>
    %823 = vector.extract_strided_slice %813 {offsets = [0, 32], sizes = [2, 32], strides = [1, 1]} : vector<2x96xf32> to vector<2x32xf32>
    %824 = arith.addf %822, %823 : vector<2x32xf32>
    %825 = arith.negf %824 : vector<2x32xf32>
    %826 = math.exp %825 : vector<2x32xf32>
    %cst_118 = arith.constant 1.000000e+00 : f32
    %827 = vector.broadcast %cst_118 : f32 to vector<2x32xf32>
    %828 = arith.addf %827, %826 : vector<2x32xf32>
    %829 = arith.divf %827, %828 : vector<2x32xf32>
    %830 = vector.extract_strided_slice %812 {offsets = [0, 64], sizes = [2, 32], strides = [1, 1]} : vector<2x96xf32> to vector<2x32xf32>
    %831 = vector.extract_strided_slice %813 {offsets = [0, 64], sizes = [2, 32], strides = [1, 1]} : vector<2x96xf32> to vector<2x32xf32>
    %832 = vector.broadcast %581 : vector<1x32xf32> to vector<2x32xf32>
    %833 = arith.addf %831, %832 : vector<2x32xf32>
    %834 = arith.mulf %821, %833 : vector<2x32xf32>
    %835 = arith.addf %830, %834 : vector<2x32xf32>
    %836 = math.tanh %835 : vector<2x32xf32>
    %cst_119 = arith.constant 1.000000e+00 : f32
    %837 = vector.broadcast %cst_119 : f32 to vector<2x32xf32>
    %838 = arith.subf %837, %829 : vector<2x32xf32>
    %839 = arith.mulf %838, %836 : vector<2x32xf32>
    %840 = arith.mulf %829, %776 : vector<2x32xf32>
    %841 = arith.addf %839, %840 : vector<2x32xf32>
    %842 = tpu.concatenate %810, %841 in 1 : vector<2x32xf32>, vector<2x32xf32> -> vector<2x64xf32>
    %843 = arith.truncf %842 : vector<2x64xf32> to vector<2x64xbf16>
    %cst_120 = arith.constant dense<0.000000e+00> : vector<2x192xf32>
    %844 = tpu.matmul %843, %575, %cst_120 {dimension_numbers = #tpu.dot_dimension_numbers<[1], [0], [0], [1], [0, 0, 1, 1], [], []>} : vector<2x64xbf16>, vector<64x192xbf16>, vector<2x192xf32> -> vector<2x192xf32>
    %845 = vector.extract_strided_slice %573 {offsets = [0, 4, 0], sizes = [2, 1, 96], strides = [1, 1, 1]} : vector<2x8x192xf32> to vector<2x1x96xf32>
    %846 = vector.shape_cast %845 : vector<2x1x96xf32> to vector<2x96xf32>
    %847 = vector.extract_strided_slice %844 {offsets = [0, 0], sizes = [2, 96], strides = [1, 1]} : vector<2x192xf32> to vector<2x96xf32>
    %848 = vector.extract_strided_slice %846 {offsets = [0, 0], sizes = [2, 32], strides = [1, 1]} : vector<2x96xf32> to vector<2x32xf32>
    %849 = vector.extract_strided_slice %847 {offsets = [0, 0], sizes = [2, 32], strides = [1, 1]} : vector<2x96xf32> to vector<2x32xf32>
    %850 = arith.addf %848, %849 : vector<2x32xf32>
    %851 = arith.negf %850 : vector<2x32xf32>
    %852 = math.exp %851 : vector<2x32xf32>
    %cst_121 = arith.constant 1.000000e+00 : f32
    %853 = vector.broadcast %cst_121 : f32 to vector<2x32xf32>
    %854 = arith.addf %853, %852 : vector<2x32xf32>
    %855 = arith.divf %853, %854 : vector<2x32xf32>
    %856 = vector.extract_strided_slice %846 {offsets = [0, 32], sizes = [2, 32], strides = [1, 1]} : vector<2x96xf32> to vector<2x32xf32>
    %857 = vector.extract_strided_slice %847 {offsets = [0, 32], sizes = [2, 32], strides = [1, 1]} : vector<2x96xf32> to vector<2x32xf32>
    %858 = arith.addf %856, %857 : vector<2x32xf32>
    %859 = arith.negf %858 : vector<2x32xf32>
    %860 = math.exp %859 : vector<2x32xf32>
    %cst_122 = arith.constant 1.000000e+00 : f32
    %861 = vector.broadcast %cst_122 : f32 to vector<2x32xf32>
    %862 = arith.addf %861, %860 : vector<2x32xf32>
    %863 = arith.divf %861, %862 : vector<2x32xf32>
    %864 = vector.extract_strided_slice %846 {offsets = [0, 64], sizes = [2, 32], strides = [1, 1]} : vector<2x96xf32> to vector<2x32xf32>
    %865 = vector.extract_strided_slice %847 {offsets = [0, 64], sizes = [2, 32], strides = [1, 1]} : vector<2x96xf32> to vector<2x32xf32>
    %866 = vector.broadcast %578 : vector<1x32xf32> to vector<2x32xf32>
    %867 = arith.addf %865, %866 : vector<2x32xf32>
    %868 = arith.mulf %855, %867 : vector<2x32xf32>
    %869 = arith.addf %864, %868 : vector<2x32xf32>
    %870 = math.tanh %869 : vector<2x32xf32>
    %cst_123 = arith.constant 1.000000e+00 : f32
    %871 = vector.broadcast %cst_123 : f32 to vector<2x32xf32>
    %872 = arith.subf %871, %863 : vector<2x32xf32>
    %873 = arith.mulf %872, %870 : vector<2x32xf32>
    %874 = arith.mulf %863, %810 : vector<2x32xf32>
    %875 = arith.addf %873, %874 : vector<2x32xf32>
    %876 = vector.extract_strided_slice %573 {offsets = [0, 3, 96], sizes = [2, 1, 96], strides = [1, 1, 1]} : vector<2x8x192xf32> to vector<2x1x96xf32>
    %877 = vector.shape_cast %876 : vector<2x1x96xf32> to vector<2x96xf32>
    %878 = vector.extract_strided_slice %844 {offsets = [0, 96], sizes = [2, 96], strides = [1, 1]} : vector<2x192xf32> to vector<2x96xf32>
    %879 = vector.extract_strided_slice %877 {offsets = [0, 0], sizes = [2, 32], strides = [1, 1]} : vector<2x96xf32> to vector<2x32xf32>
    %880 = vector.extract_strided_slice %878 {offsets = [0, 0], sizes = [2, 32], strides = [1, 1]} : vector<2x96xf32> to vector<2x32xf32>
    %881 = arith.addf %879, %880 : vector<2x32xf32>
    %882 = arith.negf %881 : vector<2x32xf32>
    %883 = math.exp %882 : vector<2x32xf32>
    %cst_124 = arith.constant 1.000000e+00 : f32
    %884 = vector.broadcast %cst_124 : f32 to vector<2x32xf32>
    %885 = arith.addf %884, %883 : vector<2x32xf32>
    %886 = arith.divf %884, %885 : vector<2x32xf32>
    %887 = vector.extract_strided_slice %877 {offsets = [0, 32], sizes = [2, 32], strides = [1, 1]} : vector<2x96xf32> to vector<2x32xf32>
    %888 = vector.extract_strided_slice %878 {offsets = [0, 32], sizes = [2, 32], strides = [1, 1]} : vector<2x96xf32> to vector<2x32xf32>
    %889 = arith.addf %887, %888 : vector<2x32xf32>
    %890 = arith.negf %889 : vector<2x32xf32>
    %891 = math.exp %890 : vector<2x32xf32>
    %cst_125 = arith.constant 1.000000e+00 : f32
    %892 = vector.broadcast %cst_125 : f32 to vector<2x32xf32>
    %893 = arith.addf %892, %891 : vector<2x32xf32>
    %894 = arith.divf %892, %893 : vector<2x32xf32>
    %895 = vector.extract_strided_slice %877 {offsets = [0, 64], sizes = [2, 32], strides = [1, 1]} : vector<2x96xf32> to vector<2x32xf32>
    %896 = vector.extract_strided_slice %878 {offsets = [0, 64], sizes = [2, 32], strides = [1, 1]} : vector<2x96xf32> to vector<2x32xf32>
    %897 = vector.broadcast %581 : vector<1x32xf32> to vector<2x32xf32>
    %898 = arith.addf %896, %897 : vector<2x32xf32>
    %899 = arith.mulf %886, %898 : vector<2x32xf32>
    %900 = arith.addf %895, %899 : vector<2x32xf32>
    %901 = math.tanh %900 : vector<2x32xf32>
    %cst_126 = arith.constant 1.000000e+00 : f32
    %902 = vector.broadcast %cst_126 : f32 to vector<2x32xf32>
    %903 = arith.subf %902, %894 : vector<2x32xf32>
    %904 = arith.mulf %903, %901 : vector<2x32xf32>
    %905 = arith.mulf %894, %841 : vector<2x32xf32>
    %906 = arith.addf %904, %905 : vector<2x32xf32>
    %907 = tpu.concatenate %875, %906 in 1 : vector<2x32xf32>, vector<2x32xf32> -> vector<2x64xf32>
    %908 = arith.truncf %907 : vector<2x64xf32> to vector<2x64xbf16>
    %cst_127 = arith.constant dense<0.000000e+00> : vector<2x192xf32>
    %909 = tpu.matmul %908, %575, %cst_127 {dimension_numbers = #tpu.dot_dimension_numbers<[1], [0], [0], [1], [0, 0, 1, 1], [], []>} : vector<2x64xbf16>, vector<64x192xbf16>, vector<2x192xf32> -> vector<2x192xf32>
    %910 = vector.extract_strided_slice %573 {offsets = [0, 5, 0], sizes = [2, 1, 96], strides = [1, 1, 1]} : vector<2x8x192xf32> to vector<2x1x96xf32>
    %911 = vector.shape_cast %910 : vector<2x1x96xf32> to vector<2x96xf32>
    %912 = vector.extract_strided_slice %909 {offsets = [0, 0], sizes = [2, 96], strides = [1, 1]} : vector<2x192xf32> to vector<2x96xf32>
    %913 = vector.extract_strided_slice %911 {offsets = [0, 0], sizes = [2, 32], strides = [1, 1]} : vector<2x96xf32> to vector<2x32xf32>
    %914 = vector.extract_strided_slice %912 {offsets = [0, 0], sizes = [2, 32], strides = [1, 1]} : vector<2x96xf32> to vector<2x32xf32>
    %915 = arith.addf %913, %914 : vector<2x32xf32>
    %916 = arith.negf %915 : vector<2x32xf32>
    %917 = math.exp %916 : vector<2x32xf32>
    %cst_128 = arith.constant 1.000000e+00 : f32
    %918 = vector.broadcast %cst_128 : f32 to vector<2x32xf32>
    %919 = arith.addf %918, %917 : vector<2x32xf32>
    %920 = arith.divf %918, %919 : vector<2x32xf32>
    %921 = vector.extract_strided_slice %911 {offsets = [0, 32], sizes = [2, 32], strides = [1, 1]} : vector<2x96xf32> to vector<2x32xf32>
    %922 = vector.extract_strided_slice %912 {offsets = [0, 32], sizes = [2, 32], strides = [1, 1]} : vector<2x96xf32> to vector<2x32xf32>
    %923 = arith.addf %921, %922 : vector<2x32xf32>
    %924 = arith.negf %923 : vector<2x32xf32>
    %925 = math.exp %924 : vector<2x32xf32>
    %cst_129 = arith.constant 1.000000e+00 : f32
    %926 = vector.broadcast %cst_129 : f32 to vector<2x32xf32>
    %927 = arith.addf %926, %925 : vector<2x32xf32>
    %928 = arith.divf %926, %927 : vector<2x32xf32>
    %929 = vector.extract_strided_slice %911 {offsets = [0, 64], sizes = [2, 32], strides = [1, 1]} : vector<2x96xf32> to vector<2x32xf32>
    %930 = vector.extract_strided_slice %912 {offsets = [0, 64], sizes = [2, 32], strides = [1, 1]} : vector<2x96xf32> to vector<2x32xf32>
    %931 = vector.broadcast %578 : vector<1x32xf32> to vector<2x32xf32>
    %932 = arith.addf %930, %931 : vector<2x32xf32>
    %933 = arith.mulf %920, %932 : vector<2x32xf32>
    %934 = arith.addf %929, %933 : vector<2x32xf32>
    %935 = math.tanh %934 : vector<2x32xf32>
    %cst_130 = arith.constant 1.000000e+00 : f32
    %936 = vector.broadcast %cst_130 : f32 to vector<2x32xf32>
    %937 = arith.subf %936, %928 : vector<2x32xf32>
    %938 = arith.mulf %937, %935 : vector<2x32xf32>
    %939 = arith.mulf %928, %875 : vector<2x32xf32>
    %940 = arith.addf %938, %939 : vector<2x32xf32>
    %941 = vector.extract_strided_slice %573 {offsets = [0, 2, 96], sizes = [2, 1, 96], strides = [1, 1, 1]} : vector<2x8x192xf32> to vector<2x1x96xf32>
    %942 = vector.shape_cast %941 : vector<2x1x96xf32> to vector<2x96xf32>
    %943 = vector.extract_strided_slice %909 {offsets = [0, 96], sizes = [2, 96], strides = [1, 1]} : vector<2x192xf32> to vector<2x96xf32>
    %944 = vector.extract_strided_slice %942 {offsets = [0, 0], sizes = [2, 32], strides = [1, 1]} : vector<2x96xf32> to vector<2x32xf32>
    %945 = vector.extract_strided_slice %943 {offsets = [0, 0], sizes = [2, 32], strides = [1, 1]} : vector<2x96xf32> to vector<2x32xf32>
    %946 = arith.addf %944, %945 : vector<2x32xf32>
    %947 = arith.negf %946 : vector<2x32xf32>
    %948 = math.exp %947 : vector<2x32xf32>
    %cst_131 = arith.constant 1.000000e+00 : f32
    %949 = vector.broadcast %cst_131 : f32 to vector<2x32xf32>
    %950 = arith.addf %949, %948 : vector<2x32xf32>
    %951 = arith.divf %949, %950 : vector<2x32xf32>
    %952 = vector.extract_strided_slice %942 {offsets = [0, 32], sizes = [2, 32], strides = [1, 1]} : vector<2x96xf32> to vector<2x32xf32>
    %953 = vector.extract_strided_slice %943 {offsets = [0, 32], sizes = [2, 32], strides = [1, 1]} : vector<2x96xf32> to vector<2x32xf32>
    %954 = arith.addf %952, %953 : vector<2x32xf32>
    %955 = arith.negf %954 : vector<2x32xf32>
    %956 = math.exp %955 : vector<2x32xf32>
    %cst_132 = arith.constant 1.000000e+00 : f32
    %957 = vector.broadcast %cst_132 : f32 to vector<2x32xf32>
    %958 = arith.addf %957, %956 : vector<2x32xf32>
    %959 = arith.divf %957, %958 : vector<2x32xf32>
    %960 = vector.extract_strided_slice %942 {offsets = [0, 64], sizes = [2, 32], strides = [1, 1]} : vector<2x96xf32> to vector<2x32xf32>
    %961 = vector.extract_strided_slice %943 {offsets = [0, 64], sizes = [2, 32], strides = [1, 1]} : vector<2x96xf32> to vector<2x32xf32>
    %962 = vector.broadcast %581 : vector<1x32xf32> to vector<2x32xf32>
    %963 = arith.addf %961, %962 : vector<2x32xf32>
    %964 = arith.mulf %951, %963 : vector<2x32xf32>
    %965 = arith.addf %960, %964 : vector<2x32xf32>
    %966 = math.tanh %965 : vector<2x32xf32>
    %cst_133 = arith.constant 1.000000e+00 : f32
    %967 = vector.broadcast %cst_133 : f32 to vector<2x32xf32>
    %968 = arith.subf %967, %959 : vector<2x32xf32>
    %969 = arith.mulf %968, %966 : vector<2x32xf32>
    %970 = arith.mulf %959, %906 : vector<2x32xf32>
    %971 = arith.addf %969, %970 : vector<2x32xf32>
    %972 = tpu.concatenate %940, %971 in 1 : vector<2x32xf32>, vector<2x32xf32> -> vector<2x64xf32>
    %973 = arith.truncf %972 : vector<2x64xf32> to vector<2x64xbf16>
    %cst_134 = arith.constant dense<0.000000e+00> : vector<2x192xf32>
    %974 = tpu.matmul %973, %575, %cst_134 {dimension_numbers = #tpu.dot_dimension_numbers<[1], [0], [0], [1], [0, 0, 1, 1], [], []>} : vector<2x64xbf16>, vector<64x192xbf16>, vector<2x192xf32> -> vector<2x192xf32>
    %975 = vector.extract_strided_slice %573 {offsets = [0, 6, 0], sizes = [2, 1, 96], strides = [1, 1, 1]} : vector<2x8x192xf32> to vector<2x1x96xf32>
    %976 = vector.shape_cast %975 : vector<2x1x96xf32> to vector<2x96xf32>
    %977 = vector.extract_strided_slice %974 {offsets = [0, 0], sizes = [2, 96], strides = [1, 1]} : vector<2x192xf32> to vector<2x96xf32>
    %978 = vector.extract_strided_slice %976 {offsets = [0, 0], sizes = [2, 32], strides = [1, 1]} : vector<2x96xf32> to vector<2x32xf32>
    %979 = vector.extract_strided_slice %977 {offsets = [0, 0], sizes = [2, 32], strides = [1, 1]} : vector<2x96xf32> to vector<2x32xf32>
    %980 = arith.addf %978, %979 : vector<2x32xf32>
    %981 = arith.negf %980 : vector<2x32xf32>
    %982 = math.exp %981 : vector<2x32xf32>
    %cst_135 = arith.constant 1.000000e+00 : f32
    %983 = vector.broadcast %cst_135 : f32 to vector<2x32xf32>
    %984 = arith.addf %983, %982 : vector<2x32xf32>
    %985 = arith.divf %983, %984 : vector<2x32xf32>
    %986 = vector.extract_strided_slice %976 {offsets = [0, 32], sizes = [2, 32], strides = [1, 1]} : vector<2x96xf32> to vector<2x32xf32>
    %987 = vector.extract_strided_slice %977 {offsets = [0, 32], sizes = [2, 32], strides = [1, 1]} : vector<2x96xf32> to vector<2x32xf32>
    %988 = arith.addf %986, %987 : vector<2x32xf32>
    %989 = arith.negf %988 : vector<2x32xf32>
    %990 = math.exp %989 : vector<2x32xf32>
    %cst_136 = arith.constant 1.000000e+00 : f32
    %991 = vector.broadcast %cst_136 : f32 to vector<2x32xf32>
    %992 = arith.addf %991, %990 : vector<2x32xf32>
    %993 = arith.divf %991, %992 : vector<2x32xf32>
    %994 = vector.extract_strided_slice %976 {offsets = [0, 64], sizes = [2, 32], strides = [1, 1]} : vector<2x96xf32> to vector<2x32xf32>
    %995 = vector.extract_strided_slice %977 {offsets = [0, 64], sizes = [2, 32], strides = [1, 1]} : vector<2x96xf32> to vector<2x32xf32>
    %996 = vector.broadcast %578 : vector<1x32xf32> to vector<2x32xf32>
    %997 = arith.addf %995, %996 : vector<2x32xf32>
    %998 = arith.mulf %985, %997 : vector<2x32xf32>
    %999 = arith.addf %994, %998 : vector<2x32xf32>
    %1000 = math.tanh %999 : vector<2x32xf32>
    %cst_137 = arith.constant 1.000000e+00 : f32
    %1001 = vector.broadcast %cst_137 : f32 to vector<2x32xf32>
    %1002 = arith.subf %1001, %993 : vector<2x32xf32>
    %1003 = arith.mulf %1002, %1000 : vector<2x32xf32>
    %1004 = arith.mulf %993, %940 : vector<2x32xf32>
    %1005 = arith.addf %1003, %1004 : vector<2x32xf32>
    %1006 = vector.extract_strided_slice %573 {offsets = [0, 1, 96], sizes = [2, 1, 96], strides = [1, 1, 1]} : vector<2x8x192xf32> to vector<2x1x96xf32>
    %1007 = vector.shape_cast %1006 : vector<2x1x96xf32> to vector<2x96xf32>
    %1008 = vector.extract_strided_slice %974 {offsets = [0, 96], sizes = [2, 96], strides = [1, 1]} : vector<2x192xf32> to vector<2x96xf32>
    %1009 = vector.extract_strided_slice %1007 {offsets = [0, 0], sizes = [2, 32], strides = [1, 1]} : vector<2x96xf32> to vector<2x32xf32>
    %1010 = vector.extract_strided_slice %1008 {offsets = [0, 0], sizes = [2, 32], strides = [1, 1]} : vector<2x96xf32> to vector<2x32xf32>
    %1011 = arith.addf %1009, %1010 : vector<2x32xf32>
    %1012 = arith.negf %1011 : vector<2x32xf32>
    %1013 = math.exp %1012 : vector<2x32xf32>
    %cst_138 = arith.constant 1.000000e+00 : f32
    %1014 = vector.broadcast %cst_138 : f32 to vector<2x32xf32>
    %1015 = arith.addf %1014, %1013 : vector<2x32xf32>
    %1016 = arith.divf %1014, %1015 : vector<2x32xf32>
    %1017 = vector.extract_strided_slice %1007 {offsets = [0, 32], sizes = [2, 32], strides = [1, 1]} : vector<2x96xf32> to vector<2x32xf32>
    %1018 = vector.extract_strided_slice %1008 {offsets = [0, 32], sizes = [2, 32], strides = [1, 1]} : vector<2x96xf32> to vector<2x32xf32>
    %1019 = arith.addf %1017, %1018 : vector<2x32xf32>
    %1020 = arith.negf %1019 : vector<2x32xf32>
    %1021 = math.exp %1020 : vector<2x32xf32>
    %cst_139 = arith.constant 1.000000e+00 : f32
    %1022 = vector.broadcast %cst_139 : f32 to vector<2x32xf32>
    %1023 = arith.addf %1022, %1021 : vector<2x32xf32>
    %1024 = arith.divf %1022, %1023 : vector<2x32xf32>
    %1025 = vector.extract_strided_slice %1007 {offsets = [0, 64], sizes = [2, 32], strides = [1, 1]} : vector<2x96xf32> to vector<2x32xf32>
    %1026 = vector.extract_strided_slice %1008 {offsets = [0, 64], sizes = [2, 32], strides = [1, 1]} : vector<2x96xf32> to vector<2x32xf32>
    %1027 = vector.broadcast %581 : vector<1x32xf32> to vector<2x32xf32>
    %1028 = arith.addf %1026, %1027 : vector<2x32xf32>
    %1029 = arith.mulf %1016, %1028 : vector<2x32xf32>
    %1030 = arith.addf %1025, %1029 : vector<2x32xf32>
    %1031 = math.tanh %1030 : vector<2x32xf32>
    %cst_140 = arith.constant 1.000000e+00 : f32
    %1032 = vector.broadcast %cst_140 : f32 to vector<2x32xf32>
    %1033 = arith.subf %1032, %1024 : vector<2x32xf32>
    %1034 = arith.mulf %1033, %1031 : vector<2x32xf32>
    %1035 = arith.mulf %1024, %971 : vector<2x32xf32>
    %1036 = arith.addf %1034, %1035 : vector<2x32xf32>
    %1037 = tpu.concatenate %1005, %1036 in 1 : vector<2x32xf32>, vector<2x32xf32> -> vector<2x64xf32>
    %1038 = arith.truncf %1037 : vector<2x64xf32> to vector<2x64xbf16>
    %cst_141 = arith.constant dense<0.000000e+00> : vector<2x192xf32>
    %1039 = tpu.matmul %1038, %575, %cst_141 {dimension_numbers = #tpu.dot_dimension_numbers<[1], [0], [0], [1], [0, 0, 1, 1], [], []>} : vector<2x64xbf16>, vector<64x192xbf16>, vector<2x192xf32> -> vector<2x192xf32>
    %1040 = vector.extract_strided_slice %573 {offsets = [0, 7, 0], sizes = [2, 1, 96], strides = [1, 1, 1]} : vector<2x8x192xf32> to vector<2x1x96xf32>
    %1041 = vector.shape_cast %1040 : vector<2x1x96xf32> to vector<2x96xf32>
    %1042 = vector.extract_strided_slice %1039 {offsets = [0, 0], sizes = [2, 96], strides = [1, 1]} : vector<2x192xf32> to vector<2x96xf32>
    %1043 = vector.extract_strided_slice %1041 {offsets = [0, 0], sizes = [2, 32], strides = [1, 1]} : vector<2x96xf32> to vector<2x32xf32>
    %1044 = vector.extract_strided_slice %1042 {offsets = [0, 0], sizes = [2, 32], strides = [1, 1]} : vector<2x96xf32> to vector<2x32xf32>
    %1045 = arith.addf %1043, %1044 : vector<2x32xf32>
    %1046 = arith.negf %1045 : vector<2x32xf32>
    %1047 = math.exp %1046 : vector<2x32xf32>
    %cst_142 = arith.constant 1.000000e+00 : f32
    %1048 = vector.broadcast %cst_142 : f32 to vector<2x32xf32>
    %1049 = arith.addf %1048, %1047 : vector<2x32xf32>
    %1050 = arith.divf %1048, %1049 : vector<2x32xf32>
    %1051 = vector.extract_strided_slice %1041 {offsets = [0, 32], sizes = [2, 32], strides = [1, 1]} : vector<2x96xf32> to vector<2x32xf32>
    %1052 = vector.extract_strided_slice %1042 {offsets = [0, 32], sizes = [2, 32], strides = [1, 1]} : vector<2x96xf32> to vector<2x32xf32>
    %1053 = arith.addf %1051, %1052 : vector<2x32xf32>
    %1054 = arith.negf %1053 : vector<2x32xf32>
    %1055 = math.exp %1054 : vector<2x32xf32>
    %cst_143 = arith.constant 1.000000e+00 : f32
    %1056 = vector.broadcast %cst_143 : f32 to vector<2x32xf32>
    %1057 = arith.addf %1056, %1055 : vector<2x32xf32>
    %1058 = arith.divf %1056, %1057 : vector<2x32xf32>
    %1059 = vector.extract_strided_slice %1041 {offsets = [0, 64], sizes = [2, 32], strides = [1, 1]} : vector<2x96xf32> to vector<2x32xf32>
    %1060 = vector.extract_strided_slice %1042 {offsets = [0, 64], sizes = [2, 32], strides = [1, 1]} : vector<2x96xf32> to vector<2x32xf32>
    %1061 = vector.broadcast %578 : vector<1x32xf32> to vector<2x32xf32>
    %1062 = arith.addf %1060, %1061 : vector<2x32xf32>
    %1063 = arith.mulf %1050, %1062 : vector<2x32xf32>
    %1064 = arith.addf %1059, %1063 : vector<2x32xf32>
    %1065 = math.tanh %1064 : vector<2x32xf32>
    %cst_144 = arith.constant 1.000000e+00 : f32
    %1066 = vector.broadcast %cst_144 : f32 to vector<2x32xf32>
    %1067 = arith.subf %1066, %1058 : vector<2x32xf32>
    %1068 = arith.mulf %1067, %1065 : vector<2x32xf32>
    %1069 = arith.mulf %1058, %1005 : vector<2x32xf32>
    %1070 = arith.addf %1068, %1069 : vector<2x32xf32>
    %1071 = vector.extract_strided_slice %573 {offsets = [0, 0, 96], sizes = [2, 1, 96], strides = [1, 1, 1]} : vector<2x8x192xf32> to vector<2x1x96xf32>
    %1072 = vector.shape_cast %1071 : vector<2x1x96xf32> to vector<2x96xf32>
    %1073 = vector.extract_strided_slice %1039 {offsets = [0, 96], sizes = [2, 96], strides = [1, 1]} : vector<2x192xf32> to vector<2x96xf32>
    %1074 = vector.extract_strided_slice %1072 {offsets = [0, 0], sizes = [2, 32], strides = [1, 1]} : vector<2x96xf32> to vector<2x32xf32>
    %1075 = vector.extract_strided_slice %1073 {offsets = [0, 0], sizes = [2, 32], strides = [1, 1]} : vector<2x96xf32> to vector<2x32xf32>
    %1076 = arith.addf %1074, %1075 : vector<2x32xf32>
    %1077 = arith.negf %1076 : vector<2x32xf32>
    %1078 = math.exp %1077 : vector<2x32xf32>
    %cst_145 = arith.constant 1.000000e+00 : f32
    %1079 = vector.broadcast %cst_145 : f32 to vector<2x32xf32>
    %1080 = arith.addf %1079, %1078 : vector<2x32xf32>
    %1081 = arith.divf %1079, %1080 : vector<2x32xf32>
    %1082 = vector.extract_strided_slice %1072 {offsets = [0, 32], sizes = [2, 32], strides = [1, 1]} : vector<2x96xf32> to vector<2x32xf32>
    %1083 = vector.extract_strided_slice %1073 {offsets = [0, 32], sizes = [2, 32], strides = [1, 1]} : vector<2x96xf32> to vector<2x32xf32>
    %1084 = arith.addf %1082, %1083 : vector<2x32xf32>
    %1085 = arith.negf %1084 : vector<2x32xf32>
    %1086 = math.exp %1085 : vector<2x32xf32>
    %cst_146 = arith.constant 1.000000e+00 : f32
    %1087 = vector.broadcast %cst_146 : f32 to vector<2x32xf32>
    %1088 = arith.addf %1087, %1086 : vector<2x32xf32>
    %1089 = arith.divf %1087, %1088 : vector<2x32xf32>
    %1090 = vector.extract_strided_slice %1072 {offsets = [0, 64], sizes = [2, 32], strides = [1, 1]} : vector<2x96xf32> to vector<2x32xf32>
    %1091 = vector.extract_strided_slice %1073 {offsets = [0, 64], sizes = [2, 32], strides = [1, 1]} : vector<2x96xf32> to vector<2x32xf32>
    %1092 = vector.broadcast %581 : vector<1x32xf32> to vector<2x32xf32>
    %1093 = arith.addf %1091, %1092 : vector<2x32xf32>
    %1094 = arith.mulf %1081, %1093 : vector<2x32xf32>
    %1095 = arith.addf %1090, %1094 : vector<2x32xf32>
    %1096 = math.tanh %1095 : vector<2x32xf32>
    %cst_147 = arith.constant 1.000000e+00 : f32
    %1097 = vector.broadcast %cst_147 : f32 to vector<2x32xf32>
    %1098 = arith.subf %1097, %1089 : vector<2x32xf32>
    %1099 = arith.mulf %1098, %1096 : vector<2x32xf32>
    %1100 = arith.mulf %1089, %1036 : vector<2x32xf32>
    %1101 = arith.addf %1099, %1100 : vector<2x32xf32>
    %1102 = vector.shape_cast %615 : vector<2x32xf32> to vector<2x1x32xf32>
    %1103 = vector.shape_cast %680 : vector<2x32xf32> to vector<2x1x32xf32>
    %1104 = vector.shape_cast %745 : vector<2x32xf32> to vector<2x1x32xf32>
    %1105 = vector.shape_cast %810 : vector<2x32xf32> to vector<2x1x32xf32>
    %1106 = vector.shape_cast %875 : vector<2x32xf32> to vector<2x1x32xf32>
    %1107 = vector.shape_cast %940 : vector<2x32xf32> to vector<2x1x32xf32>
    %1108 = vector.shape_cast %1005 : vector<2x32xf32> to vector<2x1x32xf32>
    %1109 = vector.shape_cast %1070 : vector<2x32xf32> to vector<2x1x32xf32>
    %1110 = tpu.concatenate %1102, %1103, %1104, %1105, %1106, %1107, %1108, %1109 in 1 : vector<2x1x32xf32>, vector<2x1x32xf32>, vector<2x1x32xf32>, vector<2x1x32xf32>, vector<2x1x32xf32>, vector<2x1x32xf32>, vector<2x1x32xf32>, vector<2x1x32xf32> -> vector<2x8x32xf32>
    %1111 = vector.shape_cast %1110 : vector<2x8x32xf32> to vector<16x32xf32>
    %1112 = vector.shape_cast %1101 : vector<2x32xf32> to vector<2x1x32xf32>
    %1113 = vector.shape_cast %1036 : vector<2x32xf32> to vector<2x1x32xf32>
    %1114 = vector.shape_cast %971 : vector<2x32xf32> to vector<2x1x32xf32>
    %1115 = vector.shape_cast %906 : vector<2x32xf32> to vector<2x1x32xf32>
    %1116 = vector.shape_cast %841 : vector<2x32xf32> to vector<2x1x32xf32>
    %1117 = vector.shape_cast %776 : vector<2x32xf32> to vector<2x1x32xf32>
    %1118 = vector.shape_cast %711 : vector<2x32xf32> to vector<2x1x32xf32>
    %1119 = vector.shape_cast %646 : vector<2x32xf32> to vector<2x1x32xf32>
    %1120 = tpu.concatenate %1112, %1113, %1114, %1115, %1116, %1117, %1118, %1119 in 1 : vector<2x1x32xf32>, vector<2x1x32xf32>, vector<2x1x32xf32>, vector<2x1x32xf32>, vector<2x1x32xf32>, vector<2x1x32xf32>, vector<2x1x32xf32>, vector<2x1x32xf32> -> vector<2x8x32xf32>
    %1121 = vector.shape_cast %1120 : vector<2x8x32xf32> to vector<16x32xf32>
    %1122 = arith.truncf %1111 : vector<16x32xf32> to vector<16x32xbf16>
    %1123 = arith.truncf %1121 : vector<16x32xf32> to vector<16x32xbf16>
    %c1_148 = arith.constant 1 : index
    %c0_149 = arith.constant 0 : index
    %c0_150 = arith.constant 0 : index
    %1124 = vector.load %arg2[%c1_148, %c0_149, %c0_150] : memref<2x64x192xbf16, #tpu.memory_space<vmem>>, vector<1x64x192xbf16>
    %1125 = vector.shape_cast %1124 : vector<1x64x192xbf16> to vector<64x192xbf16>
    %1126 = vector.extract_strided_slice %1125 {offsets = [0, 0], sizes = [32, 192], strides = [1, 1]} : vector<64x192xbf16> to vector<32x192xbf16>
    %cst_151 = arith.constant dense<0.000000e+00> : vector<16x192xf32>
    %1127 = tpu.matmul %1122, %1126, %cst_151 {dimension_numbers = #tpu.dot_dimension_numbers<[1], [0], [0], [1], [0, 0, 1, 1], [], []>} : vector<16x32xbf16>, vector<32x192xbf16>, vector<16x192xf32> -> vector<16x192xf32>
    %1128 = vector.extract_strided_slice %1125 {offsets = [32, 0], sizes = [32, 192], strides = [1, 1]} : vector<64x192xbf16> to vector<32x192xbf16>
    %cst_152 = arith.constant dense<0.000000e+00> : vector<16x192xf32>
    %1129 = tpu.matmul %1123, %1128, %cst_152 {dimension_numbers = #tpu.dot_dimension_numbers<[1], [0], [0], [1], [0, 0, 1, 1], [], []>} : vector<16x32xbf16>, vector<32x192xbf16>, vector<16x192xf32> -> vector<16x192xf32>
    %1130 = arith.addf %1127, %1129 : vector<16x192xf32>
    %1131 = vector.shape_cast %1130 : vector<16x192xf32> to vector<2x8x192xf32>
    %c2 = arith.constant 2 : index
    %c0_153 = arith.constant 0 : index
    %c0_154 = arith.constant 0 : index
    %1132 = vector.load %arg4[%c2, %c0_153, %c0_154] : memref<3x1x192xf32, #tpu.memory_space<vmem>>, vector<1x1x192xf32>
    %1133 = vector.shape_cast %1132 : vector<1x1x192xf32> to vector<1x192xf32>
    %1134 = vector.shape_cast %1133 : vector<1x192xf32> to vector<1x1x192xf32>
    %1135 = vector.broadcast %1134 : vector<1x1x192xf32> to vector<2x8x192xf32>
    %1136 = arith.addf %1131, %1135 : vector<2x8x192xf32>
    %c2_155 = arith.constant 2 : index
    %c0_156 = arith.constant 0 : index
    %c0_157 = arith.constant 0 : index
    %1137 = vector.load %arg3[%c2_155, %c0_156, %c0_157] : memref<3x64x192xbf16, #tpu.memory_space<vmem>>, vector<1x64x192xbf16>
    %1138 = vector.shape_cast %1137 : vector<1x64x192xbf16> to vector<64x192xbf16>
    %1139 = vector.extract_strided_slice %1138 {offsets = [0, 0], sizes = [32, 96], strides = [1, 1]} : vector<64x192xbf16> to vector<32x96xbf16>
    %c2_158 = arith.constant 2 : index
    %c0_159 = arith.constant 0 : index
    %c0_160 = arith.constant 0 : index
    %1140 = vector.load %arg5[%c2_158, %c0_159, %c0_160] : memref<3x1x64xf32, #tpu.memory_space<vmem>>, vector<1x1x64xf32>
    %1141 = vector.shape_cast %1140 : vector<1x1x64xf32> to vector<1x64xf32>
    %1142 = vector.extract_strided_slice %1141 {offsets = [0, 0], sizes = [1, 32], strides = [1, 1]} : vector<1x64xf32> to vector<1x32xf32>
    %c2_161 = arith.constant 2 : index
    %c0_162 = arith.constant 0 : index
    %c0_163 = arith.constant 0 : index
    %1143 = vector.load %arg5[%c2_161, %c0_162, %c0_163] : memref<3x1x64xf32, #tpu.memory_space<vmem>>, vector<1x1x64xf32>
    %1144 = vector.shape_cast %1143 : vector<1x1x64xf32> to vector<1x64xf32>
    %1145 = vector.extract_strided_slice %1144 {offsets = [0, 32], sizes = [1, 32], strides = [1, 1]} : vector<1x64xf32> to vector<1x32xf32>
    %cst_164 = arith.constant 0.000000e+00 : f32
    %1146 = vector.broadcast %cst_164 : f32 to vector<2x32xf32>
    %cst_165 = arith.constant 0.000000e+00 : f32
    %1147 = vector.broadcast %cst_165 : f32 to vector<2x96xf32>
    %1148 = vector.extract_strided_slice %1136 {offsets = [0, 0, 0], sizes = [2, 1, 96], strides = [1, 1, 1]} : vector<2x8x192xf32> to vector<2x1x96xf32>
    %1149 = vector.shape_cast %1148 : vector<2x1x96xf32> to vector<2x96xf32>
    %1150 = vector.extract_strided_slice %1149 {offsets = [0, 0], sizes = [2, 32], strides = [1, 1]} : vector<2x96xf32> to vector<2x32xf32>
    %1151 = vector.extract_strided_slice %1147 {offsets = [0, 0], sizes = [2, 32], strides = [1, 1]} : vector<2x96xf32> to vector<2x32xf32>
    %1152 = arith.addf %1150, %1151 : vector<2x32xf32>
    %1153 = arith.negf %1152 : vector<2x32xf32>
    %1154 = math.exp %1153 : vector<2x32xf32>
    %cst_166 = arith.constant 1.000000e+00 : f32
    %1155 = vector.broadcast %cst_166 : f32 to vector<2x32xf32>
    %1156 = arith.addf %1155, %1154 : vector<2x32xf32>
    %1157 = arith.divf %1155, %1156 : vector<2x32xf32>
    %1158 = vector.extract_strided_slice %1149 {offsets = [0, 32], sizes = [2, 32], strides = [1, 1]} : vector<2x96xf32> to vector<2x32xf32>
    %1159 = vector.extract_strided_slice %1147 {offsets = [0, 32], sizes = [2, 32], strides = [1, 1]} : vector<2x96xf32> to vector<2x32xf32>
    %1160 = arith.addf %1158, %1159 : vector<2x32xf32>
    %1161 = arith.negf %1160 : vector<2x32xf32>
    %1162 = math.exp %1161 : vector<2x32xf32>
    %cst_167 = arith.constant 1.000000e+00 : f32
    %1163 = vector.broadcast %cst_167 : f32 to vector<2x32xf32>
    %1164 = arith.addf %1163, %1162 : vector<2x32xf32>
    %1165 = arith.divf %1163, %1164 : vector<2x32xf32>
    %1166 = vector.extract_strided_slice %1149 {offsets = [0, 64], sizes = [2, 32], strides = [1, 1]} : vector<2x96xf32> to vector<2x32xf32>
    %1167 = vector.extract_strided_slice %1147 {offsets = [0, 64], sizes = [2, 32], strides = [1, 1]} : vector<2x96xf32> to vector<2x32xf32>
    %1168 = vector.broadcast %1142 : vector<1x32xf32> to vector<2x32xf32>
    %1169 = arith.addf %1167, %1168 : vector<2x32xf32>
    %1170 = arith.mulf %1157, %1169 : vector<2x32xf32>
    %1171 = arith.addf %1166, %1170 : vector<2x32xf32>
    %1172 = math.tanh %1171 : vector<2x32xf32>
    %cst_168 = arith.constant 1.000000e+00 : f32
    %1173 = vector.broadcast %cst_168 : f32 to vector<2x32xf32>
    %1174 = arith.subf %1173, %1165 : vector<2x32xf32>
    %1175 = arith.mulf %1174, %1172 : vector<2x32xf32>
    %1176 = arith.mulf %1165, %1146 : vector<2x32xf32>
    %1177 = arith.addf %1175, %1176 : vector<2x32xf32>
    %1178 = arith.truncf %1177 : vector<2x32xf32> to vector<2x32xbf16>
    %cst_169 = arith.constant dense<0.000000e+00> : vector<2x96xf32>
    %1179 = tpu.matmul %1178, %1139, %cst_169 {dimension_numbers = #tpu.dot_dimension_numbers<[1], [0], [0], [1], [0, 0, 1, 1], [], []>} : vector<2x32xbf16>, vector<32x96xbf16>, vector<2x96xf32> -> vector<2x96xf32>
    %1180 = vector.extract_strided_slice %1136 {offsets = [0, 1, 0], sizes = [2, 1, 96], strides = [1, 1, 1]} : vector<2x8x192xf32> to vector<2x1x96xf32>
    %1181 = vector.shape_cast %1180 : vector<2x1x96xf32> to vector<2x96xf32>
    %1182 = vector.extract_strided_slice %1181 {offsets = [0, 0], sizes = [2, 32], strides = [1, 1]} : vector<2x96xf32> to vector<2x32xf32>
    %1183 = vector.extract_strided_slice %1179 {offsets = [0, 0], sizes = [2, 32], strides = [1, 1]} : vector<2x96xf32> to vector<2x32xf32>
    %1184 = arith.addf %1182, %1183 : vector<2x32xf32>
    %1185 = arith.negf %1184 : vector<2x32xf32>
    %1186 = math.exp %1185 : vector<2x32xf32>
    %cst_170 = arith.constant 1.000000e+00 : f32
    %1187 = vector.broadcast %cst_170 : f32 to vector<2x32xf32>
    %1188 = arith.addf %1187, %1186 : vector<2x32xf32>
    %1189 = arith.divf %1187, %1188 : vector<2x32xf32>
    %1190 = vector.extract_strided_slice %1181 {offsets = [0, 32], sizes = [2, 32], strides = [1, 1]} : vector<2x96xf32> to vector<2x32xf32>
    %1191 = vector.extract_strided_slice %1179 {offsets = [0, 32], sizes = [2, 32], strides = [1, 1]} : vector<2x96xf32> to vector<2x32xf32>
    %1192 = arith.addf %1190, %1191 : vector<2x32xf32>
    %1193 = arith.negf %1192 : vector<2x32xf32>
    %1194 = math.exp %1193 : vector<2x32xf32>
    %cst_171 = arith.constant 1.000000e+00 : f32
    %1195 = vector.broadcast %cst_171 : f32 to vector<2x32xf32>
    %1196 = arith.addf %1195, %1194 : vector<2x32xf32>
    %1197 = arith.divf %1195, %1196 : vector<2x32xf32>
    %1198 = vector.extract_strided_slice %1181 {offsets = [0, 64], sizes = [2, 32], strides = [1, 1]} : vector<2x96xf32> to vector<2x32xf32>
    %1199 = vector.extract_strided_slice %1179 {offsets = [0, 64], sizes = [2, 32], strides = [1, 1]} : vector<2x96xf32> to vector<2x32xf32>
    %1200 = vector.broadcast %1142 : vector<1x32xf32> to vector<2x32xf32>
    %1201 = arith.addf %1199, %1200 : vector<2x32xf32>
    %1202 = arith.mulf %1189, %1201 : vector<2x32xf32>
    %1203 = arith.addf %1198, %1202 : vector<2x32xf32>
    %1204 = math.tanh %1203 : vector<2x32xf32>
    %cst_172 = arith.constant 1.000000e+00 : f32
    %1205 = vector.broadcast %cst_172 : f32 to vector<2x32xf32>
    %1206 = arith.subf %1205, %1197 : vector<2x32xf32>
    %1207 = arith.mulf %1206, %1204 : vector<2x32xf32>
    %1208 = arith.mulf %1197, %1177 : vector<2x32xf32>
    %1209 = arith.addf %1207, %1208 : vector<2x32xf32>
    %1210 = arith.truncf %1209 : vector<2x32xf32> to vector<2x32xbf16>
    %cst_173 = arith.constant dense<0.000000e+00> : vector<2x96xf32>
    %1211 = tpu.matmul %1210, %1139, %cst_173 {dimension_numbers = #tpu.dot_dimension_numbers<[1], [0], [0], [1], [0, 0, 1, 1], [], []>} : vector<2x32xbf16>, vector<32x96xbf16>, vector<2x96xf32> -> vector<2x96xf32>
    %1212 = vector.extract_strided_slice %1136 {offsets = [0, 2, 0], sizes = [2, 1, 96], strides = [1, 1, 1]} : vector<2x8x192xf32> to vector<2x1x96xf32>
    %1213 = vector.shape_cast %1212 : vector<2x1x96xf32> to vector<2x96xf32>
    %1214 = vector.extract_strided_slice %1213 {offsets = [0, 0], sizes = [2, 32], strides = [1, 1]} : vector<2x96xf32> to vector<2x32xf32>
    %1215 = vector.extract_strided_slice %1211 {offsets = [0, 0], sizes = [2, 32], strides = [1, 1]} : vector<2x96xf32> to vector<2x32xf32>
    %1216 = arith.addf %1214, %1215 : vector<2x32xf32>
    %1217 = arith.negf %1216 : vector<2x32xf32>
    %1218 = math.exp %1217 : vector<2x32xf32>
    %cst_174 = arith.constant 1.000000e+00 : f32
    %1219 = vector.broadcast %cst_174 : f32 to vector<2x32xf32>
    %1220 = arith.addf %1219, %1218 : vector<2x32xf32>
    %1221 = arith.divf %1219, %1220 : vector<2x32xf32>
    %1222 = vector.extract_strided_slice %1213 {offsets = [0, 32], sizes = [2, 32], strides = [1, 1]} : vector<2x96xf32> to vector<2x32xf32>
    %1223 = vector.extract_strided_slice %1211 {offsets = [0, 32], sizes = [2, 32], strides = [1, 1]} : vector<2x96xf32> to vector<2x32xf32>
    %1224 = arith.addf %1222, %1223 : vector<2x32xf32>
    %1225 = arith.negf %1224 : vector<2x32xf32>
    %1226 = math.exp %1225 : vector<2x32xf32>
    %cst_175 = arith.constant 1.000000e+00 : f32
    %1227 = vector.broadcast %cst_175 : f32 to vector<2x32xf32>
    %1228 = arith.addf %1227, %1226 : vector<2x32xf32>
    %1229 = arith.divf %1227, %1228 : vector<2x32xf32>
    %1230 = vector.extract_strided_slice %1213 {offsets = [0, 64], sizes = [2, 32], strides = [1, 1]} : vector<2x96xf32> to vector<2x32xf32>
    %1231 = vector.extract_strided_slice %1211 {offsets = [0, 64], sizes = [2, 32], strides = [1, 1]} : vector<2x96xf32> to vector<2x32xf32>
    %1232 = vector.broadcast %1142 : vector<1x32xf32> to vector<2x32xf32>
    %1233 = arith.addf %1231, %1232 : vector<2x32xf32>
    %1234 = arith.mulf %1221, %1233 : vector<2x32xf32>
    %1235 = arith.addf %1230, %1234 : vector<2x32xf32>
    %1236 = math.tanh %1235 : vector<2x32xf32>
    %cst_176 = arith.constant 1.000000e+00 : f32
    %1237 = vector.broadcast %cst_176 : f32 to vector<2x32xf32>
    %1238 = arith.subf %1237, %1229 : vector<2x32xf32>
    %1239 = arith.mulf %1238, %1236 : vector<2x32xf32>
    %1240 = arith.mulf %1229, %1209 : vector<2x32xf32>
    %1241 = arith.addf %1239, %1240 : vector<2x32xf32>
    %1242 = arith.truncf %1241 : vector<2x32xf32> to vector<2x32xbf16>
    %cst_177 = arith.constant dense<0.000000e+00> : vector<2x96xf32>
    %1243 = tpu.matmul %1242, %1139, %cst_177 {dimension_numbers = #tpu.dot_dimension_numbers<[1], [0], [0], [1], [0, 0, 1, 1], [], []>} : vector<2x32xbf16>, vector<32x96xbf16>, vector<2x96xf32> -> vector<2x96xf32>
    %1244 = vector.extract_strided_slice %1136 {offsets = [0, 3, 0], sizes = [2, 1, 96], strides = [1, 1, 1]} : vector<2x8x192xf32> to vector<2x1x96xf32>
    %1245 = vector.shape_cast %1244 : vector<2x1x96xf32> to vector<2x96xf32>
    %1246 = vector.extract_strided_slice %1245 {offsets = [0, 0], sizes = [2, 32], strides = [1, 1]} : vector<2x96xf32> to vector<2x32xf32>
    %1247 = vector.extract_strided_slice %1243 {offsets = [0, 0], sizes = [2, 32], strides = [1, 1]} : vector<2x96xf32> to vector<2x32xf32>
    %1248 = arith.addf %1246, %1247 : vector<2x32xf32>
    %1249 = arith.negf %1248 : vector<2x32xf32>
    %1250 = math.exp %1249 : vector<2x32xf32>
    %cst_178 = arith.constant 1.000000e+00 : f32
    %1251 = vector.broadcast %cst_178 : f32 to vector<2x32xf32>
    %1252 = arith.addf %1251, %1250 : vector<2x32xf32>
    %1253 = arith.divf %1251, %1252 : vector<2x32xf32>
    %1254 = vector.extract_strided_slice %1245 {offsets = [0, 32], sizes = [2, 32], strides = [1, 1]} : vector<2x96xf32> to vector<2x32xf32>
    %1255 = vector.extract_strided_slice %1243 {offsets = [0, 32], sizes = [2, 32], strides = [1, 1]} : vector<2x96xf32> to vector<2x32xf32>
    %1256 = arith.addf %1254, %1255 : vector<2x32xf32>
    %1257 = arith.negf %1256 : vector<2x32xf32>
    %1258 = math.exp %1257 : vector<2x32xf32>
    %cst_179 = arith.constant 1.000000e+00 : f32
    %1259 = vector.broadcast %cst_179 : f32 to vector<2x32xf32>
    %1260 = arith.addf %1259, %1258 : vector<2x32xf32>
    %1261 = arith.divf %1259, %1260 : vector<2x32xf32>
    %1262 = vector.extract_strided_slice %1245 {offsets = [0, 64], sizes = [2, 32], strides = [1, 1]} : vector<2x96xf32> to vector<2x32xf32>
    %1263 = vector.extract_strided_slice %1243 {offsets = [0, 64], sizes = [2, 32], strides = [1, 1]} : vector<2x96xf32> to vector<2x32xf32>
    %1264 = vector.broadcast %1142 : vector<1x32xf32> to vector<2x32xf32>
    %1265 = arith.addf %1263, %1264 : vector<2x32xf32>
    %1266 = arith.mulf %1253, %1265 : vector<2x32xf32>
    %1267 = arith.addf %1262, %1266 : vector<2x32xf32>
    %1268 = math.tanh %1267 : vector<2x32xf32>
    %cst_180 = arith.constant 1.000000e+00 : f32
    %1269 = vector.broadcast %cst_180 : f32 to vector<2x32xf32>
    %1270 = arith.subf %1269, %1261 : vector<2x32xf32>
    %1271 = arith.mulf %1270, %1268 : vector<2x32xf32>
    %1272 = arith.mulf %1261, %1241 : vector<2x32xf32>
    %1273 = arith.addf %1271, %1272 : vector<2x32xf32>
    %1274 = arith.truncf %1273 : vector<2x32xf32> to vector<2x32xbf16>
    %cst_181 = arith.constant dense<0.000000e+00> : vector<2x96xf32>
    %1275 = tpu.matmul %1274, %1139, %cst_181 {dimension_numbers = #tpu.dot_dimension_numbers<[1], [0], [0], [1], [0, 0, 1, 1], [], []>} : vector<2x32xbf16>, vector<32x96xbf16>, vector<2x96xf32> -> vector<2x96xf32>
    %1276 = vector.extract_strided_slice %1136 {offsets = [0, 4, 0], sizes = [2, 1, 96], strides = [1, 1, 1]} : vector<2x8x192xf32> to vector<2x1x96xf32>
    %1277 = vector.shape_cast %1276 : vector<2x1x96xf32> to vector<2x96xf32>
    %1278 = vector.extract_strided_slice %1277 {offsets = [0, 0], sizes = [2, 32], strides = [1, 1]} : vector<2x96xf32> to vector<2x32xf32>
    %1279 = vector.extract_strided_slice %1275 {offsets = [0, 0], sizes = [2, 32], strides = [1, 1]} : vector<2x96xf32> to vector<2x32xf32>
    %1280 = arith.addf %1278, %1279 : vector<2x32xf32>
    %1281 = arith.negf %1280 : vector<2x32xf32>
    %1282 = math.exp %1281 : vector<2x32xf32>
    %cst_182 = arith.constant 1.000000e+00 : f32
    %1283 = vector.broadcast %cst_182 : f32 to vector<2x32xf32>
    %1284 = arith.addf %1283, %1282 : vector<2x32xf32>
    %1285 = arith.divf %1283, %1284 : vector<2x32xf32>
    %1286 = vector.extract_strided_slice %1277 {offsets = [0, 32], sizes = [2, 32], strides = [1, 1]} : vector<2x96xf32> to vector<2x32xf32>
    %1287 = vector.extract_strided_slice %1275 {offsets = [0, 32], sizes = [2, 32], strides = [1, 1]} : vector<2x96xf32> to vector<2x32xf32>
    %1288 = arith.addf %1286, %1287 : vector<2x32xf32>
    %1289 = arith.negf %1288 : vector<2x32xf32>
    %1290 = math.exp %1289 : vector<2x32xf32>
    %cst_183 = arith.constant 1.000000e+00 : f32
    %1291 = vector.broadcast %cst_183 : f32 to vector<2x32xf32>
    %1292 = arith.addf %1291, %1290 : vector<2x32xf32>
    %1293 = arith.divf %1291, %1292 : vector<2x32xf32>
    %1294 = vector.extract_strided_slice %1277 {offsets = [0, 64], sizes = [2, 32], strides = [1, 1]} : vector<2x96xf32> to vector<2x32xf32>
    %1295 = vector.extract_strided_slice %1275 {offsets = [0, 64], sizes = [2, 32], strides = [1, 1]} : vector<2x96xf32> to vector<2x32xf32>
    %1296 = vector.broadcast %1142 : vector<1x32xf32> to vector<2x32xf32>
    %1297 = arith.addf %1295, %1296 : vector<2x32xf32>
    %1298 = arith.mulf %1285, %1297 : vector<2x32xf32>
    %1299 = arith.addf %1294, %1298 : vector<2x32xf32>
    %1300 = math.tanh %1299 : vector<2x32xf32>
    %cst_184 = arith.constant 1.000000e+00 : f32
    %1301 = vector.broadcast %cst_184 : f32 to vector<2x32xf32>
    %1302 = arith.subf %1301, %1293 : vector<2x32xf32>
    %1303 = arith.mulf %1302, %1300 : vector<2x32xf32>
    %1304 = arith.mulf %1293, %1273 : vector<2x32xf32>
    %1305 = arith.addf %1303, %1304 : vector<2x32xf32>
    %1306 = arith.truncf %1305 : vector<2x32xf32> to vector<2x32xbf16>
    %cst_185 = arith.constant dense<0.000000e+00> : vector<2x96xf32>
    %1307 = tpu.matmul %1306, %1139, %cst_185 {dimension_numbers = #tpu.dot_dimension_numbers<[1], [0], [0], [1], [0, 0, 1, 1], [], []>} : vector<2x32xbf16>, vector<32x96xbf16>, vector<2x96xf32> -> vector<2x96xf32>
    %1308 = vector.extract_strided_slice %1136 {offsets = [0, 5, 0], sizes = [2, 1, 96], strides = [1, 1, 1]} : vector<2x8x192xf32> to vector<2x1x96xf32>
    %1309 = vector.shape_cast %1308 : vector<2x1x96xf32> to vector<2x96xf32>
    %1310 = vector.extract_strided_slice %1309 {offsets = [0, 0], sizes = [2, 32], strides = [1, 1]} : vector<2x96xf32> to vector<2x32xf32>
    %1311 = vector.extract_strided_slice %1307 {offsets = [0, 0], sizes = [2, 32], strides = [1, 1]} : vector<2x96xf32> to vector<2x32xf32>
    %1312 = arith.addf %1310, %1311 : vector<2x32xf32>
    %1313 = arith.negf %1312 : vector<2x32xf32>
    %1314 = math.exp %1313 : vector<2x32xf32>
    %cst_186 = arith.constant 1.000000e+00 : f32
    %1315 = vector.broadcast %cst_186 : f32 to vector<2x32xf32>
    %1316 = arith.addf %1315, %1314 : vector<2x32xf32>
    %1317 = arith.divf %1315, %1316 : vector<2x32xf32>
    %1318 = vector.extract_strided_slice %1309 {offsets = [0, 32], sizes = [2, 32], strides = [1, 1]} : vector<2x96xf32> to vector<2x32xf32>
    %1319 = vector.extract_strided_slice %1307 {offsets = [0, 32], sizes = [2, 32], strides = [1, 1]} : vector<2x96xf32> to vector<2x32xf32>
    %1320 = arith.addf %1318, %1319 : vector<2x32xf32>
    %1321 = arith.negf %1320 : vector<2x32xf32>
    %1322 = math.exp %1321 : vector<2x32xf32>
    %cst_187 = arith.constant 1.000000e+00 : f32
    %1323 = vector.broadcast %cst_187 : f32 to vector<2x32xf32>
    %1324 = arith.addf %1323, %1322 : vector<2x32xf32>
    %1325 = arith.divf %1323, %1324 : vector<2x32xf32>
    %1326 = vector.extract_strided_slice %1309 {offsets = [0, 64], sizes = [2, 32], strides = [1, 1]} : vector<2x96xf32> to vector<2x32xf32>
    %1327 = vector.extract_strided_slice %1307 {offsets = [0, 64], sizes = [2, 32], strides = [1, 1]} : vector<2x96xf32> to vector<2x32xf32>
    %1328 = vector.broadcast %1142 : vector<1x32xf32> to vector<2x32xf32>
    %1329 = arith.addf %1327, %1328 : vector<2x32xf32>
    %1330 = arith.mulf %1317, %1329 : vector<2x32xf32>
    %1331 = arith.addf %1326, %1330 : vector<2x32xf32>
    %1332 = math.tanh %1331 : vector<2x32xf32>
    %cst_188 = arith.constant 1.000000e+00 : f32
    %1333 = vector.broadcast %cst_188 : f32 to vector<2x32xf32>
    %1334 = arith.subf %1333, %1325 : vector<2x32xf32>
    %1335 = arith.mulf %1334, %1332 : vector<2x32xf32>
    %1336 = arith.mulf %1325, %1305 : vector<2x32xf32>
    %1337 = arith.addf %1335, %1336 : vector<2x32xf32>
    %1338 = arith.truncf %1337 : vector<2x32xf32> to vector<2x32xbf16>
    %cst_189 = arith.constant dense<0.000000e+00> : vector<2x96xf32>
    %1339 = tpu.matmul %1338, %1139, %cst_189 {dimension_numbers = #tpu.dot_dimension_numbers<[1], [0], [0], [1], [0, 0, 1, 1], [], []>} : vector<2x32xbf16>, vector<32x96xbf16>, vector<2x96xf32> -> vector<2x96xf32>
    %1340 = vector.extract_strided_slice %1136 {offsets = [0, 6, 0], sizes = [2, 1, 96], strides = [1, 1, 1]} : vector<2x8x192xf32> to vector<2x1x96xf32>
    %1341 = vector.shape_cast %1340 : vector<2x1x96xf32> to vector<2x96xf32>
    %1342 = vector.extract_strided_slice %1341 {offsets = [0, 0], sizes = [2, 32], strides = [1, 1]} : vector<2x96xf32> to vector<2x32xf32>
    %1343 = vector.extract_strided_slice %1339 {offsets = [0, 0], sizes = [2, 32], strides = [1, 1]} : vector<2x96xf32> to vector<2x32xf32>
    %1344 = arith.addf %1342, %1343 : vector<2x32xf32>
    %1345 = arith.negf %1344 : vector<2x32xf32>
    %1346 = math.exp %1345 : vector<2x32xf32>
    %cst_190 = arith.constant 1.000000e+00 : f32
    %1347 = vector.broadcast %cst_190 : f32 to vector<2x32xf32>
    %1348 = arith.addf %1347, %1346 : vector<2x32xf32>
    %1349 = arith.divf %1347, %1348 : vector<2x32xf32>
    %1350 = vector.extract_strided_slice %1341 {offsets = [0, 32], sizes = [2, 32], strides = [1, 1]} : vector<2x96xf32> to vector<2x32xf32>
    %1351 = vector.extract_strided_slice %1339 {offsets = [0, 32], sizes = [2, 32], strides = [1, 1]} : vector<2x96xf32> to vector<2x32xf32>
    %1352 = arith.addf %1350, %1351 : vector<2x32xf32>
    %1353 = arith.negf %1352 : vector<2x32xf32>
    %1354 = math.exp %1353 : vector<2x32xf32>
    %cst_191 = arith.constant 1.000000e+00 : f32
    %1355 = vector.broadcast %cst_191 : f32 to vector<2x32xf32>
    %1356 = arith.addf %1355, %1354 : vector<2x32xf32>
    %1357 = arith.divf %1355, %1356 : vector<2x32xf32>
    %1358 = vector.extract_strided_slice %1341 {offsets = [0, 64], sizes = [2, 32], strides = [1, 1]} : vector<2x96xf32> to vector<2x32xf32>
    %1359 = vector.extract_strided_slice %1339 {offsets = [0, 64], sizes = [2, 32], strides = [1, 1]} : vector<2x96xf32> to vector<2x32xf32>
    %1360 = vector.broadcast %1142 : vector<1x32xf32> to vector<2x32xf32>
    %1361 = arith.addf %1359, %1360 : vector<2x32xf32>
    %1362 = arith.mulf %1349, %1361 : vector<2x32xf32>
    %1363 = arith.addf %1358, %1362 : vector<2x32xf32>
    %1364 = math.tanh %1363 : vector<2x32xf32>
    %cst_192 = arith.constant 1.000000e+00 : f32
    %1365 = vector.broadcast %cst_192 : f32 to vector<2x32xf32>
    %1366 = arith.subf %1365, %1357 : vector<2x32xf32>
    %1367 = arith.mulf %1366, %1364 : vector<2x32xf32>
    %1368 = arith.mulf %1357, %1337 : vector<2x32xf32>
    %1369 = arith.addf %1367, %1368 : vector<2x32xf32>
    %1370 = arith.truncf %1369 : vector<2x32xf32> to vector<2x32xbf16>
    %cst_193 = arith.constant dense<0.000000e+00> : vector<2x96xf32>
    %1371 = tpu.matmul %1370, %1139, %cst_193 {dimension_numbers = #tpu.dot_dimension_numbers<[1], [0], [0], [1], [0, 0, 1, 1], [], []>} : vector<2x32xbf16>, vector<32x96xbf16>, vector<2x96xf32> -> vector<2x96xf32>
    %1372 = vector.extract_strided_slice %1136 {offsets = [0, 7, 0], sizes = [2, 1, 96], strides = [1, 1, 1]} : vector<2x8x192xf32> to vector<2x1x96xf32>
    %1373 = vector.shape_cast %1372 : vector<2x1x96xf32> to vector<2x96xf32>
    %1374 = vector.extract_strided_slice %1373 {offsets = [0, 0], sizes = [2, 32], strides = [1, 1]} : vector<2x96xf32> to vector<2x32xf32>
    %1375 = vector.extract_strided_slice %1371 {offsets = [0, 0], sizes = [2, 32], strides = [1, 1]} : vector<2x96xf32> to vector<2x32xf32>
    %1376 = arith.addf %1374, %1375 : vector<2x32xf32>
    %1377 = arith.negf %1376 : vector<2x32xf32>
    %1378 = math.exp %1377 : vector<2x32xf32>
    %cst_194 = arith.constant 1.000000e+00 : f32
    %1379 = vector.broadcast %cst_194 : f32 to vector<2x32xf32>
    %1380 = arith.addf %1379, %1378 : vector<2x32xf32>
    %1381 = arith.divf %1379, %1380 : vector<2x32xf32>
    %1382 = vector.extract_strided_slice %1373 {offsets = [0, 32], sizes = [2, 32], strides = [1, 1]} : vector<2x96xf32> to vector<2x32xf32>
    %1383 = vector.extract_strided_slice %1371 {offsets = [0, 32], sizes = [2, 32], strides = [1, 1]} : vector<2x96xf32> to vector<2x32xf32>
    %1384 = arith.addf %1382, %1383 : vector<2x32xf32>
    %1385 = arith.negf %1384 : vector<2x32xf32>
    %1386 = math.exp %1385 : vector<2x32xf32>
    %cst_195 = arith.constant 1.000000e+00 : f32
    %1387 = vector.broadcast %cst_195 : f32 to vector<2x32xf32>
    %1388 = arith.addf %1387, %1386 : vector<2x32xf32>
    %1389 = arith.divf %1387, %1388 : vector<2x32xf32>
    %1390 = vector.extract_strided_slice %1373 {offsets = [0, 64], sizes = [2, 32], strides = [1, 1]} : vector<2x96xf32> to vector<2x32xf32>
    %1391 = vector.extract_strided_slice %1371 {offsets = [0, 64], sizes = [2, 32], strides = [1, 1]} : vector<2x96xf32> to vector<2x32xf32>
    %1392 = vector.broadcast %1142 : vector<1x32xf32> to vector<2x32xf32>
    %1393 = arith.addf %1391, %1392 : vector<2x32xf32>
    %1394 = arith.mulf %1381, %1393 : vector<2x32xf32>
    %1395 = arith.addf %1390, %1394 : vector<2x32xf32>
    %1396 = math.tanh %1395 : vector<2x32xf32>
    %cst_196 = arith.constant 1.000000e+00 : f32
    %1397 = vector.broadcast %cst_196 : f32 to vector<2x32xf32>
    %1398 = arith.subf %1397, %1389 : vector<2x32xf32>
    %1399 = arith.mulf %1398, %1396 : vector<2x32xf32>
    %1400 = arith.mulf %1389, %1369 : vector<2x32xf32>
    %1401 = arith.addf %1399, %1400 : vector<2x32xf32>
    %1402 = vector.extract_strided_slice %1136 {offsets = [0, 7, 96], sizes = [2, 1, 96], strides = [1, 1, 1]} : vector<2x8x192xf32> to vector<2x1x96xf32>
    %1403 = vector.shape_cast %1402 : vector<2x1x96xf32> to vector<2x96xf32>
    %cst_197 = arith.constant 0.000000e+00 : f32
    %1404 = vector.broadcast %cst_197 : f32 to vector<2x96xf32>
    %cst_198 = arith.constant 0.000000e+00 : f32
    %1405 = vector.broadcast %cst_198 : f32 to vector<2x32xf32>
    %1406 = vector.extract_strided_slice %1403 {offsets = [0, 0], sizes = [2, 32], strides = [1, 1]} : vector<2x96xf32> to vector<2x32xf32>
    %1407 = vector.extract_strided_slice %1404 {offsets = [0, 0], sizes = [2, 32], strides = [1, 1]} : vector<2x96xf32> to vector<2x32xf32>
    %1408 = arith.addf %1406, %1407 : vector<2x32xf32>
    %1409 = arith.negf %1408 : vector<2x32xf32>
    %1410 = math.exp %1409 : vector<2x32xf32>
    %cst_199 = arith.constant 1.000000e+00 : f32
    %1411 = vector.broadcast %cst_199 : f32 to vector<2x32xf32>
    %1412 = arith.addf %1411, %1410 : vector<2x32xf32>
    %1413 = arith.divf %1411, %1412 : vector<2x32xf32>
    %1414 = vector.extract_strided_slice %1403 {offsets = [0, 32], sizes = [2, 32], strides = [1, 1]} : vector<2x96xf32> to vector<2x32xf32>
    %1415 = vector.extract_strided_slice %1404 {offsets = [0, 32], sizes = [2, 32], strides = [1, 1]} : vector<2x96xf32> to vector<2x32xf32>
    %1416 = arith.addf %1414, %1415 : vector<2x32xf32>
    %1417 = arith.negf %1416 : vector<2x32xf32>
    %1418 = math.exp %1417 : vector<2x32xf32>
    %cst_200 = arith.constant 1.000000e+00 : f32
    %1419 = vector.broadcast %cst_200 : f32 to vector<2x32xf32>
    %1420 = arith.addf %1419, %1418 : vector<2x32xf32>
    %1421 = arith.divf %1419, %1420 : vector<2x32xf32>
    %1422 = vector.extract_strided_slice %1403 {offsets = [0, 64], sizes = [2, 32], strides = [1, 1]} : vector<2x96xf32> to vector<2x32xf32>
    %1423 = vector.extract_strided_slice %1404 {offsets = [0, 64], sizes = [2, 32], strides = [1, 1]} : vector<2x96xf32> to vector<2x32xf32>
    %1424 = vector.broadcast %1145 : vector<1x32xf32> to vector<2x32xf32>
    %1425 = arith.addf %1423, %1424 : vector<2x32xf32>
    %1426 = arith.mulf %1413, %1425 : vector<2x32xf32>
    %1427 = arith.addf %1422, %1426 : vector<2x32xf32>
    %1428 = math.tanh %1427 : vector<2x32xf32>
    %cst_201 = arith.constant 1.000000e+00 : f32
    %1429 = vector.broadcast %cst_201 : f32 to vector<2x32xf32>
    %1430 = arith.subf %1429, %1421 : vector<2x32xf32>
    %1431 = arith.mulf %1430, %1428 : vector<2x32xf32>
    %1432 = arith.mulf %1421, %1405 : vector<2x32xf32>
    %1433 = arith.addf %1431, %1432 : vector<2x32xf32>
    %1434 = tpu.concatenate %1401, %1433 in 1 : vector<2x32xf32>, vector<2x32xf32> -> vector<2x64xf32>
    %1435 = arith.truncf %1434 : vector<2x64xf32> to vector<2x64xbf16>
    %c0_202 = arith.constant 0 : index
    %c0_203 = arith.constant 0 : index
    %1436 = vector.load %arg6[%c0_202, %c0_203] : memref<64x128xbf16, #tpu.memory_space<vmem>>, vector<64x128xbf16>
    %cst_204 = arith.constant dense<0.000000e+00> : vector<2x128xf32>
    %1437 = tpu.matmul %1435, %1436, %cst_204 {dimension_numbers = #tpu.dot_dimension_numbers<[1], [0], [0], [1], [0, 0, 1, 1], [], []>} : vector<2x64xbf16>, vector<64x128xbf16>, vector<2x128xf32> -> vector<2x128xf32>
    %c0_205 = arith.constant 0 : index
    %c0_206 = arith.constant 0 : index
    %1438 = vector.load %arg7[%c0_205, %c0_206] : memref<1x128xf32, #tpu.memory_space<vmem>>, vector<1x128xf32>
    %1439 = vector.broadcast %1438 : vector<1x128xf32> to vector<2x128xf32>
    %1440 = arith.addf %1437, %1439 : vector<2x128xf32>
    %cst_207 = arith.constant 0.000000e+00 : f32
    %1441 = vector.broadcast %cst_207 : f32 to vector<2x128xf32>
    %1442 = arith.maximumf %1440, %1441 : vector<2x128xf32>
    %1443 = arith.truncf %1442 : vector<2x128xf32> to vector<2x128xbf16>
    %c0_208 = arith.constant 0 : index
    %c0_209 = arith.constant 0 : index
    %1444 = vector.load %arg8[%c0_208, %c0_209] : memref<128x2xbf16, #tpu.memory_space<vmem>>, vector<128x2xbf16>
    %cst_210 = arith.constant dense<0.000000e+00> : vector<2x2xf32>
    %1445 = tpu.matmul %1443, %1444, %cst_210 {dimension_numbers = #tpu.dot_dimension_numbers<[1], [0], [0], [1], [0, 0, 1, 1], [], []>} : vector<2x128xbf16>, vector<128x2xbf16>, vector<2x2xf32> -> vector<2x2xf32>
    %c0_211 = arith.constant 0 : index
    %c0_212 = arith.constant 0 : index
    %1446 = vector.load %arg9[%c0_211, %c0_212] : memref<1x2xf32, #tpu.memory_space<vmem>>, vector<1x2xf32>
    %1447 = vector.broadcast %1446 : vector<1x2xf32> to vector<2x2xf32>
    %1448 = arith.addf %1445, %1447 : vector<2x2xf32>
    %c0_213 = arith.constant 0 : index
    %c0_214 = arith.constant 0 : index
    %1449 = vector.load %arg10[%c0_213, %c0_214] : memref<2x2xf32, #tpu.memory_space<vmem>>, vector<2x2xf32>
    tpu.vector_store %arg10[%c0_213, %c0_214], %1448 {strides = array<i32>} : memref<2x2xf32, #tpu.memory_space<vmem>>, vector<2x2xf32>,
    return
  }
}

</mosaic_0001>

<bundles_post_ra>
// kernel: tpu_custom_call.1
= control target key start
LH: loop header
LB: loop body
LE: loop exit
PB: predicated region body
PF: predicated region fallthrough
CT: control target
= control target key end

     0   :  { %15 = vsyncpa [#allocation3], 0  ;;  %s8790_s0 = inlined_call_operand.hbm [shape: f32[2,8,32], index: 0, kind: input, shape index: {}]   ;;  %s8791_s1 = inlined_call_operand.vmem [shape: bf16[32,192], index: 1, kind: input, shape index: {}]   ;;  %s8792_s2 = inlined_call_operand.hbm [shape: bf16[2,64,192], index: 2, kind: input, shape index: {}]   ;;  %s8793_s3 = inlined_call_operand.hbm [shape: bf16[3,64,192], index: 3, kind: input, shape index: {}]   ;;  %s8794_s4 = inlined_call_operand.hbm [shape: f32[3,1,192], index: 4, kind: input, shape index: {}]   ;;  %s8795_s5 = inlined_call_operand.vmem [shape: f32[3,1,64], index: 5, kind: input, shape index: {}]   ;;  %s8796_s6 = inlined_call_operand.vmem [shape: bf16[64,128], index: 6, kind: input, shape index: {}]   ;;  %s8797_s7 = inlined_call_operand.vmem [shape: f32[1,128], index: 7, kind: input, shape index: {}]   ;;  %s8798_s8 = inlined_call_operand.vmem [shape: bf16[128,2], index: 8, kind: input, shape index: {}]   ;;  %s8799_s9 = inlined_call_operand.vmem [shape: f32[1,2], index: 9, kind: input, shape index: {}]   ;;  %s8800_s10 = inlined_call_operand.hbm [shape: f32[2,2], index: 10, kind: output, shape index: {}]  }
   0x1   :  { %16 = vsyncpa [#allocation6], 0 }
   0x2   :  { %17 = vsyncpa [#allocation9], 0 }
   0x3   :  { %18 = vsyncpa [#allocation4], 0  ;;  %s38_s15 = sshll.u32 %s8792_s2, 4  ;;  %s7014_s16 = smov [#allocation5]   ;;  %s39_s15 = int_to_ptr.hbm [resolvable:$true] %s38_s15 }
   0x4   :  { %s40_s17 = sshll.u32 %s7014_s16, 4  ;;  %s23_s20 = sshll.u32 %s8790_s0, 4  ;;  %s41_s17 = int_to_ptr.vmem [resolvable:$true] %s40_s17  ;;  %s24_s20 = int_to_ptr.hbm [resolvable:$true] %s23_s20 }
   0x5   :  { %s7015_s21 = smov 128   ;;  %s7016_s22 = smov 8  }
   0x6   :  { %46 = dma.hbm_to_vmem [thread:$0]  %s39_s15, 2048, %s41_s17, [#allocation6], %s7015_s21, %s7015_s21, %s7016_s22  }
   0x7   :  { %s7017_s23 = smov [#allocation2]   ;;  %s51_s27 = sshll.u32 %s8793_s3, 4  ;;  %s52_s27 = int_to_ptr.hbm [resolvable:$true] %s51_s27 }
   0x8   :  { %s25_s24 = sshll.u32 %s7017_s23, 4  ;;  %s64_s29 = sshll.u32 %s8794_s4, 4  ;;  %s26_s24 = int_to_ptr.vmem [resolvable:$true] %s25_s24  ;;  %s65_s29 = int_to_ptr.hbm [resolvable:$true] %s64_s29 }
   0x9   :  { %31 = dma.hbm_to_vmem [thread:$0]  %s24_s20, 256, %s26_s24, [#allocation3], %s7015_s21, %s7015_s21, %s7016_s22  }
   0xa   :  { %s7018_s30 = smov [#allocation7]   ;;  %s7019_s0 = smov [#allocation8]  }
   0xb   :  { %s53_s11 = sshll.u32 %s7018_s30, 4  ;;  %s66_s12 = sshll.u32 %s7019_s0, 4  ;;  %s54_s11 = int_to_ptr.vmem [resolvable:$true] %s53_s11  ;;  %s67_s12 = int_to_ptr.vmem [resolvable:$true] %s66_s12 }
   0xc   :  { %59 = dma.hbm_to_vmem [thread:$0]  %s52_s27, 3072, %s54_s11, [#allocation6], %s7015_s21, %s7015_s21, %s7016_s22  }
   0xd   :  { %s7020_s13 = smov 32   ;;  %s7021_s14 = smov 2  }
   0xe   :  { %72 = dma.hbm_to_vmem [thread:$0]  %s65_s29, 96, %s67_s12, [#allocation9], %s7020_s13, %s7020_s13, %s7021_s14  }
   0xf   :  { %7006 = dma.done.wait [#allocation3], 256  }
  0x10   :  { %7007 = vsyncadd [#allocation3], 4294967040 }
  0x11   :  { %7008 = dma.done.wait [#allocation6], 5120  }
  0x12   :  { %7009 = vsyncadd [#allocation6], 4294962176 }
  0x13   :  { %7010 = dma.done.wait [#allocation9], 96  }
  0x14   :  { %7011 = vsyncadd [#allocation9], 4294967200  ;;  %v5853_v0 = vld [vmem:[%s8791_s1 + $0x10] sm:$0xf]  ;;  %v6204_v1 = vld [vmem:[%s8791_s1 + $0x14] sm:$0xf0] }
  0x15   :  { %v5845_v2 = vld [vmem:[%s8791_s1] sm:$0xf]  ;;  %v5854_v3 = vor.u32 %v6204_v1, %v5853_v0  ;;  %v6202_v4 = vld [vmem:[%s8791_s1 + $0x4] sm:$0xf0]  ;;  %v6203_v8 = vld [vmem:[%s8791_s1 + $0x14] sm:$0xf] }
  0x16   :  { %v100_v5 = vld [vmem:[#allocation2] sm:$0xff]  ;;  %v101_v6 = vld [vmem:[#allocation2 + $0x8] sm:$0xff]  ;;  %v5846_v9 = vor.u32 %v6202_v4, %v5845_v2  ;;  %v5855_v10 = vld [vmem:[%s8791_s1 + $0x18] sm:$0xf0]  ;;  %s7022_s30 = smov 64   ;;  %vm127_vm0 = vcmask 261120  }
  0x17   :  { %v7109_v7 = vld [vmem:[%s8795_s5] ss:$0 sm:$0xff]  ;;  %137 = vmatpush.bf16.msra.mxu0 %v5854_v3  ;;  %v6201_v11 = vld [vmem:[%s8791_s1 + $0x4] sm:$0xf]  ;;  %v5847_v12 = vld [vmem:[%s8791_s1 + $0x8] sm:$0xf0]  ;;  %v5858_v13 = vor.u32 %v6203_v8, %v5855_v10  ;;  %v102_v14 = vpack.c.bf16 %v101_v6, %v100_v5 }
  0x18   :  { %293 = vrot.lane.b32.xlu0 %v7109_v7, %s7022_s30  ;;  %v5850_v15 = vor.u32 %v6201_v11, %v5847_v12  ;;  %v159_v16 = vld [vmem:[#allocation8] sm:$0x3]  ;;  %s7023_s1 = smov 96   ;;  %vm8808_vm12 = vcmask 1041409   ;;  %s7024_s23 = smov [#allocation10]  }
  0x19   :  { %151 = vmatpush.bf16.msra.mxu1 %v5858_v13  ;;  %v161_v17 = vperm.slane %v159_v16, 0  ;;  %v162_v54 = vperm.slane %v159_v16, 1  ;;  %s5829_s24 = sshll.u32 %s7024_s23, 4  ;;  %s5830_s24 = int_to_ptr.vmem [resolvable:$true] %s5829_s24 }
  0x1b   :  { %138 = vmatpush.bf16.msra.mxu0 %v5846_v9 }
  0x1d   :  { %152 = vmatpush.bf16.msra.mxu1 %v5850_v15 }
  0x1e   :  { %5859 = vmatmul.msk.bf16.vlgmr.msra.gmra.mxu0 %vm127_vm0, %v102_v14 }
  0x20   :  { %5860 = vmatmul.msk.bf16.vlgmr.msra.gmra.mxu1 %vm127_vm0, %v102_v14 }
  0x8a   :  { %v294_v36 = vpop.permute.xlu0 %293 }
  0x9b   :  { %v140_v18 = vpop.f32.mrf.mxu0 }
  0x9c   :  { %v7127_v19 = vadd.f32 %v161_v17, %v140_v18 }
  0x9d   :  { %v154_v53 = vpop.f32.mrf.mxu1 }
  0x9e   :  { %v5861_v20 = vmul.f32 -1.442695, %v7127_v19  ;;  %v7143_v55 = vadd.f32 %v162_v54, %v154_v53 }
  0xa0   :  { %6277 = vpow2.f32 %v5861_v20  ;;  %v5863_v6 = vmul.f32 -1.442695, %v7143_v55 }
  0xa3   :  { %v142_v21 = vpop.f32.mrf.mxu0 }
  0xa4   :  { %v7130_v22 = vadd.f32 %v161_v17, %v142_v21 }
  0xa5   :  { %v156_v58 = vpop.f32.mrf.mxu1 }
  0xa6   :  { %v6278_v23 = vpop.eup %6277  ;;  %v5862_v24 = vmul.f32 -1.442695, %v7130_v22  ;;  %v7146_v59 = vadd.f32 %v162_v54, %v156_v58 }
  0xa7   :  { %v186_v25 = vadd.f32 1.0, %v6278_v23 }
  0xa8   :  { %6279 = vpow2.f32 %v5862_v24  ;;  %v5864_v8 = vmul.f32 -1.442695, %v7146_v59 }
  0xa9   :  { %6281 = vrcp.f32 %v186_v25  ;;  %v199_v31 = vand.u32 2147483648, %v186_v25  ;;  %v197_v33 = vand.u32 2147483647, %v186_v25  ;;  %vm193_vm2 = vweird.f32 %v186_v25 }
  0xab   :  { %v200_v37 = vor.u32 1.1754944e-38, %v199_v31  ;;  %vm198_vm4 = vcmp.eq.f32.partialorder %v197_v33, 8.507059e+37 }
  0xae   :  { %v6280_v26 = vpop.eup %6279 }
  0xaf   :  { %v6282_v27 = vpop.eup %6281  ;;  %v187_v28 = vadd.f32 1.0, %v6280_v26 }
  0xb0   :  { %v189_v29 = vmul.f32 %v6282_v27, %v186_v25  ;;  %vm194_vm1 = vweird.f32 %v6282_v27 }
  0xb1   :  { %6283 = vrcp.f32 %v187_v28  ;;  %vm195_vm3 = vmor %vm193_vm2, %vm194_vm1  ;;  %v214_v44 = vand.u32 2147483648, %v187_v28  ;;  %v212_v46 = vand.u32 2147483647, %v187_v28  ;;  %vm208_vm6 = vweird.f32 %v187_v28 }
  0xb2   :  { %v190_v30 = vsub.f32 1.0, %v189_v29 }
  0xb3   :  { %v215_v48 = vor.u32 1.1754944e-38, %v214_v44  ;;  %vm213_vm8 = vcmp.eq.f32.partialorder %v212_v46, 8.507059e+37 }
  0xb4   :  { %v191_v32 = vmul.f32 %v6282_v27, %v190_v30 }
  0xb6   :  { %v192_v34 = vadd.f32 %v6282_v27, %v191_v32 }
  0xb7   :  { %v6284_v35 = vpop.eup %6283 }
  0xb8   :  { %v204_v38 = vmul.f32 %v6284_v35, %v187_v28  ;;  %v196_v39 = vsel %vm195_vm3, %v6282_v27, %v192_v34  ;;  %vm209_vm5 = vweird.f32 %v6284_v35  ;;  %vm8807_vm3 = vcmask 523264  }
  0xb9   :  { %v7133_v40 = vsel %vm198_vm4, %v200_v37, %v196_v39  ;;  %vm210_vm7 = vmor %vm208_vm6, %vm209_vm5 }
  0xba   :  { %v205_v41 = vsub.f32 1.0, %v204_v38  ;;  %v296_v42 = vmul.f32 %v294_v36, %v7133_v40  ;;  %v222_v43 = vmul.f32 %v7109_v7, %v7133_v40  ;;  %v236_v27 = vsub.f32 1.0, %v7133_v40 }
  0xbb   :  { %v248_v33 = vmul.f32 0.0, %v7133_v40 }
  0xbc   :  { %v206_v45 = vmul.f32 %v6284_v35, %v205_v41  ;;  %300 = vrot.lane.b32.xlu1 %v296_v42, %s7022_s30  ;;  %226 = vrot.lane.b32.xlu2 %v222_v43, %s7022_s30 }
  0xbe   :  { %v207_v47 = vadd.f32 %v6284_v35, %v206_v45 }
  0xc0   :  { %v211_v49 = vsel %vm210_vm7, %v6284_v35, %v207_v47 }
  0xc1   :  { %v216_v50 = vsel %vm213_vm8, %v215_v48, %v211_v49 }
  0xc2   :  { %v297_v51 = vmul.f32 %v294_v36, %v216_v50  ;;  %v223_v52 = vmul.f32 %v7109_v7, %v216_v50  ;;  %v237_v20 = vsub.f32 1.0, %v216_v50  ;;  %v249_v25 = vmul.f32 0.0, %v216_v50 }
  0xc4   :  { %302 = vrot.lane.b32.xlu1 %v297_v51, %s7022_s30  ;;  %228 = vrot.lane.b32.xlu0 %v223_v52, %s7022_s30 }
 0x116   :  { %v227_v1 = vpop.permute.xlu2 %226 }
 0x117   :  { %v232_v2 = vadd.f32 %v227_v1, %v7127_v19  ;;  %v5883_v1 = vld [vmem:[#allocation7 + $0x20] sm:$0xf] }
 0x12e   :  { %v301_v56 = vpop.permute.xlu1 %300 }
 0x12f   :  { %v306_v57 = vadd.f32 %v301_v56, %v7143_v55 }
 0x131   :  { %6285 = vtanh.f32 %v306_v57 }
 0x136   :  { %v303_v60 = vpop.permute.xlu1 %302  ;;  %v229_v61 = vpop.permute.xlu0 %228 }
 0x137   :  { %v6286_v62 = vpop.eup %6285  ;;  %v307_v63 = vadd.f32 %v303_v60, %v7146_v59  ;;  %v233_v0 = vadd.f32 %v229_v61, %v7130_v22 }
 0x138   :  { %314 = vrot.lane.b32.xlu0 %v6286_v62, %s7023_s1 }
 0x139   :  { %6287 = vtanh.f32 %v307_v63  ;;  %v5891_v63 = vld [vmem:[#allocation7 + $0x30] sm:$0xf] }
 0x13a   :  { %6289 = vtanh.f32 %v233_v0  ;;  %v6212_v0 = vld [vmem:[#allocation7 + $0x34] sm:$0xf0] }
 0x13b   :  { %6291 = vtanh.f32 %v232_v2  ;;  %v7185_v2 = vor.u32 %v6212_v0, %v5891_v63 }
 0x13c   :  { %6293 = vpow2.f32 %v5863_v6  ;;  %v6208_v6 = vld [vmem:[#allocation7 + $0x14] sm:$0xf0] }
 0x13d   :  { %6295 = vpow2.f32 %v5864_v8  ;;  %392 = vmatpush.bf16.msra.mxu3 %v7185_v2  ;;  %668 = vmatpush.bf16.msrb.mxu0 %v7185_v2 }
 0x13e   :  { %938 = vmatpush.bf16.msra.mxu2 %v7185_v2 }
 0x13f   :  { %v6288_v3 = vpop.eup %6287 }
 0x140   :  { %v6290_v4 = vpop.eup %6289  ;;  %316 = vrot.lane.b32.xlu1 %v6288_v3, %s7023_s1  ;;  %v6210_v3 = vld [vmem:[#allocation7 + $0x24] sm:$0xf0] }
 0x141   :  { %242 = vrot.lane.b32.xlu2 %v6290_v4, %s7023_s1  ;;  %v6292_v5 = vpop.eup %6291  ;;  %v7188_v4 = vor.u32 %v6210_v3, %v5883_v1 }
 0x142   :  { %v6294_v9 = vpop.eup %6293 }
 0x143   :  { %v260_v10 = vadd.f32 1.0, %v6294_v9  ;;  %v6296_v11 = vpop.eup %6295  ;;  %393 = vmatpush.bf16.msra.mxu3 %v7188_v4  ;;  %669 = vmatpush.bf16.msrb.mxu0 %v7188_v4  ;;  %v5867_v9 = vld [vmem:[#allocation7] sm:$0xf] }
 0x144   :  { %v261_v12 = vadd.f32 1.0, %v6296_v11  ;;  %939 = vmatpush.bf16.msra.mxu2 %v7188_v4 }
 0x145   :  { %6297 = vrcp.f32 %v260_v10  ;;  %vm267_vm9 = vweird.f32 %v260_v10  ;;  %v273_v28 = vand.u32 2147483648, %v260_v10  ;;  %v271_v31 = vand.u32 2147483647, %v260_v10 }
 0x146   :  { %6299 = vrcp.f32 %v261_v12  ;;  %vm282_vm13 = vweird.f32 %v261_v12  ;;  %v288_v39 = vand.u32 2147483648, %v261_v12  ;;  %v286_v40 = vand.u32 2147483647, %v261_v12 }
 0x147   :  { %v274_v38 = vor.u32 1.1754944e-38, %v273_v28  ;;  %vm272_vm15 = vcmp.eq.f32.partialorder %v271_v31, 8.507059e+37 }
 0x148   :  { %v289_v45 = vor.u32 1.1754944e-38, %v288_v39  ;;  %vm287_vm2 = vcmp.eq.f32.partialorder %v286_v40, 8.507059e+37 }
 0x149   :  { %240 = vrot.lane.b32.xlu2 %v6292_v5, %s7023_s1  ;;  %v5875_v5 = vld [vmem:[#allocation7 + $0x10] sm:$0xf] }
 0x14a   :  { %v7193_v8 = vor.u32 %v6208_v6, %v5875_v5 }
 0x14b   :  { %v6298_v13 = vpop.eup %6297 }
 0x14c   :  { %v263_v14 = vmul.f32 %v6298_v13, %v260_v10  ;;  %v6300_v15 = vpop.eup %6299  ;;  %vm268_vm10 = vweird.f32 %v6298_v13  ;;  %394 = vmatpush.bf16.msra.mxu3 %v7193_v8  ;;  %670 = vmatpush.bf16.msrb.mxu0 %v7193_v8  ;;  %v6206_v10 = vld [vmem:[#allocation7 + $0x4] sm:$0xf0] }
 0x14d   :  { %v278_v18 = vmul.f32 %v6300_v15, %v261_v12  ;;  %vm7163_vm11 = vmor %vm267_vm9, %vm268_vm10  ;;  %vm283_vm14 = vweird.f32 %v6300_v15  ;;  %940 = vmatpush.bf16.msra.mxu2 %v7193_v8  ;;  %v7200_v11 = vor.u32 %v6206_v10, %v5867_v9  ;;  %v6211_v12 = vld [vmem:[#allocation7 + $0x34] sm:$0xf] }
 0x14e   :  { %v264_v17 = vsub.f32 1.0, %v263_v14  ;;  %vm284_vm1 = vmor %vm282_vm13, %vm283_vm14 }
 0x14f   :  { %v279_v24 = vsub.f32 1.0, %v278_v18  ;;  %v6207_v18 = vld [vmem:[#allocation7 + $0x14] sm:$0xf] }
 0x150   :  { %v265_v23 = vmul.f32 %v6298_v13, %v264_v17  ;;  %395 = vmatpush.bf16.msra.mxu3 %v7200_v11  ;;  %671 = vmatpush.bf16.msrb.mxu0 %v7200_v11 }
 0x151   :  { %458 = vrot.lane.b32.xlu2 %v7109_v7, %s7022_s30  ;;  %v280_v32 = vmul.f32 %v6300_v15, %v279_v24  ;;  %941 = vmatpush.bf16.msra.mxu2 %v7200_v11  ;;  %v5869_v24 = vld [vmem:[#allocation7 + $0x8] sm:$0xf0] }
 0x152   :  { %v266_v30 = vadd.f32 %v6298_v13, %v265_v23  ;;  %v6205_v23 = vld [vmem:[#allocation7 + $0x4] sm:$0xf] }
 0x153   :  { %v281_v42 = vadd.f32 %v6300_v15, %v280_v32 }
 0x154   :  { %v270_v41 = vsel %vm7163_vm11, %v6298_v13, %v266_v30  ;;  %v5893_v13 = vld [vmem:[#allocation7 + $0x38] sm:$0xf0]  ;;  %1211 = vmatpush.bf16.msra.mxu0 %v7185_v2 }
 0x155   :  { %v275_v44 = vsel %vm272_vm15, %v274_v38, %v270_v41  ;;  %v285_v46 = vsel %vm284_vm1, %v6300_v15, %v281_v42  ;;  %v7206_v14 = vor.u32 %v6211_v12, %v5893_v13  ;;  %v6209_v15 = vld [vmem:[#allocation7 + $0x24] sm:$0xf]  ;;  %1478 = vmatpush.bf16.msrb.mxu2 %v7185_v2 }
 0x156   :  { %v310_v48 = vsub.f32 1.0, %v275_v44  ;;  %v290_v49 = vsel %vm287_vm2, %v289_v45, %v285_v46  ;;  %v322_v51 = vmul.f32 0.0, %v275_v44 }
 0x157   :  { %v311_v52 = vsub.f32 1.0, %v290_v49  ;;  %v323_v56 = vmul.f32 0.0, %v290_v49  ;;  %405 = vmatpush.bf16.msrb.mxu3 %v7206_v14  ;;  %681 = vmatpush.bf16.msrb.mxu1 %v7206_v14 }
 0x158   :  { %1212 = vmatpush.bf16.msra.mxu0 %v7188_v4 }
 0x159   :  { %1479 = vmatpush.bf16.msrb.mxu2 %v7188_v4 }
 0x15c   :  { %1213 = vmatpush.bf16.msra.mxu0 %v7193_v8 }
 0x15d   :  { %1480 = vmatpush.bf16.msrb.mxu2 %v7193_v8 }
 0x160   :  { %1214 = vmatpush.bf16.msra.mxu0 %v7200_v11 }
 0x161   :  { %1481 = vmatpush.bf16.msrb.mxu2 %v7200_v11 }
 0x19b   :  { %v243_v16 = vpop.permute.xlu2 %242 }
 0x19c   :  { %v247_v21 = vmul.f32 %v243_v16, %v237_v20  ;;  %v5885_v16 = vld [vmem:[#allocation7 + $0x28] sm:$0xf0]  ;;  %v5877_v20 = vld [vmem:[#allocation7 + $0x18] sm:$0xf0] }
 0x19d   :  { %v7210_v17 = vor.u32 %v6209_v15, %v5885_v16 }
 0x19e   :  { %v7159_v26 = vadd.f32 %v249_v25, %v247_v21  ;;  %v7216_v21 = vor.u32 %v6207_v18, %v5877_v20  ;;  %v7222_v25 = vor.u32 %v6205_v23, %v5869_v24 }
 0x19f   :  { %406 = vmatpush.bf16.msrb.mxu3 %v7210_v17  ;;  %682 = vmatpush.bf16.msrb.mxu1 %v7210_v17 }
 0x1a0   :  { %v328_v36 = vrot.slane %v7159_v26, 7 }
 0x1a3   :  { %v241_v29 = vpop.permute.xlu2 %240  ;;  %407 = vmatpush.bf16.msrb.mxu3 %v7216_v21  ;;  %683 = vmatpush.bf16.msrb.mxu1 %v7216_v21 }
 0x1a4   :  { %v246_v34 = vmul.f32 %v241_v29, %v236_v27 }
 0x1a6   :  { %v7168_v37 = vadd.f32 %v248_v33, %v246_v34 }
 0x1a7   :  { %408 = vmatpush.bf16.msrb.mxu3 %v7222_v25  ;;  %684 = vmatpush.bf16.msrb.mxu1 %v7222_v25 }
 0x1a8   :  { %v330_v43 = vsel %vm8808_vm12, %v328_v36, %v7168_v37 }
 0x1a9   :  { %331 = vrot.lane.b32.xlu0 %v330_v43, %s7023_s1 }
 0x1aa   :  { %v315_v47 = vpop.permute.xlu0 %314 }
 0x1ab   :  { %v320_v50 = vmul.f32 %v315_v47, %v310_v48  ;;  %1224 = vmatpush.bf16.msra.mxu1 %v7206_v14  ;;  %v7244_v31 = vpop.permute.xlu2 %458 }
 0x1ad   :  { %v7177_v54 = vadd.f32 %v322_v51, %v320_v50 }
 0x1af   :  { %v336_v60 = vrot.slane %v7177_v54, 7  ;;  %1225 = vmatpush.bf16.msra.mxu1 %v7210_v17 }
 0x1b2   :  { %v317_v53 = vpop.permute.xlu1 %316 }
 0x1b3   :  { %v321_v57 = vmul.f32 %v317_v53, %v311_v52  ;;  %1226 = vmatpush.bf16.msra.mxu1 %v7216_v21 }
 0x1b5   :  { %v7179_v58 = vadd.f32 %v323_v56, %v321_v57 }
 0x1b7   :  { %v337_v61 = vrot.slane %v7179_v58, 6  ;;  %1227 = vmatpush.bf16.msra.mxu1 %v7222_v25 }
 0x1b9   :  { %v338_v62 = vsel %vm8808_vm12, %v337_v61, %v336_v60 }
 0x1ba   :  { %339 = vrot.lane.b32.xlu1 %v338_v62, %s7020_s13 }
 0x21b   :  { %v332_v27 = vpop.permute.xlu0 %331 }
 0x22c   :  { %v340_v28 = vpop.permute.xlu1 %339 }
 0x22d   :  { %v342_v29 = vsel %vm127_vm0, %v332_v27, %v340_v28 }
 0x22e   :  { %v343_v30 = vpack.c.bf16 %v342_v29, %v342_v29 }
 0x230   :  { %5897 = vmatmul.msk.bf16.vlgmr.msra.gmra.mxu3 %vm8807_vm3, %v343_v30 }
 0x231   :  { %951 = vmatpush.bf16.msra.mxu3 %v7206_v14 }
 0x235   :  { %952 = vmatpush.bf16.msra.mxu3 %v7210_v17 }
 0x239   :  { %953 = vmatpush.bf16.msra.mxu3 %v7216_v21 }
 0x23d   :  { %954 = vmatpush.bf16.msra.mxu3 %v7222_v25 }
 0x240   :  { %5898 = vmatmul.msk.bf16.vlgmr.msrb.gmra.mxu3 %vm8807_vm3, %v343_v30 }
 0x241   :  { %1491 = vmatpush.bf16.msrb.mxu3 %v7206_v14 }
 0x245   :  { %1492 = vmatpush.bf16.msrb.mxu3 %v7210_v17 }
 0x249   :  { %1493 = vmatpush.bf16.msrb.mxu3 %v7216_v21 }
 0x24d   :  { %1494 = vmatpush.bf16.msrb.mxu3 %v7222_v25 }
 0x2b3   :  { %v397_v32 = vpop.f32.mrf.mxu3 }
 0x2b4   :  { %v461_v33 = vadd.f32 %v7244_v31, %v397_v32  ;;  %v504_v43 = vrot.slane %v397_v32, 3  ;;  %v419_v46 = vadd.f32 %v397_v32, %v7130_v22  ;;  %v415_v47 = vrot.slane %v397_v32, 7 }
 0x2b5   :  { %v503_v53 = vrot.slane %v397_v32, 2 }
 0x2b6   :  { %466 = vrot.lane.b32.xlu0 %v461_v33, %s7022_s30  ;;  %v463_v35 = vrot.slane %v461_v33, 7  ;;  %v508_v44 = vadd.f32 %v504_v43, %v7130_v22  ;;  %v5900_v48 = vmul.f32 -1.442695, %v419_v46  ;;  %v418_v50 = vadd.f32 %v415_v47, %v7127_v19 }
 0x2b7   :  { %v507_v60 = vadd.f32 %v503_v53, %v7127_v19 }
 0x2b8   :  { %v5902_v45 = vmul.f32 -1.442695, %v508_v44  ;;  %v5899_v52 = vmul.f32 -1.442695, %v418_v50 }
 0x2b9   :  { %v5901_v62 = vmul.f32 -1.442695, %v507_v60 }
 0x2ba   :  { %6301 = vpow2.f32 %v5902_v45 }
 0x2bb   :  { %v399_v34 = vpop.f32.mrf.mxu3  ;;  %6303 = vpow2.f32 %v5900_v48 }
 0x2be   :  { %464 = vrot.lane.b32.xlu0 %v463_v35, %s7022_s30 }
 0x2c0   :  { %v6302_v49 = vpop.eup %6301 }
 0x2c1   :  { %v516_v51 = vadd.f32 1.0, %v6302_v49  ;;  %v6304_v56 = vpop.eup %6303 }
 0x2c2   :  { %v427_v57 = vadd.f32 1.0, %v6304_v56 }
 0x2c3   :  { %v7249_v38 = vpop.f32.mrf.mxu3  ;;  %6305 = vrcp.f32 %v516_v51  ;;  %v543_v18 = vand.u32 2147483648, %v516_v51  ;;  %vm537_vm5 = vweird.f32 %v516_v51  ;;  %v541_v20 = vand.u32 2147483647, %v516_v51 }
 0x2c4   :  { %v592_v39 = vadd.f32 %v7109_v7, %v7249_v38  ;;  %6307 = vpow2.f32 %v5899_v52  ;;  %v454_v35 = vand.u32 2147483648, %v427_v57  ;;  %vm448_vm9 = vweird.f32 %v427_v57 }
 0x2c5   :  { %6309 = vrcp.f32 %v427_v57  ;;  %v544_v28 = vor.u32 1.1754944e-38, %v543_v18  ;;  %vm542_vm7 = vcmp.eq.f32.partialorder %v541_v20, 8.507059e+37 }
 0x2c6   :  { %v595_v41 = vrot.slane %v592_v39, 3  ;;  %v594_v42 = vrot.slane %v592_v39, 2  ;;  %6311 = vpow2.f32 %v5901_v62  ;;  %v455_v43 = vor.u32 1.1754944e-38, %v454_v35 }
 0x2c8   :  { %598 = vrot.lane.b32.xlu2 %v595_v41, %s7022_s30  ;;  %596 = vrot.lane.b32.xlu1 %v594_v42, %s7022_s30  ;;  %v452_v41 = vand.u32 2147483647, %v427_v57 }
 0x2c9   :  { %v6306_v61 = vpop.eup %6305 }
 0x2ca   :  { %v6308_v63 = vpop.eup %6307  ;;  %v533_v0 = vmul.f32 %v6306_v61, %v516_v51  ;;  %vm538_vm4 = vweird.f32 %v6306_v61  ;;  %vm453_vm11 = vcmp.eq.f32.partialorder %v452_v41, 8.507059e+37 }
 0x2cb   :  { %v412_v40 = vpop.f32.mrf.mxu3  ;;  %v426_v1 = vadd.f32 1.0, %v6308_v63  ;;  %v6310_v3 = vpop.eup %6309  ;;  %vm539_vm6 = vmor %vm537_vm5, %vm538_vm4 }
 0x2cc   :  { %v534_v5 = vsub.f32 1.0, %v533_v0  ;;  %v444_v6 = vmul.f32 %v6310_v3, %v427_v57  ;;  %v6312_v9 = vpop.eup %6311  ;;  %vm449_vm8 = vweird.f32 %v6310_v3 }
 0x2cd   :  { %6313 = vrcp.f32 %v426_v1  ;;  %v515_v12 = vadd.f32 1.0, %v6312_v9  ;;  %vm450_vm10 = vmor %vm448_vm9, %vm449_vm8  ;;  %v439_v49 = vand.u32 2147483648, %v426_v1  ;;  %vm433_vm14 = vweird.f32 %v426_v1 }
 0x2ce   :  { %v535_v10 = vmul.f32 %v6306_v61, %v534_v5  ;;  %v445_v13 = vsub.f32 1.0, %v444_v6  ;;  %v437_v51 = vand.u32 2147483647, %v426_v1 }
 0x2cf   :  { %6315 = vrcp.f32 %v515_v12  ;;  %v440_v53 = vor.u32 1.1754944e-38, %v439_v49  ;;  %v528_v63 = vand.u32 2147483648, %v515_v12  ;;  %vm522_vm4 = vweird.f32 %v515_v12 }
 0x2d0   :  { %v536_v16 = vadd.f32 %v6306_v61, %v535_v10  ;;  %v446_v23 = vmul.f32 %v6310_v3, %v445_v13  ;;  %vm438_vm1 = vcmp.eq.f32.partialorder %v437_v51, 8.507059e+37  ;;  %v526_v0 = vand.u32 2147483647, %v515_v12 }
 0x2d2   :  { %v540_v27 = vsel %vm539_vm6, %v6306_v61, %v536_v16  ;;  %v447_v32 = vadd.f32 %v6310_v3, %v446_v23  ;;  %vm527_vm6 = vcmp.eq.f32.partialorder %v526_v0, 8.507059e+37 }
 0x2d3   :  { %v6314_v15 = vpop.eup %6313  ;;  %v545_v29 = vsel %vm542_vm7, %v544_v28, %v540_v27 }
 0x2d4   :  { %v429_v24 = vmul.f32 %v6314_v15, %v426_v1  ;;  %v451_v42 = vsel %vm450_vm10, %v6310_v3, %v447_v32  ;;  %vm434_vm13 = vweird.f32 %v6314_v15  ;;  %v529_v1 = vor.u32 1.1754944e-38, %v528_v63 }
 0x2d5   :  { %v6316_v39 = vpop.eup %6315  ;;  %v7260_v46 = vsel %vm453_vm11, %v455_v43, %v451_v42  ;;  %vm435_vm15 = vmor %vm433_vm14, %vm434_vm13  ;;  %v548_v32 = vrot.slane %v7249_v38, 2  ;;  %vm8805_vm13 = vcmask 1042434  }
 0x2d6   :  { %v430_v33 = vsub.f32 1.0, %v429_v24  ;;  %v518_v44 = vmul.f32 %v6316_v39, %v515_v12  ;;  %vm523_vm2 = vweird.f32 %v6316_v39  ;;  %v485_v51 = vsub.f32 1.0, %v7260_v46 }
 0x2d7   :  { %vm524_vm5 = vmor %vm522_vm4, %vm523_vm2 }
 0x2d8   :  { %v431_v40 = vmul.f32 %v6314_v15, %v430_v33  ;;  %v519_v50 = vsub.f32 1.0, %v518_v44 }
 0x2da   :  { %v432_v48 = vadd.f32 %v6314_v15, %v431_v40  ;;  %v520_v56 = vmul.f32 %v6316_v39, %v519_v50 }
 0x2dc   :  { %v436_v52 = vsel %vm435_vm15, %v6314_v15, %v432_v48  ;;  %v521_v62 = vadd.f32 %v6316_v39, %v520_v56 }
 0x2dd   :  { %v7264_v60 = vsel %vm438_vm1, %v440_v53, %v436_v52 }
 0x2de   :  { %v525_v3 = vsel %vm524_vm5, %v6316_v39, %v521_v62  ;;  %v496_v62 = vrot.slane %v7168_v37, 7 }
 0x2df   :  { %v530_v5 = vsel %vm527_vm6, %v529_v1, %v525_v3 }
 0x322   :  { %v599_v30 = vpop.permute.xlu2 %598 }
 0x323   :  { %v603_v34 = vmul.f32 %v599_v30, %v545_v29  ;;  %v549_v30 = vrot.slane %v7249_v38, 3 }
 0x325   :  { %608 = vrot.lane.b32.xlu0 %v603_v34, %s7022_s30  ;;  %v553_v33 = vadd.f32 %v549_v30, %v7146_v59  ;;  %v552_v34 = vadd.f32 %v548_v32, %v7143_v55 }
 0x327   :  { %v5904_v35 = vmul.f32 -1.442695, %v553_v33  ;;  %v5903_v39 = vmul.f32 -1.442695, %v552_v34 }
 0x328   :  { %v467_v45 = vpop.permute.xlu0 %466 }
 0x329   :  { %v471_v47 = vmul.f32 %v467_v45, %v7260_v46 }
 0x32b   :  { %476 = vrot.lane.b32.xlu1 %v471_v47, %s7022_s30 }
 0x330   :  { %v465_v57 = vpop.permute.xlu0 %464 }
 0x331   :  { %v470_v61 = vmul.f32 %v465_v57, %v7264_v60  ;;  %v500_v57 = vmul.f32 %v7260_v46, %v328_v36 }
 0x333   :  { %474 = vrot.lane.b32.xlu1 %v470_v61, %s7022_s30  ;;  %v484_v61 = vsub.f32 1.0, %v7264_v60 }
 0x33a   :  { %v597_v6 = vpop.permute.xlu1 %596 }
 0x33b   :  { %v602_v9 = vmul.f32 %v597_v6, %v530_v5 }
 0x33d   :  { %606 = vrot.lane.b32.xlu2 %v602_v9, %s7022_s30 }
 0x397   :  { %v609_v10 = vpop.permute.xlu0 %608  ;;  %v607_v13 = vpop.permute.xlu2 %606 }
 0x398   :  { %v613_v15 = vadd.f32 %v609_v10, %v7146_v59  ;;  %v612_v16 = vadd.f32 %v607_v13, %v7143_v55  ;;  %v499_v10 = vmul.f32 %v496_v62, %v7264_v60 }
 0x39a   :  { %6317 = vtanh.f32 %v613_v15 }
 0x39b   :  { %6319 = vtanh.f32 %v612_v16 }
 0x39d   :  { %v477_v18 = vpop.permute.xlu1 %476 }
 0x39e   :  { %v481_v12 = vadd.f32 %v477_v18, %v7130_v22 }
 0x3a0   :  { %v6318_v20 = vpop.eup %6317  ;;  %6321 = vtanh.f32 %v481_v12 }
 0x3a1   :  { %v6320_v23 = vpop.eup %6319  ;;  %622 = vrot.lane.b32.xlu1 %v6318_v20, %s7023_s1 }
 0x3a2   :  { %620 = vrot.lane.b32.xlu0 %v6320_v23, %s7023_s1 }
 0x3a5   :  { %v475_v24 = vpop.permute.xlu1 %474 }
 0x3a6   :  { %v6322_v27 = vpop.eup %6321  ;;  %v480_v28 = vadd.f32 %v475_v24, %v7127_v19 }
 0x3a7   :  { %490 = vrot.lane.b32.xlu2 %v6322_v27, %s7023_s1  ;;  %v629_v27 = vrot.slane %v7179_v58, 1 }
 0x3a8   :  { %6323 = vtanh.f32 %v480_v28 }
 0x3a9   :  { %6325 = vpow2.f32 %v5904_v35 }
 0x3aa   :  { %6327 = vpow2.f32 %v5903_v39 }
 0x3ae   :  { %v6324_v29 = vpop.eup %6323 }
 0x3af   :  { %488 = vrot.lane.b32.xlu2 %v6324_v29, %s7023_s1  ;;  %v6326_v41 = vpop.eup %6325  ;;  %v628_v29 = vrot.slane %v7177_v54, 1 }
 0x3b0   :  { %v6328_v42 = vpop.eup %6327  ;;  %v561_v40 = vadd.f32 1.0, %v6326_v41 }
 0x3b1   :  { %v560_v43 = vadd.f32 1.0, %v6328_v42 }
 0x3b2   :  { %6329 = vrcp.f32 %v561_v40  ;;  %v588_v1 = vand.u32 2147483648, %v561_v40  ;;  %vm582_vm9 = vweird.f32 %v561_v40  ;;  %v586_v9 = vand.u32 2147483647, %v561_v40 }
 0x3b3   :  { %6331 = vrcp.f32 %v560_v43  ;;  %v573_v6 = vand.u32 2147483648, %v560_v43  ;;  %vm567_vm10 = vweird.f32 %v560_v43  ;;  %v571_v36 = vand.u32 2147483647, %v560_v43 }
 0x3b4   :  { %v589_v12 = vor.u32 1.1754944e-38, %v588_v1  ;;  %vm587_vm15 = vcmp.eq.f32.partialorder %v586_v9, 8.507059e+37 }
 0x3b5   :  { %v574_v20 = vor.u32 1.1754944e-38, %v573_v6  ;;  %vm572_vm1 = vcmp.eq.f32.partialorder %v571_v36, 8.507059e+37 }
 0x3b8   :  { %v6330_v44 = vpop.eup %6329 }
 0x3b9   :  { %v6332_v45 = vpop.eup %6331  ;;  %v578_v47 = vmul.f32 %v6330_v44, %v561_v40  ;;  %vm583_vm7 = vweird.f32 %v6330_v44 }
 0x3ba   :  { %v563_v48 = vmul.f32 %v6332_v45, %v560_v43  ;;  %vm568_vm8 = vweird.f32 %v6332_v45  ;;  %vm584_vm11 = vmor %vm582_vm9, %vm583_vm7 }
 0x3bb   :  { %v579_v49 = vsub.f32 1.0, %v578_v47  ;;  %vm569_vm14 = vmor %vm567_vm10, %vm568_vm8 }
 0x3bc   :  { %v564_v38 = vsub.f32 1.0, %v563_v48 }
 0x3bd   :  { %v580_v52 = vmul.f32 %v6330_v44, %v579_v49 }
 0x3be   :  { %v565_v56 = vmul.f32 %v6332_v45, %v564_v38 }
 0x3bf   :  { %v581_v63 = vadd.f32 %v6330_v44, %v580_v52 }
 0x3c0   :  { %v566_v3 = vadd.f32 %v6332_v45, %v565_v56 }
 0x3c1   :  { %v585_v46 = vsel %vm584_vm11, %v6330_v44, %v581_v63 }
 0x3c2   :  { %v570_v18 = vsel %vm569_vm14, %v6332_v45, %v566_v3  ;;  %v590_v23 = vsel %vm587_vm15, %v589_v12, %v585_v46 }
 0x3c3   :  { %v575_v24 = vsel %vm572_vm1, %v574_v20, %v570_v18  ;;  %v617_v28 = vsub.f32 1.0, %v590_v23  ;;  %v633_v35 = vmul.f32 %v629_v27, %v590_v23 }
 0x3c4   :  { %v616_v30 = vsub.f32 1.0, %v575_v24  ;;  %v632_v41 = vmul.f32 %v628_v29, %v575_v24 }
 0x401   :  { %v491_v50 = vpop.permute.xlu2 %490 }
 0x402   :  { %v495_v53 = vmul.f32 %v491_v50, %v485_v51 }
 0x404   :  { %v7287_v0 = vadd.f32 %v500_v57, %v495_v53 }
 0x406   :  { %v638_v15 = vrot.slane %v7287_v0, 7 }
 0x409   :  { %v489_v5 = vpop.permute.xlu2 %488 }
 0x40a   :  { %v494_v13 = vmul.f32 %v489_v5, %v484_v61 }
 0x40c   :  { %v7291_v16 = vadd.f32 %v499_v10, %v494_v13 }
 0x40e   :  { %v640_v60 = vsel %vm8805_vm13, %v638_v15, %v7291_v16 }
 0x40f   :  { %641 = vrot.lane.b32.xlu0 %v640_v60, %s7023_s1 }
 0x413   :  { %v623_v32 = vpop.permute.xlu1 %622 }
 0x414   :  { %v621_v33 = vpop.permute.xlu0 %620  ;;  %v627_v34 = vmul.f32 %v623_v32, %v617_v28 }
 0x415   :  { %v626_v39 = vmul.f32 %v621_v33, %v616_v30 }
 0x416   :  { %v7300_v42 = vadd.f32 %v633_v35, %v627_v34 }
 0x417   :  { %v7302_v40 = vadd.f32 %v632_v41, %v626_v39 }
 0x418   :  { %v647_v43 = vrot.slane %v7300_v42, 4 }
 0x419   :  { %v646_v44 = vrot.slane %v7302_v40, 5 }
 0x41b   :  { %v648_v45 = vsel %vm8805_vm13, %v647_v43, %v646_v44 }
 0x41c   :  { %649 = vrot.lane.b32.xlu1 %v648_v45, %s7020_s13 }
 0x481   :  { %v642_v47 = vpop.permute.xlu0 %641 }
 0x48e   :  { %v650_v48 = vpop.permute.xlu1 %649 }
 0x48f   :  { %v652_v49 = vsel %vm127_vm0, %v642_v47, %v650_v48 }
 0x490   :  { %v653_v38 = vpack.c.bf16 %v652_v49, %v652_v49 }
 0x492   :  { %v657_v50 = vshll.u32 %v653_v38, 16  ;;  %v655_v51 = vshrl.u32 %v653_v38, 16 }
 0x494   :  { %v659_v52 = vrot.slane %v657_v50, 1 }
 0x496   :  { %v660_v53 = vor.u32 %v659_v52, %v655_v51 }
 0x498   :  { %5905 = vmatmul.msk.bf16.vlgmr.msrb.gmra.mxu0 %vm8807_vm3, %v660_v53  ;;  %5906 = vmatmul.msk.bf16.vlgmr.msrb.gmra.mxu1 %vm8807_vm3, %v660_v53 }
 0x499   :  { %1754 = vmatpush.bf16.msrb.mxu0 %v7185_v2  ;;  %1767 = vmatpush.bf16.msrb.mxu1 %v7206_v14 }
 0x49d   :  { %1755 = vmatpush.bf16.msrb.mxu0 %v7188_v4  ;;  %1768 = vmatpush.bf16.msrb.mxu1 %v7210_v17 }
 0x4a1   :  { %1756 = vmatpush.bf16.msrb.mxu0 %v7193_v8  ;;  %1769 = vmatpush.bf16.msrb.mxu1 %v7216_v21 }
 0x4a5   :  { %1757 = vmatpush.bf16.msrb.mxu0 %v7200_v11  ;;  %1770 = vmatpush.bf16.msrb.mxu1 %v7222_v25 }
 0x515   :  { %v673_v56 = vpop.f32.mrf.mxu0  ;;  %v7319_v57 = vpop.f32.mrf.mxu1 }
 0x516   :  { %v867_v61 = vadd.f32 %v7109_v7, %v7319_v57  ;;  %v735_v62 = vadd.f32 %v673_v56, %v7244_v31  ;;  %v692_v10 = vrot.slane %v673_v56, 7  ;;  %v691_v7 = vrot.slane %v673_v56, 6 }
 0x517   :  { %v778_v20 = vrot.slane %v673_v56, 3  ;;  %v779_v60 = vrot.slane %v673_v56, 4 }
 0x518   :  { %v870_v63 = vrot.slane %v867_v61, 4  ;;  %v869_v3 = vrot.slane %v867_v61, 3  ;;  %v738_v1 = vrot.slane %v735_v62, 7  ;;  %v737_v9 = vrot.slane %v735_v62, 6 }
 0x519   :  { %v696_v13 = vadd.f32 %v692_v10, %v7130_v22  ;;  %v695_v46 = vadd.f32 %v691_v7, %v7127_v19  ;;  %v782_v24 = vadd.f32 %v778_v20, %v7127_v19  ;;  %v783_v27 = vadd.f32 %v779_v60, %v7130_v22 }
 0x51a   :  { %873 = vrot.lane.b32.xlu1 %v870_v63, %s7022_s30  ;;  %871 = vrot.lane.b32.xlu0 %v869_v3, %s7022_s30 }
 0x51b   :  { %741 = vrot.lane.b32.xlu2 %v738_v1, %s7022_s30  ;;  %v5908_v36 = vmul.f32 -1.442695, %v696_v13  ;;  %v5907_v18 = vmul.f32 -1.442695, %v695_v46  ;;  %v5909_v29 = vmul.f32 -1.442695, %v782_v24 }
 0x51c   :  { %v5910_v30 = vmul.f32 -1.442695, %v783_v27 }
 0x51d   :  { %v675_v5 = vpop.f32.mrf.mxu0  ;;  %v688_v6 = vpop.f32.mrf.mxu1  ;;  %6333 = vpow2.f32 %v5908_v36 }
 0x51e   :  { %6335 = vpow2.f32 %v5907_v18 }
 0x523   :  { %739 = vrot.lane.b32.xlu2 %v737_v9, %s7022_s30  ;;  %v6334_v12 = vpop.eup %6333 }
 0x524   :  { %v704_v23 = vadd.f32 1.0, %v6334_v12  ;;  %v6336_v28 = vpop.eup %6335 }
 0x525   :  { %v703_v32 = vadd.f32 1.0, %v6336_v28 }
 0x526   :  { %6337 = vrcp.f32 %v704_v23  ;;  %v731_v50 = vand.u32 2147483648, %v704_v23  ;;  %vm725_vm4 = vweird.f32 %v704_v23  ;;  %v729_v51 = vand.u32 2147483647, %v704_v23 }
 0x527   :  { %6339 = vpow2.f32 %v5909_v29  ;;  %v716_v6 = vand.u32 2147483648, %v703_v32  ;;  %vm710_vm8 = vweird.f32 %v703_v32  ;;  %v714_v13 = vand.u32 2147483647, %v703_v32 }
 0x528   :  { %6341 = vpow2.f32 %v5910_v30  ;;  %v732_v61 = vor.u32 1.1754944e-38, %v731_v50  ;;  %vm730_vm6 = vcmp.eq.f32.partialorder %v729_v51, 8.507059e+37 }
 0x529   :  { %6343 = vrcp.f32 %v703_v32  ;;  %v717_v36 = vor.u32 1.1754944e-38, %v716_v6  ;;  %vm715_vm10 = vcmp.eq.f32.partialorder %v714_v13, 8.507059e+37 }
 0x52c   :  { %v6338_v33 = vpop.eup %6337 }
 0x52d   :  { %v721_v34 = vmul.f32 %v6338_v33, %v704_v23  ;;  %v6340_v35 = vpop.eup %6339  ;;  %vm726_vm2 = vweird.f32 %v6338_v33 }
 0x52e   :  { %v6342_v39 = vpop.eup %6341  ;;  %v790_v44 = vadd.f32 1.0, %v6340_v35  ;;  %vm727_vm5 = vmor %vm725_vm4, %vm726_vm2 }
 0x52f   :  { %v722_v41 = vsub.f32 1.0, %v721_v34  ;;  %v6344_v43 = vpop.eup %6343  ;;  %v791_v45 = vadd.f32 1.0, %v6342_v39 }
 0x530   :  { %v706_v48 = vmul.f32 %v6344_v43, %v703_v32  ;;  %6345 = vrcp.f32 %v790_v44  ;;  %vm711_vm7 = vweird.f32 %v6344_v43  ;;  %vm797_vm15 = vweird.f32 %v790_v44 }
 0x531   :  { %v723_v47 = vmul.f32 %v6338_v33, %v722_v41  ;;  %6347 = vrcp.f32 %v791_v45  ;;  %vm712_vm9 = vmor %vm710_vm8, %vm711_vm7  ;;  %v818_v29 = vand.u32 2147483648, %v791_v45  ;;  %v803_v30 = vand.u32 2147483648, %v790_v44 }
 0x532   :  { %v707_v38 = vsub.f32 1.0, %v706_v48  ;;  %vm812_vm1 = vweird.f32 %v791_v45  ;;  %v816_v32 = vand.u32 2147483647, %v791_v45 }
 0x533   :  { %v724_v49 = vadd.f32 %v6338_v33, %v723_v47  ;;  %v819_v39 = vor.u32 1.1754944e-38, %v818_v29  ;;  %v804_v41 = vor.u32 1.1754944e-38, %v803_v30 }
 0x534   :  { %v708_v53 = vmul.f32 %v6344_v43, %v707_v38 }
 0x535   :  { %v728_v52 = vsel %vm727_vm5, %v6338_v33, %v724_v49  ;;  %v801_v33 = vand.u32 2147483647, %v790_v44  ;;  %vm817_vm5 = vcmp.eq.f32.partialorder %v816_v32, 8.507059e+37 }
 0x536   :  { %v6346_v56 = vpop.eup %6345  ;;  %v7332_v3 = vsel %vm730_vm6, %v732_v61, %v728_v52  ;;  %v709_v5 = vadd.f32 %v6344_v43, %v708_v53 }
 0x537   :  { %v6348_v62 = vpop.eup %6347  ;;  %v793_v10 = vmul.f32 %v6346_v56, %v790_v44  ;;  %vm798_vm11 = vweird.f32 %v6346_v56  ;;  %vm802_vm6 = vcmp.eq.f32.partialorder %v801_v33, 8.507059e+37 }
 0x538   :  { %v808_v9 = vmul.f32 %v6348_v62, %v791_v45  ;;  %v713_v7 = vsel %vm712_vm9, %v6344_v43, %v709_v5  ;;  %vm813_vm14 = vweird.f32 %v6348_v62  ;;  %vm799_vm2 = vmor %vm797_vm15, %vm798_vm11 }
 0x539   :  { %v794_v18 = vsub.f32 1.0, %v793_v10  ;;  %v7336_v20 = vsel %vm715_vm10, %v717_v36, %v713_v7  ;;  %vm814_vm4 = vmor %vm812_vm1, %vm813_vm14  ;;  %v824_v10 = vrot.slane %v7319_v57, 4 }
 0x53a   :  { %v809_v46 = vsub.f32 1.0, %v808_v9  ;;  %v823_v9 = vrot.slane %v7319_v57, 3 }
 0x53b   :  { %v795_v24 = vmul.f32 %v6346_v56, %v794_v18  ;;  %v828_v7 = vadd.f32 %v824_v10, %v7146_v59 }
 0x53c   :  { %v810_v23 = vmul.f32 %v6348_v62, %v809_v46  ;;  %v827_v13 = vadd.f32 %v823_v9, %v7143_v55  ;;  %v760_v9 = vsub.f32 1.0, %v7332_v3 }
 0x53d   :  { %v796_v28 = vadd.f32 %v6346_v56, %v795_v24  ;;  %v5912_v46 = vmul.f32 -1.442695, %v828_v7 }
 0x53e   :  { %v811_v27 = vadd.f32 %v6348_v62, %v810_v23  ;;  %v5911_v36 = vmul.f32 -1.442695, %v827_v13 }
 0x53f   :  { %v800_v35 = vsel %vm799_vm2, %v6346_v56, %v796_v28  ;;  %vm2259_vm2 = vcmask 1040384  }
 0x540   :  { %v815_v34 = vsel %vm814_vm4, %v6348_v62, %v811_v27  ;;  %v805_v49 = vsel %vm802_vm6, %v804_v41, %v800_v35  ;;  %vm8803_vm4 = vcmask 1043459  }
 0x541   :  { %v820_v47 = vsel %vm817_vm5, %v819_v39, %v815_v34  ;;  %vm2262_vm5 = vcmask 1041408  }
 0x575   :  { %v742_v63 = vpop.permute.xlu2 %741 }
 0x576   :  { %v746_v1 = vmul.f32 %v742_v63, %v7332_v3 }
 0x578   :  { %751 = vrot.lane.b32.xlu0 %v746_v1, %s7022_s30 }
 0x57d   :  { %v740_v12 = vpop.permute.xlu2 %739 }
 0x57e   :  { %v745_v60 = vmul.f32 %v740_v12, %v7336_v20 }
 0x580   :  { %749 = vrot.lane.b32.xlu0 %v745_v60, %s7022_s30 }
 0x58c   :  { %v874_v43 = vpop.permute.xlu1 %873  ;;  %v872_v48 = vpop.permute.xlu0 %871 }
 0x58d   :  { %v878_v38 = vmul.f32 %v874_v43, %v820_v47  ;;  %v877_v50 = vmul.f32 %v872_v48, %v805_v49 }
 0x58f   :  { %881 = vrot.lane.b32.xlu1 %v877_v50, %s7022_s30  ;;  %883 = vrot.lane.b32.xlu2 %v878_v38, %s7022_s30 }
 0x5e9   :  { %v884_v45 = vpop.permute.xlu2 %883 }
 0x5ea   :  { %v888_v44 = vadd.f32 %v884_v45, %v7146_v59  ;;  %v752_v51 = vpop.permute.xlu0 %751 }
 0x5eb   :  { %v756_v52 = vadd.f32 %v752_v51, %v7130_v22 }
 0x5ec   :  { %6349 = vtanh.f32 %v888_v44 }
 0x5ed   :  { %6351 = vtanh.f32 %v756_v52  ;;  %v903_v52 = vrot.slane %v7302_v40, 1 }
 0x5f2   :  { %v6350_v53 = vpop.eup %6349  ;;  %v750_v56 = vpop.permute.xlu0 %749 }
 0x5f3   :  { %897 = vrot.lane.b32.xlu0 %v6350_v53, %s7023_s1  ;;  %v6352_v61 = vpop.eup %6351  ;;  %v755_v62 = vadd.f32 %v750_v56, %v7127_v19  ;;  %v904_v56 = vrot.slane %v7300_v42, 1 }
 0x5f4   :  { %765 = vrot.lane.b32.xlu1 %v6352_v61, %s7023_s1 }
 0x5f5   :  { %6353 = vtanh.f32 %v755_v62 }
 0x5fb   :  { %v6354_v63 = vpop.eup %6353 }
 0x5fc   :  { %763 = vrot.lane.b32.xlu1 %v6354_v63, %s7023_s1 }
 0x601   :  { %v882_v1 = vpop.permute.xlu1 %881 }
 0x602   :  { %v887_v5 = vadd.f32 %v882_v1, %v7143_v55 }
 0x604   :  { %6355 = vtanh.f32 %v887_v5 }
 0x605   :  { %6357 = vpow2.f32 %v5911_v36  ;;  %v775_v36 = vmul.f32 %v7332_v3, %v638_v15  ;;  %v759_v15 = vsub.f32 1.0, %v7336_v20  ;;  %v771_v3 = vrot.slane %v7291_v16, 7 }
 0x606   :  { %6359 = vpow2.f32 %v5912_v46 }
 0x60a   :  { %v6356_v6 = vpop.eup %6355 }
 0x60b   :  { %895 = vrot.lane.b32.xlu2 %v6356_v6, %s7023_s1  ;;  %v6358_v18 = vpop.eup %6357 }
 0x60c   :  { %v6360_v12 = vpop.eup %6359  ;;  %v835_v60 = vadd.f32 1.0, %v6358_v18 }
 0x60d   :  { %v836_v23 = vadd.f32 1.0, %v6360_v12 }
 0x60e   :  { %6361 = vrcp.f32 %v835_v60  ;;  %vm842_vm9 = vweird.f32 %v835_v60  ;;  %v848_v39 = vand.u32 2147483648, %v835_v60  ;;  %v846_v43 = vand.u32 2147483647, %v835_v60 }
 0x60f   :  { %6363 = vrcp.f32 %v836_v23  ;;  %v863_v41 = vand.u32 2147483648, %v836_v23  ;;  %vm857_vm11 = vweird.f32 %v836_v23  ;;  %v861_v47 = vand.u32 2147483647, %v836_v23 }
 0x610   :  { %v849_v38 = vor.u32 1.1754944e-38, %v848_v39  ;;  %vm847_vm15 = vcmp.eq.f32.partialorder %v846_v43, 8.507059e+37 }
 0x611   :  { %v864_v50 = vor.u32 1.1754944e-38, %v863_v41  ;;  %vm862_vm1 = vcmp.eq.f32.partialorder %v861_v47, 8.507059e+37 }
 0x614   :  { %v6362_v24 = vpop.eup %6361 }
 0x615   :  { %v6364_v27 = vpop.eup %6363  ;;  %v838_v28 = vmul.f32 %v6362_v24, %v835_v60  ;;  %vm843_vm7 = vweird.f32 %v6362_v24 }
 0x616   :  { %v853_v29 = vmul.f32 %v6364_v27, %v836_v23  ;;  %vm858_vm8 = vweird.f32 %v6364_v27  ;;  %vm844_vm10 = vmor %vm842_vm9, %vm843_vm7  ;;  %v2261_v23 = vsel %vm2259_vm2, %v7159_v26, %v7287_v0  ;;  %v2260_v26 = vsel %vm2259_vm2, %v7168_v37, %v7291_v16 }
 0x617   :  { %v839_v30 = vsub.f32 1.0, %v838_v28  ;;  %vm859_vm14 = vmor %vm857_vm11, %vm858_vm8 }
 0x618   :  { %v854_v57 = vsub.f32 1.0, %v853_v29  ;;  %v774_v29 = vmul.f32 %v771_v3, %v7336_v20 }
 0x619   :  { %v840_v32 = vmul.f32 %v6362_v24, %v839_v30 }
 0x61a   :  { %v855_v33 = vmul.f32 %v6364_v27, %v854_v57 }
 0x61b   :  { %v841_v34 = vadd.f32 %v6362_v24, %v840_v32 }
 0x61c   :  { %v856_v35 = vadd.f32 %v6364_v27, %v855_v33 }
 0x61d   :  { %v845_v48 = vsel %vm844_vm10, %v6362_v24, %v841_v34 }
 0x61e   :  { %v860_v49 = vsel %vm859_vm14, %v6364_v27, %v856_v35  ;;  %v850_v45 = vsel %vm847_vm15, %v849_v38, %v845_v48 }
 0x61f   :  { %v865_v44 = vsel %vm862_vm1, %v864_v50, %v860_v49  ;;  %v891_v51 = vsub.f32 1.0, %v850_v45  ;;  %v907_v63 = vmul.f32 %v903_v52, %v850_v45 }
 0x620   :  { %v892_v53 = vsub.f32 1.0, %v865_v44  ;;  %v908_v5 = vmul.f32 %v904_v56, %v865_v44 }
 0x665   :  { %v896_v61 = vpop.permute.xlu2 %895  ;;  %v898_v62 = vpop.permute.xlu0 %897 }
 0x666   :  { %v901_v1 = vmul.f32 %v896_v61, %v891_v51  ;;  %v902_v6 = vmul.f32 %v898_v62, %v892_v53  ;;  %v766_v13 = vpop.permute.xlu1 %765 }
 0x667   :  { %v770_v46 = vmul.f32 %v766_v13, %v760_v9 }
 0x668   :  { %v7357_v10 = vadd.f32 %v907_v63, %v901_v1  ;;  %v7359_v7 = vadd.f32 %v908_v5, %v902_v6 }
 0x669   :  { %v7366_v60 = vadd.f32 %v775_v36, %v770_v46 }
 0x66a   :  { %v921_v18 = vrot.slane %v7357_v10, 3  ;;  %v922_v12 = vrot.slane %v7359_v7, 2 }
 0x66b   :  { %v7374_v27 = vsel %vm2262_vm5, %v2261_v23, %v7366_v60  ;;  %v913_v57 = vrot.slane %v7366_v60, 7 }
 0x66c   :  { %v923_v24 = vsel %vm8803_vm4, %v922_v12, %v921_v18 }
 0x66d   :  { %924 = vrot.lane.b32.xlu0 %v923_v24, %s7020_s13 }
 0x66e   :  { %v764_v28 = vpop.permute.xlu1 %763 }
 0x66f   :  { %v769_v30 = vmul.f32 %v764_v28, %v759_v15 }
 0x671   :  { %v7381_v32 = vadd.f32 %v774_v29, %v769_v30 }
 0x673   :  { %v7388_v0 = vsel %vm2262_vm5, %v2260_v26, %v7381_v32  ;;  %v915_v33 = vsel %vm8803_vm4, %v913_v57, %v7381_v32 }
 0x674   :  { %916 = vrot.lane.b32.xlu2 %v915_v33, %s7023_s1 }
 0x6ce   :  { %v917_v20 = vpop.permute.xlu2 %916 }
 0x6df   :  { %v925_v34 = vpop.permute.xlu0 %924 }
 0x6e0   :  { %v927_v35 = vsel %vm127_vm0, %v917_v20, %v925_v34 }
 0x6e1   :  { %v928_v39 = vpack.c.bf16 %v927_v35, %v927_v35 }
 0x6e3   :  { %v930_v41 = vrot.slane %v928_v39, 1 }
 0x6e5   :  { %5913 = vmatmul.msk.bf16.vlgmr.msra.gmra.mxu2 %vm8807_vm3, %v930_v41  ;;  %5914 = vmatmul.msk.bf16.vlgmr.msra.gmra.mxu3 %vm8807_vm3, %v930_v41 }
 0x6e6   :  { %2021 = vmatpush.bf16.msra.mxu2 %v7185_v2  ;;  %2034 = vmatpush.bf16.msra.mxu3 %v7206_v14  ;;  %v7412_v2 = vld [vmem:[%s8795_s5] ss:$0 sm:$0xff] }
 0x6ea   :  { %2022 = vmatpush.bf16.msra.mxu2 %v7188_v4  ;;  %2035 = vmatpush.bf16.msra.mxu3 %v7210_v17 }
 0x6ee   :  { %2023 = vmatpush.bf16.msra.mxu2 %v7193_v8  ;;  %2036 = vmatpush.bf16.msra.mxu3 %v7216_v21 }
 0x6f2   :  { %2024 = vmatpush.bf16.msra.mxu2 %v7200_v11  ;;  %2037 = vmatpush.bf16.msra.mxu3 %v7222_v25 }
 0x768   :  { %v943_v37 = vpop.f32.mrf.mxu2  ;;  %v7406_v16 = vpop.f32.mrf.mxu3 }
 0x769   :  { %v1005_v43 = vadd.f32 %v943_v37, %v7244_v31  ;;  %v1135_v4 = vadd.f32 %v7412_v2, %v7406_v16  ;;  %v1048_v47 = vrot.slane %v943_v37, 4  ;;  %v961_v50 = vrot.slane %v943_v37, 5 }
 0x76a   :  { %v962_v45 = vrot.slane %v943_v37, 6 }
 0x76b   :  { %v1008_v8 = vrot.slane %v1005_v43, 6  ;;  %v1007_v14 = vrot.slane %v1005_v43, 5  ;;  %v1137_v11 = vrot.slane %v1135_v4, 4  ;;  %v1138_v25 = vrot.slane %v1135_v4, 5 }
 0x76c   :  { %v1050_v48 = vadd.f32 %v1048_v47, %v7127_v19  ;;  %v965_v51 = vadd.f32 %v961_v50, %v7127_v19  ;;  %v966_v52 = vadd.f32 %v962_v45, %v7130_v22  ;;  %v1051_v62 = vadd.f32 %v961_v50, %v7130_v22 }
 0x76d   :  { %1011 = vrot.lane.b32.xlu1 %v1008_v8, %s7022_s30  ;;  %1009 = vrot.lane.b32.xlu0 %v1007_v14, %s7022_s30 }
 0x76e   :  { %1139 = vrot.lane.b32.xlu2 %v1137_v11, %s7022_s30  ;;  %v5917_v49 = vmul.f32 -1.442695, %v1050_v48  ;;  %v5915_v53 = vmul.f32 -1.442695, %v965_v51  ;;  %v5916_v56 = vmul.f32 -1.442695, %v966_v52 }
 0x76f   :  { %v5918_v1 = vmul.f32 -1.442695, %v1051_v62 }
 0x770   :  { %v945_v17 = vpop.f32.mrf.mxu2  ;;  %v958_v21 = vpop.f32.mrf.mxu3  ;;  %6365 = vpow2.f32 %v5917_v49 }
 0x775   :  { %1141 = vrot.lane.b32.xlu1 %v1138_v25, %s7022_s30 }
 0x776   :  { %v6366_v38 = vpop.eup %6365 }
 0x777   :  { %v1058_v44 = vadd.f32 1.0, %v6366_v38 }
 0x779   :  { %6367 = vrcp.f32 %v1058_v44  ;;  %v1071_v23 = vand.u32 2147483648, %v1058_v44  ;;  %vm1065_vm7 = vweird.f32 %v1058_v44  ;;  %v1069_v24 = vand.u32 2147483647, %v1058_v44 }
 0x77a   :  { %6369 = vpow2.f32 %v5915_v53 }
 0x77b   :  { %6371 = vpow2.f32 %v5916_v56  ;;  %v1072_v29 = vor.u32 1.1754944e-38, %v1071_v23  ;;  %vm1070_vm9 = vcmp.eq.f32.partialorder %v1069_v24, 8.507059e+37 }
 0x77c   :  { %6373 = vpow2.f32 %v5918_v1 }
 0x77f   :  { %v6368_v61 = vpop.eup %6367 }
 0x780   :  { %v1061_v63 = vmul.f32 %v6368_v61, %v1058_v44  ;;  %v6370_v5 = vpop.eup %6369  ;;  %vm1066_vm6 = vweird.f32 %v6368_v61 }
 0x781   :  { %v6372_v9 = vpop.eup %6371  ;;  %v973_v13 = vadd.f32 1.0, %v6370_v5  ;;  %vm1067_vm8 = vmor %vm1065_vm7, %vm1066_vm6 }
 0x782   :  { %v1062_v6 = vsub.f32 1.0, %v1061_v63  ;;  %v974_v36 = vadd.f32 1.0, %v6372_v9  ;;  %v6374_v12 = vpop.eup %6373 }
 0x783   :  { %6375 = vrcp.f32 %v973_v13  ;;  %v1059_v15 = vadd.f32 1.0, %v6374_v12  ;;  %vm980_vm14 = vweird.f32 %v973_v13  ;;  %v986_v25 = vand.u32 2147483648, %v973_v13 }
 0x784   :  { %v1063_v46 = vmul.f32 %v6368_v61, %v1062_v6  ;;  %6377 = vrcp.f32 %v974_v36  ;;  %v1001_v21 = vand.u32 2147483648, %v974_v36  ;;  %vm995_vm15 = vweird.f32 %v974_v36 }
 0x785   :  { %6379 = vrcp.f32 %v1059_v15  ;;  %v999_v47 = vand.u32 2147483647, %v974_v36  ;;  %v984_v48 = vand.u32 2147483647, %v973_v13  ;;  %v987_v44 = vor.u32 1.1754944e-38, %v986_v25 }
 0x786   :  { %v1064_v18 = vadd.f32 %v6368_v61, %v1063_v46  ;;  %v1002_v45 = vor.u32 1.1754944e-38, %v1001_v21  ;;  %v1086_v1 = vand.u32 2147483648, %v1059_v15  ;;  %v1084_v5 = vand.u32 2147483647, %v1059_v15 }
 0x787   :  { %vm1000_vm7 = vcmp.eq.f32.partialorder %v999_v47, 8.507059e+37 }
 0x788   :  { %v1068_v3 = vsel %vm1067_vm8, %v6368_v61, %v1064_v18  ;;  %vm985_vm8 = vcmp.eq.f32.partialorder %v984_v48, 8.507059e+37  ;;  %v1087_v9 = vor.u32 1.1754944e-38, %v1086_v1 }
 0x789   :  { %v6376_v28 = vpop.eup %6375  ;;  %v1073_v26 = vsel %vm1070_vm9, %v1072_v29, %v1068_v3 }
 0x78a   :  { %v6378_v30 = vpop.eup %6377  ;;  %v976_v35 = vmul.f32 %v6376_v28, %v973_v13  ;;  %vm981_vm10 = vweird.f32 %v6376_v28 }
 0x78b   :  { %v991_v34 = vmul.f32 %v6378_v30, %v974_v36  ;;  %v6380_v37 = vpop.eup %6379  ;;  %vm996_vm11 = vweird.f32 %v6378_v30  ;;  %vm982_vm1 = vmor %vm980_vm14, %vm981_vm10  ;;  %vm1080_vm10 = vweird.f32 %v1059_v15  ;;  %vm1085_vm14 = vcmp.eq.f32.partialorder %v1084_v5, 8.507059e+37 }
 0x78c   :  { %v977_v41 = vsub.f32 1.0, %v976_v35  ;;  %v1076_v8 = vmul.f32 %v6380_v37, %v1059_v15  ;;  %vm997_vm6 = vmor %vm995_vm15, %vm996_vm11  ;;  %vm1081_vm9 = vweird.f32 %v6380_v37 }
 0x78d   :  { %v992_v39 = vsub.f32 1.0, %v991_v34  ;;  %vm1082_vm11 = vmor %vm1080_vm10, %vm1081_vm9  ;;  %v1091_v34 = vrot.slane %v7406_v16, 4 }
 0x78e   :  { %v978_v4 = vmul.f32 %v6376_v28, %v977_v41  ;;  %v1077_v17 = vsub.f32 1.0, %v1076_v8 }
 0x78f   :  { %v993_v43 = vmul.f32 %v6378_v30, %v992_v39  ;;  %v1095_v35 = vadd.f32 %v1091_v34, %v7143_v55  ;;  %v1092_v39 = vrot.slane %v7406_v16, 5  ;;  %v1172_v34 = vrot.slane %v7359_v7, 1 }
 0x790   :  { %v979_v11 = vadd.f32 %v6376_v28, %v978_v4  ;;  %v1078_v50 = vmul.f32 %v6380_v37, %v1077_v17 }
 0x791   :  { %v994_v14 = vadd.f32 %v6378_v30, %v993_v43  ;;  %v5919_v41 = vmul.f32 -1.442695, %v1095_v35 }
 0x792   :  { %v983_v38 = vsel %vm982_vm1, %v6376_v28, %v979_v11  ;;  %v1079_v63 = vadd.f32 %v6380_v37, %v1078_v50 }
 0x793   :  { %v998_v49 = vsel %vm997_vm6, %v6378_v30, %v994_v14  ;;  %v7427_v56 = vsel %vm985_vm8, %v987_v44, %v983_v38 }
 0x794   :  { %v7425_v52 = vsel %vm1000_vm7, %v1002_v45, %v998_v49  ;;  %v1083_v6 = vsel %vm1082_vm11, %v6380_v37, %v1079_v63  ;;  %v1096_v37 = vadd.f32 %v1092_v39, %v7146_v59  ;;  %vm2265_vm11 = vcmask 1042432  }
 0x795   :  { %v1088_v13 = vsel %vm1085_vm14, %v1087_v9, %v1083_v6  ;;  %v1030_v5 = vsub.f32 1.0, %v7425_v52  ;;  %v1029_v6 = vsub.f32 1.0, %v7427_v56 }
 0x796   :  { %v5920_v43 = vmul.f32 -1.442695, %v1096_v37 }
 0x7c8   :  { %v1140_v33 = vpop.permute.xlu2 %1139 }
 0x7c9   :  { %v1145_v20 = vmul.f32 %v1140_v33, %v1073_v26 }
 0x7cb   :  { %1149 = vrot.lane.b32.xlu0 %v1145_v20, %s7022_s30 }
 0x7df   :  { %v1012_v51 = vpop.permute.xlu1 %1011  ;;  %v1010_v53 = vpop.permute.xlu0 %1009 }
 0x7e0   :  { %v1016_v61 = vmul.f32 %v1012_v51, %v7425_v52  ;;  %v1015_v62 = vmul.f32 %v1010_v53, %v7427_v56 }
 0x7e2   :  { %1019 = vrot.lane.b32.xlu1 %v1015_v62, %s7022_s30  ;;  %1021 = vrot.lane.b32.xlu2 %v1016_v61, %s7022_s30  ;;  %v1041_v62 = vrot.slane %v7381_v32, 7 }
 0x7e7   :  { %v1142_v36 = vpop.permute.xlu1 %1141 }
 0x7e8   :  { %v1146_v46 = vmul.f32 %v1142_v36, %v1088_v13  ;;  %v1045_v13 = vmul.f32 %v7425_v52, %v913_v57 }
 0x7ea   :  { %1151 = vrot.lane.b32.xlu2 %v1146_v46, %s7022_s30 }
 0x83c   :  { %v1022_v18 = vpop.permute.xlu2 %1021 }
 0x83d   :  { %v1026_v12 = vadd.f32 %v1022_v18, %v7130_v22  ;;  %v1150_v23 = vpop.permute.xlu0 %1149 }
 0x83e   :  { %v1155_v24 = vadd.f32 %v1150_v23, %v7143_v55 }
 0x83f   :  { %6381 = vtanh.f32 %v1026_v12  ;;  %v1044_v12 = vmul.f32 %v1041_v62, %v7427_v56 }
 0x840   :  { %6383 = vtanh.f32 %v1155_v24 }
 0x844   :  { %v1152_v3 = vpop.permute.xlu2 %1151 }
 0x845   :  { %v6382_v28 = vpop.eup %6381  ;;  %v1156_v15 = vadd.f32 %v1152_v3, %v7146_v59 }
 0x846   :  { %1035 = vrot.lane.b32.xlu0 %v6382_v28, %s7023_s1  ;;  %v6384_v29 = vpop.eup %6383  ;;  %v1171_v28 = vrot.slane %v7357_v10, 1 }
 0x847   :  { %6385 = vtanh.f32 %v1156_v15  ;;  %1163 = vrot.lane.b32.xlu1 %v6384_v29, %s7023_s1 }
 0x84d   :  { %v6386_v30 = vpop.eup %6385 }
 0x84e   :  { %1165 = vrot.lane.b32.xlu0 %v6386_v30, %s7023_s1 }
 0x854   :  { %v1020_v26 = vpop.permute.xlu1 %1019 }
 0x855   :  { %v1025_v33 = vadd.f32 %v1020_v26, %v7127_v19 }
 0x857   :  { %6387 = vtanh.f32 %v1025_v33 }
 0x858   :  { %6389 = vpow2.f32 %v5919_v41 }
 0x859   :  { %6391 = vpow2.f32 %v5920_v43 }
 0x85d   :  { %v6388_v20 = vpop.eup %6387 }
 0x85e   :  { %1033 = vrot.lane.b32.xlu2 %v6388_v20, %s7023_s1  ;;  %v6390_v4 = vpop.eup %6389 }
 0x85f   :  { %v1103_v8 = vadd.f32 1.0, %v6390_v4  ;;  %v6392_v14 = vpop.eup %6391 }
 0x860   :  { %v1104_v11 = vadd.f32 1.0, %v6392_v14 }
 0x861   :  { %6393 = vrcp.f32 %v1103_v8  ;;  %v1116_v50 = vand.u32 2147483648, %v1103_v8  ;;  %vm1110_vm1 = vweird.f32 %v1103_v8  ;;  %v1114_v44 = vand.u32 2147483647, %v1103_v8 }
 0x862   :  { %6395 = vrcp.f32 %v1104_v11  ;;  %vm1125_vm9 = vweird.f32 %v1104_v11  ;;  %v1131_v63 = vand.u32 2147483648, %v1104_v11  ;;  %v1129_v9 = vand.u32 2147483647, %v1104_v11 }
 0x863   :  { %v1117_v53 = vor.u32 1.1754944e-38, %v1116_v50  ;;  %vm1115_vm8 = vcmp.eq.f32.partialorder %v1114_v44, 8.507059e+37 }
 0x864   :  { %v1132_v3 = vor.u32 1.1754944e-38, %v1131_v63  ;;  %vm1130_vm14 = vcmp.eq.f32.partialorder %v1129_v9, 8.507059e+37 }
 0x867   :  { %v6394_v17 = vpop.eup %6393 }
 0x868   :  { %v1106_v21 = vmul.f32 %v6394_v17, %v1103_v8  ;;  %v6396_v25 = vpop.eup %6395  ;;  %vm1111_vm15 = vweird.f32 %v6394_v17 }
 0x869   :  { %v1121_v48 = vmul.f32 %v6396_v25, %v1104_v11  ;;  %vm1112_vm6 = vmor %vm1110_vm1, %vm1111_vm15  ;;  %vm1126_vm7 = vweird.f32 %v6396_v25  ;;  %vm8801_vm15 = vcmask 1044484  }
 0x86a   :  { %v1107_v47 = vsub.f32 1.0, %v1106_v21  ;;  %vm1127_vm10 = vmor %vm1125_vm9, %vm1126_vm7 }
 0x86b   :  { %v1122_v38 = vsub.f32 1.0, %v1121_v48 }
 0x86c   :  { %v1108_v49 = vmul.f32 %v6394_v17, %v1107_v47 }
 0x86d   :  { %v1123_v45 = vmul.f32 %v6396_v25, %v1122_v38 }
 0x86e   :  { %v1109_v16 = vadd.f32 %v6394_v17, %v1108_v49 }
 0x86f   :  { %v1124_v61 = vadd.f32 %v6396_v25, %v1123_v45 }
 0x870   :  { %v1113_v51 = vsel %vm1112_vm6, %v6394_v17, %v1109_v16 }
 0x871   :  { %v1118_v1 = vsel %vm1115_vm8, %v1117_v53, %v1113_v51  ;;  %v1128_v32 = vsel %vm1127_vm10, %v6396_v25, %v1124_v61 }
 0x872   :  { %v1159_v24 = vsub.f32 1.0, %v1118_v1  ;;  %v1133_v57 = vsel %vm1130_vm14, %v1132_v3, %v1128_v32  ;;  %v1175_v52 = vmul.f32 %v1171_v28, %v1118_v1 }
 0x873   :  { %v1160_v35 = vsub.f32 1.0, %v1133_v57  ;;  %v1176_v37 = vmul.f32 %v1172_v34, %v1133_v57 }
 0x8b8   :  { %v1036_v36 = vpop.permute.xlu0 %1035  ;;  %v1034_v46 = vpop.permute.xlu2 %1033 }
 0x8b9   :  { %v1040_v18 = vmul.f32 %v1036_v36, %v1030_v5  ;;  %v1039_v23 = vmul.f32 %v1034_v46, %v1029_v6  ;;  %v1164_v15 = vpop.permute.xlu1 %1163 }
 0x8ba   :  { %v1169_v60 = vmul.f32 %v1164_v15, %v1159_v24 }
 0x8bb   :  { %v7454_v29 = vadd.f32 %v1045_v13, %v1040_v18  ;;  %v7456_v30 = vadd.f32 %v1044_v12, %v1039_v23 }
 0x8bc   :  { %v7469_v20 = vadd.f32 %v1175_v52, %v1169_v60 }
 0x8bd   :  { %v1181_v26 = vrot.slane %v7454_v29, 7  ;;  %v7462_v56 = vsel %vm2265_vm11, %v7374_v27, %v7454_v29  ;;  %v7467_v33 = vsel %vm2265_vm11, %v7388_v0, %v7456_v30 }
 0x8be   :  { %v1189_v0 = vrot.slane %v7469_v20, 1 }
 0x8bf   :  { %v1183_v39 = vsel %vm8801_vm15, %v1181_v26, %v7456_v30 }
 0x8c0   :  { %v1166_v41 = vpop.permute.xlu0 %1165  ;;  %1184 = vrot.lane.b32.xlu1 %v1183_v39, %s7023_s1 }
 0x8c1   :  { %v1170_v27 = vmul.f32 %v1166_v41, %v1160_v35 }
 0x8c3   :  { %v7477_v43 = vadd.f32 %v1176_v37, %v1170_v27 }
 0x8c5   :  { %v1190_v4 = vsel %vm8801_vm15, %v7477_v43, %v1189_v0 }
 0x8c6   :  { %1191 = vrot.lane.b32.xlu2 %v1190_v4, %s7020_s13 }
 0x920   :  { %v1192_v8 = vpop.permute.xlu2 %1191 }
 0x932   :  { %v1185_v14 = vpop.permute.xlu1 %1184 }
 0x933   :  { %v1194_v11 = vsel %vm127_vm0, %v1185_v14, %v1192_v8 }
 0x934   :  { %v1195_v17 = vpack.c.bf16 %v1194_v11, %v1194_v11 }
 0x936   :  { %v1197_v21 = vshrl.u32 %v1195_v17, 16  ;;  %v1200_v25 = vshll.u32 %v1195_v17, 16 }
 0x938   :  { %v1199_v47 = vrot.slane %v1197_v21, 1  ;;  %v1202_v48 = vrot.slane %v1200_v25, 2 }
 0x93a   :  { %v1203_v49 = vor.u32 %v1202_v48, %v1199_v47 }
 0x93c   :  { %5921 = vmatmul.msk.bf16.vlgmr.msra.gmra.mxu0 %vm8807_vm3, %v1203_v49  ;;  %5922 = vmatmul.msk.bf16.vlgmr.msra.gmra.mxu1 %vm8807_vm3, %v1203_v49 }
 0x9b9   :  { %v1216_v38 = vpop.f32.mrf.mxu0  ;;  %v7488_v16 = vpop.f32.mrf.mxu1 }
 0x9ba   :  { %v1408_v50 = vadd.f32 %v7412_v2, %v7488_v16  ;;  %v1278_v45 = vadd.f32 %v1216_v38, %v7244_v31  ;;  %v1321_v1 = vrot.slane %v1216_v38, 6  ;;  %v1235_v36 = vrot.slane %v1216_v38, 5 }
 0x9bb   :  { %v1234_v24 = vrot.slane %v1216_v38, 4 }
 0x9bc   :  { %v1411_v44 = vrot.slane %v1408_v50, 6  ;;  %v1410_v51 = vrot.slane %v1408_v50, 5  ;;  %v1281_v53 = vrot.slane %v1278_v45, 5  ;;  %v1280_v63 = vrot.slane %v1278_v45, 4 }
 0x9bd   :  { %v1324_v5 = vadd.f32 %v1321_v1, %v7130_v22  ;;  %v1323_v46 = vadd.f32 %v1235_v36, %v7127_v19  ;;  %v1239_v12 = vadd.f32 %v1235_v36, %v7130_v22  ;;  %v1238_v15 = vadd.f32 %v1234_v24, %v7127_v19 }
 0x9be   :  { %1414 = vrot.lane.b32.xlu2 %v1411_v44, %s7022_s30  ;;  %1412 = vrot.lane.b32.xlu1 %v1410_v51, %s7022_s30 }
 0x9bf   :  { %1284 = vrot.lane.b32.xlu0 %v1281_v53, %s7022_s30  ;;  %v5926_v6 = vmul.f32 -1.442695, %v1324_v5  ;;  %v5925_v23 = vmul.f32 -1.442695, %v1323_v46  ;;  %v5924_v3 = vmul.f32 -1.442695, %v1239_v12 }
 0x9c0   :  { %v5923_v52 = vmul.f32 -1.442695, %v1238_v15 }
 0x9c1   :  { %v1218_v61 = vpop.f32.mrf.mxu0  ;;  %v1231_v62 = vpop.f32.mrf.mxu1  ;;  %6397 = vpow2.f32 %v5926_v6 }
 0x9c7   :  { %1282 = vrot.lane.b32.xlu0 %v1280_v63, %s7022_s30  ;;  %v6398_v9 = vpop.eup %6397 }
 0x9c8   :  { %v1332_v13 = vadd.f32 1.0, %v6398_v9 }
 0x9ca   :  { %6399 = vrcp.f32 %v1332_v13  ;;  %v1359_v41 = vand.u32 2147483648, %v1332_v13  ;;  %vm1353_vm6 = vweird.f32 %v1332_v13  ;;  %v1357_v37 = vand.u32 2147483647, %v1332_v13 }
 0x9cb   :  { %6401 = vpow2.f32 %v5925_v23 }
 0x9cc   :  { %6403 = vpow2.f32 %v5924_v3  ;;  %v1360_v8 = vor.u32 1.1754944e-38, %v1359_v41  ;;  %vm1358_vm8 = vcmp.eq.f32.partialorder %v1357_v37, 8.507059e+37 }
 0x9cd   :  { %6405 = vpow2.f32 %v5923_v52 }
 0x9d0   :  { %v6400_v18 = vpop.eup %6399 }
 0x9d1   :  { %v1349_v32 = vmul.f32 %v6400_v18, %v1332_v13  ;;  %v6402_v60 = vpop.eup %6401  ;;  %vm1354_vm1 = vweird.f32 %v6400_v18 }
 0x9d2   :  { %v6404_v34 = vpop.eup %6403  ;;  %v1331_v35 = vadd.f32 1.0, %v6402_v60  ;;  %vm1355_vm7 = vmor %vm1353_vm6, %vm1354_vm1 }
 0x9d3   :  { %v1350_v28 = vsub.f32 1.0, %v1349_v32  ;;  %v1247_v27 = vadd.f32 1.0, %v6404_v34  ;;  %v6406_v14 = vpop.eup %6405 }
 0x9d4   :  { %6407 = vrcp.f32 %v1331_v35  ;;  %v1246_v47 = vadd.f32 1.0, %v6406_v14  ;;  %v1344_v63 = vand.u32 2147483648, %v1331_v35  ;;  %vm1338_vm10 = vweird.f32 %v1331_v35 }
 0x9d5   :  { %v1351_v57 = vmul.f32 %v6400_v18, %v1350_v28  ;;  %6409 = vrcp.f32 %v1247_v27  ;;  %v1342_v1 = vand.u32 2147483647, %v1331_v35  ;;  %v1274_v13 = vand.u32 2147483648, %v1247_v27 }
 0x9d6   :  { %6411 = vrcp.f32 %v1246_v47  ;;  %v1345_v36 = vor.u32 1.1754944e-38, %v1344_v63  ;;  %vm1268_vm6 = vweird.f32 %v1247_v27  ;;  %v1272_v46 = vand.u32 2147483647, %v1247_v27 }
 0x9d7   :  { %v1352_v39 = vadd.f32 %v6400_v18, %v1351_v57  ;;  %v1275_v3 = vor.u32 1.1754944e-38, %v1274_v13  ;;  %v1259_v52 = vand.u32 2147483648, %v1246_v47  ;;  %v1257_v34 = vand.u32 2147483647, %v1246_v47 }
 0x9d8   :  { %vm1273_vm15 = vcmp.eq.f32.partialorder %v1272_v46, 8.507059e+37 }
 0x9d9   :  { %v1356_v4 = vsel %vm1355_vm7, %v6400_v18, %v1352_v39  ;;  %vm1343_vm7 = vcmp.eq.f32.partialorder %v1342_v1, 8.507059e+37  ;;  %v1260_v39 = vor.u32 1.1754944e-38, %v1259_v52 }
 0x9da   :  { %v1361_v17 = vsel %vm1358_vm8, %v1360_v8, %v1356_v4  ;;  %v6408_v25 = vpop.eup %6407 }
 0x9db   :  { %v6410_v48 = vpop.eup %6409  ;;  %v1334_v49 = vmul.f32 %v6408_v25, %v1331_v35  ;;  %vm1339_vm9 = vweird.f32 %v6408_v25 }
 0x9dc   :  { %v1264_v38 = vmul.f32 %v6410_v48, %v1247_v27  ;;  %v6412_v44 = vpop.eup %6411  ;;  %vm1340_vm14 = vmor %vm1338_vm10, %vm1339_vm9  ;;  %vm1269_vm1 = vweird.f32 %v6410_v48  ;;  %vm1253_vm10 = vweird.f32 %v1246_v47 }
 0x9dd   :  { %v1335_v50 = vsub.f32 1.0, %v1334_v49  ;;  %v1249_v61 = vmul.f32 %v6412_v44, %v1246_v47  ;;  %vm1270_vm8 = vmor %vm1268_vm6, %vm1269_vm1  ;;  %vm1254_vm9 = vweird.f32 %v6412_v44  ;;  %vm1258_vm1 = vcmp.eq.f32.partialorder %v1257_v34, 8.507059e+37 }
 0x9de   :  { %v1265_v45 = vsub.f32 1.0, %v1264_v38 }
 0x9df   :  { %v1336_v51 = vmul.f32 %v6408_v25, %v1335_v50  ;;  %v1250_v6 = vsub.f32 1.0, %v1249_v61 }
 0x9e0   :  { %v1266_v53 = vmul.f32 %v6410_v48, %v1265_v45  ;;  %v1365_v45 = vrot.slane %v7488_v16, 6 }
 0x9e1   :  { %v1337_v62 = vadd.f32 %v6408_v25, %v1336_v51  ;;  %v1251_v32 = vmul.f32 %v6412_v44, %v1250_v6 }
 0x9e2   :  { %v1267_v5 = vadd.f32 %v6410_v48, %v1266_v53  ;;  %v1369_v51 = vadd.f32 %v1365_v45, %v7146_v59 }
 0x9e3   :  { %v1341_v9 = vsel %vm1340_vm14, %v6408_v25, %v1337_v62  ;;  %v1252_v57 = vadd.f32 %v6412_v44, %v1251_v32  ;;  %vm1255_vm14 = vmor %vm1253_vm10, %vm1254_vm9 }
 0x9e4   :  { %v1346_v12 = vsel %vm1343_vm7, %v1345_v36, %v1341_v9  ;;  %v1271_v23 = vsel %vm1270_vm8, %v6410_v48, %v1267_v5  ;;  %v5928_v61 = vmul.f32 -1.442695, %v1369_v51 }
 0x9e5   :  { %v7502_v15 = vsel %vm1273_vm15, %v1275_v3, %v1271_v23  ;;  %v1256_v35 = vsel %vm1255_vm14, %v6412_v44, %v1252_v57  ;;  %v1364_v44 = vrot.slane %v7488_v16, 5 }
 0x9e6   :  { %v7507_v27 = vsel %vm1258_vm1, %v1260_v39, %v1256_v35 }
 0x9e7   :  { %v1368_v53 = vadd.f32 %v1364_v44, %v7143_v55  ;;  %v1318_v44 = vmul.f32 %v7502_v15, %v1181_v26  ;;  %v1302_v29 = vsub.f32 1.0, %v7507_v27  ;;  %v1314_v26 = vrot.slane %v7456_v30, 7 }
 0x9e9   :  { %v5927_v62 = vmul.f32 -1.442695, %v1368_v53 }
 0xa18   :  { %v1415_v11 = vpop.permute.xlu2 %1414 }
 0xa19   :  { %v1419_v21 = vmul.f32 %v1415_v11, %v1361_v17 }
 0xa1b   :  { %1424 = vrot.lane.b32.xlu0 %v1419_v21, %s7022_s30 }
 0xa30   :  { %v1413_v18 = vpop.permute.xlu1 %1412 }
 0xa31   :  { %v1418_v24 = vmul.f32 %v1413_v18, %v1346_v12  ;;  %v1285_v28 = vpop.permute.xlu0 %1284 }
 0xa32   :  { %v1289_v60 = vmul.f32 %v1285_v28, %v7502_v15 }
 0xa33   :  { %1422 = vrot.lane.b32.xlu2 %v1418_v24, %s7022_s30 }
 0xa34   :  { %1294 = vrot.lane.b32.xlu1 %v1289_v60, %s7022_s30 }
 0xa39   :  { %v1283_v41 = vpop.permute.xlu0 %1282 }
 0xa3a   :  { %v1288_v37 = vmul.f32 %v1283_v41, %v7507_v27 }
 0xa3c   :  { %1292 = vrot.lane.b32.xlu1 %v1288_v37, %s7022_s30 }
 0xa8d   :  { %v1425_v4 = vpop.permute.xlu0 %1424  ;;  %v1423_v8 = vpop.permute.xlu2 %1422 }
 0xa8e   :  { %v1429_v14 = vadd.f32 %v1425_v4, %v7146_v59  ;;  %v1428_v11 = vadd.f32 %v1423_v8, %v7143_v55  ;;  %v1444_v8 = vrot.slane %v7477_v43, 1 }
 0xa90   :  { %6413 = vtanh.f32 %v1429_v14 }
 0xa91   :  { %6415 = vtanh.f32 %v1428_v11 }
 0xa96   :  { %v6414_v17 = vpop.eup %6413 }
 0xa97   :  { %v6416_v21 = vpop.eup %6415  ;;  %1438 = vrot.lane.b32.xlu1 %v6414_v17, %s7023_s1 }
 0xa98   :  { %1436 = vrot.lane.b32.xlu0 %v6416_v21, %s7023_s1 }
 0xaa6   :  { %v1295_v25 = vpop.permute.xlu1 %1294 }
 0xaa7   :  { %v1299_v47 = vadd.f32 %v1295_v25, %v7130_v22 }
 0xaa9   :  { %6417 = vtanh.f32 %v1299_v47 }
 0xaae   :  { %v1293_v48 = vpop.permute.xlu1 %1292 }
 0xaaf   :  { %v6418_v49 = vpop.eup %6417  ;;  %v1298_v38 = vadd.f32 %v1293_v48, %v7127_v19 }
 0xab0   :  { %1308 = vrot.lane.b32.xlu2 %v6418_v49, %s7023_s1  ;;  %v1303_v49 = vsub.f32 1.0, %v7502_v15 }
 0xab1   :  { %6419 = vtanh.f32 %v1298_v38 }
 0xab2   :  { %6421 = vpow2.f32 %v5928_v61 }
 0xab3   :  { %6423 = vpow2.f32 %v5927_v62 }
 0xab7   :  { %v6420_v50 = vpop.eup %6419 }
 0xab8   :  { %1306 = vrot.lane.b32.xlu2 %v6420_v50, %s7023_s1  ;;  %v6422_v63 = vpop.eup %6421 }
 0xab9   :  { %v6424_v1 = vpop.eup %6423  ;;  %v1377_v5 = vadd.f32 1.0, %v6422_v63 }
 0xaba   :  { %v1376_v6 = vadd.f32 1.0, %v6424_v1  ;;  %v1317_v1 = vmul.f32 %v1314_v26, %v7507_v27 }
 0xabb   :  { %6425 = vrcp.f32 %v1377_v5  ;;  %v1404_v3 = vand.u32 2147483648, %v1377_v5  ;;  %vm1398_vm7 = vweird.f32 %v1377_v5  ;;  %v1402_v60 = vand.u32 2147483647, %v1377_v5 }
 0xabc   :  { %6427 = vrcp.f32 %v1376_v6  ;;  %v1389_v28 = vand.u32 2147483648, %v1376_v6  ;;  %vm1383_vm8 = vweird.f32 %v1376_v6  ;;  %v1387_v57 = vand.u32 2147483647, %v1376_v6 }
 0xabd   :  { %v1405_v35 = vor.u32 1.1754944e-38, %v1404_v3  ;;  %vm1403_vm14 = vcmp.eq.f32.partialorder %v1402_v60, 8.507059e+37 }
 0xabe   :  { %v1390_v39 = vor.u32 1.1754944e-38, %v1389_v28  ;;  %vm1388_vm1 = vcmp.eq.f32.partialorder %v1387_v57, 8.507059e+37 }
 0xac1   :  { %v6426_v9 = vpop.eup %6425 }
 0xac2   :  { %v6428_v13 = vpop.eup %6427  ;;  %v1394_v36 = vmul.f32 %v6426_v9, %v1377_v5  ;;  %vm1399_vm15 = vweird.f32 %v6426_v9 }
 0xac3   :  { %v1379_v46 = vmul.f32 %v6428_v13, %v1376_v6  ;;  %vm1384_vm6 = vweird.f32 %v6428_v13  ;;  %vm1400_vm9 = vmor %vm1398_vm7, %vm1399_vm15  ;;  %vm2268_vm15 = vcmask 1043456  }
 0xac4   :  { %v1395_v18 = vsub.f32 1.0, %v1394_v36  ;;  %vm1385_vm10 = vmor %vm1383_vm8, %vm1384_vm6  ;;  %vm8802_vm6 = vcmask 1045509  }
 0xac5   :  { %v1380_v16 = vsub.f32 1.0, %v1379_v46 }
 0xac6   :  { %v1396_v12 = vmul.f32 %v6426_v9, %v1395_v18 }
 0xac7   :  { %v1381_v23 = vmul.f32 %v6428_v13, %v1380_v16 }
 0xac8   :  { %v1397_v32 = vadd.f32 %v6426_v9, %v1396_v12 }
 0xac9   :  { %v1382_v24 = vadd.f32 %v6428_v13, %v1381_v23 }
 0xaca   :  { %v1401_v52 = vsel %vm1400_vm9, %v6426_v9, %v1397_v32 }
 0xacb   :  { %v1386_v34 = vsel %vm1385_vm10, %v6428_v13, %v1382_v24  ;;  %v1406_v41 = vsel %vm1403_vm14, %v1405_v35, %v1401_v52 }
 0xacc   :  { %v1391_v37 = vsel %vm1388_vm1, %v1390_v39, %v1386_v34  ;;  %v1433_v4 = vsub.f32 1.0, %v1406_v41  ;;  %v1448_v21 = vmul.f32 %v1444_v8, %v1406_v41 }
 0xacd   :  { %v1432_v14 = vsub.f32 1.0, %v1391_v37  ;;  %v1447_v47 = vmul.f32 %v1391_v37, %v1189_v0 }
 0xb09   :  { %v1439_v11 = vpop.permute.xlu1 %1438 }
 0xb0a   :  { %v1437_v17 = vpop.permute.xlu0 %1436  ;;  %v1443_v25 = vmul.f32 %v1439_v11, %v1433_v4  ;;  %v1309_v38 = vpop.permute.xlu2 %1308 }
 0xb0b   :  { %v1442_v48 = vmul.f32 %v1437_v17, %v1432_v14  ;;  %v1313_v51 = vmul.f32 %v1309_v38, %v1303_v49 }
 0xb0c   :  { %v7527_v50 = vadd.f32 %v1448_v21, %v1443_v25 }
 0xb0d   :  { %v7529_v45 = vadd.f32 %v1447_v47, %v1442_v48  ;;  %v7535_v61 = vadd.f32 %v1318_v44, %v1313_v51 }
 0xb0e   :  { %v1462_v53 = vrot.slane %v7527_v50, 6 }
 0xb0f   :  { %v1461_v0 = vrot.slane %v7529_v45, 7  ;;  %v7541_v62 = vsel %vm2268_vm15, %v7462_v56, %v7535_v61  ;;  %v1453_v6 = vrot.slane %v7535_v61, 7 }
 0xb11   :  { %v1463_v63 = vsel %vm8802_vm6, %v1462_v53, %v1461_v0 }
 0xb12   :  { %1464 = vrot.lane.b32.xlu1 %v1463_v63, %s7020_s13  ;;  %v1307_v15 = vpop.permute.xlu2 %1306 }
 0xb13   :  { %v1312_v5 = vmul.f32 %v1307_v15, %v1302_v29 }
 0xb15   :  { %v7549_v9 = vadd.f32 %v1317_v1, %v1312_v5 }
 0xb17   :  { %v7554_v56 = vsel %vm2268_vm15, %v7467_v33, %v7549_v9  ;;  %v1455_v13 = vsel %vm8802_vm6, %v1453_v6, %v7549_v9 }
 0xb18   :  { %1456 = vrot.lane.b32.xlu0 %v1455_v13, %s7023_s1 }
 0xb84   :  { %v1465_v30 = vpop.permute.xlu1 %1464 }
 0xb8a   :  { %v1457_v36 = vpop.permute.xlu0 %1456 }
 0xb8b   :  { %v1467_v27 = vsel %vm127_vm0, %v1457_v36, %v1465_v30 }
 0xb8c   :  { %v1468_v46 = vpack.c.bf16 %v1467_v27, %v1467_v27 }
 0xb8e   :  { %v1470_v18 = vrot.slane %v1468_v46, 2 }
 0xb90   :  { %5929 = vmatmul.msk.bf16.vlgmr.msrb.gmra.mxu2 %vm8807_vm3, %v1470_v18  ;;  %5930 = vmatmul.msk.bf16.vlgmr.msrb.gmra.mxu3 %vm8807_vm3, %v1470_v18 }
 0xc13   :  { %v1483_v16 = vpop.f32.mrf.mxu2  ;;  %v7564_v33 = vpop.f32.mrf.mxu3 }
 0xc14   :  { %v1677_v12 = vadd.f32 %v7412_v2, %v7564_v33  ;;  %v1545_v23 = vadd.f32 %v1483_v16, %v7244_v31  ;;  %v1502_v52 = vrot.slane %v1483_v16, 4  ;;  %v1501_v2 = vrot.slane %v1483_v16, 3 }
 0xc15   :  { %v1589_v8 = vrot.slane %v1483_v16, 7  ;;  %v1588_v11 = vrot.slane %v1483_v16, 6 }
 0xc16   :  { %v1548_v32 = vrot.slane %v1545_v23, 4  ;;  %v1680_v24 = vrot.slane %v1677_v12, 7  ;;  %v1679_v3 = vrot.slane %v1677_v12, 6  ;;  %v1547_v57 = vrot.slane %v1545_v23, 3 }
 0xc17   :  { %v1506_v34 = vadd.f32 %v1502_v52, %v7130_v22  ;;  %v1505_v39 = vadd.f32 %v1501_v2, %v7127_v19  ;;  %v1593_v17 = vadd.f32 %v1589_v8, %v7130_v22  ;;  %v1592_v47 = vadd.f32 %v1588_v11, %v7127_v19 }
 0xc18   :  { %1551 = vrot.lane.b32.xlu2 %v1548_v32, %s7022_s30  ;;  %1683 = vrot.lane.b32.xlu1 %v1680_v24, %s7022_s30 }
 0xc19   :  { %1681 = vrot.lane.b32.xlu0 %v1679_v3, %s7022_s30  ;;  %v5932_v35 = vmul.f32 -1.442695, %v1506_v34  ;;  %v5931_v41 = vmul.f32 -1.442695, %v1505_v39  ;;  %v5934_v48 = vmul.f32 -1.442695, %v1593_v17 }
 0xc1a   :  { %v5933_v38 = vmul.f32 -1.442695, %v1592_v47 }
 0xc1b   :  { %v1485_v28 = vpop.f32.mrf.mxu2  ;;  %v1498_v60 = vpop.f32.mrf.mxu3  ;;  %6429 = vpow2.f32 %v5932_v35 }
 0xc1c   :  { %6431 = vpow2.f32 %v5931_v41 }
 0xc20   :  { %1549 = vrot.lane.b32.xlu2 %v1547_v57, %s7022_s30 }
 0xc21   :  { %v6430_v37 = vpop.eup %6429 }
 0xc22   :  { %v1514_v4 = vadd.f32 1.0, %v6430_v37  ;;  %v6432_v14 = vpop.eup %6431 }
 0xc23   :  { %v1513_v21 = vadd.f32 1.0, %v6432_v14 }
 0xc24   :  { %6433 = vrcp.f32 %v1514_v4  ;;  %v1541_v5 = vand.u32 2147483648, %v1514_v4  ;;  %vm1535_vm8 = vweird.f32 %v1514_v4  ;;  %v1539_v30 = vand.u32 2147483647, %v1514_v4 }
 0xc25   :  { %6435 = vrcp.f32 %v1513_v21  ;;  %v1526_v24 = vand.u32 2147483648, %v1513_v21  ;;  %vm1520_vm1 = vweird.f32 %v1513_v21  ;;  %v1524_v3 = vand.u32 2147483647, %v1513_v21 }
 0xc26   :  { %6437 = vpow2.f32 %v5934_v48  ;;  %v1542_v46 = vor.u32 1.1754944e-38, %v1541_v5  ;;  %vm1540_vm10 = vcmp.eq.f32.partialorder %v1539_v30, 8.507059e+37 }
 0xc27   :  { %6439 = vpow2.f32 %v5933_v38  ;;  %v1527_v52 = vor.u32 1.1754944e-38, %v1526_v24  ;;  %v1634_v24 = vrot.slane %v7564_v33, 7 }
 0xc2a   :  { %v6434_v25 = vpop.eup %6433 }
 0xc2b   :  { %v1531_v49 = vmul.f32 %v6434_v25, %v1514_v4  ;;  %v6436_v51 = vpop.eup %6435  ;;  %vm1536_vm7 = vweird.f32 %v6434_v25 }
 0xc2c   :  { %v6438_v53 = vpop.eup %6437  ;;  %v1516_v63 = vmul.f32 %v6436_v51, %v1513_v21  ;;  %vm1537_vm9 = vmor %vm1535_vm8, %vm1536_vm7  ;;  %vm1521_vm14 = vweird.f32 %v6436_v51  ;;  %vm1525_vm7 = vcmp.eq.f32.partialorder %v1524_v3, 8.507059e+37  ;;  %v1633_v3 = vrot.slane %v7564_v33, 6 }
 0xc2d   :  { %v1532_v44 = vsub.f32 1.0, %v1531_v49  ;;  %v6440_v29 = vpop.eup %6439  ;;  %v1601_v26 = vadd.f32 1.0, %v6438_v53  ;;  %vm1522_vm6 = vmor %vm1520_vm1, %vm1521_vm14 }
 0xc2e   :  { %v1517_v1 = vsub.f32 1.0, %v1516_v63  ;;  %v1600_v13 = vadd.f32 1.0, %v6440_v29 }
 0xc2f   :  { %v1533_v0 = vmul.f32 %v6434_v25, %v1532_v44  ;;  %6441 = vrcp.f32 %v1601_v26  ;;  %v1628_v11 = vand.u32 2147483648, %v1601_v26  ;;  %v1626_v17 = vand.u32 2147483647, %v1601_v26 }
 0xc30   :  { %v1518_v27 = vmul.f32 %v6436_v51, %v1517_v1  ;;  %6443 = vrcp.f32 %v1600_v13  ;;  %v1613_v47 = vand.u32 2147483648, %v1600_v13  ;;  %vm1607_vm14 = vweird.f32 %v1600_v13 }
 0xc31   :  { %v1534_v15 = vadd.f32 %v6434_v25, %v1533_v0  ;;  %v1629_v48 = vor.u32 1.1754944e-38, %v1628_v11  ;;  %v1611_v49 = vand.u32 2147483647, %v1600_v13  ;;  %vm1627_vm1 = vcmp.eq.f32.partialorder %v1626_v17, 8.507059e+37 }
 0xc32   :  { %v1519_v23 = vadd.f32 %v6436_v51, %v1518_v27  ;;  %v1614_v0 = vor.u32 1.1754944e-38, %v1613_v47 }
 0xc33   :  { %v1538_v36 = vsel %vm1537_vm9, %v6434_v25, %v1534_v15  ;;  %vm1622_vm9 = vweird.f32 %v1601_v26  ;;  %vm1612_vm4 = vcmp.eq.f32.partialorder %v1611_v49, 8.507059e+37 }
 0xc34   :  { %v7577_v16 = vsel %vm1540_vm10, %v1542_v46, %v1538_v36  ;;  %v1523_v60 = vsel %vm1522_vm6, %v6436_v51, %v1519_v23 }
 0xc35   :  { %v6442_v32 = vpop.eup %6441  ;;  %v7581_v2 = vsel %vm1525_vm7, %v1527_v52, %v1523_v60  ;;  %v1637_v60 = vadd.f32 %v1633_v3, %v7143_v55 }
 0xc36   :  { %v6444_v28 = vpop.eup %6443  ;;  %v1618_v57 = vmul.f32 %v6442_v32, %v1601_v26  ;;  %vm1623_vm8 = vweird.f32 %v6442_v32 }
 0xc37   :  { %v1603_v35 = vmul.f32 %v6444_v28, %v1600_v13  ;;  %vm1624_vm6 = vmor %vm1622_vm9, %vm1623_vm8  ;;  %vm1608_vm10 = vweird.f32 %v6444_v28  ;;  %v5935_v52 = vmul.f32 -1.442695, %v1637_v60 }
 0xc38   :  { %v1619_v41 = vsub.f32 1.0, %v1618_v57  ;;  %vm1609_vm7 = vmor %vm1607_vm14, %vm1608_vm10 }
 0xc39   :  { %v1604_v37 = vsub.f32 1.0, %v1603_v35 }
 0xc3a   :  { %v1620_v4 = vmul.f32 %v6442_v32, %v1619_v41 }
 0xc3b   :  { %v1605_v8 = vmul.f32 %v6444_v28, %v1604_v37 }
 0xc3c   :  { %v1621_v14 = vadd.f32 %v6442_v32, %v1620_v4 }
 0xc3d   :  { %v1606_v21 = vadd.f32 %v6444_v28, %v1605_v8 }
 0xc3e   :  { %v1625_v25 = vsel %vm1624_vm6, %v6442_v32, %v1621_v14 }
 0xc3f   :  { %v1630_v38 = vsel %vm1627_vm1, %v1629_v48, %v1625_v25  ;;  %v1610_v51 = vsel %vm1609_vm7, %v6444_v28, %v1606_v21  ;;  %v1638_v28 = vadd.f32 %v1634_v24, %v7146_v59 }
 0xc40   :  { %v1615_v63 = vsel %vm1612_vm4, %v1614_v0, %v1610_v51 }
 0xc41   :  { %v5936_v57 = vmul.f32 -1.442695, %v1638_v28 }
 0xc72   :  { %v1552_v18 = vpop.permute.xlu2 %1551 }
 0xc73   :  { %v1556_v12 = vmul.f32 %v1552_v18, %v7577_v16 }
 0xc75   :  { %1561 = vrot.lane.b32.xlu0 %v1556_v12, %s7022_s30 }
 0xc7a   :  { %v1550_v34 = vpop.permute.xlu2 %1549 }
 0xc7b   :  { %v1555_v39 = vmul.f32 %v1550_v34, %v7581_v2 }
 0xc7d   :  { %1559 = vrot.lane.b32.xlu0 %v1555_v39, %s7022_s30 }
 0xc8a   :  { %v1684_v44 = vpop.permute.xlu1 %1683 }
 0xc8b   :  { %v1688_v53 = vmul.f32 %v1684_v44, %v1630_v38  ;;  %v1682_v29 = vpop.permute.xlu0 %1681 }
 0xc8c   :  { %v1687_v26 = vmul.f32 %v1682_v29, %v1615_v63 }
 0xc8d   :  { %1693 = vrot.lane.b32.xlu2 %v1688_v53, %s7022_s30 }
 0xc8e   :  { %1691 = vrot.lane.b32.xlu1 %v1687_v26, %s7022_s30 }
 0xce7   :  { %v1694_v15 = vpop.permute.xlu2 %1693  ;;  %v1562_v1 = vpop.permute.xlu0 %1561 }
 0xce8   :  { %v1698_v5 = vadd.f32 %v1694_v15, %v7146_v59  ;;  %v1566_v13 = vadd.f32 %v1562_v1, %v7130_v22  ;;  %v1714_v15 = vrot.slane %v7527_v50, 1 }
 0xcea   :  { %6445 = vtanh.f32 %v1698_v5  ;;  %v1570_v5 = vsub.f32 1.0, %v7577_v16 }
 0xceb   :  { %6447 = vtanh.f32 %v1566_v13 }
 0xcef   :  { %v1560_v30 = vpop.permute.xlu0 %1559 }
 0xcf0   :  { %v6446_v36 = vpop.eup %6445  ;;  %v1565_v27 = vadd.f32 %v1560_v30, %v7127_v19 }
 0xcf1   :  { %v6448_v46 = vpop.eup %6447  ;;  %1707 = vrot.lane.b32.xlu0 %v6446_v36, %s7023_s1 }
 0xcf2   :  { %6449 = vtanh.f32 %v1565_v27  ;;  %1575 = vrot.lane.b32.xlu1 %v6448_v46, %s7023_s1  ;;  %v1713_v46 = vrot.slane %v7529_v45, 1 }
 0xcf8   :  { %v6450_v18 = vpop.eup %6449 }
 0xcfa   :  { %1573 = vrot.lane.b32.xlu1 %v6450_v18, %s7023_s1 }
 0xd00   :  { %v1692_v12 = vpop.permute.xlu1 %1691 }
 0xd01   :  { %v1697_v23 = vadd.f32 %v1692_v12, %v7143_v55  ;;  %v1585_v12 = vmul.f32 %v7577_v16, %v1453_v6  ;;  %v1569_v6 = vsub.f32 1.0, %v7581_v2  ;;  %v1581_v16 = vrot.slane %v7549_v9, 7 }
 0xd03   :  { %6451 = vtanh.f32 %v1697_v23 }
 0xd04   :  { %6453 = vpow2.f32 %v5936_v57 }
 0xd05   :  { %6455 = vpow2.f32 %v5935_v52 }
 0xd09   :  { %v6452_v32 = vpop.eup %6451 }
 0xd0a   :  { %1705 = vrot.lane.b32.xlu2 %v6452_v32, %s7023_s1  ;;  %v6454_v34 = vpop.eup %6453 }
 0xd0b   :  { %v6456_v35 = vpop.eup %6455  ;;  %v1646_v39 = vadd.f32 1.0, %v6454_v34 }
 0xd0c   :  { %v1645_v41 = vadd.f32 1.0, %v6456_v35 }
 0xd0d   :  { %6457 = vrcp.f32 %v1646_v39  ;;  %v1673_v47 = vand.u32 2147483648, %v1646_v39  ;;  %vm1667_vm8 = vweird.f32 %v1646_v39  ;;  %v1671_v48 = vand.u32 2147483647, %v1646_v39 }
 0xd0e   :  { %6459 = vrcp.f32 %v1645_v41  ;;  %v1658_v38 = vand.u32 2147483648, %v1645_v41  ;;  %vm1652_vm10 = vweird.f32 %v1645_v41  ;;  %v1656_v51 = vand.u32 2147483647, %v1645_v41 }
 0xd0f   :  { %v1674_v53 = vor.u32 1.1754944e-38, %v1673_v47  ;;  %vm1672_vm1 = vcmp.eq.f32.partialorder %v1671_v48, 8.507059e+37 }
 0xd10   :  { %v1659_v29 = vor.u32 1.1754944e-38, %v1658_v38  ;;  %vm1657_vm7 = vcmp.eq.f32.partialorder %v1656_v51, 8.507059e+37  ;;  %v7644_v38 = vld [vmem:[%s8795_s5] ss:$0 sm:$0xff] }
 0xd13   :  { %v6458_v37 = vpop.eup %6457 }
 0xd14   :  { %v6460_v4 = vpop.eup %6459  ;;  %v1663_v8 = vmul.f32 %v6458_v37, %v1646_v39  ;;  %vm1668_vm4 = vweird.f32 %v6458_v37  ;;  %v1584_v39 = vmul.f32 %v1581_v16, %v7581_v2 }
 0xd15   :  { %v1648_v14 = vmul.f32 %v6460_v4, %v1645_v41  ;;  %vm1653_vm9 = vweird.f32 %v6460_v4  ;;  %vm1669_vm6 = vmor %vm1667_vm8, %vm1668_vm4  ;;  %vm2271_vm4 = vcmask 1044480   ;;  %vm8804_vm8 = vcmask 1046534  }
 0xd16   :  { %v1664_v11 = vsub.f32 1.0, %v1663_v8  ;;  %vm1654_vm14 = vmor %vm1652_vm10, %vm1653_vm9 }
 0xd17   :  { %v1649_v33 = vsub.f32 1.0, %v1648_v14 }
 0xd18   :  { %v1665_v17 = vmul.f32 %v6458_v37, %v1664_v11 }
 0xd19   :  { %v1650_v21 = vmul.f32 %v6460_v4, %v1649_v33 }
 0xd1a   :  { %v1666_v25 = vadd.f32 %v6458_v37, %v1665_v17 }
 0xd1b   :  { %v1651_v49 = vadd.f32 %v6460_v4, %v1650_v21 }
 0xd1c   :  { %v1670_v44 = vsel %vm1669_vm6, %v6458_v37, %v1666_v25 }
 0xd1d   :  { %v1655_v0 = vsel %vm1654_vm14, %v6460_v4, %v1651_v49  ;;  %v1675_v63 = vsel %vm1672_vm1, %v1674_v53, %v1670_v44 }
 0xd1e   :  { %v1660_v26 = vsel %vm1657_vm7, %v1659_v29, %v1655_v0  ;;  %v1702_v1 = vsub.f32 1.0, %v1675_v63  ;;  %v1718_v27 = vmul.f32 %v1714_v15, %v1675_v63 }
 0xd1f   :  { %v1701_v18 = vsub.f32 1.0, %v1660_v26  ;;  %v1717_v28 = vmul.f32 %v1713_v46, %v1660_v26 }
 0xd63   :  { %v1708_v13 = vpop.permute.xlu0 %1707 }
 0xd64   :  { %v1576_v30 = vpop.permute.xlu1 %1575  ;;  %v1712_v36 = vmul.f32 %v1708_v13, %v1702_v1  ;;  %v1706_v32 = vpop.permute.xlu2 %1705 }
 0xd65   :  { %v1580_v23 = vmul.f32 %v1576_v30, %v1570_v5  ;;  %v1711_v3 = vmul.f32 %v1706_v32, %v1701_v18 }
 0xd66   :  { %v7605_v24 = vadd.f32 %v1718_v27, %v1712_v36 }
 0xd67   :  { %v7607_v60 = vadd.f32 %v1585_v12, %v1580_v23  ;;  %v7609_v57 = vadd.f32 %v1717_v28, %v1711_v3 }
 0xd68   :  { %v1732_v61 = vrot.slane %v7605_v24, 4 }
 0xd69   :  { %v7614_v52 = vsel %vm2271_vm4, %v7541_v62, %v7607_v60  ;;  %v1731_v34 = vrot.slane %v7609_v57, 5  ;;  %v1723_v62 = vrot.slane %v7607_v60, 7 }
 0xd6b   :  { %v1733_v37 = vsel %vm8804_vm8, %v1732_v61, %v1731_v34 }
 0xd6c   :  { %v1574_v35 = vpop.permute.xlu1 %1573  ;;  %1734 = vrot.lane.b32.xlu0 %v1733_v37, %s7020_s13 }
 0xd6d   :  { %v1579_v41 = vmul.f32 %v1574_v35, %v1569_v6 }
 0xd6f   :  { %v7624_v4 = vadd.f32 %v1584_v39, %v1579_v41 }
 0xd71   :  { %v7629_v8 = vsel %vm2271_vm4, %v7554_v56, %v7624_v4  ;;  %v1725_v9 = vsel %vm8804_vm8, %v1723_v62, %v7624_v4 }
 0xd72   :  { %1726 = vrot.lane.b32.xlu2 %v1725_v9, %s7023_s1 }
 0xdcc   :  { %v1727_v2 = vpop.permute.xlu2 %1726 }
 0xdde   :  { %v1735_v14 = vpop.permute.xlu0 %1734 }
 0xddf   :  { %v1737_v11 = vsel %vm127_vm0, %v1727_v2, %v1735_v14 }
 0xde0   :  { %v1738_v33 = vpack.c.bf16 %v1737_v11, %v1737_v11 }
 0xde2   :  { %v1740_v17 = vshrl.u32 %v1738_v33, 16  ;;  %v1743_v21 = vshll.u32 %v1738_v33, 16 }
 0xde4   :  { %v1742_v25 = vrot.slane %v1740_v17, 2  ;;  %v1745_v47 = vrot.slane %v1743_v21, 3 }
 0xde6   :  { %v1746_v48 = vor.u32 %v1745_v47, %v1742_v25 }
 0xde8   :  { %5937 = vmatmul.msk.bf16.vlgmr.msrb.gmra.mxu0 %vm8807_vm3, %v1746_v48  ;;  %5938 = vmatmul.msk.bf16.vlgmr.msrb.gmra.mxu1 %vm8807_vm3, %v1746_v48 }
 0xe65   :  { %v1759_v56 = vpop.f32.mrf.mxu0  ;;  %v7639_v49 = vpop.f32.mrf.mxu1 }
 0xe66   :  { %v1951_v44 = vadd.f32 %v7644_v38, %v7639_v49  ;;  %v1821_v51 = vadd.f32 %v1759_v56, %v7244_v31  ;;  %v1864_v15 = vrot.slane %v1759_v56, 7  ;;  %v1778_v36 = vrot.slane %v1759_v56, 3 }
 0xe67   :  { %v1868_v27 = vadd.f32 %v1759_v56, %v7130_v22  ;;  %v1777_v23 = vrot.slane %v1759_v56, 2 }
 0xe68   :  { %1956 = vrot.lane.b32.xlu0 %v1951_v44, %s7022_s30  ;;  %v1953_v53 = vrot.slane %v1951_v44, 7  ;;  %v1824_v0 = vrot.slane %v1821_v51, 3  ;;  %v1823_v26 = vrot.slane %v1821_v51, 2  ;;  %v1867_v1 = vadd.f32 %v1864_v15, %v7127_v19 }
 0xe69   :  { %v1782_v46 = vadd.f32 %v1778_v36, %v7130_v22  ;;  %v5942_v18 = vmul.f32 -1.442695, %v1868_v27  ;;  %v1781_v28 = vadd.f32 %v1777_v23, %v7127_v19 }
 0xe6a   :  { %1954 = vrot.lane.b32.xlu2 %v1953_v53, %s7022_s30  ;;  %1827 = vrot.lane.b32.xlu1 %v1824_v0, %s7022_s30  ;;  %v5941_v5 = vmul.f32 -1.442695, %v1867_v1 }
 0xe6b   :  { %v5940_v32 = vmul.f32 -1.442695, %v1782_v46  ;;  %v5939_v16 = vmul.f32 -1.442695, %v1781_v28 }
 0xe6c   :  { %6461 = vpow2.f32 %v5941_v5 }
 0xe6d   :  { %v1761_v63 = vpop.f32.mrf.mxu0  ;;  %v1774_v29 = vpop.f32.mrf.mxu1 }
 0xe72   :  { %1825 = vrot.lane.b32.xlu1 %v1823_v26, %s7022_s30  ;;  %v6462_v13 = vpop.eup %6461 }
 0xe73   :  { %v1875_v30 = vadd.f32 1.0, %v6462_v13 }
 0xe75   :  { %6463 = vrcp.f32 %v1875_v30  ;;  %v1888_v9 = vand.u32 2147483648, %v1875_v30  ;;  %vm1882_vm6 = vweird.f32 %v1875_v30  ;;  %v1886_v2 = vand.u32 2147483647, %v1875_v30 }
 0xe76   :  { %6465 = vpow2.f32 %v5942_v18 }
 0xe77   :  { %6467 = vpow2.f32 %v5940_v32  ;;  %v1889_v33 = vor.u32 1.1754944e-38, %v1888_v9  ;;  %vm1887_vm14 = vcmp.eq.f32.partialorder %v1886_v2, 8.507059e+37 }
 0xe78   :  { %6469 = vpow2.f32 %v5939_v16 }
 0xe7b   :  { %v6464_v12 = vpop.eup %6463 }
 0xe7c   :  { %v1878_v3 = vmul.f32 %v6464_v12, %v1875_v30  ;;  %v6466_v6 = vpop.eup %6465  ;;  %vm1883_vm9 = vweird.f32 %v6464_v12 }
 0xe7d   :  { %v6468_v34 = vpop.eup %6467  ;;  %v1876_v39 = vadd.f32 1.0, %v6466_v6  ;;  %vm1884_vm10 = vmor %vm1882_vm6, %vm1883_vm9 }
 0xe7e   :  { %v1879_v61 = vsub.f32 1.0, %v1878_v3  ;;  %v1790_v41 = vadd.f32 1.0, %v6468_v34  ;;  %v6470_v14 = vpop.eup %6469 }
 0xe7f   :  { %6471 = vrcp.f32 %v1876_v39  ;;  %v1789_v21 = vadd.f32 1.0, %v6470_v14  ;;  %vm1897_vm7 = vweird.f32 %v1876_v39  ;;  %v1903_v5 = vand.u32 2147483648, %v1876_v39 }
 0xe80   :  { %v1880_v35 = vmul.f32 %v6464_v12, %v1879_v61  ;;  %6473 = vrcp.f32 %v1790_v41  ;;  %v1901_v13 = vand.u32 2147483647, %v1876_v39  ;;  %v1817_v27 = vand.u32 2147483648, %v1790_v41 }
 0xe81   :  { %6475 = vrcp.f32 %v1789_v21  ;;  %v1815_v18 = vand.u32 2147483647, %v1790_v41 }
 0xe82   :  { %v1881_v37 = vadd.f32 %v6464_v12, %v1880_v35  ;;  %vm1902_vm8 = vcmp.eq.f32.partialorder %v1901_v13, 8.507059e+37  ;;  %v1818_v61 = vor.u32 1.1754944e-38, %v1817_v27 }
 0xe83   :  { %vm1816_vm13 = vcmp.eq.f32.partialorder %v1815_v18, 8.507059e+37 }
 0xe84   :  { %v1885_v11 = vsel %vm1884_vm10, %v6464_v12, %v1881_v37  ;;  %vm1811_vm10 = vweird.f32 %v1790_v41  ;;  %v1904_v12 = vor.u32 1.1754944e-38, %v1903_v5  ;;  %v1800_v37 = vand.u32 2147483647, %v1789_v21 }
 0xe85   :  { %v6472_v17 = vpop.eup %6471  ;;  %v1890_v47 = vsel %vm1887_vm14, %v1889_v33, %v1885_v11 }
 0xe86   :  { %v6474_v56 = vpop.eup %6473  ;;  %v1893_v44 = vmul.f32 %v6472_v17, %v1876_v39  ;;  %vm1898_vm1 = vweird.f32 %v6472_v17 }
 0xe87   :  { %v1807_v51 = vmul.f32 %v6474_v56, %v1790_v41  ;;  %v6476_v63 = vpop.eup %6475  ;;  %vm1812_vm9 = vweird.f32 %v6474_v56  ;;  %vm1899_vm6 = vmor %vm1897_vm7, %vm1898_vm1  ;;  %v1802_v41 = vand.u32 2147483648, %v1789_v21  ;;  %vm1796_vm7 = vweird.f32 %v1789_v21 }
 0xe88   :  { %v1894_v53 = vsub.f32 1.0, %v1893_v44  ;;  %v1792_v15 = vmul.f32 %v6476_v63, %v1789_v21  ;;  %vm1813_vm14 = vmor %vm1811_vm10, %vm1812_vm9  ;;  %vm1797_vm1 = vweird.f32 %v6476_v63 }
 0xe89   :  { %v1808_v0 = vsub.f32 1.0, %v1807_v51  ;;  %vm1798_vm9 = vmor %vm1796_vm7, %vm1797_vm1  ;;  %v1803_v2 = vor.u32 1.1754944e-38, %v1802_v41 }
 0xe8a   :  { %v1895_v29 = vmul.f32 %v6472_v17, %v1894_v53  ;;  %v1793_v36 = vsub.f32 1.0, %v1792_v15  ;;  %v1912_v15 = vadd.f32 %v7639_v49, %v7146_v59 }
 0xe8b   :  { %v1809_v26 = vmul.f32 %v6474_v56, %v1808_v0 }
 0xe8c   :  { %v1896_v1 = vadd.f32 %v6472_v17, %v1895_v29  ;;  %v1794_v32 = vmul.f32 %v6476_v63, %v1793_v36  ;;  %v5944_v5 = vmul.f32 -1.442695, %v1912_v15 }
 0xe8d   :  { %v1810_v30 = vadd.f32 %v6474_v56, %v1809_v26  ;;  %v1908_v26 = vrot.slane %v7639_v49, 7 }
 0xe8e   :  { %v1900_v46 = vsel %vm1899_vm6, %v6472_v17, %v1896_v1  ;;  %v1795_v39 = vadd.f32 %v6476_v63, %v1794_v32 }
 0xe8f   :  { %v1814_v23 = vsel %vm1813_vm14, %v6474_v56, %v1810_v30  ;;  %v1905_v28 = vsel %vm1902_vm8, %v1904_v12, %v1900_v46  ;;  %vm1801_vm8 = vcmp.eq.f32.partialorder %v1800_v37, 8.507059e+37  ;;  %v1911_v1 = vadd.f32 %v1908_v26, %v7143_v55 }
 0xe90   :  { %v7658_v34 = vsel %vm1816_vm13, %v1818_v61, %v1814_v23  ;;  %v1799_v9 = vsel %vm1798_vm9, %v6476_v63, %v1795_v39 }
 0xe91   :  { %v7663_v11 = vsel %vm1801_vm8, %v1803_v2, %v1799_v9  ;;  %v5943_v13 = vmul.f32 -1.442695, %v1911_v1 }
 0xec4   :  { %v1955_v25 = vpop.permute.xlu2 %1954 }
 0xec5   :  { %v1960_v48 = vmul.f32 %v1955_v25, %v1890_v47 }
 0xec7   :  { %1964 = vrot.lane.b32.xlu0 %v1960_v48, %s7022_s30 }
 0xeda   :  { %v1957_v3 = vpop.permute.xlu0 %1956 }
 0xedb   :  { %v1961_v6 = vmul.f32 %v1957_v3, %v1905_v28 }
 0xedc   :  { %v1828_v16 = vpop.permute.xlu1 %1827 }
 0xedd   :  { %v1832_v35 = vmul.f32 %v1828_v16, %v7658_v34  ;;  %1966 = vrot.lane.b32.xlu1 %v1961_v6, %s7022_s30 }
 0xedf   :  { %1837 = vrot.lane.b32.xlu2 %v1832_v35, %s7022_s30 }
 0xee4   :  { %v1826_v14 = vpop.permute.xlu1 %1825 }
 0xee5   :  { %v1831_v33 = vmul.f32 %v1826_v14, %v7663_v11 }
 0xee7   :  { %1835 = vrot.lane.b32.xlu2 %v1831_v33, %s7022_s30 }
 0xf39   :  { %v1965_v17 = vpop.permute.xlu0 %1964  ;;  %v1838_v25 = vpop.permute.xlu2 %1837 }
 0xf3a   :  { %v1970_v47 = vadd.f32 %v1965_v17, %v7143_v55  ;;  %v1842_v48 = vadd.f32 %v1838_v25, %v7130_v22 }
 0xf3c   :  { %6477 = vtanh.f32 %v1970_v47 }
 0xf3d   :  { %6479 = vtanh.f32 %v1842_v48  ;;  %v1987_v48 = vrot.slane %v7605_v24, 1 }
 0xf41   :  { %v1836_v21 = vpop.permute.xlu2 %1835 }
 0xf42   :  { %v6478_v56 = vpop.eup %6477  ;;  %v1841_v44 = vadd.f32 %v1836_v21, %v7127_v19 }
 0xf43   :  { %v6480_v51 = vpop.eup %6479  ;;  %1978 = vrot.lane.b32.xlu1 %v6478_v56, %s7023_s1 }
 0xf44   :  { %6481 = vtanh.f32 %v1841_v44  ;;  %1851 = vrot.lane.b32.xlu0 %v6480_v51, %s7023_s1 }
 0xf4a   :  { %v6482_v53 = vpop.eup %6481 }
 0xf4c   :  { %1849 = vrot.lane.b32.xlu0 %v6482_v53, %s7023_s1  ;;  %v1986_v53 = vrot.slane %v7609_v57, 1 }
 0xf4f   :  { %v1967_v0 = vpop.permute.xlu1 %1966 }
 0xf50   :  { %v1971_v63 = vadd.f32 %v1967_v0, %v7146_v59 }
 0xf52   :  { %6483 = vtanh.f32 %v1971_v63  ;;  %v1846_v63 = vsub.f32 1.0, %v7658_v34 }
 0xf53   :  { %6485 = vpow2.f32 %v5944_v5  ;;  %v1861_v5 = vmul.f32 %v7658_v34, %v1723_v62  ;;  %v1845_v62 = vsub.f32 1.0, %v7663_v11  ;;  %v1857_v34 = vrot.slane %v7624_v4, 7 }
 0xf54   :  { %6487 = vpow2.f32 %v5943_v13 }
 0xf58   :  { %v6484_v29 = vpop.eup %6483 }
 0xf59   :  { %1980 = vrot.lane.b32.xlu2 %v6484_v29, %s7023_s1  ;;  %v6486_v30 = vpop.eup %6485 }
 0xf5a   :  { %v6488_v36 = vpop.eup %6487  ;;  %v1920_v27 = vadd.f32 1.0, %v6486_v30 }
 0xf5b   :  { %v1919_v46 = vadd.f32 1.0, %v6488_v36 }
 0xf5c   :  { %6489 = vrcp.f32 %v1920_v27  ;;  %v1947_v16 = vand.u32 2147483648, %v1920_v27  ;;  %vm1941_vm6 = vweird.f32 %v1920_v27  ;;  %v1945_v35 = vand.u32 2147483647, %v1920_v27 }
 0xf5d   :  { %6491 = vrcp.f32 %v1919_v46  ;;  %v1932_v41 = vand.u32 2147483648, %v1919_v46  ;;  %vm1926_vm1 = vweird.f32 %v1919_v46  ;;  %v1930_v9 = vand.u32 2147483647, %v1919_v46 }
 0xf5e   :  { %v1948_v2 = vor.u32 1.1754944e-38, %v1947_v16  ;;  %vm1946_vm9 = vcmp.eq.f32.partialorder %v1945_v35, 8.507059e+37 }
 0xf5f   :  { %v1933_v17 = vor.u32 1.1754944e-38, %v1932_v41  ;;  %vm1931_vm8 = vcmp.eq.f32.partialorder %v1930_v9, 8.507059e+37 }
 0xf62   :  { %v6490_v18 = vpop.eup %6489 }
 0xf63   :  { %v6492_v12 = vpop.eup %6491  ;;  %v1937_v23 = vmul.f32 %v6490_v18, %v1920_v27  ;;  %vm1942_vm13 = vweird.f32 %v6490_v18 }
 0xf64   :  { %v1922_v32 = vmul.f32 %v6492_v12, %v1919_v46  ;;  %vm1927_vm10 = vweird.f32 %v6492_v12  ;;  %vm1943_vm14 = vmor %vm1941_vm6, %vm1942_vm13  ;;  %vm2274_vm13 = vcmask 1045504   ;;  %vm8806_vm6 = vcmask 1047559  }
 0xf65   :  { %v1938_v3 = vsub.f32 1.0, %v1937_v23  ;;  %vm1928_vm7 = vmor %vm1926_vm1, %vm1927_vm10  ;;  %v1860_v23 = vmul.f32 %v1857_v34, %v7663_v11 }
 0xf66   :  { %v1923_v28 = vsub.f32 1.0, %v1922_v32 }
 0xf67   :  { %v1939_v61 = vmul.f32 %v6490_v18, %v1938_v3 }
 0xf68   :  { %v1924_v49 = vmul.f32 %v6492_v12, %v1923_v28 }
 0xf69   :  { %v1940_v6 = vadd.f32 %v6490_v18, %v1939_v61 }
 0xf6a   :  { %v1925_v39 = vadd.f32 %v6492_v12, %v1924_v49 }
 0xf6b   :  { %v1944_v37 = vsel %vm1943_vm14, %v6490_v18, %v1940_v6 }
 0xf6c   :  { %v1929_v14 = vsel %vm1928_vm7, %v6492_v12, %v1925_v39  ;;  %v1949_v33 = vsel %vm1946_vm9, %v1948_v2, %v1944_v37 }
 0xf6d   :  { %v1934_v25 = vsel %vm1931_vm8, %v1933_v17, %v1929_v14  ;;  %v1975_v47 = vsub.f32 1.0, %v1949_v33  ;;  %v1991_v56 = vmul.f32 %v1987_v48, %v1949_v33 }
 0xf6e   :  { %v1974_v51 = vsub.f32 1.0, %v1934_v25  ;;  %v1990_v26 = vmul.f32 %v1986_v53, %v1934_v25 }
 0xfb3   :  { %v1981_v21 = vpop.permute.xlu2 %1980 }
 0xfb4   :  { %v1985_v44 = vmul.f32 %v1981_v21, %v1975_v47 }
 0xfb5   :  { %v1979_v0 = vpop.permute.xlu1 %1978 }
 0xfb6   :  { %v7682_v29 = vadd.f32 %v1991_v56, %v1985_v44  ;;  %v1984_v15 = vmul.f32 %v1979_v0, %v1974_v51  ;;  %v1852_v1 = vpop.permute.xlu0 %1851 }
 0xfb7   :  { %v1856_v13 = vmul.f32 %v1852_v1, %v1846_v63 }
 0xfb8   :  { %v7687_v30 = vadd.f32 %v1990_v26, %v1984_v15  ;;  %v2005_v46 = vrot.slane %v7682_v29, 2 }
 0xfb9   :  { %v7689_v36 = vadd.f32 %v1861_v5, %v1856_v13 }
 0xfba   :  { %v2004_v27 = vrot.slane %v7687_v30, 3 }
 0xfbb   :  { %v7696_v18 = vsel %vm2274_vm13, %v7614_v52, %v7689_v36  ;;  %v1996_v3 = vrot.slane %v7689_v36, 7 }
 0xfbc   :  { %v2006_v60 = vsel %vm8806_vm6, %v2005_v46, %v2004_v27 }
 0xfbd   :  { %2007 = vrot.lane.b32.xlu2 %v2006_v60, %s7020_s13 }
 0xfbe   :  { %v1850_v12 = vpop.permute.xlu0 %1849 }
 0xfbf   :  { %v1855_v32 = vmul.f32 %v1850_v12, %v1845_v62 }
 0xfc1   :  { %v7704_v28 = vadd.f32 %v1860_v23, %v1855_v32 }
 0xfc3   :  { %v1998_v52 = vsel %vm8806_vm6, %v1996_v3, %v7704_v28  ;;  %v7713_v61 = vsel %vm2274_vm13, %v7629_v8, %v7704_v28 }
 0xfc4   :  { %1999 = vrot.lane.b32.xlu1 %v1998_v52, %s7023_s1 }
0x1017   :  { %v2008_v4 = vpop.permute.xlu2 %2007 }
0x1036   :  { %v2000_v49 = vpop.permute.xlu1 %1999 }
0x1037   :  { %v2010_v11 = vsel %vm127_vm0, %v2000_v49, %v2008_v4 }
0x1038   :  { %v2011_v6 = vpack.c.bf16 %v2010_v11, %v2010_v11 }
0x103a   :  { %v2013_v16 = vrot.slane %v2011_v6, 3 }
0x103c   :  { %5945 = vmatmul.msk.bf16.vlgmr.msra.gmra.mxu2 %vm8807_vm3, %v2013_v16  ;;  %5946 = vmatmul.msk.bf16.vlgmr.msra.gmra.mxu3 %vm8807_vm3, %v2013_v16 }
0x10bf   :  { %v2026_v35 = vpop.f32.mrf.mxu2  ;;  %v7719_v39 = vpop.f32.mrf.mxu3 }
0x10c0   :  { %v2088_v41 = vadd.f32 %v2026_v35, %v7244_v31  ;;  %v2216_v8 = vadd.f32 %v7644_v38, %v7719_v39  ;;  %v2132_v17 = vadd.f32 %v2026_v35, %v7127_v19  ;;  %v2044_v38 = vrot.slane %v2026_v35, 1 }
0x10c1   :  { %v2045_v48 = vrot.slane %v2026_v35, 2 }
0x10c2   :  { %2219 = vrot.lane.b32.xlu2 %v2216_v8, %s7022_s30  ;;  %v2091_v37 = vrot.slane %v2088_v41, 2  ;;  %v2090_v9 = vrot.slane %v2088_v41, 1  ;;  %v2218_v33 = vrot.slane %v2216_v8, 1  ;;  %v5949_v25 = vmul.f32 -1.442695, %v2132_v17 }
0x10c3   :  { %v2048_v21 = vadd.f32 %v2044_v38, %v7127_v19  ;;  %v2049_v56 = vadd.f32 %v2045_v48, %v7130_v22  ;;  %v2133_v63 = vadd.f32 %v2044_v38, %v7130_v22 }
0x10c4   :  { %2094 = vrot.lane.b32.xlu1 %v2091_v37, %s7022_s30  ;;  %2092 = vrot.lane.b32.xlu0 %v2090_v9, %s7022_s30  ;;  %6493 = vpow2.f32 %v5949_v25 }
0x10c5   :  { %v5947_v51 = vmul.f32 -1.442695, %v2048_v21  ;;  %v5948_v53 = vmul.f32 -1.442695, %v2049_v56  ;;  %v5950_v15 = vmul.f32 -1.442695, %v2133_v63 }
0x10c7   :  { %v2028_v2 = vpop.f32.mrf.mxu2  ;;  %v2041_v14 = vpop.f32.mrf.mxu3 }
0x10ca   :  { %v6494_v31 = vpop.eup %6493 }
0x10cb   :  { %v2140_v47 = vadd.f32 1.0, %v6494_v31 }
0x10cc   :  { %2221 = vrot.lane.b32.xlu0 %v2218_v33, %s7022_s30 }
0x10cd   :  { %6495 = vrcp.f32 %v2140_v47  ;;  %v2153_v62 = vand.u32 2147483648, %v2140_v47  ;;  %vm2147_vm14 = vweird.f32 %v2140_v47  ;;  %v2151_v34 = vand.u32 2147483647, %v2140_v47 }
0x10ce   :  { %6497 = vpow2.f32 %v5947_v51 }
0x10cf   :  { %6499 = vpow2.f32 %v5948_v53  ;;  %v2154_v23 = vor.u32 1.1754944e-38, %v2153_v62  ;;  %vm2152_vm7 = vcmp.eq.f32.partialorder %v2151_v34, 8.507059e+37 }
0x10d0   :  { %6501 = vpow2.f32 %v5950_v15 }
0x10d3   :  { %v6496_v44 = vpop.eup %6495 }
0x10d4   :  { %v2143_v0 = vmul.f32 %v6496_v44, %v2140_v47  ;;  %v6498_v5 = vpop.eup %6497  ;;  %vm2148_vm10 = vweird.f32 %v6496_v44 }
0x10d5   :  { %v6500_v13 = vpop.eup %6499  ;;  %v2056_v27 = vadd.f32 1.0, %v6498_v5  ;;  %vm2149_vm1 = vmor %vm2147_vm14, %vm2148_vm10 }
0x10d6   :  { %v2144_v26 = vsub.f32 1.0, %v2143_v0  ;;  %v2057_v60 = vadd.f32 1.0, %v6500_v13  ;;  %v6502_v32 = vpop.eup %6501 }
0x10d7   :  { %6503 = vrcp.f32 %v2056_v27  ;;  %v2141_v11 = vadd.f32 1.0, %v6502_v32  ;;  %vm2063_vm10 = vweird.f32 %v2056_v27  ;;  %v2069_v38 = vand.u32 2147483648, %v2056_v27 }
0x10d8   :  { %v2145_v1 = vmul.f32 %v6496_v44, %v2144_v26  ;;  %6505 = vrcp.f32 %v2057_v60  ;;  %v2084_v47 = vand.u32 2147483648, %v2057_v60  ;;  %vm2078_vm14 = vweird.f32 %v2057_v60 }
0x10d9   :  { %6507 = vrcp.f32 %v2141_v11  ;;  %v2082_v48 = vand.u32 2147483647, %v2057_v60  ;;  %v2067_v21 = vand.u32 2147483647, %v2056_v27  ;;  %v2070_v0 = vor.u32 1.1754944e-38, %v2069_v38 }
0x10da   :  { %v2146_v46 = vadd.f32 %v6496_v44, %v2145_v1  ;;  %v2085_v53 = vor.u32 1.1754944e-38, %v2084_v47 }
0x10db   :  { %vm2083_vm6 = vcmp.eq.f32.partialorder %v2082_v48, 8.507059e+37  ;;  %vm2068_vm3 = vcmp.eq.f32.partialorder %v2067_v21, 8.507059e+37 }
0x10dc   :  { %v2150_v12 = vsel %vm2149_vm1, %v6496_v44, %v2146_v46 }
0x10dd   :  { %v2155_v52 = vsel %vm2152_vm7, %v2154_v23, %v2150_v12  ;;  %v6504_v6 = vpop.eup %6503 }
0x10de   :  { %v6506_v16 = vpop.eup %6505  ;;  %v2059_v41 = vmul.f32 %v6504_v6, %v2056_v27  ;;  %vm2064_vm9 = vweird.f32 %v6504_v6  ;;  %v2168_v27 = vand.u32 2147483648, %v2141_v11 }
0x10df   :  { %v2074_v35 = vmul.f32 %v6506_v16, %v2057_v60  ;;  %v6508_v9 = vpop.eup %6507  ;;  %vm2079_vm8 = vweird.f32 %v6506_v16  ;;  %vm2065_vm1 = vmor %vm2063_vm10, %vm2064_vm9  ;;  %v2166_v60 = vand.u32 2147483647, %v2141_v11 }
0x10e0   :  { %v2060_v37 = vsub.f32 1.0, %v2059_v41  ;;  %v2158_v33 = vmul.f32 %v6508_v9, %v2141_v11  ;;  %vm2080_vm7 = vmor %vm2078_vm14, %vm2079_vm8  ;;  %vm2163_vm9 = vweird.f32 %v6508_v9  ;;  %vm2162_vm8 = vweird.f32 %v2141_v11 }
0x10e1   :  { %v2075_v8 = vsub.f32 1.0, %v2074_v35  ;;  %vm2164_vm10 = vmor %vm2162_vm8, %vm2163_vm9  ;;  %v2169_v34 = vor.u32 1.1754944e-38, %v2168_v27  ;;  %v6217_v27 = vld [vmem:[#allocation5 + $0x24] sm:$0xf] }
0x10e2   :  { %v2061_v14 = vmul.f32 %v6504_v6, %v2060_v37  ;;  %v2159_v31 = vsub.f32 1.0, %v2158_v33  ;;  %v2173_v33 = vrot.slane %v7719_v39, 1 }
0x10e3   :  { %v2076_v2 = vmul.f32 %v6506_v16, %v2075_v8 }
0x10e4   :  { %v2062_v25 = vadd.f32 %v6504_v6, %v2061_v14  ;;  %v2160_v51 = vmul.f32 %v6508_v9, %v2159_v31 }
0x10e5   :  { %v2077_v17 = vadd.f32 %v6506_v16, %v2076_v2 }
0x10e6   :  { %v2066_v44 = vsel %vm2065_vm1, %v6504_v6, %v2062_v25  ;;  %v2161_v46 = vadd.f32 %v6508_v9, %v2160_v51  ;;  %v6220_v51 = vld [vmem:[#allocation5 + $0x34] sm:$0xf0] }
0x10e7   :  { %v2081_v56 = vsel %vm2080_vm7, %v6506_v16, %v2077_v17  ;;  %v7735_v1 = vsel %vm2068_vm3, %v2070_v0, %v2066_v44  ;;  %v6219_v0 = vld [vmem:[#allocation5 + $0x34] sm:$0xf] }
0x10e8   :  { %v7733_v26 = vsel %vm2083_vm6, %v2085_v53, %v2081_v56  ;;  %v2165_v62 = vsel %vm2164_vm10, %v6508_v9, %v2161_v46  ;;  %vm2167_vm6 = vcmp.eq.f32.partialorder %v2166_v60, 8.507059e+37  ;;  %v6218_v46 = vld [vmem:[#allocation5 + $0x24] sm:$0xf0]  ;;  %v5957_v60 = vld [vmem:[#allocation5 + $0x28] sm:$0xf0] }
0x10e9   :  { %v2170_v12 = vsel %vm2167_vm6, %v2169_v34, %v2165_v62  ;;  %vm8809_vm6 = vcmask 1046528  }
0x111c   :  { %v2220_v4 = vpop.permute.xlu2 %2219 }
0x111d   :  { %v2225_v49 = vmul.f32 %v2220_v4, %v2155_v52 }
0x111f   :  { %2229 = vrot.lane.b32.xlu0 %v2225_v49, %s7022_s30 }
0x1136   :  { %v2095_v63 = vpop.permute.xlu1 %2094  ;;  %v2093_v15 = vpop.permute.xlu0 %2092 }
0x1137   :  { %v2099_v5 = vmul.f32 %v2095_v63, %v7733_v26  ;;  %v2098_v13 = vmul.f32 %v2093_v15, %v7735_v1  ;;  %v5965_v63 = vld [vmem:[#allocation5 + $0x38] sm:$0xf0]  ;;  %v5955_v15 = vld [vmem:[#allocation5 + $0x20] sm:$0xf] }
0x1138   :  { %v5956_v34 = vor.u32 %v6218_v46, %v5955_v15 }
0x1139   :  { %2102 = vrot.lane.b32.xlu1 %v2098_v13, %s7022_s30  ;;  %2104 = vrot.lane.b32.xlu2 %v2099_v5, %s7022_s30  ;;  %v5968_v13 = vor.u32 %v6219_v0, %v5965_v63 }
0x113b   :  { %2347 = vmatpush.bf16.msra.mxu1 %v5968_v13 }
0x113e   :  { %v2222_v23 = vpop.permute.xlu0 %2221 }
0x113f   :  { %v2226_v32 = vmul.f32 %v2222_v23, %v2170_v12 }
0x1141   :  { %2231 = vrot.lane.b32.xlu1 %v2226_v32, %s7022_s30 }
0x1191   :  { %v2230_v52 = vpop.permute.xlu0 %2229 }
0x1192   :  { %v2235_v4 = vadd.f32 %v2230_v52, %v7143_v55  ;;  %v5960_v52 = vor.u32 %v6217_v27, %v5957_v60 }
0x1193   :  { %v2105_v49 = vpop.permute.xlu2 %2104 }
0x1194   :  { %6509 = vtanh.f32 %v2235_v4  ;;  %v2109_v6 = vadd.f32 %v2105_v49, %v7130_v22  ;;  %v2176_v22 = vadd.f32 %v7719_v39, %v7143_v55  ;;  %v5981_v4 = vld [vmem:[#allocation5 + $0x10] sm:$0xf]  ;;  %v6216_v49 = vld [vmem:[#allocation5 + $0x14] sm:$0xf0]  ;;  %2348 = vmatpush.bf16.msra.mxu1 %v5960_v52 }
0x1196   :  { %6511 = vtanh.f32 %v2109_v6  ;;  %v5951_v14 = vmul.f32 -1.442695, %v2176_v22  ;;  %v5973_v6 = vld [vmem:[#allocation5] sm:$0xf]  ;;  %v5975_v22 = vld [vmem:[#allocation5 + $0x8] sm:$0xf0] }
0x119a   :  { %v6510_v16 = vpop.eup %6509 }
0x119b   :  { %2243 = vrot.lane.b32.xlu1 %v6510_v16, %s7023_s1 }
0x119c   :  { %v6512_v11 = vpop.eup %6511 }
0x119d   :  { %2118 = vrot.lane.b32.xlu0 %v6512_v11, %s7023_s1  ;;  %v5982_v11 = vor.u32 %v6216_v49, %v5981_v4 }
0x119f   :  { %2387 = vmatpush.bf16.msrb.mxu2 %v5982_v11 }
0x11ab   :  { %v2103_v35 = vpop.permute.xlu1 %2102 }
0x11ac   :  { %v2108_v41 = vadd.f32 %v2103_v35, %v7127_v19  ;;  %v2177_v19 = vadd.f32 %v2173_v33, %v7146_v59  ;;  %v6214_v35 = vld [vmem:[#allocation5 + $0x4] sm:$0xf0] }
0x11ad   :  { %v5974_v33 = vor.u32 %v6214_v35, %v5973_v6 }
0x11ae   :  { %6513 = vtanh.f32 %v2108_v41  ;;  %v5952_v25 = vmul.f32 -1.442695, %v2177_v19  ;;  %v6215_v41 = vld [vmem:[#allocation5 + $0x14] sm:$0xf] }
0x11af   :  { %2388 = vmatpush.bf16.msrb.mxu2 %v5974_v33 }
0x11b3   :  { %v2232_v8 = vpop.permute.xlu1 %2231 }
0x11b4   :  { %v6514_v37 = vpop.eup %6513  ;;  %v2236_v9 = vadd.f32 %v2232_v8, %v7146_v59  ;;  %v5963_v59 = vld [vmem:[#allocation5 + $0x30] sm:$0xf]  ;;  %v5983_v8 = vld [vmem:[#allocation5 + $0x18] sm:$0xf0] }
0x11b5   :  { %2116 = vrot.lane.b32.xlu2 %v6514_v37, %s7023_s1  ;;  %v5964_v53 = vor.u32 %v6220_v51, %v5963_v59  ;;  %v2112_v51 = vsub.f32 1.0, %v7735_v1 }
0x11b6   :  { %6515 = vtanh.f32 %v2236_v9  ;;  %v5986_v9 = vor.u32 %v6215_v41, %v5983_v8 }
0x11b7   :  { %6517 = vpow2.f32 %v5951_v14  ;;  %2333 = vmatpush.bf16.msra.mxu0 %v5964_v53  ;;  %v2113_v53 = vsub.f32 1.0, %v7733_v26 }
0x11b8   :  { %6519 = vpow2.f32 %v5952_v25  ;;  %2401 = vmatpush.bf16.msrb.mxu3 %v5986_v9  ;;  %v2251_v25 = vrot.slane %v7687_v30, 1 }
0x11bb   :  { %2334 = vmatpush.bf16.msra.mxu0 %v5956_v34 }
0x11bc   :  { %v6516_v2 = vpop.eup %6515 }
0x11bd   :  { %2245 = vrot.lane.b32.xlu2 %v6516_v2, %s7023_s1  ;;  %v6518_v17 = vpop.eup %6517  ;;  %v6213_v2 = vld [vmem:[#allocation5 + $0x4] sm:$0xf] }
0x11be   :  { %v2184_v31 = vadd.f32 1.0, %v6518_v17  ;;  %v6520_v47 = vpop.eup %6519  ;;  %v5978_v17 = vor.u32 %v6213_v2, %v5975_v22 }
0x11bf   :  { %v7754_v48 = vadd.f32 1.0, %v6520_v47 }
0x11c0   :  { %6521 = vrcp.f32 %v2184_v31  ;;  %vm2191_vm14 = vweird.f32 %v2184_v31  ;;  %v2197_v62 = vand.u32 2147483648, %v2184_v31  ;;  %v2195_v23 = vand.u32 2147483647, %v2184_v31  ;;  %2402 = vmatpush.bf16.msrb.mxu3 %v5978_v17 }
0x11c1   :  { %6523 = vrcp.f32 %v7754_v48  ;;  %vm2206_vm8 = vweird.f32 %v7754_v48 }
0x11c2   :  { %v2198_v37 = vor.u32 1.1754944e-38, %v2197_v62  ;;  %vm2196_vm7 = vcmp.eq.f32.partialorder %v2195_v23, 8.507059e+37  ;;  %v2252_v23 = vrot.slane %v7682_v29, 1 }
0x11c6   :  { %v6522_v38 = vpop.eup %6521 }
0x11c7   :  { %v2187_v21 = vmul.f32 %v6522_v38, %v2184_v31  ;;  %v7757_v55 = vpop.eup %6523  ;;  %vm2192_vm3 = vweird.f32 %v6522_v38 }
0x11c8   :  { %v2202_v39 = vmul.f32 %v7757_v55, %v7754_v48  ;;  %vm7761_vm1 = vmor %vm2191_vm14, %vm2192_vm3  ;;  %vm2207_vm9 = vweird.f32 %v7757_v55 }
0x11c9   :  { %v2188_v56 = vsub.f32 1.0, %v2187_v21  ;;  %v2124_v21 = vrot.slane %v7704_v28, 7  ;;  %v2128_v28 = vmul.f32 %v7733_v26, %v1996_v3  ;;  %vm2208_vm10 = vmor %vm2206_vm8, %vm2207_vm9 }
0x11ca   :  { %v2203_v32 = vsub.f32 1.0, %v2202_v39 }
0x11cb   :  { %v2189_v44 = vmul.f32 %v6522_v38, %v2188_v56  ;;  %v2210_v56 = vand.u32 2147483647, %v7754_v48  ;;  %v2127_v0 = vmul.f32 %v2124_v21, %v7735_v1 }
0x11cc   :  { %v2204_v14 = vmul.f32 %v7757_v55, %v2203_v32 }
0x11cd   :  { %v2190_v5 = vadd.f32 %v6522_v38, %v2189_v44  ;;  %v2212_v44 = vand.u32 2147483648, %v7754_v48  ;;  %vm2211_vm3 = vcmp.eq.f32.partialorder %v2210_v56, 8.507059e+37 }
0x11ce   :  { %v2205_v47 = vadd.f32 %v7757_v55, %v2204_v14 }
0x11cf   :  { %v2194_v16 = vsel %vm7761_vm1, %v6522_v38, %v2190_v5  ;;  %v2213_v27 = vor.u32 1.1754944e-38, %v2212_v44 }
0x11d0   :  { %v2199_v19 = vsel %vm2196_vm7, %v2198_v37, %v2194_v16  ;;  %v2209_v46 = vsel %vm2208_vm10, %v7757_v55, %v2205_v47 }
0x11d1   :  { %v2239_v31 = vsub.f32 1.0, %v2199_v19  ;;  %v2255_v59 = vmul.f32 %v2251_v25, %v2199_v19  ;;  %v2214_v3 = vsel %vm2211_vm3, %v2213_v27, %v2209_v46 }
0x11d2   :  { %v2256_v4 = vmul.f32 %v2252_v23, %v2214_v3 }
0x120d   :  { %v2244_v38 = vpop.permute.xlu1 %2243 }
0x120e   :  { %v2249_v39 = vmul.f32 %v2244_v38, %v2239_v31 }
0x120f   :  { %v2117_v63 = vpop.permute.xlu2 %2116  ;;  %v2119_v15 = vpop.permute.xlu0 %2118 }
0x1210   :  { %v2257_v5 = vadd.f32 %v2255_v59, %v2249_v39  ;;  %v2122_v48 = vmul.f32 %v2117_v63, %v2112_v51  ;;  %v2123_v13 = vmul.f32 %v2119_v15, %v2113_v53 }
0x1212   :  { %v2280_v60 = vsel %vm2259_vm2, %v2257_v5, %v7687_v30  ;;  %v2129_v1 = vadd.f32 %v2127_v0, %v2122_v48  ;;  %v2130_v62 = vadd.f32 %v2128_v28, %v2123_v13  ;;  %v2240_v30 = vsub.f32 1.0, %v2214_v3 }
0x1213   :  { %v2282_v36 = vsel %vm2262_vm5, %v2280_v60, %v7609_v57 }
0x1214   :  { %v2278_v26 = vsel %vm8809_vm6, %v7713_v61, %v2129_v1  ;;  %v2279_v34 = vsel %vm8809_vm6, %v7696_v18, %v2130_v62  ;;  %v2284_v55 = vsel %vm2265_vm11, %v2282_v36, %v7529_v45 }
0x1215   :  { %v2294_v12 = vpack.c.bf16 %v2279_v34, %v2278_v26  ;;  %v2286_v57 = vsel %vm2268_vm15, %v2284_v55, %v7469_v20 }
0x1216   :  { %v2288_v61 = vsel %vm2271_vm4, %v2286_v57, %v7357_v10 }
0x1217   :  { %v2246_v32 = vpop.permute.xlu2 %2245  ;;  %2356 = vrot.lane.b32.xlu0 %v2294_v12, %s7023_s1  ;;  %v2290_v11 = vsel %vm2274_vm13, %v2288_v61, %v7302_v40 }
0x1218   :  { %v2250_v52 = vmul.f32 %v2246_v32, %v2240_v30 }
0x121a   :  { %v2258_v49 = vadd.f32 %v2256_v4, %v2250_v52 }
0x121c   :  { %v2281_v18 = vsel %vm2259_vm2, %v2258_v49, %v7682_v29  ;;  %v2292_v29 = vsel %vm8809_vm6, %v2290_v11, %v7177_v54  ;;  %v7829_v54 = vld [vmem:[#allocation8 + $0x2] sm:$0x3] }
0x121d   :  { %v2283_v45 = vsel %vm2262_vm5, %v2281_v18, %v7605_v24  ;;  %v2412_v40 = vperm.slane %v7829_v54, 0  ;;  %v2413_v57 = vperm.slane %v7829_v54, 1 }
0x121e   :  { %v2285_v6 = vsel %vm2265_vm11, %v2283_v45, %v7527_v50 }
0x121f   :  { %v2287_v16 = vsel %vm2268_vm15, %v2285_v6, %v7477_v43 }
0x1220   :  { %v2289_v20 = vsel %vm2271_vm4, %v2287_v16, %v7359_v7 }
0x1221   :  { %v2291_v10 = vsel %vm2274_vm13, %v2289_v20, %v7300_v42  ;;  %v7825_v42 = vld [vmem:[%s8795_s5 + $0x1] ss:$0 sm:$0xff] }
0x1222   :  { %v2293_v24 = vsel %vm8809_vm6, %v2291_v10, %v7179_v58  ;;  %2546 = vrot.lane.b32.xlu1 %v7825_v42, %s7022_s30 }
0x1223   :  { %v2295_v35 = vpack.c.bf16 %v2293_v24, %v2292_v29 }
0x1225   :  { %5969 = vmatmul.msk.bf16.vlgmr.msra.gmra.mxu0 %vm127_vm0, %v2295_v35  ;;  %5970 = vmatmul.msk.bf16.vlgmr.msra.gmra.mxu1 %vm127_vm0, %v2295_v35 }
0x1289   :  { %v2357_v43 = vpop.permute.xlu0 %2356 }
0x128a   :  { %5987 = vmatmul.msk.bf16.vlgmr.msrb.gmra.mxu2 %vm127_vm0, %v2357_v43  ;;  %5988 = vmatmul.msk.bf16.vlgmr.msrb.gmra.mxu3 %vm127_vm0, %v2357_v43 }
0x1294   :  { %v2547_v51 = vpop.permute.xlu1 %2546 }
0x12a2   :  { %v2336_v58 = vpop.f32.mrf.mxu0  ;;  %v2350_v23 = vpop.f32.mrf.mxu1 }
0x12aa   :  { %v2338_v37 = vpop.f32.mrf.mxu0  ;;  %v2352_v16 = vpop.f32.mrf.mxu1 }
0x130d   :  { %v2390_v7 = vpop.f32.mrf.mxu2  ;;  %v2404_v55 = vpop.f32.mrf.mxu3 }
0x130e   :  { %v2391_v50 = vadd.f32 %v2390_v7, %v2336_v58  ;;  %v2405_v4 = vadd.f32 %v2404_v55, %v2350_v23 }
0x1310   :  { %v7832_v41 = vadd.f32 %v2412_v40, %v2391_v50  ;;  %v7856_v49 = vadd.f32 %v2413_v57, %v2405_v4 }
0x1312   :  { %v5990_v8 = vmul.f32 -1.442695, %v7832_v41  ;;  %v5992_v54 = vmul.f32 -1.442695, %v7856_v49 }
0x1314   :  { %6525 = vpow2.f32 %v5990_v8 }
0x1315   :  { %v2392_v9 = vpop.f32.mrf.mxu2  ;;  %v2406_v61 = vpop.f32.mrf.mxu3 }
0x1316   :  { %v2393_v2 = vadd.f32 %v2392_v9, %v2338_v37  ;;  %v2407_v11 = vadd.f32 %v2406_v61, %v2352_v16  ;;  %v6227_v16 = vld [vmem:[#allocation7 + $0x74] sm:$0xf] }
0x1318   :  { %v7835_v22 = vadd.f32 %v2412_v40, %v2393_v2  ;;  %v7860_v20 = vadd.f32 %v2413_v57, %v2407_v11 }
0x131a   :  { %v6526_v14 = vpop.eup %6525  ;;  %v5991_v33 = vmul.f32 -1.442695, %v7835_v22  ;;  %v5993_v43 = vmul.f32 -1.442695, %v7860_v20 }
0x131b   :  { %v2439_v19 = vadd.f32 1.0, %v6526_v14 }
0x131c   :  { %6527 = vpow2.f32 %v5991_v33 }
0x131d   :  { %6529 = vrcp.f32 %v2439_v19  ;;  %v2452_v21 = vand.u32 2147483648, %v2439_v19  ;;  %v2450_v44 = vand.u32 2147483647, %v2439_v19  ;;  %vm2446_vm1 = vweird.f32 %v2439_v19 }
0x131f   :  { %v2453_v53 = vor.u32 1.1754944e-38, %v2452_v21  ;;  %vm2451_vm9 = vcmp.eq.f32.partialorder %v2450_v44, 8.507059e+37 }
0x1322   :  { %v6528_v17 = vpop.eup %6527 }
0x1323   :  { %v6530_v25 = vpop.eup %6529  ;;  %v2440_v31 = vadd.f32 1.0, %v6528_v17 }
0x1324   :  { %v2442_v47 = vmul.f32 %v6530_v25, %v2439_v19  ;;  %vm2447_vm14 = vweird.f32 %v6530_v25 }
0x1325   :  { %6531 = vrcp.f32 %v2440_v31  ;;  %vm2448_vm7 = vmor %vm2446_vm1, %vm2447_vm14  ;;  %v2467_v48 = vand.u32 2147483648, %v2440_v31  ;;  %v2465_v46 = vand.u32 2147483647, %v2440_v31  ;;  %vm2461_vm10 = vweird.f32 %v2440_v31 }
0x1326   :  { %v2443_v38 = vsub.f32 1.0, %v2442_v47 }
0x1327   :  { %v2468_v60 = vor.u32 1.1754944e-38, %v2467_v48  ;;  %vm2466_vm14 = vcmp.eq.f32.partialorder %v2465_v46, 8.507059e+37 }
0x1328   :  { %v2444_v56 = vmul.f32 %v6530_v25, %v2443_v38 }
0x132a   :  { %v2445_v39 = vadd.f32 %v6530_v25, %v2444_v56 }
0x132b   :  { %v6532_v59 = vpop.eup %6531 }
0x132c   :  { %v2449_v0 = vsel %vm2448_vm7, %v6530_v25, %v2445_v39  ;;  %v2457_v63 = vmul.f32 %v6532_v59, %v2440_v31  ;;  %vm2462_vm8 = vweird.f32 %v6532_v59 }
0x132d   :  { %v7838_v28 = vsel %vm2451_vm9, %v2453_v53, %v2449_v0  ;;  %vm2463_vm3 = vmor %vm2461_vm10, %vm2462_vm8 }
0x132e   :  { %v2458_v15 = vsub.f32 1.0, %v2457_v63  ;;  %v2549_v5 = vmul.f32 %v2547_v51, %v7838_v28  ;;  %v2475_v26 = vmul.f32 %v7825_v42, %v7838_v28  ;;  %v2489_v63 = vsub.f32 1.0, %v7838_v28 }
0x1330   :  { %v2459_v13 = vmul.f32 %v6532_v59, %v2458_v15  ;;  %2553 = vrot.lane.b32.xlu0 %v2549_v5, %s7022_s30 }
0x1332   :  { %v2460_v27 = vadd.f32 %v6532_v59, %v2459_v13  ;;  %v2501_v13 = vmul.f32 0.0, %v7838_v28 }
0x1334   :  { %v2464_v1 = vsel %vm2463_vm3, %v6532_v59, %v2460_v27 }
0x1335   :  { %v7842_v62 = vsel %vm2466_vm14, %v2468_v60, %v2464_v1 }
0x1336   :  { %v2550_v36 = vmul.f32 %v2547_v51, %v7842_v62  ;;  %v2476_v3 = vmul.f32 %v7825_v42, %v7842_v62  ;;  %v2490_v25 = vsub.f32 1.0, %v7842_v62  ;;  %v2502_v44 = vmul.f32 0.0, %v7842_v62 }
0x1338   :  { %2555 = vrot.lane.b32.xlu1 %v2550_v36, %s7022_s30  ;;  %2481 = vrot.lane.b32.xlu2 %v2476_v3, %s7022_s30 }
0x1340   :  { %2479 = vrot.lane.b32.xlu2 %v2475_v26, %s7022_s30 }
0x1392   :  { %v2482_v34 = vpop.permute.xlu2 %2481 }
0x1393   :  { %v2486_v12 = vadd.f32 %v2482_v34, %v7835_v22 }
0x1395   :  { %6533 = vtanh.f32 %v2486_v12 }
0x139a   :  { %v2480_v30 = vpop.permute.xlu2 %2479 }
0x139b   :  { %v6534_v32 = vpop.eup %6533  ;;  %v2485_v52 = vadd.f32 %v2480_v30, %v7832_v41 }
0x139c   :  { %2495 = vrot.lane.b32.xlu0 %v6534_v32, %s7023_s1 }
0x139d   :  { %6535 = vtanh.f32 %v2485_v52 }
0x13a2   :  { %v2554_v18 = vpop.permute.xlu0 %2553 }
0x13a3   :  { %v6536_v45 = vpop.eup %6535  ;;  %v2559_v6 = vadd.f32 %v2554_v18, %v7856_v49 }
0x13a4   :  { %2493 = vrot.lane.b32.xlu0 %v6536_v45, %s7023_s1  ;;  %v6020_v45 = vld [vmem:[#allocation7 + $0x70] sm:$0xf] }
0x13a5   :  { %6537 = vtanh.f32 %v2559_v6  ;;  %v6228_v6 = vld [vmem:[#allocation7 + $0x74] sm:$0xf0] }
0x13a6   :  { %v7891_v11 = vor.u32 %v6228_v6, %v6020_v45 }
0x13a8   :  { %2643 = vmatpush.bf16.msrb.mxu0 %v7891_v11  ;;  %2918 = vmatpush.bf16.msra.mxu2 %v7891_v11 }
0x13aa   :  { %v2556_v10 = vpop.permute.xlu1 %2555 }
0x13ab   :  { %v6538_v29 = vpop.eup %6537  ;;  %v2560_v24 = vadd.f32 %v2556_v10, %v7860_v20  ;;  %v6022_v10 = vld [vmem:[#allocation7 + $0x78] sm:$0xf0] }
0x13ac   :  { %2567 = vrot.lane.b32.xlu1 %v6538_v29, %s7023_s1  ;;  %2709 = vrot.lane.b32.xlu0 %v7825_v42, %s7022_s30  ;;  %v6012_v29 = vld [vmem:[#allocation7 + $0x60] sm:$0xf] }
0x13ad   :  { %6539 = vtanh.f32 %v2560_v24  ;;  %v6226_v24 = vld [vmem:[#allocation7 + $0x64] sm:$0xf0] }
0x13ae   :  { %6541 = vpow2.f32 %v5993_v43  ;;  %v6225_v43 = vld [vmem:[#allocation7 + $0x64] sm:$0xf] }
0x13af   :  { %6543 = vpow2.f32 %v5992_v54  ;;  %v6014_v54 = vld [vmem:[#allocation7 + $0x68] sm:$0xf0] }
0x13b3   :  { %v6540_v35 = vpop.eup %6539 }
0x13b4   :  { %2569 = vrot.lane.b32.xlu2 %v6540_v35, %s7023_s1  ;;  %v6542_v58 = vpop.eup %6541  ;;  %v7893_v35 = vor.u32 %v6227_v16, %v6022_v10 }
0x13b5   :  { %v2514_v40 = vadd.f32 1.0, %v6542_v58  ;;  %v6544_v7 = vpop.eup %6543  ;;  %v7896_v58 = vor.u32 %v6226_v24, %v6012_v29 }
0x13b6   :  { %v2513_v50 = vadd.f32 1.0, %v6544_v7  ;;  %2656 = vmatpush.bf16.msrb.mxu1 %v7893_v35  ;;  %v6004_v7 = vld [vmem:[#allocation7 + $0x50] sm:$0xf]  ;;  %2931 = vmatpush.bf16.msra.mxu3 %v7893_v35 }
0x13b7   :  { %6545 = vrcp.f32 %v2514_v40  ;;  %v2541_v38 = vand.u32 2147483648, %v2514_v40  ;;  %vm2535_vm7 = vweird.f32 %v2514_v40  ;;  %v2539_v56 = vand.u32 2147483647, %v2514_v40  ;;  %2644 = vmatpush.bf16.msrb.mxu0 %v7896_v58  ;;  %2919 = vmatpush.bf16.msra.mxu2 %v7896_v58 }
0x13b8   :  { %6547 = vrcp.f32 %v2513_v50  ;;  %vm2520_vm10 = vweird.f32 %v2513_v50  ;;  %v2526_v53 = vand.u32 2147483648, %v2513_v50  ;;  %v2524_v15 = vand.u32 2147483647, %v2513_v50 }
0x13b9   :  { %v2542_v51 = vor.u32 1.1754944e-38, %v2541_v38  ;;  %vm2540_vm3 = vcmp.eq.f32.partialorder %v2539_v56, 8.507059e+37 }
0x13ba   :  { %v2527_v1 = vor.u32 1.1754944e-38, %v2526_v53 }
0x13bd   :  { %v6546_v8 = vpop.eup %6545 }
0x13be   :  { %v2531_v37 = vmul.f32 %v6546_v8, %v2514_v40  ;;  %v6548_v9 = vpop.eup %6547  ;;  %vm2536_vm1 = vweird.f32 %v6546_v8  ;;  %v7900_v40 = vor.u32 %v6225_v43, %v6014_v54 }
0x13bf   :  { %v2516_v14 = vmul.f32 %v6548_v9, %v2513_v50  ;;  %vm2537_vm9 = vmor %vm2535_vm7, %vm2536_vm1  ;;  %vm2521_vm8 = vweird.f32 %v6548_v9  ;;  %vm2525_vm1 = vcmp.eq.f32.partialorder %v2524_v15, 8.507059e+37  ;;  %v6224_v50 = vld [vmem:[#allocation7 + $0x54] sm:$0xf0]  ;;  %vm8814_vm7 = vcmask 523264  }
0x13c0   :  { %v2532_v2 = vsub.f32 1.0, %v2531_v37  ;;  %vm2522_vm14 = vmor %vm2520_vm10, %vm2521_vm8  ;;  %v6006_v37 = vld [vmem:[#allocation7 + $0x58] sm:$0xf0]  ;;  %2657 = vmatpush.bf16.msrb.mxu1 %v7900_v40  ;;  %2932 = vmatpush.bf16.msra.mxu3 %v7900_v40 }
0x13c1   :  { %v2517_v19 = vsub.f32 1.0, %v2516_v14  ;;  %v5996_v14 = vld [vmem:[#allocation7 + $0x40] sm:$0xf] }
0x13c2   :  { %v2533_v33 = vmul.f32 %v6546_v8, %v2532_v2 }
0x13c3   :  { %v2518_v47 = vmul.f32 %v6548_v9, %v2517_v19 }
0x13c4   :  { %v2534_v31 = vadd.f32 %v6546_v8, %v2533_v33  ;;  %v6222_v33 = vld [vmem:[#allocation7 + $0x44] sm:$0xf0] }
0x13c5   :  { %v2519_v59 = vadd.f32 %v6548_v9, %v2518_v47  ;;  %v7912_v19 = vor.u32 %v6222_v33, %v5996_v14 }
0x13c6   :  { %v2538_v39 = vsel %vm2537_vm9, %v6546_v8, %v2534_v31  ;;  %v6223_v8 = vld [vmem:[#allocation7 + $0x54] sm:$0xf]  ;;  %vm8815_vm9 = vmmov %vm8814_vm7 }
0x13c7   :  { %v2543_v5 = vsel %vm2540_vm3, %v2542_v51, %v2538_v39  ;;  %v2523_v27 = vsel %vm2522_vm14, %v6548_v9, %v2519_v59  ;;  %v7904_v9 = vor.u32 %v6224_v50, %v6004_v7  ;;  %v7908_v2 = vor.u32 %v6223_v8, %v6006_v37 }
0x13c8   :  { %v2564_v36 = vsub.f32 1.0, %v2543_v5  ;;  %v2528_v26 = vsel %vm2525_vm1, %v2527_v1, %v2523_v27  ;;  %v2576_v28 = vmul.f32 0.0, %v2543_v5 }
0x13c9   :  { %v2563_v55 = vsub.f32 1.0, %v2528_v26  ;;  %v2575_v52 = vmul.f32 0.0, %v2528_v26  ;;  %2645 = vmatpush.bf16.msrb.mxu0 %v7904_v9  ;;  %2920 = vmatpush.bf16.msra.mxu2 %v7904_v9 }
0x13ca   :  { %2658 = vmatpush.bf16.msrb.mxu1 %v7908_v2  ;;  %2933 = vmatpush.bf16.msra.mxu3 %v7908_v2 }
0x13cd   :  { %2646 = vmatpush.bf16.msrb.mxu0 %v7912_v19  ;;  %2921 = vmatpush.bf16.msra.mxu2 %v7912_v19 }
0x13d1   :  { %3187 = vmatpush.bf16.msra.mxu0 %v7891_v11  ;;  %3459 = vmatpush.bf16.msrb.mxu2 %v7891_v11 }
0x13d5   :  { %3188 = vmatpush.bf16.msra.mxu0 %v7896_v58  ;;  %3460 = vmatpush.bf16.msrb.mxu2 %v7896_v58 }
0x13d9   :  { %3189 = vmatpush.bf16.msra.mxu0 %v7904_v9  ;;  %3461 = vmatpush.bf16.msrb.mxu2 %v7904_v9 }
0x13dd   :  { %3190 = vmatpush.bf16.msra.mxu0 %v7912_v19  ;;  %3462 = vmatpush.bf16.msrb.mxu2 %v7912_v19 }
0x140e   :  { %v2496_v17 = vpop.permute.xlu0 %2495  ;;  %v2570_v60 = vpop.permute.xlu2 %2569 }
0x140f   :  { %v2500_v21 = vmul.f32 %v2496_v17, %v2490_v25  ;;  %v2574_v34 = vmul.f32 %v2570_v60, %v2564_v36  ;;  %v6221_v17 = vld [vmem:[#allocation7 + $0x44] sm:$0xf]  ;;  %v5998_v25 = vld [vmem:[#allocation7 + $0x48] sm:$0xf0] }
0x1410   :  { %v7921_v31 = vor.u32 %v6221_v17, %v5998_v25 }
0x1411   :  { %v7871_v0 = vadd.f32 %v2502_v44, %v2500_v21  ;;  %v7883_v30 = vadd.f32 %v2576_v28, %v2574_v34 }
0x1412   :  { %2659 = vmatpush.bf16.msrb.mxu1 %v7921_v31  ;;  %2934 = vmatpush.bf16.msra.mxu3 %v7921_v31 }
0x1413   :  { %v2581_v62 = vrot.slane %v7871_v0, 7  ;;  %v2589_v61 = vrot.slane %v7883_v30, 6 }
0x1416   :  { %v2494_v48 = vpop.permute.xlu0 %2493  ;;  %3200 = vmatpush.bf16.msra.mxu1 %v7893_v35  ;;  %3472 = vmatpush.bf16.msrb.mxu3 %v7893_v35 }
0x1417   :  { %v2499_v46 = vmul.f32 %v2494_v48, %v2489_v63 }
0x1419   :  { %v7876_v3 = vadd.f32 %v2501_v13, %v2499_v46 }
0x141a   :  { %3201 = vmatpush.bf16.msra.mxu1 %v7900_v40  ;;  %3473 = vmatpush.bf16.msrb.mxu3 %v7900_v40 }
0x141b   :  { %v2582_v12 = vsel %vm8808_vm12, %v2581_v62, %v7876_v3 }
0x141c   :  { %2583 = vrot.lane.b32.xlu1 %v2582_v12, %s7023_s1 }
0x141e   :  { %v2568_v23 = vpop.permute.xlu1 %2567  ;;  %3202 = vmatpush.bf16.msra.mxu1 %v7908_v2  ;;  %3474 = vmatpush.bf16.msrb.mxu3 %v7908_v2  ;;  %v7950_v44 = vpop.permute.xlu0 %2709 }
0x141f   :  { %v2573_v32 = vmul.f32 %v2568_v23, %v2563_v55 }
0x1421   :  { %v7885_v4 = vadd.f32 %v2575_v52, %v2573_v32 }
0x1422   :  { %3203 = vmatpush.bf16.msra.mxu1 %v7921_v31  ;;  %3475 = vmatpush.bf16.msrb.mxu3 %v7921_v31 }
0x1423   :  { %v2588_v57 = vrot.slane %v7885_v4, 7 }
0x1425   :  { %v2590_v18 = vsel %vm8808_vm12, %v2589_v61, %v2588_v57 }
0x1426   :  { %2591 = vrot.lane.b32.xlu2 %v2590_v18, %s7020_s13 }
0x1480   :  { %v2592_v47 = vpop.permute.xlu2 %2591 }
0x148e   :  { %v2584_v38 = vpop.permute.xlu1 %2583 }
0x148f   :  { %v2594_v21 = vsel %vm127_vm0, %v2584_v38, %v2592_v47 }
0x1490   :  { %v2595_v56 = vpack.c.bf16 %v2594_v21, %v2594_v21 }
0x1492   :  { %6026 = vmatmul.msk.bf16.vlgmr.msrb.gmra.mxu0 %vm8814_vm7, %v2595_v56  ;;  %6027 = vmatmul.msk.bf16.vlgmr.msrb.gmra.mxu1 %vm8815_vm9, %v2595_v56 }
0x1493   :  { %3725 = vmatpush.bf16.msrb.mxu0 %v7891_v11  ;;  %3738 = vmatpush.bf16.msrb.mxu1 %v7893_v35 }
0x1497   :  { %3726 = vmatpush.bf16.msrb.mxu0 %v7896_v58  ;;  %3739 = vmatpush.bf16.msrb.mxu1 %v7900_v40 }
0x149b   :  { %3727 = vmatpush.bf16.msrb.mxu0 %v7904_v9  ;;  %3740 = vmatpush.bf16.msrb.mxu1 %v7908_v2 }
0x149f   :  { %3728 = vmatpush.bf16.msrb.mxu0 %v7912_v19  ;;  %3741 = vmatpush.bf16.msrb.mxu1 %v7921_v31 }
0x150f   :  { %v2648_v39 = vpop.f32.mrf.mxu0  ;;  %v7952_v59 = vpop.f32.mrf.mxu1 }
0x1510   :  { %v2843_v51 = vadd.f32 %v7825_v42, %v7952_v59  ;;  %v2712_v53 = vadd.f32 %v7950_v44, %v2648_v39  ;;  %v2754_v46 = vrot.slane %v2648_v39, 2  ;;  %v2755_v26 = vrot.slane %v2648_v39, 3 }
0x1511   :  { %v2670_v34 = vadd.f32 %v2648_v39, %v7835_v22  ;;  %v2666_v28 = vrot.slane %v2648_v39, 7 }
0x1512   :  { %2717 = vrot.lane.b32.xlu1 %v2712_v53, %s7022_s30  ;;  %v2846_v63 = vrot.slane %v2843_v51, 3  ;;  %v2845_v15 = vrot.slane %v2843_v51, 2  ;;  %v2714_v13 = vrot.slane %v2712_v53, 7  ;;  %v2758_v27 = vadd.f32 %v2754_v46, %v7832_v41 }
0x1513   :  { %v2759_v12 = vadd.f32 %v2755_v26, %v7835_v22  ;;  %v6029_v55 = vmul.f32 -1.442695, %v2670_v34  ;;  %v2669_v52 = vadd.f32 %v2666_v28, %v7832_v41 }
0x1514   :  { %2849 = vrot.lane.b32.xlu0 %v2846_v63, %s7022_s30  ;;  %2847 = vrot.lane.b32.xlu2 %v2845_v15, %s7022_s30  ;;  %v6030_v60 = vmul.f32 -1.442695, %v2758_v27 }
0x1515   :  { %v6031_v32 = vmul.f32 -1.442695, %v2759_v12  ;;  %v6028_v61 = vmul.f32 -1.442695, %v2669_v52 }
0x1516   :  { %6549 = vpow2.f32 %v6030_v60 }
0x1517   :  { %v2650_v5 = vpop.f32.mrf.mxu0  ;;  %v2663_v48 = vpop.f32.mrf.mxu1 }
0x151a   :  { %2715 = vrot.lane.b32.xlu1 %v2714_v13, %s7022_s30 }
0x151c   :  { %v6550_v1 = vpop.eup %6549 }
0x151d   :  { %v2766_v36 = vadd.f32 1.0, %v6550_v1 }
0x151f   :  { %6551 = vrcp.f32 %v2766_v36  ;;  %v2779_v43 = vand.u32 2147483648, %v2766_v36  ;;  %vm2773_vm10 = vweird.f32 %v2766_v36  ;;  %v2777_v7 = vand.u32 2147483647, %v2766_v36 }
0x1520   :  { %6553 = vpow2.f32 %v6029_v55 }
0x1521   :  { %6555 = vpow2.f32 %v6031_v32  ;;  %v2780_v37 = vor.u32 1.1754944e-38, %v2779_v43  ;;  %vm2778_vm14 = vcmp.eq.f32.partialorder %v2777_v7, 8.507059e+37 }
0x1522   :  { %6557 = vpow2.f32 %v6028_v61 }
0x1525   :  { %v6552_v23 = vpop.eup %6551 }
0x1526   :  { %v2769_v57 = vmul.f32 %v6552_v23, %v2766_v36  ;;  %v6554_v45 = vpop.eup %6553  ;;  %vm2774_vm8 = vweird.f32 %v6552_v23 }
0x1527   :  { %v6556_v6 = vpop.eup %6555  ;;  %v2678_v10 = vadd.f32 1.0, %v6554_v45  ;;  %vm2775_vm3 = vmor %vm2773_vm10, %vm2774_vm8 }
0x1528   :  { %v2770_v18 = vsub.f32 1.0, %v2769_v57  ;;  %v2767_v29 = vadd.f32 1.0, %v6556_v6  ;;  %v6558_v54 = vpop.eup %6557 }
0x1529   :  { %6559 = vrcp.f32 %v2678_v10  ;;  %v2677_v8 = vadd.f32 1.0, %v6558_v54  ;;  %v2705_v13 = vand.u32 2147483648, %v2678_v10  ;;  %vm2699_vm7 = vweird.f32 %v2678_v10 }
0x152a   :  { %v2771_v16 = vmul.f32 %v6552_v23, %v2770_v18  ;;  %6561 = vrcp.f32 %v2767_v29  ;;  %v2703_v46 = vand.u32 2147483647, %v2678_v10  ;;  %v2794_v60 = vand.u32 2147483648, %v2767_v29 }
0x152b   :  { %6563 = vrcp.f32 %v2677_v8  ;;  %vm2788_vm10 = vweird.f32 %v2767_v29  ;;  %v2792_v36 = vand.u32 2147483647, %v2767_v29  ;;  %v2706_v34 = vor.u32 1.1754944e-38, %v2705_v13 }
0x152c   :  { %v2772_v24 = vadd.f32 %v6552_v23, %v2771_v16  ;;  %v2690_v18 = vand.u32 2147483648, %v2677_v8  ;;  %v2688_v6 = vand.u32 2147483647, %v2677_v8 }
0x152d   :  { %vm2793_vm12 = vcmp.eq.f32.partialorder %v2792_v36, 8.507059e+37 }
0x152e   :  { %v2776_v50 = vsel %vm2775_vm3, %v6552_v23, %v2772_v24  ;;  %v2795_v23 = vor.u32 1.1754944e-38, %v2794_v60 }
0x152f   :  { %v6560_v14 = vpop.eup %6559  ;;  %v2781_v17 = vsel %vm2778_vm14, %v2780_v37, %v2776_v50  ;;  %vm2704_vm14 = vcmp.eq.f32.partialorder %v2703_v46, 8.507059e+37 }
0x1530   :  { %v6562_v47 = vpop.eup %6561  ;;  %v2695_v38 = vmul.f32 %v6560_v14, %v2678_v10  ;;  %vm2700_vm1 = vweird.f32 %v6560_v14  ;;  %v2691_v10 = vor.u32 1.1754944e-38, %v2690_v18 }
0x1531   :  { %v2784_v21 = vmul.f32 %v6562_v47, %v2767_v29  ;;  %v6564_v39 = vpop.eup %6563  ;;  %vm2789_vm9 = vweird.f32 %v6562_v47  ;;  %vm2701_vm8 = vmor %vm2699_vm7, %vm2700_vm1  ;;  %vm2684_vm1 = vweird.f32 %v2677_v8 }
0x1532   :  { %v2696_v56 = vsub.f32 1.0, %v2695_v38  ;;  %v2680_v63 = vmul.f32 %v6564_v39, %v2677_v8  ;;  %vm2790_vm3 = vmor %vm2788_vm10, %vm2789_vm9  ;;  %vm2685_vm6 = vweird.f32 %v6564_v39  ;;  %vm2689_vm9 = vcmp.eq.f32.partialorder %v2688_v6, 8.507059e+37 }
0x1533   :  { %v2785_v51 = vsub.f32 1.0, %v2784_v21  ;;  %vm2686_vm7 = vmor %vm2684_vm1, %vm2685_vm6 }
0x1534   :  { %v2697_v53 = vmul.f32 %v6560_v14, %v2696_v56  ;;  %v2681_v48 = vsub.f32 1.0, %v2680_v63  ;;  %v2799_v56 = vrot.slane %v7952_v59, 2 }
0x1535   :  { %v2786_v15 = vmul.f32 %v6562_v47, %v2785_v51 }
0x1536   :  { %v2698_v5 = vadd.f32 %v6560_v14, %v2697_v53  ;;  %v2682_v26 = vmul.f32 %v6564_v39, %v2681_v48  ;;  %v2803_v51 = vadd.f32 %v2799_v56, %v7856_v49 }
0x1537   :  { %v2787_v27 = vadd.f32 %v6562_v47, %v2786_v15 }
0x1538   :  { %v2702_v1 = vsel %vm2701_vm8, %v6560_v14, %v2698_v5  ;;  %v2683_v52 = vadd.f32 %v6564_v39, %v2682_v26  ;;  %v6032_v63 = vmul.f32 -1.442695, %v2803_v51 }
0x1539   :  { %v2791_v12 = vsel %vm2790_vm3, %v6562_v47, %v2787_v27  ;;  %v7966_v55 = vsel %vm2704_vm14, %v2706_v34, %v2702_v1 }
0x153a   :  { %v2796_v61 = vsel %vm2793_vm12, %v2795_v23, %v2791_v12  ;;  %v2687_v16 = vsel %vm2686_vm7, %v6564_v39, %v2683_v52  ;;  %v2800_v39 = vrot.slane %v7952_v59, 3  ;;  %v2751_v56 = vmul.f32 %v7966_v55, %v2581_v62 }
0x153b   :  { %v7971_v24 = vsel %vm2689_vm9, %v2691_v10, %v2687_v16  ;;  %vm8816_vm9 = vcmask 1042434  }
0x153c   :  { %v2804_v53 = vadd.f32 %v2800_v39, %v7860_v20 }
0x153e   :  { %v6033_v15 = vmul.f32 -1.442695, %v2804_v53  ;;  %v2747_v53 = vrot.slane %v7876_v3, 7 }
0x156e   :  { %v2848_v33 = vpop.permute.xlu2 %2847 }
0x156f   :  { %v2853_v25 = vmul.f32 %v2848_v33, %v2781_v17 }
0x1571   :  { %2857 = vrot.lane.b32.xlu0 %v2853_v25, %s7022_s30 }
0x1584   :  { %v2718_v28 = vpop.permute.xlu1 %2717 }
0x1585   :  { %v2722_v32 = vmul.f32 %v2718_v28, %v7966_v55 }
0x1586   :  { %v2850_v57 = vpop.permute.xlu0 %2849 }
0x1587   :  { %v2854_v45 = vmul.f32 %v2850_v57, %v2796_v61  ;;  %2727 = vrot.lane.b32.xlu2 %v2722_v32, %s7022_s30 }
0x1589   :  { %2859 = vrot.lane.b32.xlu1 %v2854_v45, %s7022_s30 }
0x158c   :  { %v2716_v29 = vpop.permute.xlu1 %2715 }
0x158d   :  { %v2721_v43 = vmul.f32 %v2716_v29, %v7971_v24 }
0x158f   :  { %2725 = vrot.lane.b32.xlu2 %v2721_v43, %s7022_s30 }
0x15e1   :  { %v2728_v54 = vpop.permute.xlu2 %2727 }
0x15e2   :  { %v2732_v7 = vadd.f32 %v2728_v54, %v7835_v22  ;;  %v2879_v54 = vrot.slane %v7885_v4, 1 }
0x15e3   :  { %v2858_v50 = vpop.permute.xlu0 %2857 }
0x15e4   :  { %6565 = vtanh.f32 %v2732_v7  ;;  %v2863_v8 = vadd.f32 %v2858_v50, %v7856_v49  ;;  %v2736_v7 = vsub.f32 1.0, %v7966_v55 }
0x15e6   :  { %6567 = vtanh.f32 %v2863_v8 }
0x15e9   :  { %v2726_v37 = vpop.permute.xlu2 %2725 }
0x15ea   :  { %v6566_v14 = vpop.eup %6565  ;;  %v2731_v33 = vadd.f32 %v2726_v37, %v7832_v41  ;;  %v2880_v37 = vrot.slane %v7883_v30, 1 }
0x15eb   :  { %2741 = vrot.lane.b32.xlu0 %v6566_v14, %s7023_s1 }
0x15ec   :  { %v6568_v17 = vpop.eup %6567  ;;  %6569 = vtanh.f32 %v2731_v33 }
0x15ed   :  { %2871 = vrot.lane.b32.xlu1 %v6568_v17, %s7023_s1 }
0x15f2   :  { %v6570_v25 = vpop.eup %6569 }
0x15f3   :  { %2739 = vrot.lane.b32.xlu0 %v6570_v25, %s7023_s1 }
0x15fb   :  { %v2860_v47 = vpop.permute.xlu1 %2859 }
0x15fc   :  { %v2864_v38 = vadd.f32 %v2860_v47, %v7860_v20 }
0x15fe   :  { %6571 = vtanh.f32 %v2864_v38 }
0x15ff   :  { %6573 = vpow2.f32 %v6032_v63 }
0x1600   :  { %6575 = vpow2.f32 %v6033_v15  ;;  %v2735_v15 = vsub.f32 1.0, %v7971_v24 }
0x1604   :  { %v6572_v21 = vpop.eup %6571 }
0x1605   :  { %2873 = vrot.lane.b32.xlu2 %v6572_v21, %s7023_s1  ;;  %v6574_v5 = vpop.eup %6573 }
0x1606   :  { %v6576_v48 = vpop.eup %6575  ;;  %v2811_v13 = vadd.f32 1.0, %v6574_v5 }
0x1607   :  { %v2812_v46 = vadd.f32 1.0, %v6576_v48 }
0x1608   :  { %6577 = vrcp.f32 %v2811_v13  ;;  %vm2818_vm8 = vweird.f32 %v2811_v13  ;;  %v2824_v32 = vand.u32 2147483648, %v2811_v13  ;;  %v2822_v57 = vand.u32 2147483647, %v2811_v13 }
0x1609   :  { %6579 = vrcp.f32 %v2812_v46  ;;  %v2839_v52 = vand.u32 2147483648, %v2812_v46  ;;  %vm2833_vm3 = vweird.f32 %v2812_v46  ;;  %v2837_v61 = vand.u32 2147483647, %v2812_v46 }
0x160a   :  { %v2825_v6 = vor.u32 1.1754944e-38, %v2824_v32  ;;  %vm2823_vm1 = vcmp.eq.f32.partialorder %v2822_v57, 8.507059e+37 }
0x160b   :  { %v2840_v16 = vor.u32 1.1754944e-38, %v2839_v52  ;;  %vm2838_vm7 = vcmp.eq.f32.partialorder %v2837_v61, 8.507059e+37 }
0x160e   :  { %v6578_v27 = vpop.eup %6577 }
0x160f   :  { %v6580_v60 = vpop.eup %6579  ;;  %v2814_v1 = vmul.f32 %v6578_v27, %v2811_v13  ;;  %vm2819_vm12 = vweird.f32 %v6578_v27 }
0x1610   :  { %v2829_v36 = vmul.f32 %v6580_v60, %v2812_v46  ;;  %vm2834_vm6 = vweird.f32 %v6580_v60  ;;  %vm2820_vm10 = vmor %vm2818_vm8, %vm2819_vm12  ;;  %v2750_v46 = vmul.f32 %v2747_v53, %v7971_v24 }
0x1611   :  { %v2815_v26 = vsub.f32 1.0, %v2814_v1  ;;  %vm2835_vm14 = vmor %vm2833_vm3, %vm2834_vm6  ;;  %vm8818_vm6 = vcmask 523264  }
0x1612   :  { %v2830_v59 = vsub.f32 1.0, %v2829_v36  ;;  %vm8817_vm12 = vmmov %vm8816_vm9 }
0x1613   :  { %v2816_v34 = vmul.f32 %v6578_v27, %v2815_v26  ;;  %vm8819_vm8 = vmmov %vm8818_vm6 }
0x1614   :  { %v2831_v12 = vmul.f32 %v6580_v60, %v2830_v59 }
0x1615   :  { %v2817_v28 = vadd.f32 %v6578_v27, %v2816_v34 }
0x1616   :  { %v2832_v23 = vadd.f32 %v6580_v60, %v2831_v12 }
0x1617   :  { %v2821_v18 = vsel %vm2820_vm10, %v6578_v27, %v2817_v28 }
0x1618   :  { %v2836_v45 = vsel %vm2835_vm14, %v6580_v60, %v2832_v23  ;;  %v2826_v10 = vsel %vm2823_vm1, %v2825_v6, %v2821_v18 }
0x1619   :  { %v2841_v29 = vsel %vm2838_vm7, %v2840_v16, %v2836_v45  ;;  %v2867_v50 = vsub.f32 1.0, %v2826_v10  ;;  %v2883_v14 = vmul.f32 %v2879_v54, %v2826_v10 }
0x161a   :  { %v2868_v8 = vsub.f32 1.0, %v2841_v29  ;;  %v2884_v38 = vmul.f32 %v2880_v37, %v2841_v29 }
0x165d   :  { %v2742_v43 = vpop.permute.xlu0 %2741 }
0x165e   :  { %v2746_v25 = vmul.f32 %v2742_v43, %v2736_v7 }
0x165f   :  { %v2872_v33 = vpop.permute.xlu1 %2871  ;;  %v2874_v17 = vpop.permute.xlu2 %2873 }
0x1660   :  { %v2877_v47 = vmul.f32 %v2872_v33, %v2867_v50  ;;  %v2878_v21 = vmul.f32 %v2874_v17, %v2868_v8  ;;  %v7998_v63 = vadd.f32 %v2751_v56, %v2746_v25 }
0x1662   :  { %v7993_v39 = vadd.f32 %v2883_v14, %v2877_v47  ;;  %v7995_v51 = vadd.f32 %v2884_v38, %v2878_v21  ;;  %v2889_v55 = vrot.slane %v7998_v63, 7 }
0x1664   :  { %v2896_v5 = vrot.slane %v7993_v39, 5  ;;  %v2897_v48 = vrot.slane %v7995_v51, 4 }
0x1665   :  { %v2740_v13 = vpop.permute.xlu0 %2739 }
0x1666   :  { %v2745_v27 = vmul.f32 %v2740_v13, %v2735_v15  ;;  %v2898_v62 = vsel %vm8816_vm9, %v2897_v48, %v2896_v5 }
0x1667   :  { %2899 = vrot.lane.b32.xlu2 %v2898_v62, %s7020_s13 }
0x1668   :  { %v8007_v60 = vadd.f32 %v2750_v46, %v2745_v27 }
0x166a   :  { %v2890_v1 = vsel %vm8817_vm12, %v2889_v55, %v8007_v60 }
0x166b   :  { %2891 = vrot.lane.b32.xlu1 %v2890_v1, %s7023_s1 }
0x16c1   :  { %v2900_v36 = vpop.permute.xlu2 %2899 }
0x16dd   :  { %v2892_v26 = vpop.permute.xlu1 %2891 }
0x16de   :  { %v2902_v24 = vsel %vm127_vm0, %v2892_v26, %v2900_v36 }
0x16df   :  { %v2903_v59 = vpack.c.bf16 %v2902_v24, %v2902_v24 }
0x16e1   :  { %v2907_v34 = vshll.u32 %v2903_v59, 16  ;;  %v2905_v12 = vshrl.u32 %v2903_v59, 16 }
0x16e3   :  { %v2909_v28 = vrot.slane %v2907_v34, 1 }
0x16e5   :  { %v2910_v23 = vor.u32 %v2909_v28, %v2905_v12 }
0x16e7   :  { %6034 = vmatmul.msk.bf16.vlgmr.msra.gmra.mxu2 %vm8818_vm6, %v2910_v23  ;;  %6035 = vmatmul.msk.bf16.vlgmr.msra.gmra.mxu3 %vm8819_vm8, %v2910_v23 }
0x16e8   :  { %4013 = vmatpush.bf16.msra.mxu3 %v7893_v35  ;;  %4000 = vmatpush.bf16.msra.mxu2 %v7891_v11 }
0x16ec   :  { %4014 = vmatpush.bf16.msra.mxu3 %v7900_v40  ;;  %4001 = vmatpush.bf16.msra.mxu2 %v7896_v58 }
0x16f0   :  { %4015 = vmatpush.bf16.msra.mxu3 %v7908_v2  ;;  %4002 = vmatpush.bf16.msra.mxu2 %v7904_v9 }
0x16f4   :  { %4016 = vmatpush.bf16.msra.mxu3 %v7921_v31  ;;  %4003 = vmatpush.bf16.msra.mxu2 %v7912_v19 }
0x176a   :  { %v2923_v32 = vpop.f32.mrf.mxu2  ;;  %v8025_v52 = vpop.f32.mrf.mxu3 }
0x176b   :  { %v3117_v57 = vadd.f32 %v7825_v42, %v8025_v52  ;;  %v2985_v61 = vadd.f32 %v2923_v32, %v7950_v44  ;;  %v3029_v43 = vrot.slane %v2923_v32, 4  ;;  %v3028_v8 = vrot.slane %v2923_v32, 3 }
0x176c   :  { %v2942_v37 = vrot.slane %v2923_v32, 7  ;;  %v2941_v38 = vrot.slane %v2923_v32, 6 }
0x176d   :  { %v3120_v18 = vrot.slane %v3117_v57, 4  ;;  %v3119_v45 = vrot.slane %v3117_v57, 3  ;;  %v2988_v6 = vrot.slane %v2985_v61, 7  ;;  %v2987_v29 = vrot.slane %v2985_v61, 6 }
0x176e   :  { %v3033_v54 = vadd.f32 %v3029_v43, %v7835_v22  ;;  %v3032_v14 = vadd.f32 %v3028_v8, %v7832_v41  ;;  %v2946_v17 = vadd.f32 %v2942_v37, %v7835_v22  ;;  %v2945_v53 = vadd.f32 %v2941_v38, %v7832_v41 }
0x176f   :  { %3123 = vrot.lane.b32.xlu2 %v3120_v18, %s7022_s30  ;;  %3121 = vrot.lane.b32.xlu1 %v3119_v45, %s7022_s30 }
0x1770   :  { %2991 = vrot.lane.b32.xlu0 %v2988_v6, %s7022_s30  ;;  %v6039_v42 = vmul.f32 -1.442695, %v3033_v54  ;;  %v6038_v25 = vmul.f32 -1.442695, %v3032_v14  ;;  %v6037_v21 = vmul.f32 -1.442695, %v2946_v17 }
0x1771   :  { %v6036_v48 = vmul.f32 -1.442695, %v2945_v53 }
0x1772   :  { %v2925_v16 = vpop.f32.mrf.mxu2  ;;  %v2938_v10 = vpop.f32.mrf.mxu3  ;;  %6581 = vpow2.f32 %v6039_v42 }
0x1778   :  { %2989 = vrot.lane.b32.xlu0 %v2987_v29, %s7022_s30  ;;  %v6582_v7 = vpop.eup %6581 }
0x1779   :  { %v3041_v50 = vadd.f32 1.0, %v6582_v7 }
0x177b   :  { %6583 = vrcp.f32 %v3041_v50  ;;  %v3068_v62 = vand.u32 2147483648, %v3041_v50  ;;  %vm3062_vm3 = vweird.f32 %v3041_v50  ;;  %v3066_v36 = vand.u32 2147483647, %v3041_v50 }
0x177c   :  { %6585 = vpow2.f32 %v6038_v25 }
0x177d   :  { %6587 = vpow2.f32 %v6037_v21  ;;  %v3069_v24 = vor.u32 1.1754944e-38, %v3068_v62  ;;  %vm3067_vm1 = vcmp.eq.f32.partialorder %v3066_v36, 8.507059e+37 }
0x177e   :  { %6589 = vpow2.f32 %v6036_v48 }
0x1781   :  { %v6584_v33 = vpop.eup %6583 }
0x1782   :  { %v3058_v47 = vmul.f32 %v6584_v33, %v3041_v50  ;;  %v6586_v15 = vpop.eup %6585  ;;  %vm3063_vm10 = vweird.f32 %v6584_v33 }
0x1783   :  { %v6588_v13 = vpop.eup %6587  ;;  %v3040_v46 = vadd.f32 1.0, %v6586_v15  ;;  %vm3064_vm14 = vmor %vm3062_vm3, %vm3063_vm10 }
0x1784   :  { %v3059_v56 = vsub.f32 1.0, %v3058_v47  ;;  %v2954_v1 = vadd.f32 1.0, %v6588_v13  ;;  %v6590_v59 = vpop.eup %6589 }
0x1785   :  { %6591 = vrcp.f32 %v3040_v46  ;;  %v2953_v32 = vadd.f32 1.0, %v6590_v59  ;;  %v3053_v42 = vand.u32 2147483648, %v3040_v46  ;;  %vm3047_vm9 = vweird.f32 %v3040_v46 }
0x1786   :  { %v3060_v5 = vmul.f32 %v6584_v33, %v3059_v56  ;;  %6593 = vrcp.f32 %v2954_v1  ;;  %v3051_v7 = vand.u32 2147483647, %v3040_v46  ;;  %v2981_v14 = vand.u32 2147483648, %v2954_v1 }
0x1787   :  { %6595 = vrcp.f32 %v2953_v32  ;;  %vm2975_vm8 = vweird.f32 %v2954_v1  ;;  %v2979_v17 = vand.u32 2147483647, %v2954_v1 }
0x1788   :  { %v3061_v27 = vadd.f32 %v6584_v33, %v3060_v5  ;;  %vm3052_vm10 = vcmp.eq.f32.partialorder %v3051_v7, 8.507059e+37  ;;  %v2982_v53 = vor.u32 1.1754944e-38, %v2981_v14 }
0x178a   :  { %v3065_v26 = vsel %vm3064_vm14, %v6584_v33, %v3061_v27  ;;  %v3054_v33 = vor.u32 1.1754944e-38, %v3053_v42  ;;  %vm2980_vm14 = vcmp.eq.f32.partialorder %v2979_v17, 8.507059e+37  ;;  %v2964_v27 = vand.u32 2147483647, %v2953_v32 }
0x178b   :  { %v3070_v12 = vsel %vm3067_vm1, %v3069_v24, %v3065_v26  ;;  %v6592_v23 = vpop.eup %6591 }
0x178c   :  { %v6594_v57 = vpop.eup %6593  ;;  %v3043_v61 = vmul.f32 %v6592_v23, %v3040_v46  ;;  %vm3048_vm7 = vweird.f32 %v6592_v23  ;;  %v2966_v46 = vand.u32 2147483648, %v2953_v32 }
0x178d   :  { %v2971_v18 = vmul.f32 %v6594_v57, %v2954_v1  ;;  %v6596_v16 = vpop.eup %6595  ;;  %vm3049_vm12 = vmor %vm3047_vm9, %vm3048_vm7  ;;  %vm2976_vm6 = vweird.f32 %v6594_v57  ;;  %vm2960_vm7 = vweird.f32 %v2953_v32 }
0x178e   :  { %v3044_v45 = vsub.f32 1.0, %v3043_v61  ;;  %v2956_v43 = vmul.f32 %v6596_v16, %v2953_v32  ;;  %vm2977_vm3 = vmor %vm2975_vm8, %vm2976_vm6  ;;  %vm2961_vm1 = vweird.f32 %v6596_v16  ;;  %v2967_v1 = vor.u32 1.1754944e-38, %v2966_v46 }
0x178f   :  { %v2972_v6 = vsub.f32 1.0, %v2971_v18  ;;  %vm2962_vm9 = vmor %vm2960_vm7, %vm2961_vm1 }
0x1790   :  { %v3045_v10 = vmul.f32 %v6592_v23, %v3044_v45  ;;  %v2957_v8 = vsub.f32 1.0, %v2956_v43 }
0x1791   :  { %v2973_v29 = vmul.f32 %v6594_v57, %v2972_v6 }
0x1792   :  { %v3046_v54 = vadd.f32 %v6592_v23, %v3045_v10  ;;  %v2958_v21 = vmul.f32 %v6596_v16, %v2957_v8  ;;  %v3073_v10 = vrot.slane %v8025_v52, 3 }
0x1793   :  { %v2974_v50 = vadd.f32 %v6594_v57, %v2973_v29  ;;  %v3074_v29 = vrot.slane %v8025_v52, 4 }
0x1794   :  { %v3050_v37 = vsel %vm3049_vm12, %v6592_v23, %v3046_v54  ;;  %v2959_v13 = vadd.f32 %v6596_v16, %v2958_v21  ;;  %vm2965_vm12 = vcmp.eq.f32.partialorder %v2964_v27, 8.507059e+37  ;;  %v3077_v43 = vadd.f32 %v3073_v10, %v7856_v49 }
0x1795   :  { %v3055_v47 = vsel %vm3052_vm10, %v3054_v33, %v3050_v37  ;;  %v2978_v38 = vsel %vm2977_vm3, %v6594_v57, %v2974_v50  ;;  %v3078_v54 = vadd.f32 %v3074_v29, %v7860_v20 }
0x1796   :  { %v8039_v5 = vsel %vm2980_vm14, %v2982_v53, %v2978_v38  ;;  %v2963_v62 = vsel %vm2962_vm9, %v6596_v16, %v2959_v13  ;;  %v6040_v42 = vmul.f32 -1.442695, %v3077_v43 }
0x1797   :  { %v8044_v26 = vsel %vm2965_vm12, %v2967_v1, %v2963_v62  ;;  %v6041_v7 = vmul.f32 -1.442695, %v3078_v54  ;;  %v3025_v54 = vmul.f32 %v8039_v5, %v2889_v55  ;;  %vm8820_vm12 = vcmask 1043459  }
0x1798   :  { %v3009_v55 = vsub.f32 1.0, %v8044_v26 }
0x17c9   :  { %v3124_v34 = vpop.permute.xlu2 %3123 }
0x17ca   :  { %v3128_v28 = vmul.f32 %v3124_v34, %v3070_v12 }
0x17cc   :  { %3133 = vrot.lane.b32.xlu0 %v3128_v28, %s7022_s30 }
0x17e1   :  { %v3122_v25 = vpop.permute.xlu1 %3121 }
0x17e2   :  { %v3127_v56 = vmul.f32 %v3122_v25, %v3055_v47  ;;  %v2992_v15 = vpop.permute.xlu0 %2991 }
0x17e3   :  { %v2996_v48 = vmul.f32 %v2992_v15, %v8039_v5 }
0x17e4   :  { %3131 = vrot.lane.b32.xlu2 %v3127_v56, %s7022_s30 }
0x17e5   :  { %3001 = vrot.lane.b32.xlu1 %v2996_v48, %s7022_s30 }
0x17ea   :  { %v2990_v36 = vpop.permute.xlu0 %2989 }
0x17eb   :  { %v2995_v24 = vmul.f32 %v2990_v36, %v8044_v26 }
0x17ed   :  { %2999 = vrot.lane.b32.xlu1 %v2995_v24, %s7022_s30 }
0x183e   :  { %v3132_v59 = vpop.permute.xlu2 %3131  ;;  %v3134_v34 = vpop.permute.xlu0 %3133 }
0x183f   :  { %v3137_v12 = vadd.f32 %v3132_v59, %v7856_v49  ;;  %v3138_v28 = vadd.f32 %v3134_v34, %v7860_v20 }
0x1841   :  { %6597 = vtanh.f32 %v3137_v12 }
0x1842   :  { %6599 = vtanh.f32 %v3138_v28  ;;  %v3153_v28 = vrot.slane %v7993_v39, 1 }
0x1847   :  { %v6598_v23 = vpop.eup %6597 }
0x1848   :  { %v6600_v32 = vpop.eup %6599  ;;  %3145 = vrot.lane.b32.xlu0 %v6598_v23, %s7023_s1 }
0x1849   :  { %3147 = vrot.lane.b32.xlu1 %v6600_v32, %s7023_s1 }
0x1857   :  { %v3002_v57 = vpop.permute.xlu1 %3001 }
0x1858   :  { %v3006_v61 = vadd.f32 %v3002_v57, %v7835_v22  ;;  %v3154_v57 = vrot.slane %v7995_v51, 1 }
0x185a   :  { %6601 = vtanh.f32 %v3006_v61 }
0x185f   :  { %v3000_v18 = vpop.permute.xlu1 %2999 }
0x1860   :  { %v6602_v45 = vpop.eup %6601  ;;  %v3005_v6 = vadd.f32 %v3000_v18, %v7832_v41 }
0x1861   :  { %3015 = vrot.lane.b32.xlu2 %v6602_v45, %s7023_s1 }
0x1862   :  { %6603 = vtanh.f32 %v3005_v6  ;;  %v3010_v6 = vsub.f32 1.0, %v8039_v5  ;;  %v3021_v5 = vrot.slane %v8007_v60, 7 }
0x1863   :  { %6605 = vpow2.f32 %v6040_v42 }
0x1864   :  { %6607 = vpow2.f32 %v6041_v7 }
0x1868   :  { %v6604_v16 = vpop.eup %6603 }
0x1869   :  { %3013 = vrot.lane.b32.xlu2 %v6604_v16, %s7023_s1  ;;  %v6606_v50 = vpop.eup %6605 }
0x186a   :  { %v6608_v8 = vpop.eup %6607  ;;  %v3085_v37 = vadd.f32 1.0, %v6606_v50 }
0x186b   :  { %v3086_v14 = vadd.f32 1.0, %v6608_v8 }
0x186c   :  { %6609 = vrcp.f32 %v3085_v37  ;;  %v3098_v15 = vand.u32 2147483648, %v3085_v37  ;;  %vm3092_vm10 = vweird.f32 %v3085_v37  ;;  %v3096_v13 = vand.u32 2147483647, %v3085_v37 }
0x186d   :  { %6611 = vrcp.f32 %v3086_v14  ;;  %v3113_v46 = vand.u32 2147483648, %v3086_v14  ;;  %vm3107_vm14 = vweird.f32 %v3086_v14  ;;  %v3111_v27 = vand.u32 2147483647, %v3086_v14 }
0x186e   :  { %v3099_v1 = vor.u32 1.1754944e-38, %v3098_v15  ;;  %vm3097_vm7 = vcmp.eq.f32.partialorder %v3096_v13, 8.507059e+37 }
0x186f   :  { %v3114_v24 = vor.u32 1.1754944e-38, %v3113_v46  ;;  %vm3112_vm9 = vcmp.eq.f32.partialorder %v3111_v27, 8.507059e+37 }
0x1872   :  { %v6610_v33 = vpop.eup %6609 }
0x1873   :  { %v6612_v17 = vpop.eup %6611  ;;  %v3088_v25 = vmul.f32 %v6610_v33, %v3085_v37  ;;  %vm3093_vm6 = vweird.f32 %v6610_v33 }
0x1874   :  { %v3103_v47 = vmul.f32 %v6612_v17, %v3086_v14  ;;  %vm3108_vm8 = vweird.f32 %v6612_v17  ;;  %vm3094_vm3 = vmor %vm3092_vm10, %vm3093_vm6  ;;  %v4505_v14 = vsel %vm2259_vm2, %v7871_v0, %v7998_v63  ;;  %v4504_v0 = vsel %vm2259_vm2, %v7876_v3, %v8007_v60 }
0x1875   :  { %v3089_v38 = vsub.f32 1.0, %v3088_v25  ;;  %vm3109_vm1 = vmor %vm3107_vm14, %vm3108_vm8  ;;  %vm8822_vm8 = vcmask 523264  }
0x1876   :  { %v3104_v52 = vsub.f32 1.0, %v3103_v47  ;;  %v3024_v47 = vmul.f32 %v3021_v5, %v8044_v26  ;;  %vm8821_vm6 = vmmov %vm8820_vm12 }
0x1877   :  { %v3090_v21 = vmul.f32 %v6610_v33, %v3089_v38  ;;  %vm8823_vm10 = vmmov %vm8822_vm8 }
0x1878   :  { %v3105_v56 = vmul.f32 %v6612_v17, %v3104_v52 }
0x1879   :  { %v3091_v53 = vadd.f32 %v6610_v33, %v3090_v21 }
0x187a   :  { %v3106_v48 = vadd.f32 %v6612_v17, %v3105_v56 }
0x187b   :  { %v3095_v62 = vsel %vm3094_vm3, %v6610_v33, %v3091_v53 }
0x187c   :  { %v3110_v36 = vsel %vm3109_vm1, %v6612_v17, %v3106_v48  ;;  %v3100_v59 = vsel %vm3097_vm7, %v3099_v1, %v3095_v62 }
0x187d   :  { %v3115_v34 = vsel %vm3112_vm9, %v3114_v24, %v3110_v36  ;;  %v3141_v12 = vsub.f32 1.0, %v3100_v59  ;;  %v3157_v61 = vmul.f32 %v3153_v28, %v3100_v59 }
0x187e   :  { %v3142_v32 = vsub.f32 1.0, %v3115_v34  ;;  %v3158_v16 = vmul.f32 %v3154_v57, %v3115_v34 }
0x18ba   :  { %v3146_v23 = vpop.permute.xlu0 %3145 }
0x18bb   :  { %v3151_v18 = vmul.f32 %v3146_v23, %v3141_v12  ;;  %v3148_v45 = vpop.permute.xlu1 %3147  ;;  %v3016_v43 = vpop.permute.xlu2 %3015 }
0x18bc   :  { %v3152_v10 = vmul.f32 %v3148_v45, %v3142_v32  ;;  %v3020_v42 = vmul.f32 %v3016_v43, %v3010_v6 }
0x18bd   :  { %v8063_v29 = vadd.f32 %v3157_v61, %v3151_v18 }
0x18be   :  { %v8068_v7 = vadd.f32 %v3158_v16, %v3152_v10  ;;  %v8071_v8 = vadd.f32 %v3025_v54, %v3020_v42 }
0x18bf   :  { %v3170_v50 = vrot.slane %v8063_v29, 3 }
0x18c0   :  { %v3171_v37 = vrot.slane %v8068_v7, 2  ;;  %v8079_v33 = vsel %vm2262_vm5, %v4505_v14, %v8071_v8  ;;  %v3163_v52 = vrot.slane %v8071_v8, 7 }
0x18c2   :  { %v3172_v17 = vsel %vm8820_vm12, %v3171_v37, %v3170_v50 }
0x18c3   :  { %3173 = vrot.lane.b32.xlu1 %v3172_v17, %s7020_s13  ;;  %v3014_v25 = vpop.permute.xlu2 %3013 }
0x18c4   :  { %v3019_v38 = vmul.f32 %v3014_v25, %v3009_v55 }
0x18c6   :  { %v8087_v21 = vadd.f32 %v3024_v47, %v3019_v38 }
0x18c8   :  { %v8094_v63 = vsel %vm2262_vm5, %v4504_v0, %v8087_v21  ;;  %v3164_v56 = vsel %vm8821_vm6, %v3163_v52, %v8087_v21 }
0x18c9   :  { %3165 = vrot.lane.b32.xlu0 %v3164_v56, %s7023_s1 }
0x1935   :  { %v3174_v26 = vpop.permute.xlu1 %3173 }
0x193b   :  { %v3166_v53 = vpop.permute.xlu0 %3165 }
0x193c   :  { %v3176_v15 = vsel %vm127_vm0, %v3166_v53, %v3174_v26 }
0x193d   :  { %v3177_v48 = vpack.c.bf16 %v3176_v15, %v3176_v15 }
0x193f   :  { %v3179_v13 = vrot.slane %v3177_v48, 1 }
0x1941   :  { %6042 = vmatmul.msk.bf16.vlgmr.msra.gmra.mxu0 %vm8822_vm8, %v3179_v13  ;;  %6043 = vmatmul.msk.bf16.vlgmr.msra.gmra.mxu1 %vm8823_vm10, %v3179_v13 }
0x1942   :  { %4266 = vmatpush.bf16.msra.mxu0 %v7891_v11  ;;  %4279 = vmatpush.bf16.msra.mxu1 %v7893_v35  ;;  %v8117_v11 = vld [vmem:[%s8795_s5 + $0x1] ss:$0 sm:$0xff] }
0x1946   :  { %4267 = vmatpush.bf16.msra.mxu0 %v7896_v58  ;;  %4280 = vmatpush.bf16.msra.mxu1 %v7900_v40 }
0x194a   :  { %4268 = vmatpush.bf16.msra.mxu0 %v7904_v9  ;;  %4281 = vmatpush.bf16.msra.mxu1 %v7908_v2 }
0x194e   :  { %4269 = vmatpush.bf16.msra.mxu0 %v7912_v19  ;;  %4282 = vmatpush.bf16.msra.mxu1 %v7921_v31 }
0x19be   :  { %v3192_v3 = vpop.f32.mrf.mxu0  ;;  %v8112_v60 = vpop.f32.mrf.mxu1 }
0x19bf   :  { %v3384_v35 = vadd.f32 %v8117_v11, %v8112_v60  ;;  %v3254_v58 = vadd.f32 %v3192_v3, %v7950_v44  ;;  %v3211_v27 = vrot.slane %v3192_v3, 6  ;;  %v3210_v1 = vrot.slane %v3192_v3, 5 }
0x19c0   :  { %v3297_v12 = vrot.slane %v3192_v3, 4 }
0x19c1   :  { %v3386_v40 = vrot.slane %v3384_v35, 4  ;;  %v3257_v9 = vrot.slane %v3254_v58, 6  ;;  %v3256_v2 = vrot.slane %v3254_v58, 5  ;;  %v3387_v46 = vrot.slane %v3384_v35, 5 }
0x19c2   :  { %v3215_v62 = vadd.f32 %v3211_v27, %v7835_v22  ;;  %v3300_v24 = vadd.f32 %v3210_v1, %v7835_v22  ;;  %v3299_v23 = vadd.f32 %v3297_v12, %v7832_v41  ;;  %v3214_v57 = vadd.f32 %v3210_v1, %v7832_v41 }
0x19c3   :  { %3388 = vrot.lane.b32.xlu0 %v3386_v40, %s7022_s30  ;;  %3260 = vrot.lane.b32.xlu2 %v3257_v9, %s7022_s30 }
0x19c4   :  { %3258 = vrot.lane.b32.xlu1 %v3256_v2, %s7022_s30  ;;  %v6045_v36 = vmul.f32 -1.442695, %v3215_v62  ;;  %v6047_v59 = vmul.f32 -1.442695, %v3300_v24  ;;  %v6046_v61 = vmul.f32 -1.442695, %v3299_v23 }
0x19c5   :  { %v6044_v6 = vmul.f32 -1.442695, %v3214_v57 }
0x19c6   :  { %v3194_v19 = vpop.f32.mrf.mxu0  ;;  %v3207_v31 = vpop.f32.mrf.mxu1  ;;  %6613 = vpow2.f32 %v6045_v36 }
0x19c7   :  { %6615 = vpow2.f32 %v6047_v59 }
0x19cb   :  { %3390 = vrot.lane.b32.xlu2 %v3387_v46, %s7022_s30 }
0x19cc   :  { %v6614_v34 = vpop.eup %6613 }
0x19cd   :  { %v3223_v28 = vadd.f32 1.0, %v6614_v34  ;;  %v6616_v32 = vpop.eup %6615 }
0x19ce   :  { %v3308_v18 = vadd.f32 1.0, %v6616_v32 }
0x19cf   :  { %6617 = vrcp.f32 %v3223_v28  ;;  %v3250_v25 = vand.u32 2147483648, %v3223_v28  ;;  %vm3244_vm14 = vweird.f32 %v3223_v28  ;;  %v3248_v47 = vand.u32 2147483647, %v3223_v28 }
0x19d0   :  { %6619 = vpow2.f32 %v6046_v61  ;;  %v3335_v35 = vand.u32 2147483648, %v3308_v18  ;;  %vm3329_vm12 = vweird.f32 %v3308_v18  ;;  %v3333_v40 = vand.u32 2147483647, %v3308_v18 }
0x19d1   :  { %6621 = vrcp.f32 %v3308_v18  ;;  %v3251_v56 = vor.u32 1.1754944e-38, %v3250_v25  ;;  %vm3249_vm7 = vcmp.eq.f32.partialorder %v3248_v47, 8.507059e+37 }
0x19d2   :  { %6623 = vpow2.f32 %v6044_v6  ;;  %v3336_v19 = vor.u32 1.1754944e-38, %v3335_v35  ;;  %vm3334_vm8 = vcmp.eq.f32.partialorder %v3333_v40, 8.507059e+37 }
0x19d5   :  { %v6618_v45 = vpop.eup %6617 }
0x19d6   :  { %v3240_v16 = vmul.f32 %v6618_v45, %v3223_v28  ;;  %v6620_v10 = vpop.eup %6619  ;;  %vm3245_vm3 = vweird.f32 %v6618_v45 }
0x19d7   :  { %v6622_v54 = vpop.eup %6621  ;;  %v3307_v50 = vadd.f32 1.0, %v6620_v10  ;;  %vm3246_vm1 = vmor %vm3244_vm14, %vm3245_vm3 }
0x19d8   :  { %v3241_v43 = vsub.f32 1.0, %v3240_v16  ;;  %v6624_v42 = vpop.eup %6623  ;;  %v3325_v14 = vmul.f32 %v6622_v54, %v3308_v18  ;;  %vm3330_vm9 = vweird.f32 %v6622_v54 }
0x19d9   :  { %v3222_v17 = vadd.f32 1.0, %v6624_v42  ;;  %6625 = vrcp.f32 %v3307_v50  ;;  %vm3331_vm6 = vmor %vm3329_vm12, %vm3330_vm9  ;;  %v3320_v34 = vand.u32 2147483648, %v3307_v50  ;;  %vm3314_vm3 = vweird.f32 %v3307_v50 }
0x19da   :  { %v3242_v37 = vmul.f32 %v6618_v45, %v3241_v43  ;;  %v3326_v5 = vsub.f32 1.0, %v3325_v14  ;;  %v3318_v12 = vand.u32 2147483647, %v3307_v50 }
0x19db   :  { %6627 = vrcp.f32 %v3222_v17  ;;  %v3235_v32 = vand.u32 2147483648, %v3222_v17  ;;  %v3321_v57 = vor.u32 1.1754944e-38, %v3320_v34  ;;  %v3233_v61 = vand.u32 2147483647, %v3222_v17 }
0x19dc   :  { %v3243_v55 = vadd.f32 %v6618_v45, %v3242_v37  ;;  %v3327_v0 = vmul.f32 %v6622_v54, %v3326_v5  ;;  %vm3319_vm9 = vcmp.eq.f32.partialorder %v3318_v12, 8.507059e+37 }
0x19dd   :  { %v3236_v10 = vor.u32 1.1754944e-38, %v3235_v32 }
0x19de   :  { %v3247_v38 = vsel %vm3246_vm1, %v6618_v45, %v3243_v55  ;;  %v3328_v13 = vadd.f32 %v6622_v54, %v3327_v0 }
0x19df   :  { %v6626_v26 = vpop.eup %6625  ;;  %v8130_v15 = vsel %vm3249_vm7, %v3251_v56, %v3247_v38  ;;  %vm3229_vm7 = vweird.f32 %v3222_v17 }
0x19e0   :  { %v3310_v58 = vmul.f32 %v6626_v26, %v3307_v50  ;;  %v3332_v9 = vsel %vm3331_vm6, %v6622_v54, %v3328_v13  ;;  %vm3315_vm10 = vweird.f32 %v6626_v26  ;;  %vm3234_vm6 = vcmp.eq.f32.partialorder %v3233_v61, 8.507059e+37 }
0x19e1   :  { %v6628_v3 = vpop.eup %6627  ;;  %v3337_v27 = vsel %vm3334_vm8, %v3336_v19, %v3332_v9  ;;  %vm3316_vm14 = vmor %vm3314_vm3, %vm3315_vm10  ;;  %v3341_v13 = vrot.slane %v8112_v60, 5 }
0x19e2   :  { %v3225_v2 = vmul.f32 %v6628_v3, %v3222_v17  ;;  %v3311_v31 = vsub.f32 1.0, %v3310_v58  ;;  %vm3230_vm1 = vweird.f32 %v6628_v3 }
0x19e3   :  { %vm3231_vm12 = vmor %vm3229_vm7, %vm3230_vm1  ;;  %v3345_v35 = vadd.f32 %v3341_v13, %v7860_v20 }
0x19e4   :  { %v3226_v1 = vsub.f32 1.0, %v3225_v2  ;;  %v3312_v36 = vmul.f32 %v6626_v26, %v3311_v31 }
0x19e5   :  { %v6049_v58 = vmul.f32 -1.442695, %v3345_v35 }
0x19e6   :  { %v3227_v24 = vmul.f32 %v6628_v3, %v3226_v1  ;;  %v3313_v59 = vadd.f32 %v6626_v26, %v3312_v36 }
0x19e8   :  { %v3228_v28 = vadd.f32 %v6628_v3, %v3227_v24  ;;  %v3317_v23 = vsel %vm3316_vm14, %v6626_v26, %v3313_v59 }
0x19e9   :  { %v3322_v45 = vsel %vm3319_vm9, %v3321_v57, %v3317_v23 }
0x19ea   :  { %v3232_v6 = vsel %vm3231_vm12, %v6628_v3, %v3228_v28 }
0x19eb   :  { %v8135_v54 = vsel %vm3234_vm6, %v3236_v10, %v3232_v6  ;;  %v3290_v10 = vrot.slane %v8087_v21, 7  ;;  %vm8824_vm6 = vcmask 1044484  }
0x1a1d   :  { %v3261_v53 = vpop.permute.xlu2 %3260 }
0x1a1e   :  { %v3265_v48 = vmul.f32 %v3261_v53, %v8130_v15  ;;  %v3340_v53 = vrot.slane %v8112_v60, 4 }
0x1a20   :  { %3270 = vrot.lane.b32.xlu0 %v3265_v48, %s7022_s30  ;;  %v3344_v48 = vadd.f32 %v3340_v53, %v7856_v49 }
0x1a22   :  { %v6048_v3 = vmul.f32 -1.442695, %v3344_v48  ;;  %v3421_v48 = vrot.slane %v8068_v7, 1 }
0x1a25   :  { %v3391_v46 = vpop.permute.xlu2 %3390 }
0x1a26   :  { %v3395_v62 = vmul.f32 %v3391_v46, %v3337_v27 }
0x1a28   :  { %3400 = vrot.lane.b32.xlu0 %v3395_v62, %s7022_s30 }
0x1a35   :  { %v3389_v18 = vpop.permute.xlu0 %3388 }
0x1a36   :  { %v3394_v16 = vmul.f32 %v3389_v18, %v3322_v45  ;;  %v3259_v43 = vpop.permute.xlu1 %3258  ;;  %v3279_v18 = vsub.f32 1.0, %v8130_v15 }
0x1a37   :  { %v3264_v42 = vmul.f32 %v3259_v43, %v8135_v54 }
0x1a38   :  { %3398 = vrot.lane.b32.xlu1 %v3394_v16, %s7022_s30  ;;  %v3278_v16 = vsub.f32 1.0, %v8135_v54 }
0x1a39   :  { %3268 = vrot.lane.b32.xlu2 %v3264_v42, %s7022_s30  ;;  %v3294_v42 = vmul.f32 %v8130_v15, %v3163_v52 }
0x1a92   :  { %v3271_v50 = vpop.permute.xlu0 %3270 }
0x1a93   :  { %v3269_v37 = vpop.permute.xlu2 %3268  ;;  %v3275_v14 = vadd.f32 %v3271_v50, %v7835_v22 }
0x1a94   :  { %v3274_v17 = vadd.f32 %v3269_v37, %v7832_v41 }
0x1a95   :  { %6629 = vtanh.f32 %v3275_v14 }
0x1a96   :  { %6631 = vtanh.f32 %v3274_v17 }
0x1a9a   :  { %v3401_v55 = vpop.permute.xlu0 %3400 }
0x1a9b   :  { %v6630_v5 = vpop.eup %6629  ;;  %v3405_v25 = vadd.f32 %v3401_v55, %v7860_v20  ;;  %v3293_v55 = vmul.f32 %v3290_v10, %v8135_v54 }
0x1a9c   :  { %v6632_v47 = vpop.eup %6631  ;;  %3284 = vrot.lane.b32.xlu1 %v6630_v5, %s7023_s1 }
0x1a9d   :  { %6633 = vtanh.f32 %v3405_v25  ;;  %3282 = vrot.lane.b32.xlu0 %v6632_v47, %s7023_s1 }
0x1aa3   :  { %v6634_v38 = vpop.eup %6633 }
0x1aa4   :  { %3414 = vrot.lane.b32.xlu1 %v6634_v38, %s7023_s1  ;;  %v3420_v38 = vrot.slane %v8063_v29, 1 }
0x1aaa   :  { %v3399_v0 = vpop.permute.xlu1 %3398 }
0x1aab   :  { %v3404_v56 = vadd.f32 %v3399_v0, %v7856_v49 }
0x1aad   :  { %6635 = vtanh.f32 %v3404_v56 }
0x1aae   :  { %6637 = vpow2.f32 %v6048_v3 }
0x1aaf   :  { %6639 = vpow2.f32 %v6049_v58 }
0x1ab3   :  { %v6636_v26 = vpop.eup %6635 }
0x1ab4   :  { %3412 = vrot.lane.b32.xlu2 %v6636_v26, %s7023_s1  ;;  %v6638_v40 = vpop.eup %6637 }
0x1ab5   :  { %v3352_v9 = vadd.f32 1.0, %v6638_v40  ;;  %v6640_v2 = vpop.eup %6639 }
0x1ab6   :  { %v3353_v19 = vadd.f32 1.0, %v6640_v2 }
0x1ab7   :  { %6641 = vrcp.f32 %v3352_v9  ;;  %v3365_v59 = vand.u32 2147483648, %v3352_v9  ;;  %vm3359_vm10 = vweird.f32 %v3352_v9  ;;  %v3363_v34 = vand.u32 2147483647, %v3352_v9 }
0x1ab8   :  { %6643 = vrcp.f32 %v3353_v19  ;;  %v3380_v61 = vand.u32 2147483648, %v3353_v19  ;;  %vm3374_vm7 = vweird.f32 %v3353_v19  ;;  %v3378_v45 = vand.u32 2147483647, %v3353_v19 }
0x1ab9   :  { %v3366_v23 = vor.u32 1.1754944e-38, %v3365_v59  ;;  %vm3364_vm14 = vcmp.eq.f32.partialorder %v3363_v34, 8.507059e+37 }
0x1aba   :  { %v3381_v25 = vor.u32 1.1754944e-38, %v3380_v61  ;;  %vm3379_vm12 = vcmp.eq.f32.partialorder %v3378_v45, 8.507059e+37 }
0x1abd   :  { %v6642_v31 = vpop.eup %6641 }
0x1abe   :  { %v3355_v46 = vmul.f32 %v6642_v31, %v3352_v9  ;;  %v6644_v27 = vpop.eup %6643  ;;  %vm3360_vm8 = vweird.f32 %v6642_v31 }
0x1abf   :  { %v3370_v1 = vmul.f32 %v6644_v27, %v3353_v19  ;;  %vm3361_vm3 = vmor %vm3359_vm10, %vm3360_vm8  ;;  %vm3375_vm1 = vweird.f32 %v6644_v27  ;;  %vm8826_vm10 = vcmask 523264  }
0x1ac0   :  { %v3356_v62 = vsub.f32 1.0, %v3355_v46  ;;  %vm3376_vm9 = vmor %vm3374_vm7, %vm3375_vm1 }
0x1ac1   :  { %v3371_v24 = vsub.f32 1.0, %v3370_v1  ;;  %vm8825_vm8 = vmmov %vm8824_vm6 }
0x1ac2   :  { %v3357_v36 = vmul.f32 %v6642_v31, %v3356_v62 }
0x1ac3   :  { %v3372_v12 = vmul.f32 %v6644_v27, %v3371_v24 }
0x1ac4   :  { %v3358_v60 = vadd.f32 %v6642_v31, %v3357_v36 }
0x1ac5   :  { %v3373_v32 = vadd.f32 %v6644_v27, %v3372_v12 }
0x1ac6   :  { %v3362_v28 = vsel %vm3361_vm3, %v6642_v31, %v3358_v60  ;;  %vm8827_vm3 = vmmov %vm8826_vm10 }
0x1ac7   :  { %v3367_v57 = vsel %vm3364_vm14, %v3366_v23, %v3362_v28  ;;  %v3377_v17 = vsel %vm3376_vm9, %v6644_v27, %v3373_v32 }
0x1ac8   :  { %v3408_v14 = vsub.f32 1.0, %v3367_v57  ;;  %v3382_v56 = vsel %vm3379_vm12, %v3381_v25, %v3377_v17  ;;  %v3424_v15 = vmul.f32 %v3420_v38, %v3367_v57 }
0x1ac9   :  { %v3409_v53 = vsub.f32 1.0, %v3382_v56 }
0x1b0e   :  { %v3285_v6 = vpop.permute.xlu1 %3284  ;;  %v3413_v43 = vpop.permute.xlu2 %3412 }
0x1b0f   :  { %v3289_v50 = vmul.f32 %v3285_v6, %v3279_v18  ;;  %v3283_v37 = vpop.permute.xlu0 %3282  ;;  %v3418_v0 = vmul.f32 %v3413_v43, %v3408_v14 }
0x1b10   :  { %v3288_v5 = vmul.f32 %v3283_v37, %v3278_v16 }
0x1b11   :  { %v8159_v47 = vadd.f32 %v3294_v42, %v3289_v50  ;;  %v8175_v26 = vadd.f32 %v3424_v15, %v3418_v0 }
0x1b12   :  { %v8162_v21 = vadd.f32 %v3293_v55, %v3288_v5 }
0x1b13   :  { %v3430_v8 = vrot.slane %v8159_v47, 7  ;;  %v8168_v52 = vsel %vm2265_vm11, %v8079_v33, %v8159_v47  ;;  %v3425_v33 = vmul.f32 %v3421_v48, %v3382_v56  ;;  %v3437_v58 = vrot.slane %v8175_v26, 1 }
0x1b14   :  { %v8173_v54 = vsel %vm2265_vm11, %v8094_v63, %v8162_v21 }
0x1b15   :  { %v3431_v13 = vsel %vm8824_vm6, %v3430_v8, %v8162_v21 }
0x1b16   :  { %v3415_v3 = vpop.permute.xlu1 %3414  ;;  %3432 = vrot.lane.b32.xlu2 %v3431_v13, %s7023_s1 }
0x1b17   :  { %v3419_v35 = vmul.f32 %v3415_v3, %v3409_v53 }
0x1b19   :  { %v8184_v40 = vadd.f32 %v3425_v33, %v3419_v35 }
0x1b1b   :  { %v3438_v63 = vsel %vm8825_vm8, %v8184_v40, %v3437_v58 }
0x1b1c   :  { %3439 = vrot.lane.b32.xlu0 %v3438_v63, %s7020_s13 }
0x1b70   :  { %v3433_v9 = vpop.permute.xlu2 %3432 }
0x1b8e   :  { %v3440_v2 = vpop.permute.xlu0 %3439 }
0x1b8f   :  { %v3442_v19 = vsel %vm127_vm0, %v3433_v9, %v3440_v2 }
0x1b90   :  { %v3443_v31 = vpack.c.bf16 %v3442_v19, %v3442_v19 }
0x1b92   :  { %v3445_v46 = vshrl.u32 %v3443_v31, 16  ;;  %v3448_v27 = vshll.u32 %v3443_v31, 16 }
0x1b94   :  { %v3447_v62 = vrot.slane %v3445_v46, 1  ;;  %v3450_v1 = vrot.slane %v3448_v27, 2 }
0x1b96   :  { %v3451_v36 = vor.u32 %v3450_v1, %v3447_v62 }
0x1b98   :  { %6050 = vmatmul.msk.bf16.vlgmr.msrb.gmra.mxu2 %vm8826_vm10, %v3451_v36  ;;  %6051 = vmatmul.msk.bf16.vlgmr.msrb.gmra.mxu3 %vm8827_vm3, %v3451_v36 }
0x1c1b   :  { %v3464_v24 = vpop.f32.mrf.mxu2  ;;  %v8194_v60 = vpop.f32.mrf.mxu3 }
0x1c1c   :  { %v3656_v59 = vadd.f32 %v8117_v11, %v8194_v60  ;;  %v3526_v34 = vadd.f32 %v3464_v24, %v7950_v44  ;;  %v3483_v18 = vrot.slane %v3464_v24, 5  ;;  %v3569_v43 = vrot.slane %v3464_v24, 6 }
0x1c1d   :  { %v3482_v55 = vrot.slane %v3464_v24, 4 }
0x1c1e   :  { %v3658_v12 = vrot.slane %v3656_v59, 5  ;;  %v3659_v28 = vrot.slane %v3656_v59, 6  ;;  %v3529_v23 = vrot.slane %v3526_v34, 5  ;;  %v3528_v61 = vrot.slane %v3526_v34, 4 }
0x1c1f   :  { %v3571_v45 = vadd.f32 %v3483_v18, %v7832_v41  ;;  %v3572_v42 = vadd.f32 %v3569_v43, %v7835_v22  ;;  %v3487_v37 = vadd.f32 %v3483_v18, %v7835_v22  ;;  %v3486_v38 = vadd.f32 %v3482_v55, %v7832_v41 }
0x1c20   :  { %3662 = vrot.lane.b32.xlu0 %v3659_v28, %s7022_s30  ;;  %3660 = vrot.lane.b32.xlu2 %v3658_v12, %s7022_s30 }
0x1c21   :  { %3532 = vrot.lane.b32.xlu1 %v3529_v23, %s7022_s30  ;;  %v6054_v6 = vmul.f32 -1.442695, %v3571_v45  ;;  %v6055_v14 = vmul.f32 -1.442695, %v3572_v42  ;;  %v6053_v5 = vmul.f32 -1.442695, %v3487_v37 }
0x1c22   :  { %v6052_v15 = vmul.f32 -1.442695, %v3486_v38 }
0x1c23   :  { %v3466_v32 = vpop.f32.mrf.mxu2  ;;  %v3479_v57 = vpop.f32.mrf.mxu3  ;;  %6645 = vpow2.f32 %v6054_v6 }
0x1c29   :  { %3530 = vrot.lane.b32.xlu1 %v3528_v61, %s7022_s30  ;;  %v6646_v16 = vpop.eup %6645 }
0x1c2a   :  { %v3579_v10 = vadd.f32 1.0, %v6646_v16 }
0x1c2c   :  { %6647 = vrcp.f32 %v3579_v10  ;;  %v3592_v3 = vand.u32 2147483648, %v3579_v10  ;;  %vm3586_vm1 = vweird.f32 %v3579_v10  ;;  %v3590_v35 = vand.u32 2147483647, %v3579_v10 }
0x1c2d   :  { %6649 = vpow2.f32 %v6055_v14 }
0x1c2e   :  { %6651 = vpow2.f32 %v6053_v5  ;;  %v3593_v9 = vor.u32 1.1754944e-38, %v3592_v3  ;;  %vm3591_vm9 = vcmp.eq.f32.partialorder %v3590_v35, 8.507059e+37 }
0x1c2f   :  { %6653 = vpow2.f32 %v6052_v15 }
0x1c32   :  { %v6648_v50 = vpop.eup %6647 }
0x1c33   :  { %v3582_v17 = vmul.f32 %v6648_v50, %v3579_v10  ;;  %v6650_v0 = vpop.eup %6649  ;;  %vm3587_vm14 = vweird.f32 %v6648_v50 }
0x1c34   :  { %v6652_v53 = vpop.eup %6651  ;;  %v3580_v48 = vadd.f32 1.0, %v6650_v0  ;;  %vm3588_vm7 = vmor %vm3586_vm1, %vm3587_vm14 }
0x1c35   :  { %v3583_v25 = vsub.f32 1.0, %v3582_v17  ;;  %v3495_v33 = vadd.f32 1.0, %v6652_v53  ;;  %v6654_v2 = vpop.eup %6653 }
0x1c36   :  { %6655 = vrcp.f32 %v3580_v48  ;;  %v3494_v62 = vadd.f32 1.0, %v6654_v2  ;;  %v3607_v61 = vand.u32 2147483648, %v3580_v48  ;;  %vm3601_vm6 = vweird.f32 %v3580_v48 }
0x1c37   :  { %v3584_v56 = vmul.f32 %v6648_v50, %v3583_v25  ;;  %6657 = vrcp.f32 %v3495_v33  ;;  %v3605_v18 = vand.u32 2147483647, %v3580_v48  ;;  %v3522_v10 = vand.u32 2147483648, %v3495_v33 }
0x1c38   :  { %6659 = vrcp.f32 %v3494_v62  ;;  %v3608_v43 = vor.u32 1.1754944e-38, %v3607_v61  ;;  %vm3516_vm3 = vweird.f32 %v3495_v33  ;;  %v3520_v42 = vand.u32 2147483647, %v3495_v33 }
0x1c39   :  { %v3585_v13 = vadd.f32 %v6648_v50, %v3584_v56  ;;  %vm3606_vm14 = vcmp.eq.f32.partialorder %v3605_v18, 8.507059e+37  ;;  %v3523_v5 = vor.u32 1.1754944e-38, %v3522_v10  ;;  %v3507_v15 = vand.u32 2147483648, %v3494_v62 }
0x1c3a   :  { %v3505_v53 = vand.u32 2147483647, %v3494_v62 }
0x1c3b   :  { %v3589_v63 = vsel %vm3588_vm7, %v6648_v50, %v3585_v13  ;;  %vm3521_vm7 = vcmp.eq.f32.partialorder %v3520_v42, 8.507059e+37  ;;  %v3508_v13 = vor.u32 1.1754944e-38, %v3507_v15 }
0x1c3c   :  { %v3594_v31 = vsel %vm3591_vm9, %v3593_v9, %v3589_v63  ;;  %v6656_v27 = vpop.eup %6655 }
0x1c3d   :  { %v6658_v1 = vpop.eup %6657  ;;  %v3597_v36 = vmul.f32 %v6656_v27, %v3580_v48  ;;  %vm3602_vm12 = vweird.f32 %v6656_v27 }
0x1c3e   :  { %v3512_v24 = vmul.f32 %v6658_v1, %v3495_v33  ;;  %v6660_v12 = vpop.eup %6659  ;;  %vm3603_vm8 = vmor %vm3601_vm6, %vm3602_vm12  ;;  %vm3517_vm10 = vweird.f32 %v6658_v1  ;;  %vm3501_vm12 = vweird.f32 %v3494_v62 }
0x1c3f   :  { %v3598_v59 = vsub.f32 1.0, %v3597_v36  ;;  %v3497_v32 = vmul.f32 %v6660_v12, %v3494_v62  ;;  %vm3518_vm1 = vmor %vm3516_vm3, %vm3517_vm10  ;;  %vm3502_vm9 = vweird.f32 %v6660_v12 }
0x1c40   :  { %v3513_v34 = vsub.f32 1.0, %v3512_v24  ;;  %vm3503_vm6 = vmor %vm3501_vm12, %vm3502_vm9 }
0x1c41   :  { %v3599_v28 = vmul.f32 %v6656_v27, %v3598_v59  ;;  %v3498_v6 = vsub.f32 1.0, %v3497_v32 }
0x1c42   :  { %v3514_v23 = vmul.f32 %v6658_v1, %v3513_v34  ;;  %v3612_v34 = vrot.slane %v8194_v60, 5 }
0x1c43   :  { %v3600_v57 = vadd.f32 %v6656_v27, %v3599_v28  ;;  %v3499_v17 = vmul.f32 %v6660_v12, %v3498_v6 }
0x1c44   :  { %v3515_v45 = vadd.f32 %v6658_v1, %v3514_v23  ;;  %v3616_v28 = vadd.f32 %v3612_v34, %v7856_v49 }
0x1c45   :  { %v3604_v16 = vsel %vm3603_vm8, %v6656_v27, %v3600_v57  ;;  %v3500_v56 = vadd.f32 %v6660_v12, %v3499_v17  ;;  %vm3506_vm8 = vcmp.eq.f32.partialorder %v3505_v53, 8.507059e+37 }
0x1c46   :  { %v3609_v37 = vsel %vm3606_vm14, %v3608_v43, %v3604_v16  ;;  %v3519_v14 = vsel %vm3518_vm1, %v6658_v1, %v3515_v45  ;;  %v6056_v32 = vmul.f32 -1.442695, %v3616_v28 }
0x1c47   :  { %v8208_v38 = vsel %vm3521_vm7, %v3523_v5, %v3519_v14  ;;  %v3504_v48 = vsel %vm3503_vm6, %v6660_v12, %v3500_v56  ;;  %v3613_v12 = vrot.slane %v8194_v60, 6 }
0x1c48   :  { %v8213_v33 = vsel %vm3506_vm8, %v3508_v13, %v3504_v48  ;;  %vm8828_vm8 = vcmask 1045509  }
0x1c49   :  { %v3617_v23 = vadd.f32 %v3613_v12, %v7860_v20  ;;  %v3566_v12 = vmul.f32 %v8208_v38, %v3430_v8  ;;  %v3550_v47 = vsub.f32 1.0, %v8213_v33  ;;  %v3562_v8 = vrot.slane %v8162_v21, 7 }
0x1c4b   :  { %v6057_v57 = vmul.f32 -1.442695, %v3617_v23 }
0x1c7a   :  { %v3661_v19 = vpop.permute.xlu2 %3660 }
0x1c7b   :  { %v3666_v46 = vmul.f32 %v3661_v19, %v3594_v31 }
0x1c7d   :  { %3670 = vrot.lane.b32.xlu0 %v3666_v46, %s7022_s30 }
0x1c92   :  { %v3663_v50 = vpop.permute.xlu0 %3662 }
0x1c93   :  { %v3667_v55 = vmul.f32 %v3663_v50, %v3609_v37  ;;  %v3533_v25 = vpop.permute.xlu1 %3532 }
0x1c94   :  { %v3537_v0 = vmul.f32 %v3533_v25, %v8208_v38 }
0x1c95   :  { %3672 = vrot.lane.b32.xlu1 %v3667_v55, %s7022_s30 }
0x1c96   :  { %3542 = vrot.lane.b32.xlu2 %v3537_v0, %s7022_s30 }
0x1c9b   :  { %v3531_v3 = vpop.permute.xlu1 %3530 }
0x1c9c   :  { %v3536_v35 = vmul.f32 %v3531_v3, %v8213_v33 }
0x1c9e   :  { %3540 = vrot.lane.b32.xlu2 %v3536_v35, %s7022_s30 }
0x1cef   :  { %v3671_v63 = vpop.permute.xlu0 %3670 }
0x1cf0   :  { %v3676_v9 = vadd.f32 %v3671_v63, %v7856_v49  ;;  %v3543_v2 = vpop.permute.xlu2 %3542 }
0x1cf1   :  { %v3547_v19 = vadd.f32 %v3543_v2, %v7835_v22  ;;  %v3692_v2 = vrot.slane %v8184_v40, 1 }
0x1cf2   :  { %6661 = vtanh.f32 %v3676_v9 }
0x1cf3   :  { %6663 = vtanh.f32 %v3547_v19 }
0x1cf8   :  { %v6662_v31 = vpop.eup %6661  ;;  %v3541_v46 = vpop.permute.xlu2 %3540 }
0x1cf9   :  { %3684 = vrot.lane.b32.xlu1 %v6662_v31, %s7023_s1  ;;  %v6664_v27 = vpop.eup %6663  ;;  %v3546_v62 = vadd.f32 %v3541_v46, %v7832_v41 }
0x1cfa   :  { %3556 = vrot.lane.b32.xlu0 %v6664_v27, %s7023_s1 }
0x1cfb   :  { %6665 = vtanh.f32 %v3546_v62 }
0x1d01   :  { %v6666_v1 = vpop.eup %6665 }
0x1d02   :  { %3554 = vrot.lane.b32.xlu0 %v6666_v1, %s7023_s1 }
0x1d07   :  { %v3673_v36 = vpop.permute.xlu1 %3672 }
0x1d08   :  { %v3677_v24 = vadd.f32 %v3673_v36, %v7860_v20  ;;  %v3551_v36 = vsub.f32 1.0, %v8208_v38 }
0x1d0a   :  { %6667 = vtanh.f32 %v3677_v24 }
0x1d0b   :  { %6669 = vpow2.f32 %v6056_v32 }
0x1d0c   :  { %6671 = vpow2.f32 %v6057_v57 }
0x1d10   :  { %v6668_v59 = vpop.eup %6667 }
0x1d11   :  { %3686 = vrot.lane.b32.xlu2 %v6668_v59, %s7023_s1  ;;  %v6670_v61 = vpop.eup %6669 }
0x1d12   :  { %v6672_v18 = vpop.eup %6671  ;;  %v3624_v45 = vadd.f32 1.0, %v6670_v61 }
0x1d13   :  { %v3625_v6 = vadd.f32 1.0, %v6672_v18  ;;  %v3565_v18 = vmul.f32 %v3562_v8, %v8213_v33 }
0x1d14   :  { %6673 = vrcp.f32 %v3624_v45  ;;  %vm3631_vm14 = vweird.f32 %v3624_v45  ;;  %v3637_v5 = vand.u32 2147483648, %v3624_v45  ;;  %v3635_v0 = vand.u32 2147483647, %v3624_v45 }
0x1d15   :  { %6675 = vrcp.f32 %v3625_v6  ;;  %v3652_v25 = vand.u32 2147483648, %v3625_v6  ;;  %vm3646_vm7 = vweird.f32 %v3625_v6  ;;  %v3650_v56 = vand.u32 2147483647, %v3625_v6 }
0x1d16   :  { %v3638_v48 = vor.u32 1.1754944e-38, %v3637_v5  ;;  %vm3636_vm12 = vcmp.eq.f32.partialorder %v3635_v0, 8.507059e+37 }
0x1d17   :  { %v3653_v13 = vor.u32 1.1754944e-38, %v3652_v25  ;;  %vm3651_vm6 = vcmp.eq.f32.partialorder %v3650_v56, 8.507059e+37 }
0x1d1a   :  { %v6674_v16 = vpop.eup %6673 }
0x1d1b   :  { %v6676_v10 = vpop.eup %6675  ;;  %v3627_v43 = vmul.f32 %v6674_v16, %v3624_v45  ;;  %vm3632_vm10 = vweird.f32 %v6674_v16 }
0x1d1c   :  { %v3642_v42 = vmul.f32 %v6676_v10, %v3625_v6  ;;  %vm3647_vm3 = vweird.f32 %v6676_v10  ;;  %vm3633_vm1 = vmor %vm3631_vm14, %vm3632_vm10 }
0x1d1d   :  { %v3628_v50 = vsub.f32 1.0, %v3627_v43  ;;  %vm3648_vm9 = vmor %vm3646_vm7, %vm3647_vm3  ;;  %vm8830_vm3 = vcmask 523264  }
0x1d1e   :  { %v3643_v60 = vsub.f32 1.0, %v3642_v42  ;;  %vm8829_vm10 = vmmov %vm8828_vm8 }
0x1d1f   :  { %v3629_v37 = vmul.f32 %v6674_v16, %v3628_v50  ;;  %vm8831_vm14 = vmmov %vm8830_vm3 }
0x1d20   :  { %v3644_v14 = vmul.f32 %v6676_v10, %v3643_v60 }
0x1d21   :  { %v3630_v17 = vadd.f32 %v6674_v16, %v3629_v37 }
0x1d22   :  { %v3645_v55 = vadd.f32 %v6676_v10, %v3644_v14 }
0x1d23   :  { %v3634_v15 = vsel %vm3633_vm1, %v6674_v16, %v3630_v17 }
0x1d24   :  { %v3649_v53 = vsel %vm3648_vm9, %v6676_v10, %v3645_v55  ;;  %v3639_v3 = vsel %vm3636_vm12, %v3638_v48, %v3634_v15 }
0x1d25   :  { %v3654_v35 = vsel %vm3651_vm6, %v3653_v13, %v3649_v53  ;;  %v3680_v63 = vsub.f32 1.0, %v3639_v3  ;;  %v3695_v46 = vmul.f32 %v3639_v3, %v3437_v58 }
0x1d26   :  { %v3681_v9 = vsub.f32 1.0, %v3654_v35  ;;  %v3696_v62 = vmul.f32 %v3692_v2, %v3654_v35 }
0x1d6b   :  { %v3685_v19 = vpop.permute.xlu1 %3684  ;;  %v3687_v31 = vpop.permute.xlu2 %3686 }
0x1d6c   :  { %v3690_v27 = vmul.f32 %v3685_v19, %v3680_v63  ;;  %v3691_v1 = vmul.f32 %v3687_v31, %v3681_v9  ;;  %v3557_v59 = vpop.permute.xlu0 %3556 }
0x1d6d   :  { %v3561_v28 = vmul.f32 %v3557_v59, %v3551_v36 }
0x1d6e   :  { %v8233_v24 = vadd.f32 %v3695_v46, %v3690_v27  ;;  %v8235_v34 = vadd.f32 %v3696_v62, %v3691_v1 }
0x1d6f   :  { %v8242_v58 = vadd.f32 %v3566_v12, %v3561_v28 }
0x1d70   :  { %v3708_v23 = vrot.slane %v8233_v24, 7  ;;  %v3709_v32 = vrot.slane %v8235_v34, 6 }
0x1d71   :  { %v8248_v61 = vsel %vm2268_vm15, %v8168_v52, %v8242_v58  ;;  %v3701_v6 = vrot.slane %v8242_v58, 7 }
0x1d72   :  { %v3710_v57 = vsel %vm8828_vm8, %v3709_v32, %v3708_v23 }
0x1d73   :  { %3711 = vrot.lane.b32.xlu2 %v3710_v57, %s7020_s13 }
0x1d74   :  { %v3555_v38 = vpop.permute.xlu0 %3554 }
0x1d75   :  { %v3560_v45 = vmul.f32 %v3555_v38, %v3550_v47 }
0x1d77   :  { %v8255_v16 = vadd.f32 %v3565_v18, %v3560_v45 }
0x1d79   :  { %v8260_v10 = vsel %vm2268_vm15, %v8173_v54, %v8255_v16  ;;  %v3702_v52 = vsel %vm8829_vm10, %v3701_v6, %v8255_v16 }
0x1d7a   :  { %3703 = vrot.lane.b32.xlu1 %v3702_v52, %s7023_s1 }
0x1dcd   :  { %v3712_v21 = vpop.permute.xlu2 %3711 }
0x1dec   :  { %v3704_v43 = vpop.permute.xlu1 %3703 }
0x1ded   :  { %v3714_v33 = vsel %vm127_vm0, %v3704_v43, %v3712_v21 }
0x1dee   :  { %v3715_v42 = vpack.c.bf16 %v3714_v33, %v3714_v33 }
0x1df0   :  { %v3717_v50 = vrot.slane %v3715_v42, 2 }
0x1df2   :  { %6058 = vmatmul.msk.bf16.vlgmr.msrb.gmra.mxu0 %vm8830_vm3, %v3717_v50  ;;  %6059 = vmatmul.msk.bf16.vlgmr.msrb.gmra.mxu1 %vm8831_vm14, %v3717_v50 }
0x1e6f   :  { %v3730_v60 = vpop.f32.mrf.mxu0  ;;  %v8270_v54 = vpop.f32.mrf.mxu1 }
0x1e70   :  { %v3792_v37 = vadd.f32 %v3730_v60, %v7950_v44  ;;  %v3924_v14 = vadd.f32 %v8117_v11, %v8270_v54  ;;  %v3836_v15 = vrot.slane %v3730_v60, 7  ;;  %v3749_v13 = vrot.slane %v3730_v60, 4 }
0x1e71   :  { %v3835_v3 = vrot.slane %v3730_v60, 6  ;;  %v3748_v2 = vrot.slane %v3730_v60, 3 }
0x1e72   :  { %v3795_v17 = vrot.slane %v3792_v37, 4  ;;  %v3926_v55 = vrot.slane %v3924_v14, 6  ;;  %v3927_v5 = vrot.slane %v3924_v14, 7  ;;  %v3794_v56 = vrot.slane %v3792_v37, 3 }
0x1e73   :  { %v3840_v53 = vadd.f32 %v3836_v15, %v7835_v22  ;;  %v3753_v63 = vadd.f32 %v3749_v13, %v7835_v22  ;;  %v3839_v9 = vadd.f32 %v3835_v3, %v7832_v41  ;;  %v3752_v27 = vadd.f32 %v3748_v2, %v7832_v41 }
0x1e74   :  { %3798 = vrot.lane.b32.xlu0 %v3795_v17, %s7022_s30  ;;  %3928 = vrot.lane.b32.xlu1 %v3926_v55, %s7022_s30 }
0x1e75   :  { %3930 = vrot.lane.b32.xlu2 %v3927_v5, %s7022_s30  ;;  %v6063_v48 = vmul.f32 -1.442695, %v3840_v53  ;;  %v6061_v19 = vmul.f32 -1.442695, %v3753_v63  ;;  %v6062_v31 = vmul.f32 -1.442695, %v3839_v9 }
0x1e76   :  { %v6060_v1 = vmul.f32 -1.442695, %v3752_v27 }
0x1e77   :  { %v3732_v25 = vpop.f32.mrf.mxu0  ;;  %v3745_v0 = vpop.f32.mrf.mxu1  ;;  %6677 = vpow2.f32 %v6063_v48 }
0x1e7c   :  { %3796 = vrot.lane.b32.xlu0 %v3794_v56, %s7022_s30 }
0x1e7d   :  { %v6678_v11 = vpop.eup %6677 }
0x1e7e   :  { %v3848_v35 = vadd.f32 1.0, %v6678_v11 }
0x1e80   :  { %6679 = vrcp.f32 %v3848_v35  ;;  %v3875_v8 = vand.u32 2147483648, %v3848_v35  ;;  %vm3869_vm7 = vweird.f32 %v3848_v35  ;;  %v3873_v38 = vand.u32 2147483647, %v3848_v35 }
0x1e81   :  { %6681 = vpow2.f32 %v6061_v19 }
0x1e82   :  { %6683 = vpow2.f32 %v6062_v31  ;;  %v3876_v21 = vor.u32 1.1754944e-38, %v3875_v8  ;;  %vm3874_vm12 = vcmp.eq.f32.partialorder %v3873_v38, 8.507059e+37 }
0x1e83   :  { %6685 = vpow2.f32 %v6060_v1 }
0x1e86   :  { %v6680_v46 = vpop.eup %6679 }
0x1e87   :  { %v3865_v62 = vmul.f32 %v6680_v46, %v3848_v35  ;;  %v6682_v36 = vpop.eup %6681  ;;  %vm3870_vm1 = vweird.f32 %v6680_v46 }
0x1e88   :  { %v6684_v12 = vpop.eup %6683  ;;  %v3761_v28 = vadd.f32 1.0, %v6682_v36  ;;  %vm3871_vm9 = vmor %vm3869_vm7, %vm3870_vm1 }
0x1e89   :  { %v3866_v59 = vsub.f32 1.0, %v3865_v62  ;;  %v3847_v23 = vadd.f32 1.0, %v6684_v12  ;;  %v6686_v57 = vpop.eup %6685 }
0x1e8a   :  { %6687 = vrcp.f32 %v3761_v28  ;;  %v3760_v18 = vadd.f32 1.0, %v6686_v57  ;;  %v3788_v48 = vand.u32 2147483648, %v3761_v28  ;;  %vm3782_vm10 = vweird.f32 %v3761_v28 }
0x1e8b   :  { %v3867_v32 = vmul.f32 %v6680_v46, %v3866_v59  ;;  %6689 = vrcp.f32 %v3847_v23  ;;  %v3860_v11 = vand.u32 2147483648, %v3847_v23  ;;  %v3786_v13 = vand.u32 2147483647, %v3761_v28 }
0x1e8c   :  { %6691 = vrcp.f32 %v3760_v18  ;;  %vm3854_vm3 = vweird.f32 %v3847_v23  ;;  %v3858_v3 = vand.u32 2147483647, %v3847_v23  ;;  %v3789_v2 = vor.u32 1.1754944e-38, %v3788_v48 }
0x1e8d   :  { %v3868_v47 = vadd.f32 %v6680_v46, %v3867_v32  ;;  %v3861_v19 = vor.u32 1.1754944e-38, %v3860_v11  ;;  %vm3787_vm7 = vcmp.eq.f32.partialorder %v3786_v13, 8.507059e+37  ;;  %v3773_v12 = vand.u32 2147483648, %v3760_v18 }
0x1e8f   :  { %v3872_v45 = vsel %vm3871_vm9, %v6680_v46, %v3868_v47  ;;  %vm3859_vm9 = vcmp.eq.f32.partialorder %v3858_v3, 8.507059e+37  ;;  %v3774_v32 = vor.u32 1.1754944e-38, %v3773_v12 }
0x1e90   :  { %v6688_v52 = vpop.eup %6687  ;;  %v3877_v42 = vsel %vm3874_vm12, %v3876_v21, %v3872_v45 }
0x1e91   :  { %v6690_v43 = vpop.eup %6689  ;;  %v3778_v60 = vmul.f32 %v6688_v52, %v3761_v28  ;;  %vm3783_vm6 = vweird.f32 %v6688_v52  ;;  %v3771_v28 = vand.u32 2147483647, %v3760_v18 }
0x1e92   :  { %v3850_v37 = vmul.f32 %v6690_v43, %v3847_v23  ;;  %v6692_v17 = vpop.eup %6691  ;;  %vm3855_vm8 = vweird.f32 %v6690_v43  ;;  %vm3784_vm14 = vmor %vm3782_vm10, %vm3783_vm6  ;;  %vm3767_vm6 = vweird.f32 %v3760_v18 }
0x1e93   :  { %v3779_v14 = vsub.f32 1.0, %v3778_v60  ;;  %v3763_v25 = vmul.f32 %v6692_v17, %v3760_v18  ;;  %vm3856_vm1 = vmor %vm3854_vm3, %vm3855_vm8  ;;  %vm3768_vm12 = vweird.f32 %v6692_v17  ;;  %vm3772_vm10 = vcmp.eq.f32.partialorder %v3771_v28, 8.507059e+37 }
0x1e94   :  { %v3851_v55 = vsub.f32 1.0, %v3850_v37  ;;  %vm3769_vm8 = vmor %vm3767_vm6, %vm3768_vm12 }
0x1e95   :  { %v3780_v5 = vmul.f32 %v6688_v52, %v3779_v14  ;;  %v3764_v15 = vsub.f32 1.0, %v3763_v25 }
0x1e96   :  { %v3852_v0 = vmul.f32 %v6690_v43, %v3851_v55  ;;  %v3881_v55 = vrot.slane %v8270_v54, 7 }
0x1e97   :  { %v3781_v56 = vadd.f32 %v6688_v52, %v3780_v5  ;;  %v3765_v63 = vmul.f32 %v6692_v17, %v3764_v15 }
0x1e98   :  { %v3853_v53 = vadd.f32 %v6690_v43, %v3852_v0  ;;  %v3885_v25 = vadd.f32 %v3881_v55, %v7860_v20 }
0x1e99   :  { %v3785_v35 = vsel %vm3784_vm14, %v6688_v52, %v3781_v56  ;;  %v3766_v36 = vadd.f32 %v6692_v17, %v3765_v63 }
0x1e9a   :  { %v3857_v9 = vsel %vm3856_vm1, %v6690_v43, %v3853_v53  ;;  %v8284_v46 = vsel %vm3787_vm7, %v3789_v2, %v3785_v35  ;;  %v6065_v56 = vmul.f32 -1.442695, %v3885_v25 }
0x1e9b   :  { %v3862_v62 = vsel %vm3859_vm9, %v3861_v19, %v3857_v9  ;;  %v3770_v23 = vsel %vm3769_vm8, %v6692_v17, %v3766_v36  ;;  %v3880_v17 = vrot.slane %v8270_v54, 6 }
0x1e9c   :  { %v8289_v47 = vsel %vm3772_vm10, %v3774_v32, %v3770_v23  ;;  %vm8832_vm10 = vcmask 1046534  }
0x1e9d   :  { %v3884_v5 = vadd.f32 %v3880_v17, %v7856_v49 }
0x1e9f   :  { %v6064_v0 = vmul.f32 -1.442695, %v3884_v5 }
0x1ecf   :  { %v3931_v33 = vpop.permute.xlu2 %3930 }
0x1ed0   :  { %v3935_v50 = vmul.f32 %v3931_v33, %v3877_v42 }
0x1ed2   :  { %3940 = vrot.lane.b32.xlu0 %v3935_v50, %s7022_s30 }
0x1ee6   :  { %v3799_v31 = vpop.permute.xlu0 %3798  ;;  %v3929_v27 = vpop.permute.xlu1 %3928 }
0x1ee7   :  { %v3803_v1 = vmul.f32 %v3799_v31, %v8284_v46  ;;  %v3934_v59 = vmul.f32 %v3929_v27, %v3862_v62 }
0x1ee9   :  { %3808 = vrot.lane.b32.xlu1 %v3803_v1, %s7022_s30  ;;  %3938 = vrot.lane.b32.xlu2 %v3934_v59, %s7022_s30 }
0x1eee   :  { %v3797_v57 = vpop.permute.xlu0 %3796 }
0x1eef   :  { %v3802_v8 = vmul.f32 %v3797_v57, %v8289_v47 }
0x1ef1   :  { %3806 = vrot.lane.b32.xlu1 %v3802_v8, %s7022_s30  ;;  %v3817_v8 = vsub.f32 1.0, %v8284_v46 }
0x1f43   :  { %v3939_v38 = vpop.permute.xlu2 %3938 }
0x1f44   :  { %v3944_v45 = vadd.f32 %v3939_v38, %v7856_v49  ;;  %v3941_v52 = vpop.permute.xlu0 %3940 }
0x1f45   :  { %v3945_v18 = vadd.f32 %v3941_v52, %v7860_v20 }
0x1f46   :  { %6693 = vtanh.f32 %v3944_v45  ;;  %v3960_v45 = vrot.slane %v8233_v24, 1 }
0x1f47   :  { %6695 = vtanh.f32 %v3945_v18 }
0x1f4c   :  { %v6694_v21 = vpop.eup %6693 }
0x1f4d   :  { %3952 = vrot.lane.b32.xlu0 %v6694_v21, %s7023_s1  ;;  %v6696_v43 = vpop.eup %6695 }
0x1f4e   :  { %3954 = vrot.lane.b32.xlu1 %v6696_v43, %s7023_s1  ;;  %v3832_v43 = vmul.f32 %v8284_v46, %v3701_v6  ;;  %v3816_v6 = vsub.f32 1.0, %v8289_v47  ;;  %v3828_v46 = vrot.slane %v8255_v16, 7 }
0x1f5b   :  { %v3809_v33 = vpop.permute.xlu1 %3808 }
0x1f5c   :  { %v3813_v42 = vadd.f32 %v3809_v33, %v7835_v22 }
0x1f5e   :  { %6697 = vtanh.f32 %v3813_v42 }
0x1f63   :  { %v3807_v50 = vpop.permute.xlu1 %3806 }
0x1f64   :  { %v6698_v60 = vpop.eup %6697  ;;  %v3812_v37 = vadd.f32 %v3807_v50, %v7832_v41 }
0x1f65   :  { %3822 = vrot.lane.b32.xlu2 %v6698_v60, %s7023_s1 }
0x1f66   :  { %6699 = vtanh.f32 %v3812_v37 }
0x1f67   :  { %6701 = vpow2.f32 %v6064_v0 }
0x1f68   :  { %6703 = vpow2.f32 %v6065_v56 }
0x1f6c   :  { %v6700_v14 = vpop.eup %6699 }
0x1f6d   :  { %3820 = vrot.lane.b32.xlu2 %v6700_v14, %s7023_s1  ;;  %v6702_v15 = vpop.eup %6701  ;;  %v3961_v14 = vrot.slane %v8235_v34, 1 }
0x1f6e   :  { %v6704_v53 = vpop.eup %6703  ;;  %v3892_v48 = vadd.f32 1.0, %v6702_v15 }
0x1f6f   :  { %v3893_v11 = vadd.f32 1.0, %v6704_v53  ;;  %v3831_v53 = vmul.f32 %v3828_v46, %v8289_v47 }
0x1f70   :  { %6705 = vrcp.f32 %v3892_v48  ;;  %v3905_v27 = vand.u32 2147483648, %v3892_v48  ;;  %vm3899_vm14 = vweird.f32 %v3892_v48  ;;  %v3903_v62 = vand.u32 2147483647, %v3892_v48 }
0x1f71   :  { %6707 = vrcp.f32 %v3893_v11  ;;  %v3920_v59 = vand.u32 2147483648, %v3893_v11  ;;  %vm3914_vm9 = vweird.f32 %v3893_v11  ;;  %v3918_v28 = vand.u32 2147483647, %v3893_v11 }
0x1f72   :  { %v3906_v12 = vor.u32 1.1754944e-38, %v3905_v27  ;;  %vm3904_vm12 = vcmp.eq.f32.partialorder %v3903_v62, 8.507059e+37 }
0x1f73   :  { %v3921_v57 = vor.u32 1.1754944e-38, %v3920_v59  ;;  %vm3919_vm8 = vcmp.eq.f32.partialorder %v3918_v28, 8.507059e+37  ;;  %v8351_v59 = vld [vmem:[%s8795_s5 + $0x1] ss:$0 sm:$0xff] }
0x1f76   :  { %v6706_v13 = vpop.eup %6705 }
0x1f77   :  { %v6708_v3 = vpop.eup %6707  ;;  %v3895_v35 = vmul.f32 %v6706_v13, %v3892_v48  ;;  %vm3900_vm3 = vweird.f32 %v6706_v13 }
0x1f78   :  { %v3910_v63 = vmul.f32 %v6708_v3, %v3893_v11  ;;  %vm3901_vm1 = vmor %vm3899_vm14, %vm3900_vm3  ;;  %vm3915_vm7 = vweird.f32 %v6708_v3  ;;  %vm8834_vm14 = vcmask 523264  }
0x1f79   :  { %v3896_v9 = vsub.f32 1.0, %v3895_v35  ;;  %vm3916_vm6 = vmor %vm3914_vm9, %vm3915_vm7 }
0x1f7a   :  { %v3911_v54 = vsub.f32 1.0, %v3910_v63  ;;  %vm8833_vm3 = vmmov %vm8832_vm10 }
0x1f7b   :  { %v3897_v2 = vmul.f32 %v6706_v13, %v3896_v9 }
0x1f7c   :  { %v3912_v19 = vmul.f32 %v6708_v3, %v3911_v54 }
0x1f7d   :  { %v3898_v31 = vadd.f32 %v6706_v13, %v3897_v2 }
0x1f7e   :  { %v3913_v1 = vadd.f32 %v6708_v3, %v3912_v19 }
0x1f7f   :  { %v3902_v36 = vsel %vm3901_vm1, %v6706_v13, %v3898_v31  ;;  %vm8835_vm1 = vmmov %vm8834_vm14 }
0x1f80   :  { %v3907_v23 = vsel %vm3904_vm12, %v3906_v12, %v3902_v36  ;;  %v3917_v32 = vsel %vm3916_vm6, %v6708_v3, %v3913_v1 }
0x1f81   :  { %v3948_v38 = vsub.f32 1.0, %v3907_v23  ;;  %v3922_v18 = vsel %vm3919_vm8, %v3921_v57, %v3917_v32  ;;  %v3964_v42 = vmul.f32 %v3960_v45, %v3907_v23 }
0x1f82   :  { %v3949_v37 = vsub.f32 1.0, %v3922_v18  ;;  %v3965_v25 = vmul.f32 %v3961_v14, %v3922_v18 }
0x1fbf   :  { %v3823_v52 = vpop.permute.xlu2 %3822  ;;  %v3953_v21 = vpop.permute.xlu0 %3952 }
0x1fc0   :  { %v3827_v33 = vmul.f32 %v3823_v52, %v3817_v8  ;;  %v3958_v50 = vmul.f32 %v3953_v21, %v3948_v38  ;;  %v3955_v55 = vpop.permute.xlu1 %3954 }
0x1fc1   :  { %v3959_v58 = vmul.f32 %v3955_v55, %v3949_v37 }
0x1fc2   :  { %v8310_v60 = vadd.f32 %v3832_v43, %v3827_v33  ;;  %v8313_v17 = vadd.f32 %v3964_v42, %v3958_v50 }
0x1fc3   :  { %v8320_v0 = vadd.f32 %v3965_v25, %v3959_v58 }
0x1fc4   :  { %v8318_v5 = vsel %vm2271_vm4, %v8248_v61, %v8310_v60  ;;  %v3977_v56 = vrot.slane %v8313_v17, 5  ;;  %v3970_v13 = vrot.slane %v8310_v60, 7 }
0x1fc5   :  { %v3978_v11 = vrot.slane %v8320_v0, 4 }
0x1fc7   :  { %v3821_v15 = vpop.permute.xlu2 %3820  ;;  %v3979_v3 = vsel %vm8832_vm10, %v3978_v11, %v3977_v56 }
0x1fc8   :  { %v3826_v48 = vmul.f32 %v3821_v15, %v3816_v6  ;;  %3980 = vrot.lane.b32.xlu1 %v3979_v3, %s7020_s13 }
0x1fca   :  { %v8328_v61 = vadd.f32 %v3831_v53, %v3826_v48 }
0x1fcc   :  { %v8335_v16 = vsel %vm2271_vm4, %v8260_v10, %v8328_v61  ;;  %v3971_v47 = vsel %vm8833_vm3, %v3970_v13, %v8328_v61 }
0x1fcd   :  { %3972 = vrot.lane.b32.xlu0 %v3971_v47, %s7023_s1 }
0x203a   :  { %v3981_v35 = vpop.permute.xlu1 %3980 }
0x203f   :  { %v3973_v63 = vpop.permute.xlu0 %3972 }
0x2040   :  { %v3983_v9 = vsel %vm127_vm0, %v3973_v63, %v3981_v35 }
0x2041   :  { %v3984_v54 = vpack.c.bf16 %v3983_v9, %v3983_v9 }
0x2043   :  { %v3986_v2 = vshrl.u32 %v3984_v54, 16  ;;  %v3989_v19 = vshll.u32 %v3984_v54, 16 }
0x2045   :  { %v3988_v31 = vrot.slane %v3986_v2, 2  ;;  %v3991_v27 = vrot.slane %v3989_v19, 3 }
0x2047   :  { %v3992_v62 = vor.u32 %v3991_v27, %v3988_v31 }
0x2049   :  { %6066 = vmatmul.msk.bf16.vlgmr.msra.gmra.mxu2 %vm8834_vm14, %v3992_v62  ;;  %6067 = vmatmul.msk.bf16.vlgmr.msra.gmra.mxu3 %vm8835_vm1, %v3992_v62 }
0x20cc   :  { %v4005_v10 = vpop.f32.mrf.mxu2  ;;  %v8345_v1 = vpop.f32.mrf.mxu3 }
0x20cd   :  { %v4067_v36 = vadd.f32 %v4005_v10, %v7950_v44  ;;  %v4197_v12 = vadd.f32 %v8351_v59, %v8345_v1  ;;  %v4024_v38 = vrot.slane %v4005_v10, 3  ;;  %v4023_v52 = vrot.slane %v4005_v10, 2 }
0x20ce   :  { %v4110_v50 = vrot.slane %v4005_v10, 7  ;;  %v4114_v14 = vadd.f32 %v4005_v10, %v7835_v22 }
0x20cf   :  { %v4070_v28 = vrot.slane %v4067_v36, 3  ;;  %v4199_v23 = vrot.slane %v4197_v12, 7  ;;  %4202 = vrot.lane.b32.xlu1 %v4197_v12, %s7022_s30  ;;  %v4069_v8 = vrot.slane %v4067_v36, 2  ;;  %v4028_v45 = vadd.f32 %v4024_v38, %v7835_v22 }
0x20d0   :  { %v4027_v21 = vadd.f32 %v4023_v52, %v7832_v41  ;;  %v4113_v25 = vadd.f32 %v4110_v50, %v7832_v41  ;;  %v6071_v6 = vmul.f32 -1.442695, %v4114_v14 }
0x20d1   :  { %4073 = vrot.lane.b32.xlu2 %v4070_v28, %s7022_s30  ;;  %4200 = vrot.lane.b32.xlu0 %v4199_v23, %s7022_s30  ;;  %v6069_v18 = vmul.f32 -1.442695, %v4028_v45 }
0x20d2   :  { %v6068_v43 = vmul.f32 -1.442695, %v4027_v21  ;;  %v6070_v46 = vmul.f32 -1.442695, %v4113_v25 }
0x20d3   :  { %6709 = vpow2.f32 %v6069_v18 }
0x20d4   :  { %v4007_v32 = vpop.f32.mrf.mxu2  ;;  %v4020_v57 = vpop.f32.mrf.mxu3  ;;  %6711 = vpow2.f32 %v6068_v43 }
0x20d9   :  { %4071 = vrot.lane.b32.xlu2 %v4069_v8, %s7022_s30  ;;  %v6710_v33 = vpop.eup %6709 }
0x20da   :  { %v4036_v42 = vadd.f32 1.0, %v6710_v33  ;;  %v6712_v37 = vpop.eup %6711 }
0x20db   :  { %v4035_v55 = vadd.f32 1.0, %v6712_v37 }
0x20dc   :  { %6713 = vrcp.f32 %v4036_v42  ;;  %v4063_v2 = vand.u32 2147483648, %v4036_v42  ;;  %vm4057_vm9 = vweird.f32 %v4036_v42  ;;  %v4061_v19 = vand.u32 2147483647, %v4036_v42 }
0x20dd   :  { %6715 = vrcp.f32 %v4035_v55  ;;  %v4048_v32 = vand.u32 2147483648, %v4035_v55  ;;  %vm4042_vm10 = vweird.f32 %v4035_v55  ;;  %v4046_v8 = vand.u32 2147483647, %v4035_v55 }
0x20de   :  { %6717 = vpow2.f32 %v6071_v6  ;;  %v4064_v62 = vor.u32 1.1754944e-38, %v4063_v2  ;;  %vm4062_vm6 = vcmp.eq.f32.partialorder %v4061_v19, 8.507059e+37 }
0x20df   :  { %6719 = vpow2.f32 %v6070_v46  ;;  %v4049_v52 = vor.u32 1.1754944e-38, %v4048_v32  ;;  %vm4047_vm14 = vcmp.eq.f32.partialorder %v4046_v8, 8.507059e+37 }
0x20e2   :  { %v6714_v58 = vpop.eup %6713 }
0x20e3   :  { %v4053_v56 = vmul.f32 %v6714_v58, %v4036_v42  ;;  %v6716_v53 = vpop.eup %6715  ;;  %vm4058_vm7 = vweird.f32 %v6714_v58 }
0x20e4   :  { %v6718_v48 = vpop.eup %6717  ;;  %v4038_v3 = vmul.f32 %v6716_v53, %v4035_v55  ;;  %vm4059_vm12 = vmor %vm4057_vm9, %vm4058_vm7  ;;  %vm4043_vm8 = vweird.f32 %v6716_v53 }
0x20e5   :  { %v4054_v15 = vsub.f32 1.0, %v4053_v56  ;;  %v6720_v47 = vpop.eup %6719  ;;  %v4122_v35 = vadd.f32 1.0, %v6718_v48  ;;  %vm4044_vm3 = vmor %vm4042_vm10, %vm4043_vm8 }
0x20e6   :  { %v4121_v63 = vadd.f32 1.0, %v6720_v47  ;;  %v4039_v54 = vsub.f32 1.0, %v4038_v3 }
0x20e7   :  { %v4055_v11 = vmul.f32 %v6714_v58, %v4054_v15  ;;  %6721 = vrcp.f32 %v4122_v35  ;;  %v4149_v55 = vand.u32 2147483648, %v4122_v35  ;;  %vm4143_vm7 = vweird.f32 %v4122_v35 }
0x20e8   :  { %6723 = vrcp.f32 %v4121_v63  ;;  %v4040_v27 = vmul.f32 %v6716_v53, %v4039_v54  ;;  %v4134_v46 = vand.u32 2147483648, %v4121_v63  ;;  %v4132_v15 = vand.u32 2147483647, %v4121_v63 }
0x20e9   :  { %v4056_v9 = vadd.f32 %v6714_v58, %v4055_v11 }
0x20ea   :  { %v4041_v23 = vadd.f32 %v6716_v53, %v4040_v27  ;;  %v4135_v47 = vor.u32 1.1754944e-38, %v4134_v46 }
0x20eb   :  { %v4060_v31 = vsel %vm4059_vm12, %v6714_v58, %v4056_v9  ;;  %v4147_v58 = vand.u32 2147483647, %v4122_v35 }
0x20ec   :  { %v8363_v36 = vsel %vm4062_vm6, %v4064_v62, %v4060_v31  ;;  %v4045_v45 = vsel %vm4044_vm3, %v6716_v53, %v4041_v23  ;;  %vm4128_vm6 = vweird.f32 %v4121_v63  ;;  %v4150_v53 = vor.u32 1.1754944e-38, %v4149_v55 }
0x20ed   :  { %v6722_v12 = vpop.eup %6721  ;;  %v8367_v43 = vsel %vm4047_vm14, %v4049_v52, %v4045_v45  ;;  %vm4148_vm10 = vcmp.eq.f32.partialorder %v4147_v58, 8.507059e+37  ;;  %vm4133_vm3 = vcmp.eq.f32.partialorder %v4132_v15, 8.507059e+37  ;;  %v4158_v45 = vadd.f32 %v8345_v1, %v7860_v20 }
0x20ee   :  { %v6724_v57 = vpop.eup %6723  ;;  %v4139_v38 = vmul.f32 %v6722_v12, %v4122_v35  ;;  %vm4144_vm1 = vweird.f32 %v6722_v12 }
0x20ef   :  { %v4124_v18 = vmul.f32 %v6724_v57, %v4121_v63  ;;  %vm4129_vm9 = vweird.f32 %v6724_v57  ;;  %vm4145_vm12 = vmor %vm4143_vm7, %vm4144_vm1 }
0x20f0   :  { %v4140_v33 = vsub.f32 1.0, %v4139_v38  ;;  %vm4130_vm8 = vmor %vm4128_vm6, %vm4129_vm9  ;;  %v4154_v38 = vrot.slane %v8345_v1, 7 }
0x20f1   :  { %v4125_v50 = vsub.f32 1.0, %v4124_v18  ;;  %v6073_v18 = vmul.f32 -1.442695, %v4158_v45 }
0x20f2   :  { %v4141_v37 = vmul.f32 %v6722_v12, %v4140_v33  ;;  %v4157_v52 = vadd.f32 %v4154_v38, %v7856_v49  ;;  %v4107_v38 = vmul.f32 %v8363_v36, %v3970_v13  ;;  %v4091_v13 = vsub.f32 1.0, %v8367_v43 }
0x20f3   :  { %v4126_v14 = vmul.f32 %v6724_v57, %v4125_v50 }
0x20f4   :  { %v4142_v25 = vadd.f32 %v6722_v12, %v4141_v37 }
0x20f5   :  { %v4127_v6 = vadd.f32 %v6724_v57, %v4126_v14 }
0x20f6   :  { %v4146_v56 = vsel %vm4145_vm12, %v6722_v12, %v4142_v25 }
0x20f7   :  { %v4131_v48 = vsel %vm4130_vm8, %v6724_v57, %v4127_v6  ;;  %v4151_v3 = vsel %vm4148_vm10, %v4150_v53, %v4146_v56 }
0x20f8   :  { %v4136_v2 = vsel %vm4133_vm3, %v4135_v47, %v4131_v48  ;;  %vm8836_vm3 = vcmask 1047559  }
0x212b   :  { %v4074_v10 = vpop.permute.xlu2 %4073 }
0x212c   :  { %v4078_v28 = vmul.f32 %v4074_v10, %v8363_v36 }
0x212e   :  { %4083 = vrot.lane.b32.xlu0 %v4078_v28, %s7022_s30 }
0x2133   :  { %v4072_v21 = vpop.permute.xlu2 %4071 }
0x2134   :  { %v4077_v42 = vmul.f32 %v4072_v21, %v8367_v43  ;;  %v6072_v21 = vmul.f32 -1.442695, %v4157_v52 }
0x2136   :  { %4081 = vrot.lane.b32.xlu0 %v4077_v42, %s7022_s30 }
0x2141   :  { %v4203_v11 = vpop.permute.xlu1 %4202 }
0x2142   :  { %v4207_v9 = vmul.f32 %v4203_v11, %v4151_v3 }
0x2143   :  { %v4201_v54 = vpop.permute.xlu0 %4200 }
0x2144   :  { %v4206_v19 = vmul.f32 %v4201_v54, %v4136_v2  ;;  %4212 = vrot.lane.b32.xlu2 %v4207_v9, %s7022_s30 }
0x2146   :  { %4210 = vrot.lane.b32.xlu1 %v4206_v19, %s7022_s30 }
0x219e   :  { %v4213_v35 = vpop.permute.xlu2 %4212 }
0x219f   :  { %v4217_v31 = vadd.f32 %v4213_v35, %v7860_v20 }
0x21a0   :  { %v4084_v63 = vpop.permute.xlu0 %4083 }
0x21a1   :  { %v4088_v27 = vadd.f32 %v4084_v63, %v7835_v22  ;;  %6725 = vtanh.f32 %v4217_v31 }
0x21a3   :  { %6727 = vtanh.f32 %v4088_v27  ;;  %v4233_v27 = vrot.slane %v8320_v0, 1 }
0x21a7   :  { %v6726_v62 = vpop.eup %6725 }
0x21a8   :  { %v4082_v10 = vpop.permute.xlu0 %4081  ;;  %4226 = vrot.lane.b32.xlu0 %v6726_v62, %s7023_s1 }
0x21a9   :  { %v6728_v12 = vpop.eup %6727  ;;  %v4087_v28 = vadd.f32 %v4082_v10, %v7832_v41  ;;  %v4092_v10 = vsub.f32 1.0, %v8363_v36  ;;  %v4103_v36 = vrot.slane %v8328_v61, 7 }
0x21aa   :  { %4097 = vrot.lane.b32.xlu1 %v6728_v12, %s7023_s1 }
0x21ab   :  { %6729 = vtanh.f32 %v4087_v28 }
0x21b1   :  { %v6730_v23 = vpop.eup %6729 }
0x21b2   :  { %4095 = vrot.lane.b32.xlu1 %v6730_v23, %s7023_s1 }
0x21b8   :  { %v4211_v32 = vpop.permute.xlu1 %4210 }
0x21b9   :  { %v4216_v57 = vadd.f32 %v4211_v32, %v7856_v49  ;;  %v4232_v32 = vrot.slane %v8313_v17, 1 }
0x21bb   :  { %6731 = vtanh.f32 %v4216_v57 }
0x21bc   :  { %6733 = vpow2.f32 %v6073_v18 }
0x21bd   :  { %6735 = vpow2.f32 %v6072_v21 }
0x21c1   :  { %v6732_v8 = vpop.eup %6731 }
0x21c2   :  { %4224 = vrot.lane.b32.xlu2 %v6732_v8, %s7023_s1  ;;  %v6734_v33 = vpop.eup %6733 }
0x21c3   :  { %v6736_v42 = vpop.eup %6735  ;;  %v4166_v50 = vadd.f32 1.0, %v6734_v33 }
0x21c4   :  { %v4165_v37 = vadd.f32 1.0, %v6736_v42 }
0x21c5   :  { %6737 = vrcp.f32 %v4166_v50  ;;  %v4193_v53 = vand.u32 2147483648, %v4166_v50  ;;  %vm4187_vm1 = vweird.f32 %v4166_v50  ;;  %v4191_v48 = vand.u32 2147483647, %v4166_v50 }
0x21c6   :  { %6739 = vrcp.f32 %v4165_v37  ;;  %v4178_v3 = vand.u32 2147483648, %v4165_v37  ;;  %vm4172_vm12 = vweird.f32 %v4165_v37  ;;  %v4176_v9 = vand.u32 2147483647, %v4165_v37 }
0x21c7   :  { %v4194_v54 = vor.u32 1.1754944e-38, %v4193_v53  ;;  %vm4192_vm8 = vcmp.eq.f32.partialorder %v4191_v48, 8.507059e+37 }
0x21c8   :  { %v4179_v35 = vor.u32 1.1754944e-38, %v4178_v3  ;;  %vm4177_vm10 = vcmp.eq.f32.partialorder %v4176_v9, 8.507059e+37 }
0x21cb   :  { %v6738_v14 = vpop.eup %6737 }
0x21cc   :  { %v6740_v25 = vpop.eup %6739  ;;  %v4183_v55 = vmul.f32 %v6738_v14, %v4166_v50  ;;  %vm4188_vm14 = vweird.f32 %v6738_v14 }
0x21cd   :  { %v4168_v58 = vmul.f32 %v6740_v25, %v4165_v37  ;;  %vm4173_vm7 = vweird.f32 %v6740_v25  ;;  %vm4189_vm9 = vmor %vm4187_vm1, %vm4188_vm14  ;;  %vm8838_vm1 = vcmask 523264  }
0x21ce   :  { %v4184_v6 = vsub.f32 1.0, %v4183_v55  ;;  %vm4174_vm6 = vmor %vm4172_vm12, %vm4173_vm7  ;;  %v4106_v55 = vmul.f32 %v4103_v36, %v8367_v43 }
0x21cf   :  { %v4169_v46 = vsub.f32 1.0, %v4168_v58  ;;  %vm8837_vm14 = vmmov %vm8836_vm3 }
0x21d0   :  { %v4185_v56 = vmul.f32 %v6738_v14, %v4184_v6  ;;  %vm8839_vm7 = vmmov %vm8838_vm1 }
0x21d1   :  { %v4170_v1 = vmul.f32 %v6740_v25, %v4169_v46 }
0x21d2   :  { %v4186_v15 = vadd.f32 %v6738_v14, %v4185_v56 }
0x21d3   :  { %v4171_v11 = vadd.f32 %v6740_v25, %v4170_v1 }
0x21d4   :  { %v4190_v47 = vsel %vm4189_vm9, %v6738_v14, %v4186_v15 }
0x21d5   :  { %v4175_v2 = vsel %vm4174_vm6, %v6740_v25, %v4171_v11  ;;  %v4195_v19 = vsel %vm4192_vm8, %v4194_v54, %v4190_v47 }
0x21d6   :  { %v4180_v31 = vsel %vm4177_vm10, %v4179_v35, %v4175_v2  ;;  %v4221_v63 = vsub.f32 1.0, %v4195_v19  ;;  %v4237_v12 = vmul.f32 %v4233_v27, %v4195_v19 }
0x21d7   :  { %v4220_v23 = vsub.f32 1.0, %v4180_v31  ;;  %v4236_v18 = vmul.f32 %v4232_v32, %v4180_v31 }
0x221a   :  { %v4227_v62 = vpop.permute.xlu0 %4226 }
0x221b   :  { %v4231_v28 = vmul.f32 %v4227_v62, %v4221_v63 }
0x221c   :  { %v4098_v57 = vpop.permute.xlu1 %4097  ;;  %v4225_v8 = vpop.permute.xlu2 %4224 }
0x221d   :  { %v4102_v45 = vmul.f32 %v4098_v57, %v4092_v10  ;;  %v8391_v52 = vadd.f32 %v4237_v12, %v4231_v28  ;;  %v4230_v21 = vmul.f32 %v4225_v8, %v4220_v23 }
0x221f   :  { %v8393_v33 = vadd.f32 %v4107_v38, %v4102_v45  ;;  %v8395_v42 = vadd.f32 %v4236_v18, %v4230_v21  ;;  %v4250_v60 = vrot.slane %v8391_v52, 2 }
0x2221   :  { %v8400_v50 = vsel %vm2274_vm13, %v8318_v5, %v8393_v33  ;;  %v4249_v37 = vrot.slane %v8395_v42, 3  ;;  %v4242_v6 = vrot.slane %v8393_v33, 7 }
0x2223   :  { %v4251_v25 = vsel %vm8836_vm3, %v4250_v60, %v4249_v37 }
0x2224   :  { %v4096_v14 = vpop.permute.xlu1 %4095  ;;  %4252 = vrot.lane.b32.xlu0 %v4251_v25, %s7020_s13 }
0x2225   :  { %v4101_v58 = vmul.f32 %v4096_v14, %v4091_v13 }
0x2227   :  { %v8410_v5 = vadd.f32 %v4106_v55, %v4101_v58 }
0x2229   :  { %v8415_v46 = vsel %vm2274_vm13, %v8335_v16, %v8410_v5  ;;  %v4243_v61 = vsel %vm8837_vm14, %v4242_v6, %v8410_v5 }
0x222a   :  { %4244 = vrot.lane.b32.xlu2 %v4243_v61, %s7023_s1 }
0x2284   :  { %v4245_v43 = vpop.permute.xlu2 %4244 }
0x2296   :  { %v4253_v56 = vpop.permute.xlu0 %4252 }
0x2297   :  { %v4255_v1 = vsel %vm127_vm0, %v4245_v43, %v4253_v56 }
0x2298   :  { %v4256_v15 = vpack.c.bf16 %v4255_v1, %v4255_v1 }
0x229a   :  { %v4258_v53 = vrot.slane %v4256_v15, 3 }
0x229c   :  { %6074 = vmatmul.msk.bf16.vlgmr.msra.gmra.mxu0 %vm8838_vm1, %v4258_v53  ;;  %6075 = vmatmul.msk.bf16.vlgmr.msra.gmra.mxu1 %vm8839_vm7, %v4258_v53 }
0x2319   :  { %v4271_v48 = vpop.f32.mrf.mxu0  ;;  %v8425_v16 = vpop.f32.mrf.mxu1 }
0x231a   :  { %v4333_v11 = vadd.f32 %v4271_v48, %v7950_v44  ;;  %v4461_v3 = vadd.f32 %v8351_v59, %v8425_v16  ;;  %v4290_v35 = vrot.slane %v4271_v48, 2  ;;  %v4289_v27 = vrot.slane %v4271_v48, 1 }
0x231b   :  { %v4377_v62 = vadd.f32 %v4271_v48, %v7832_v41 }
0x231c   :  { %4464 = vrot.lane.b32.xlu0 %v4461_v3, %s7022_s30  ;;  %v4336_v47 = vrot.slane %v4333_v11, 2  ;;  %v4335_v9 = vrot.slane %v4333_v11, 1  ;;  %v4463_v19 = vrot.slane %v4461_v3, 1  ;;  %v4294_v31 = vadd.f32 %v4290_v35, %v7835_v22 }
0x231d   :  { %v4293_v10 = vadd.f32 %v4289_v27, %v7832_v41  ;;  %v6078_v12 = vmul.f32 -1.442695, %v4377_v62  ;;  %v4378_v57 = vadd.f32 %v4289_v27, %v7835_v22 }
0x231e   :  { %4339 = vrot.lane.b32.xlu2 %v4336_v47, %s7022_s30  ;;  %4337 = vrot.lane.b32.xlu1 %v4335_v9, %s7022_s30  ;;  %v6077_v44 = vmul.f32 -1.442695, %v4294_v31 }
0x231f   :  { %v6076_v23 = vmul.f32 -1.442695, %v4293_v10  ;;  %v6079_v45 = vmul.f32 -1.442695, %v4378_v57 }
0x2320   :  { %6741 = vpow2.f32 %v6077_v44 }
0x2321   :  { %v4273_v54 = vpop.f32.mrf.mxu0  ;;  %v4286_v2 = vpop.f32.mrf.mxu1 }
0x2326   :  { %4466 = vrot.lane.b32.xlu1 %v4463_v19, %s7022_s30  ;;  %v6742_v63 = vpop.eup %6741 }
0x2327   :  { %v4302_v59 = vadd.f32 1.0, %v6742_v63 }
0x2329   :  { %6743 = vrcp.f32 %v4302_v59  ;;  %v4329_v36 = vand.u32 2147483648, %v4302_v59  ;;  %vm4323_vm12 = vweird.f32 %v4302_v59  ;;  %v4327_v14 = vand.u32 2147483647, %v4302_v59 }
0x232a   :  { %6745 = vpow2.f32 %v6078_v12 }
0x232b   :  { %6747 = vpow2.f32 %v6076_v23  ;;  %v4330_v55 = vor.u32 1.1754944e-38, %v4329_v36  ;;  %vm4328_vm8 = vcmp.eq.f32.partialorder %v4327_v14, 8.507059e+37 }
0x232c   :  { %6749 = vpow2.f32 %v6079_v45 }
0x232f   :  { %v6744_v28 = vpop.eup %6743 }
0x2330   :  { %v4319_v32 = vmul.f32 %v6744_v28, %v4302_v59  ;;  %v6746_v38 = vpop.eup %6745  ;;  %vm4324_vm9 = vweird.f32 %v6744_v28 }
0x2331   :  { %v4385_v21 = vadd.f32 1.0, %v6746_v38  ;;  %v6748_v37 = vpop.eup %6747  ;;  %vm4325_vm6 = vmor %vm4323_vm12, %vm4324_vm9 }
0x2332   :  { %v4320_v8 = vsub.f32 1.0, %v4319_v32  ;;  %v4301_v13 = vadd.f32 1.0, %v6748_v37  ;;  %v6750_v58 = vpop.eup %6749 }
0x2333   :  { %6751 = vrcp.f32 %v4385_v21  ;;  %v4386_v15 = vadd.f32 1.0, %v6750_v58  ;;  %v4398_v31 = vand.u32 2147483648, %v4385_v21  ;;  %vm4392_vm3 = vweird.f32 %v4385_v21 }
0x2334   :  { %v4321_v18 = vmul.f32 %v6744_v28, %v4320_v8  ;;  %6753 = vrcp.f32 %v4301_v13  ;;  %v4396_v44 = vand.u32 2147483647, %v4385_v21  ;;  %v4314_v10 = vand.u32 2147483648, %v4301_v13 }
0x2335   :  { %6755 = vrcp.f32 %v4386_v15  ;;  %v4399_v62 = vor.u32 1.1754944e-38, %v4398_v31  ;;  %vm4308_vm9 = vweird.f32 %v4301_v13  ;;  %v4312_v12 = vand.u32 2147483647, %v4301_v13 }
0x2336   :  { %v4322_v60 = vadd.f32 %v6744_v28, %v4321_v18  ;;  %vm4397_vm7 = vcmp.eq.f32.partialorder %v4396_v44, 8.507059e+37  ;;  %v4315_v38 = vor.u32 1.1754944e-38, %v4314_v10 }
0x2338   :  { %v4326_v25 = vsel %vm4325_vm6, %v6744_v28, %v4322_v60  ;;  %vm4313_vm6 = vcmp.eq.f32.partialorder %v4312_v12, 8.507059e+37  ;;  %v4413_v60 = vand.u32 2147483648, %v4386_v15 }
0x2339   :  { %v6752_v61 = vpop.eup %6751  ;;  %v8438_v56 = vsel %vm4328_vm8, %v4330_v55, %v4326_v25 }
0x233a   :  { %v4388_v53 = vmul.f32 %v6752_v61, %v4385_v21  ;;  %v6754_v48 = vpop.eup %6753  ;;  %vm4393_vm10 = vweird.f32 %v6752_v61  ;;  %v4414_v14 = vor.u32 1.1754944e-38, %v4413_v60  ;;  %v6234_v60 = vld [vmem:[#allocation5 + $0x64] sm:$0xf0] }
0x233b   :  { %v4304_v3 = vmul.f32 %v6754_v48, %v4301_v13  ;;  %v6756_v54 = vpop.eup %6755  ;;  %vm4394_vm14 = vmor %vm4392_vm3, %vm4393_vm10  ;;  %vm4309_vm1 = vweird.f32 %v6754_v48  ;;  %vm4407_vm10 = vweird.f32 %v4386_v15  ;;  %v4411_v13 = vand.u32 2147483647, %v4386_v15 }
0x233c   :  { %v4389_v11 = vsub.f32 1.0, %v4388_v53  ;;  %v4403_v35 = vmul.f32 %v6756_v54, %v4386_v15  ;;  %vm4310_vm12 = vmor %vm4308_vm9, %vm4309_vm1  ;;  %vm4408_vm8 = vweird.f32 %v6756_v54 }
0x233d   :  { %v4305_v9 = vsub.f32 1.0, %v4304_v3  ;;  %vm4409_vm3 = vmor %vm4407_vm10, %vm4408_vm8 }
0x233e   :  { %v4390_v47 = vmul.f32 %v6752_v61, %v4389_v11  ;;  %v4404_v27 = vsub.f32 1.0, %v4403_v35 }
0x233f   :  { %v4306_v19 = vmul.f32 %v6754_v48, %v4305_v9 }
0x2340   :  { %v4391_v2 = vadd.f32 %v6752_v61, %v4390_v47  ;;  %v4405_v8 = vmul.f32 %v6756_v54, %v4404_v27 }
0x2341   :  { %v4307_v59 = vadd.f32 %v6754_v48, %v4306_v19  ;;  %v4418_v19 = vrot.slane %v8425_v16, 1 }
0x2342   :  { %v4395_v63 = vsel %vm4394_vm14, %v6752_v61, %v4391_v2  ;;  %v4406_v37 = vadd.f32 %v6756_v54, %v4405_v8  ;;  %vm4412_vm14 = vcmp.eq.f32.partialorder %v4411_v13, 8.507059e+37  ;;  %v6236_v8 = vld [vmem:[#allocation5 + $0x74] sm:$0xf0] }
0x2343   :  { %v4400_v23 = vsel %vm4397_vm7, %v4399_v62, %v4395_v63  ;;  %v4311_v57 = vsel %vm4310_vm12, %v6754_v48, %v4307_v59  ;;  %v4422_v35 = vadd.f32 %v4418_v19, %v7860_v20 }
0x2344   :  { %v8443_v18 = vsel %vm4313_vm6, %v4315_v38, %v4311_v57  ;;  %v4410_v36 = vsel %vm4409_vm3, %v6756_v54, %v4406_v37  ;;  %v6092_v57 = vld [vmem:[#allocation5 + $0x70] sm:$0xf]  ;;  %v6235_v38 = vld [vmem:[#allocation5 + $0x74] sm:$0xf]  ;;  %v6084_v37 = vld [vmem:[#allocation5 + $0x60] sm:$0xf] }
0x2345   :  { %v4415_v55 = vsel %vm4412_vm14, %v4414_v14, %v4410_v36  ;;  %v6081_v44 = vmul.f32 -1.442695, %v4422_v35  ;;  %v6233_v36 = vld [vmem:[#allocation5 + $0x64] sm:$0xf]  ;;  %v6086_v14 = vld [vmem:[#allocation5 + $0x68] sm:$0xf0] }
0x2346   :  { %vm8842_vm3 = vcmask 1046528  }
0x2378   :  { %v4340_v43 = vpop.permute.xlu2 %4339 }
0x2379   :  { %v4344_v1 = vmul.f32 %v4340_v43, %v8438_v56 }
0x237b   :  { %4349 = vrot.lane.b32.xlu0 %v4344_v1, %s7022_s30 }
0x238e   :  { %v4465_v28 = vpop.permute.xlu0 %4464 }
0x238f   :  { %v4470_v32 = vmul.f32 %v4465_v28, %v4400_v23 }
0x2390   :  { %v4338_v45 = vpop.permute.xlu1 %4337 }
0x2391   :  { %4474 = vrot.lane.b32.xlu1 %v4470_v32, %s7022_s30  ;;  %v4343_v21 = vmul.f32 %v4338_v45, %v8443_v18  ;;  %v6093_v45 = vor.u32 %v6236_v8, %v6092_v57  ;;  %v4373_v8 = vmul.f32 %v8438_v56, %v4242_v6 }
0x2393   :  { %4347 = vrot.lane.b32.xlu2 %v4343_v21, %s7022_s30  ;;  %v6094_v21 = vld [vmem:[#allocation5 + $0x78] sm:$0xf0]  ;;  %4572 = vmatpush.bf16.msrb.mxu2 %v6093_v45  ;;  %v4357_v45 = vsub.f32 1.0, %v8443_v18 }
0x2394   :  { %v6097_v13 = vor.u32 %v6235_v38, %v6094_v21 }
0x2396   :  { %4586 = vmatpush.bf16.msrb.mxu3 %v6097_v13 }
0x2398   :  { %v4467_v25 = vpop.permute.xlu1 %4466 }
0x2399   :  { %v4471_v58 = vmul.f32 %v4467_v25, %v4415_v55  ;;  %v6085_v55 = vor.u32 %v6234_v60, %v6084_v37 }
0x239b   :  { %4476 = vrot.lane.b32.xlu2 %v4471_v58, %s7022_s30  ;;  %4573 = vmatpush.bf16.msrb.mxu2 %v6085_v55 }
0x23ed   :  { %v4350_v61 = vpop.permute.xlu0 %4349  ;;  %v4348_v1 = vpop.permute.xlu2 %4347 }
0x23ee   :  { %v4354_v43 = vadd.f32 %v4350_v61, %v7835_v22  ;;  %v4353_v53 = vadd.f32 %v4348_v1, %v7832_v41  ;;  %v4421_v41 = vadd.f32 %v8425_v16, %v7856_v49  ;;  %v6089_v1 = vor.u32 %v6233_v36, %v6086_v14 }
0x23f0   :  { %6757 = vtanh.f32 %v4354_v43  ;;  %v6080_v2 = vmul.f32 -1.442695, %v4421_v41  ;;  %v6229_v41 = vld [vmem:[#allocation5 + $0x44] sm:$0xf]  ;;  %4587 = vmatpush.bf16.msrb.mxu3 %v6089_v1 }
0x23f1   :  { %6759 = vtanh.f32 %v4353_v53  ;;  %v6110_v53 = vld [vmem:[#allocation5 + $0x50] sm:$0xf] }
0x23f5   :  { %v4477_v11 = vpop.permute.xlu2 %4476 }
0x23f6   :  { %v6758_v48 = vpop.eup %6757  ;;  %v4481_v3 = vadd.f32 %v4477_v11, %v7860_v20  ;;  %v6102_v11 = vld [vmem:[#allocation5 + $0x40] sm:$0xf] }
0x23f7   :  { %4363 = vrot.lane.b32.xlu1 %v6758_v48, %s7023_s1  ;;  %v6760_v15 = vpop.eup %6759  ;;  %v6232_v48 = vld [vmem:[#allocation5 + $0x54] sm:$0xf0] }
0x23f8   :  { %4361 = vrot.lane.b32.xlu0 %v6760_v15, %s7023_s1  ;;  %6761 = vtanh.f32 %v4481_v3  ;;  %v6111_v15 = vor.u32 %v6232_v48, %v6110_v53  ;;  %v6230_v3 = vld [vmem:[#allocation5 + $0x44] sm:$0xf0] }
0x23f9   :  { %v6103_v35 = vor.u32 %v6230_v3, %v6102_v11 }
0x23fa   :  { %4626 = vmatpush.bf16.msrb.mxu0 %v6111_v15 }
0x23fe   :  { %v6762_v47 = vpop.eup %6761  ;;  %4627 = vmatpush.bf16.msrb.mxu0 %v6103_v35 }
0x2400   :  { %4490 = vrot.lane.b32.xlu0 %v6762_v47, %s7023_s1  ;;  %v6231_v47 = vld [vmem:[#allocation5 + $0x54] sm:$0xf] }
0x2403   :  { %v4475_v9 = vpop.permute.xlu1 %4474 }
0x2404   :  { %v4480_v22 = vadd.f32 %v4475_v9, %v7856_v49  ;;  %v6112_v9 = vld [vmem:[#allocation5 + $0x58] sm:$0xf0] }
0x2406   :  { %6763 = vtanh.f32 %v4480_v22 }
0x2407   :  { %6765 = vpow2.f32 %v6080_v2  ;;  %v6104_v2 = vld [vmem:[#allocation5 + $0x48] sm:$0xf0] }
0x2408   :  { %6767 = vpow2.f32 %v6081_v44 }
0x240c   :  { %v6764_v54 = vpop.eup %6763 }
0x240d   :  { %4488 = vrot.lane.b32.xlu2 %v6764_v54, %s7023_s1  ;;  %v6766_v31 = vpop.eup %6765  ;;  %v6115_v54 = vor.u32 %v6231_v47, %v6112_v9 }
0x240e   :  { %v4429_v63 = vadd.f32 1.0, %v6766_v31  ;;  %v6768_v59 = vpop.eup %6767  ;;  %v6107_v31 = vor.u32 %v6229_v41, %v6104_v2 }
0x240f   :  { %v8460_v62 = vadd.f32 1.0, %v6768_v59  ;;  %4640 = vmatpush.bf16.msrb.mxu1 %v6115_v54 }
0x2410   :  { %6769 = vrcp.f32 %v4429_v63  ;;  %v4440_v16 = vand.u32 2147483647, %v4429_v63  ;;  %v4442_v23 = vand.u32 2147483648, %v4429_v63  ;;  %vm4436_vm7 = vweird.f32 %v4429_v63 }
0x2411   :  { %6771 = vrcp.f32 %v8460_v62  ;;  %vm4451_vm8 = vweird.f32 %v8460_v62 }
0x2412   :  { %vm4441_vm12 = vcmp.eq.f32.partialorder %v4440_v16, 8.507059e+37  ;;  %v4443_v61 = vor.u32 1.1754944e-38, %v4442_v23  ;;  %v4369_v23 = vrot.slane %v8410_v5, 7 }
0x2413   :  { %4641 = vmatpush.bf16.msrb.mxu1 %v6107_v31 }
0x2414   :  { %v4372_v21 = vmul.f32 %v4369_v23, %v8443_v18 }
0x2416   :  { %v6770_v27 = vpop.eup %6769 }
0x2417   :  { %v4432_v10 = vmul.f32 %v6770_v27, %v4429_v63  ;;  %v8463_v28 = vpop.eup %6771  ;;  %vm4437_vm1 = vweird.f32 %v6770_v27  ;;  %v4496_v63 = vrot.slane %v8395_v42, 1 }
0x2418   :  { %v4447_v20 = vmul.f32 %v8463_v28, %v8460_v62  ;;  %vm8467_vm9 = vmor %vm4436_vm7, %vm4437_vm1  ;;  %vm4452_vm6 = vweird.f32 %v8463_v28 }
0x2419   :  { %v4433_v12 = vsub.f32 1.0, %v4432_v10  ;;  %vm4453_vm10 = vmor %vm4451_vm8, %vm4452_vm6  ;;  %vm8846_vm8 = vcmask 1041409  }
0x241a   :  { %v4448_v43 = vsub.f32 1.0, %v4447_v20  ;;  %v4457_v20 = vand.u32 2147483648, %v8460_v62  ;;  %vm8843_vm1 = vmmov %vm8842_vm3 }
0x241b   :  { %v4434_v49 = vmul.f32 %v6770_v27, %v4433_v12  ;;  %v4358_v12 = vsub.f32 1.0, %v8438_v56 }
0x241c   :  { %v4449_v19 = vmul.f32 %v8463_v28, %v4448_v43  ;;  %v4458_v36 = vor.u32 1.1754944e-38, %v4457_v20 }
0x241d   :  { %v4435_v32 = vadd.f32 %v6770_v27, %v4434_v49 }
0x241e   :  { %v4450_v49 = vadd.f32 %v8463_v28, %v4449_v19 }
0x241f   :  { %v4439_v58 = vsel %vm8467_vm9, %v6770_v27, %v4435_v32  ;;  %v4455_v32 = vand.u32 2147483647, %v8460_v62 }
0x2420   :  { %v4444_v22 = vsel %vm4441_vm12, %v4443_v61, %v4439_v58  ;;  %v4454_v13 = vsel %vm4453_vm10, %v8463_v28, %v4450_v49  ;;  %v4497_v28 = vrot.slane %v8391_v52, 1 }
0x2421   :  { %v4484_v44 = vsub.f32 1.0, %v4444_v22  ;;  %v4500_v27 = vmul.f32 %v4496_v63, %v4444_v22  ;;  %vm4456_vm14 = vcmp.eq.f32.partialorder %v4455_v32, 8.507059e+37 }
0x2422   :  { %v4459_v18 = vsel %vm4456_vm14, %v4458_v36, %v4454_v13 }
0x2423   :  { %v4485_v55 = vsub.f32 1.0, %v4459_v18 }
0x2467   :  { %v4489_v59 = vpop.permute.xlu2 %4488 }
0x2468   :  { %v4494_v10 = vmul.f32 %v4489_v59, %v4484_v44 }
0x2469   :  { %v4364_v16 = vpop.permute.xlu1 %4363 }
0x246a   :  { %v4502_v57 = vadd.f32 %v4500_v27, %v4494_v10  ;;  %v4368_v38 = vmul.f32 %v4364_v16, %v4358_v12  ;;  %v4362_v37 = vpop.permute.xlu0 %4361 }
0x246b   :  { %v4367_v62 = vmul.f32 %v4362_v37, %v4357_v45 }
0x246c   :  { %v4518_v5 = vsel %vm2259_vm2, %v4502_v57, %v8395_v42  ;;  %v4375_v60 = vadd.f32 %v4373_v8, %v4368_v38  ;;  %v6274_v8 = vld [vmem:[%s8795_s5 + $0x2] ss:$0 sm:$0xff] }
0x246d   :  { %v4374_v6 = vadd.f32 %v4372_v21, %v4367_v62  ;;  %v4520_v56 = vsel %vm2262_vm5, %v4518_v5, %v8313_v17 }
0x246e   :  { %v4517_v33 = vsel %vm8842_vm3, %v8400_v50, %v4375_v60  ;;  %v4522_v42 = vsel %vm2265_vm11, %v4520_v56, %v8233_v24  ;;  %v4501_v50 = vmul.f32 %v4497_v28, %v4459_v18 }
0x246f   :  { %v4516_v14 = vsel %vm8843_vm1, %v8415_v46, %v4374_v6  ;;  %v4524_v43 = vsel %vm2268_vm15, %v4522_v42, %v8175_v26 }
0x2470   :  { %v4532_v25 = vpack.c.bf16 %v4517_v33, %v4516_v14  ;;  %v4526_v1 = vsel %vm2271_vm4, %v4524_v43, %v8063_v29  ;;  %v6127_v43 = vld [vmem:[#allocation7 + $0x90] sm:$0xf] }
0x2471   :  { %v4528_v11 = vsel %vm2274_vm13, %v4526_v1, %v7993_v39  ;;  %v8528_v39 = vld [vmem:[#allocation8 + $0x4] sm:$0x3]  ;;  %v6123_v1 = vld [vmem:[#allocation7 + $0x80] sm:$0xf] }
0x2472   :  { %4595 = vrot.lane.b32.xlu1 %v4532_v25, %s7023_s1  ;;  %v4491_v58 = vpop.permute.xlu0 %4490 }
0x2473   :  { %v4495_v61 = vmul.f32 %v4491_v58, %v4485_v55 }
0x2475   :  { %v4503_v17 = vadd.f32 %v4501_v50, %v4495_v61 }
0x2477   :  { %v4519_v46 = vsel %vm2259_vm2, %v4503_v17, %v8391_v52  ;;  %vm8844_vm2 = vmmov %vm8843_vm1  ;;  %v6238_v17 = vld [vmem:[#allocation7 + $0x94] sm:$0xf0] }
0x2478   :  { %v4521_v24 = vsel %vm2262_vm5, %v4519_v46, %v8320_v0  ;;  %v4530_v52 = vsel %vm8844_vm2, %v4528_v11, %v7885_v4  ;;  %vm8845_vm5 = vmmov %vm8843_vm1  ;;  %v4652_v4 = vperm.slane %v8528_v39, 1  ;;  %v6128_v46 = vor.u32 %v6238_v17, %v6127_v43 }
0x2479   :  { %v4523_v53 = vsel %vm2265_vm11, %v4521_v24, %v8235_v34  ;;  %v4651_v34 = vperm.slane %v8528_v39, 0  ;;  %v6237_v24 = vld [vmem:[#allocation7 + $0x84] sm:$0xf0] }
0x247a   :  { %v4525_v48 = vsel %vm2268_vm15, %v4523_v53, %v8184_v40  ;;  %4772 = vmatpush.bf16.msra.mxu2 %v6128_v46  ;;  %v6124_v53 = vor.u32 %v6237_v24, %v6123_v1  ;;  %4891 = vmatpush.bf16.msra.mxu3 %v6128_v46 }
0x247b   :  { %v4527_v26 = vsel %vm2271_vm4, %v4525_v48, %v8068_v7  ;;  %5010 = vmatpush.bf16.msra.mxu0 %v6128_v46  ;;  %5129 = vmatpush.bf16.msra.mxu1 %v6128_v46 }
0x247c   :  { %v4529_v29 = vsel %vm2274_vm13, %v4527_v26, %v7995_v51 }
0x247d   :  { %v4531_v0 = vsel %vm8845_vm5, %v4529_v29, %v7883_v30 }
0x247e   :  { %v4533_v15 = vpack.c.bf16 %v4531_v0, %v4530_v52  ;;  %4773 = vmatpush.bf16.msra.mxu2 %v6124_v53  ;;  %4892 = vmatpush.bf16.msra.mxu3 %v6124_v53 }
0x247f   :  { %5011 = vmatpush.bf16.msra.mxu0 %v6124_v53  ;;  %5130 = vmatpush.bf16.msra.mxu1 %v6124_v53 }
0x2480   :  { %6098 = vmatmul.msk.bf16.vlgmr.msrb.gmra.mxu2 %vm127_vm0, %v4533_v15  ;;  %6099 = vmatmul.msk.bf16.vlgmr.msrb.gmra.mxu3 %vm127_vm0, %v4533_v15 }
0x2482   :  { %5248 = vmatpush.bf16.msrb.mxu2 %v6128_v46  ;;  %5367 = vmatpush.bf16.msrb.mxu3 %v6128_v46 }
0x2486   :  { %5249 = vmatpush.bf16.msrb.mxu2 %v6124_v53  ;;  %5368 = vmatpush.bf16.msrb.mxu3 %v6124_v53 }
0x24e4   :  { %v4596_v40 = vpop.permute.xlu1 %4595 }
0x24e5   :  { %6116 = vmatmul.msk.bf16.vlgmr.msrb.gmra.mxu0 %vm127_vm0, %v4596_v40  ;;  %6117 = vmatmul.msk.bf16.vlgmr.msrb.gmra.mxu1 %vm127_vm0, %v4596_v40 }
0x24e6   :  { %5486 = vmatpush.bf16.msrb.mxu0 %v6128_v46 }
0x24ea   :  { %5487 = vmatpush.bf16.msrb.mxu0 %v6124_v53 }
0x2503   :  { %v4575_v7 = vpop.f32.mrf.mxu2  ;;  %v4589_v51 = vpop.f32.mrf.mxu3 }
0x250b   :  { %v4577_v2 = vpop.f32.mrf.mxu2 }
0x2562   :  { %v4629_v3 = vpop.f32.mrf.mxu0  ;;  %v4643_v30 = vpop.f32.mrf.mxu1 }
0x2563   :  { %v4630_v47 = vadd.f32 %v4629_v3, %v4575_v7  ;;  %v4644_v9 = vadd.f32 %v4643_v30, %v4589_v51 }
0x2565   :  { %v8532_v22 = vadd.f32 %v4651_v34, %v4630_v47  ;;  %v8536_v54 = vadd.f32 %v4652_v4, %v4644_v9 }
0x2567   :  { %v6119_v41 = vmul.f32 -1.442695, %v8532_v22 }
0x2569   :  { %6773 = vpow2.f32 %v6119_v41 }
0x256a   :  { %v4631_v19 = vpop.f32.mrf.mxu0 }
0x256b   :  { %v4632_v35 = vadd.f32 %v4631_v19, %v4577_v2 }
0x256d   :  { %v8539_v31 = vadd.f32 %v4651_v34, %v4632_v35 }
0x256f   :  { %v6774_v44 = vpop.eup %6773  ;;  %v6120_v63 = vmul.f32 -1.442695, %v8539_v31 }
0x2570   :  { %v4674_v59 = vadd.f32 1.0, %v6774_v44 }
0x2571   :  { %6775 = vpow2.f32 %v6120_v63 }
0x2572   :  { %6777 = vrcp.f32 %v4674_v59  ;;  %v4687_v23 = vand.u32 2147483648, %v4674_v59  ;;  %v4685_v20 = vand.u32 2147483647, %v4674_v59  ;;  %vm4681_vm15 = vweird.f32 %v4674_v59 }
0x2574   :  { %v4688_v45 = vor.u32 1.1754944e-38, %v4687_v23  ;;  %vm4686_vm13 = vcmp.eq.f32.partialorder %v4685_v20, 8.507059e+37 }
0x2577   :  { %v6776_v27 = vpop.eup %6775 }
0x2578   :  { %v6778_v10 = vpop.eup %6777  ;;  %v4675_v12 = vadd.f32 1.0, %v6776_v27 }
0x2579   :  { %v4677_v49 = vmul.f32 %v6778_v10, %v4674_v59  ;;  %vm4682_vm11 = vweird.f32 %v6778_v10 }
0x257a   :  { %6779 = vrcp.f32 %v4675_v12  ;;  %vm4683_vm4 = vmor %vm4681_vm15, %vm4682_vm11  ;;  %v4702_v13 = vand.u32 2147483648, %v4675_v12  ;;  %v4700_v33 = vand.u32 2147483647, %v4675_v12  ;;  %vm4696_vm9 = vweird.f32 %v4675_v12 }
0x257b   :  { %v4678_v16 = vsub.f32 1.0, %v4677_v49 }
0x257c   :  { %v4703_v56 = vor.u32 1.1754944e-38, %v4702_v13  ;;  %vm4701_vm6 = vcmp.eq.f32.partialorder %v4700_v33, 8.507059e+37 }
0x257d   :  { %v4679_v32 = vmul.f32 %v6778_v10, %v4678_v16 }
0x257f   :  { %v4680_v57 = vadd.f32 %v6778_v10, %v4679_v32 }
0x2580   :  { %v6780_v38 = vpop.eup %6779 }
0x2581   :  { %v4684_v21 = vsel %vm4683_vm4, %v6778_v10, %v4680_v57  ;;  %v4692_v37 = vmul.f32 %v6780_v38, %v4675_v12  ;;  %vm4697_vm7 = vweird.f32 %v6780_v38  ;;  %vm8847_vm4 = vmmov %vm8846_vm8 }
0x2582   :  { %v8545_v5 = vsel %vm4686_vm13, %v4688_v45, %v4684_v21  ;;  %vm4698_vm12 = vmor %vm4696_vm9, %vm4697_vm7 }
0x2583   :  { %v4710_v60 = vmul.f32 %v6274_v8, %v8545_v5  ;;  %v4693_v62 = vsub.f32 1.0, %v4692_v37  ;;  %v4724_v11 = vsub.f32 1.0, %v8545_v5  ;;  %v4736_v29 = vmul.f32 0.0, %v8545_v5 }
0x2585   :  { %4714 = vrot.lane.b32.xlu0 %v4710_v60, %s7022_s30  ;;  %v4694_v36 = vmul.f32 %v6780_v38, %v4693_v62 }
0x2587   :  { %v4695_v6 = vadd.f32 %v6780_v38, %v4694_v36 }
0x2589   :  { %v4699_v18 = vsel %vm4698_vm12, %v6780_v38, %v4695_v6 }
0x258a   :  { %v8549_v14 = vsel %vm4701_vm6, %v4703_v56, %v4699_v18 }
0x258b   :  { %v4711_v25 = vmul.f32 %v6274_v8, %v8549_v14  ;;  %v4725_v52 = vsub.f32 1.0, %v8549_v14  ;;  %v4737_v40 = vmul.f32 0.0, %v8549_v14 }
0x258d   :  { %4716 = vrot.lane.b32.xlu2 %v4711_v25, %s7022_s30 }
0x25e7   :  { %v4717_v42 = vpop.permute.xlu2 %4716 }
0x25e8   :  { %v4721_v55 = vadd.f32 %v4717_v42, %v8539_v31 }
0x25ea   :  { %6781 = vtanh.f32 %v4721_v55 }
0x25f0   :  { %v6782_v28 = vpop.eup %6781 }
0x25f1   :  { %4730 = vrot.lane.b32.xlu1 %v6782_v28, %s7023_s1 }
0x25f7   :  { %v4715_v58 = vpop.permute.xlu0 %4714 }
0x25f8   :  { %v4720_v50 = vadd.f32 %v4715_v58, %v8532_v22 }
0x25f9   :  { %4823 = vrot.lane.b32.xlu1 %v6274_v8, %s7022_s30 }
0x25fa   :  { %6783 = vtanh.f32 %v4720_v50 }
0x2600   :  { %v6784_v61 = vpop.eup %6783 }
0x2601   :  { %4728 = vrot.lane.b32.xlu2 %v6784_v61, %s7023_s1 }
0x265b   :  { %v4729_v48 = vpop.permute.xlu2 %4728 }
0x265c   :  { %v4734_v26 = vmul.f32 %v4729_v48, %v4724_v11 }
0x265e   :  { %v4738_v15 = vadd.f32 %v4736_v29, %v4734_v26 }
0x2660   :  { %v4740_v34 = vpack.c.bf16 %v4738_v15, %v4738_v15  ;;  %v4863_v60 = vrot.slane %v4738_v15, 7 }
0x2662   :  { %v4744_v47 = vunpack.c.l.b16 %v4740_v34 }
0x2663   :  { %v4731_v0 = vpop.permute.xlu1 %4730 }
0x2664   :  { %v4735_v7 = vmul.f32 %v4731_v0, %v4725_v52 }
0x2666   :  { %v8562_v51 = vadd.f32 %v4737_v40, %v4735_v7 }
0x2668   :  { %v4741_v3 = vpack.c.bf16 %v8562_v51, %v8562_v51  ;;  %v4864_v40 = vrot.slane %v8562_v51, 7 }
0x266a   :  { %v4745_v30 = vunpack.c.l.b16 %v4741_v3 }
0x266b   :  { %v8569_v35 = vpop.permute.xlu1 %4823 }
0x266c   :  { %v4746_v9 = vrot.slane %v4745_v30, 7 }
0x266e   :  { %v4747_v41 = vsel %vm8846_vm8, %v4746_v9, %v4744_v47 }
0x266f   :  { %v4748_v2 = vpack.c.b16 %v4747_v41, %v4747_v41 }
0x2671   :  { %4749 = vrot.lane.b32.xlu0 %v4748_v2, %s7023_s1 }
0x26e3   :  { %v4750_v19 = vpop.permute.xlu0 %4749 }
0x26e4   :  { %6129 = vmatmul.msk.bf16.vlgmr.msra.gmra.mxu2 %vm127_vm0, %v4750_v19 }
0x2767   :  { %v4775_v44 = vpop.f32.mrf.mxu2 }
0x2768   :  { %v4780_v63 = vrot.slane %v4775_v44, 7  ;;  %v4826_v59 = vadd.f32 %v8569_v35, %v4775_v44  ;;  %v4784_v33 = vadd.f32 %v4775_v44, %v8539_v31 }
0x276a   :  { %v4783_v27 = vadd.f32 %v4780_v63, %v8532_v22  ;;  %v4828_v10 = vrot.slane %v4826_v59, 7  ;;  %4831 = vrot.lane.b32.xlu0 %v4826_v59, %s7022_s30  ;;  %v6131_v6 = vmul.f32 -1.442695, %v4784_v33 }
0x276c   :  { %v6130_v12 = vmul.f32 -1.442695, %v4783_v27  ;;  %4829 = vrot.lane.b32.xlu2 %v4828_v10, %s7022_s30 }
0x276e   :  { %6785 = vpow2.f32 %v6130_v12 }
0x276f   :  { %v4777_v49 = vpop.f32.mrf.mxu2 }
0x2774   :  { %v6786_v16 = vpop.eup %6785 }
0x2775   :  { %v4791_v23 = vadd.f32 1.0, %v6786_v16  ;;  %v8594_v16 = vpop.f32.mrf.mxu3 }
0x2777   :  { %6787 = vrcp.f32 %v4791_v23  ;;  %v4804_v8 = vand.u32 2147483648, %v4791_v23  ;;  %v4802_v45 = vand.u32 2147483647, %v4791_v23  ;;  %vm4798_vm3 = vweird.f32 %v4791_v23 }
0x2778   :  { %6789 = vpow2.f32 %v6131_v6 }
0x2779   :  { %v4805_v37 = vor.u32 1.1754944e-38, %v4804_v8  ;;  %vm4803_vm1 = vcmp.eq.f32.partialorder %v4802_v45, 8.507059e+37 }
0x277d   :  { %v6788_v32 = vpop.eup %6787 }
0x277e   :  { %v4794_v20 = vmul.f32 %v6788_v32, %v4791_v23  ;;  %vm4799_vm10 = vweird.f32 %v6788_v32  ;;  %v6790_v56 = vpop.eup %6789 }
0x277f   :  { %vm4800_vm14 = vmor %vm4798_vm3, %vm4799_vm10  ;;  %v4792_v18 = vadd.f32 1.0, %v6790_v56 }
0x2780   :  { %v4795_v57 = vsub.f32 1.0, %v4794_v20 }
0x2781   :  { %6791 = vrcp.f32 %v4792_v18  ;;  %v4819_v43 = vand.u32 2147483648, %v4792_v18  ;;  %vm4813_vm5 = vweird.f32 %v4792_v18  ;;  %v4817_v17 = vand.u32 2147483647, %v4792_v18 }
0x2782   :  { %v4796_v38 = vmul.f32 %v6788_v32, %v4795_v57 }
0x2783   :  { %v4820_v46 = vor.u32 1.1754944e-38, %v4819_v43  ;;  %vm4818_vm15 = vcmp.eq.f32.partialorder %v4817_v17, 8.507059e+37 }
0x2784   :  { %v4797_v21 = vadd.f32 %v6788_v32, %v4796_v38 }
0x2786   :  { %v4801_v62 = vsel %vm4800_vm14, %v6788_v32, %v4797_v21  ;;  %vm8848_vm14 = vmmov %vm8847_vm4 }
0x2787   :  { %v4806_v13 = vsel %vm4803_vm1, %v4805_v37, %v4801_v62  ;;  %v6792_v25 = vpop.eup %6791 }
0x2788   :  { %v4867_v36 = vmul.f32 %v4863_v60, %v4806_v13  ;;  %v4809_v28 = vmul.f32 %v6792_v25, %v4792_v18  ;;  %vm4814_vm2 = vweird.f32 %v6792_v25  ;;  %v4849_v47 = vsub.f32 1.0, %v4806_v13 }
0x2789   :  { %vm4815_vm11 = vmor %vm4813_vm5, %vm4814_vm2 }
0x278a   :  { %v4810_v58 = vsub.f32 1.0, %v4809_v28 }
0x278c   :  { %v4811_v50 = vmul.f32 %v6792_v25, %v4810_v58 }
0x278e   :  { %v4812_v61 = vadd.f32 %v6792_v25, %v4811_v50 }
0x2790   :  { %v4816_v1 = vsel %vm4815_vm11, %v6792_v25, %v4812_v61 }
0x2791   :  { %v4821_v53 = vsel %vm4818_vm15, %v4820_v46, %v4816_v1 }
0x2792   :  { %v4850_v7 = vsub.f32 1.0, %v4821_v53  ;;  %v4868_v3 = vmul.f32 %v4864_v40, %v4821_v53 }
0x27c6   :  { %v4830_v42 = vpop.permute.xlu2 %4829 }
0x27c7   :  { %v4835_v55 = vmul.f32 %v4830_v42, %v4806_v13 }
0x27c9   :  { %4839 = vrot.lane.b32.xlu1 %v4835_v55, %s7022_s30 }
0x27dc   :  { %v4832_v24 = vpop.permute.xlu0 %4831 }
0x27dd   :  { %v4836_v48 = vmul.f32 %v4832_v24, %v4821_v53 }
0x27df   :  { %4841 = vrot.lane.b32.xlu2 %v4836_v48, %s7022_s30 }
0x2839   :  { %v4842_v11 = vpop.permute.xlu2 %4841 }
0x283a   :  { %v4846_v26 = vadd.f32 %v4842_v11, %v8539_v31 }
0x283b   :  { %v4840_v29 = vpop.permute.xlu1 %4839 }
0x283c   :  { %6793 = vtanh.f32 %v4846_v26  ;;  %v4845_v52 = vadd.f32 %v4840_v29, %v8532_v22 }
0x283e   :  { %6795 = vtanh.f32 %v4845_v52 }
0x2842   :  { %v6794_v0 = vpop.eup %6793 }
0x2843   :  { %4855 = vrot.lane.b32.xlu1 %v6794_v0, %s7023_s1 }
0x2844   :  { %v6796_v15 = vpop.eup %6795 }
0x2845   :  { %4853 = vrot.lane.b32.xlu0 %v6796_v15, %s7023_s1 }
0x28b5   :  { %v4856_v34 = vpop.permute.xlu1 %4855 }
0x28b6   :  { %v4860_v30 = vmul.f32 %v4856_v34, %v4850_v7 }
0x28b7   :  { %v4854_v9 = vpop.permute.xlu0 %4853 }
0x28b8   :  { %v8583_v41 = vadd.f32 %v4868_v3, %v4860_v30  ;;  %v4859_v2 = vmul.f32 %v4854_v9, %v4849_v47 }
0x28ba   :  { %v8585_v19 = vadd.f32 %v4867_v36, %v4859_v2  ;;  %v4872_v44 = vpack.c.bf16 %v8583_v41, %v8583_v41 }
0x28bc   :  { %v4871_v63 = vpack.c.bf16 %v8585_v19, %v8585_v19  ;;  %v4876_v27 = vunpack.c.l.b16 %v4872_v44  ;;  %v4982_v44 = vrot.slane %v8583_v41, 7 }
0x28be   :  { %v4875_v59 = vunpack.c.l.b16 %v4871_v63  ;;  %v4981_v63 = vrot.slane %v8585_v19, 7 }
0x28c0   :  { %v4877_v51 = vrot.slane %v4875_v59, 1 }
0x28c2   :  { %v4878_v10 = vsel %vm8847_vm4, %v4876_v27, %v4877_v51 }
0x28c3   :  { %v4879_v12 = vpack.c.b16 %v4878_v10, %v4878_v10 }
0x28c5   :  { %4880 = vrot.lane.b32.xlu2 %v4879_v12, %s7023_s1 }
0x291f   :  { %v4881_v49 = vpop.permute.xlu2 %4880 }
0x2920   :  { %6132 = vmatmul.msk.bf16.vlgmr.msra.gmra.mxu3 %vm127_vm0, %v4881_v49 }
0x29a3   :  { %v4894_v23 = vpop.f32.mrf.mxu3 }
0x29a4   :  { %v4943_v32 = vadd.f32 %v4894_v23, %v8569_v35  ;;  %v4899_v38 = vrot.slane %v4894_v23, 6  ;;  %v4900_v45 = vrot.slane %v4894_v23, 7 }
0x29a6   :  { %v4945_v20 = vrot.slane %v4943_v32, 6  ;;  %v4946_v57 = vrot.slane %v4943_v32, 7  ;;  %v4903_v21 = vadd.f32 %v4899_v38, %v8532_v22  ;;  %v4904_v37 = vadd.f32 %v4900_v45, %v8539_v31 }
0x29a8   :  { %4949 = vrot.lane.b32.xlu1 %v4946_v57, %s7022_s30  ;;  %4947 = vrot.lane.b32.xlu0 %v4945_v20, %s7022_s30  ;;  %v6133_v60 = vmul.f32 -1.442695, %v4903_v21  ;;  %v6134_v62 = vmul.f32 -1.442695, %v4904_v37 }
0x29aa   :  { %6797 = vpow2.f32 %v6133_v60 }
0x29ab   :  { %v4896_v8 = vpop.f32.mrf.mxu3  ;;  %6799 = vpow2.f32 %v6134_v62 }
0x29b0   :  { %v6798_v13 = vpop.eup %6797 }
0x29b1   :  { %v6800_v36 = vpop.eup %6799  ;;  %v4911_v33 = vadd.f32 1.0, %v6798_v13 }
0x29b2   :  { %v4912_v6 = vadd.f32 1.0, %v6800_v36 }
0x29b3   :  { %6801 = vrcp.f32 %v4911_v33  ;;  %vm4918_vm9 = vweird.f32 %v4911_v33  ;;  %v4924_v1 = vand.u32 2147483648, %v4911_v33  ;;  %v4922_v24 = vand.u32 2147483647, %v4911_v33 }
0x29b4   :  { %6803 = vrcp.f32 %v4912_v6  ;;  %v4939_v17 = vand.u32 2147483648, %v4912_v6  ;;  %vm4933_vm12 = vweird.f32 %v4912_v6  ;;  %v4937_v46 = vand.u32 2147483647, %v4912_v6 }
0x29b5   :  { %v4925_v26 = vor.u32 1.1754944e-38, %v4924_v1  ;;  %vm4923_vm3 = vcmp.eq.f32.partialorder %v4922_v24, 8.507059e+37 }
0x29b6   :  { %v4940_v11 = vor.u32 1.1754944e-38, %v4939_v17  ;;  %vm4938_vm10 = vcmp.eq.f32.partialorder %v4937_v46, 8.507059e+37 }
0x29b9   :  { %v6802_v56 = vpop.eup %6801 }
0x29ba   :  { %v6804_v18 = vpop.eup %6803  ;;  %v4914_v42 = vmul.f32 %v6802_v56, %v4911_v33  ;;  %vm4919_vm13 = vweird.f32 %v6802_v56 }
0x29bb   :  { %v4929_v25 = vmul.f32 %v6804_v18, %v4912_v6  ;;  %vm4934_vm7 = vweird.f32 %v6804_v18  ;;  %vm4920_vm6 = vmor %vm4918_vm9, %vm4919_vm13 }
0x29bc   :  { %v4915_v28 = vsub.f32 1.0, %v4914_v42  ;;  %vm4935_vm8 = vmor %vm4933_vm12, %vm4934_vm7 }
0x29bd   :  { %v4930_v55 = vsub.f32 1.0, %v4929_v25  ;;  %vm8849_vm9 = vmmov %vm8848_vm14 }
0x29be   :  { %v4916_v50 = vmul.f32 %v6802_v56, %v4915_v28 }
0x29bf   :  { %v4931_v58 = vmul.f32 %v6804_v18, %v4930_v55 }
0x29c0   :  { %v4917_v43 = vadd.f32 %v6802_v56, %v4916_v50 }
0x29c1   :  { %v4932_v61 = vadd.f32 %v6804_v18, %v4931_v58 }
0x29c2   :  { %v4921_v48 = vsel %vm4920_vm6, %v6802_v56, %v4917_v43 }
0x29c3   :  { %v4936_v53 = vsel %vm4935_vm8, %v6804_v18, %v4932_v61  ;;  %v4926_v15 = vsel %vm4923_vm3, %v4925_v26, %v4921_v48 }
0x29c4   :  { %v4941_v52 = vsel %vm4938_vm10, %v4940_v11, %v4936_v53  ;;  %v4967_v59 = vsub.f32 1.0, %v4926_v15  ;;  %v4985_v12 = vmul.f32 %v4981_v63, %v4926_v15 }
0x29c5   :  { %v4968_v27 = vsub.f32 1.0, %v4941_v52  ;;  %v4986_v23 = vmul.f32 %v4982_v44, %v4941_v52 }
0x2a1a   :  { %v4950_v29 = vpop.permute.xlu1 %4949  ;;  %v4948_v0 = vpop.permute.xlu0 %4947 }
0x2a1b   :  { %v4954_v40 = vmul.f32 %v4950_v29, %v4941_v52  ;;  %v4953_v7 = vmul.f32 %v4948_v0, %v4926_v15 }
0x2a1d   :  { %4959 = vrot.lane.b32.xlu0 %v4954_v40, %s7022_s30  ;;  %4957 = vrot.lane.b32.xlu2 %v4953_v7, %s7022_s30 }
0x2a77   :  { %v4958_v34 = vpop.permute.xlu2 %4957 }
0x2a78   :  { %v4963_v3 = vadd.f32 %v4958_v34, %v8532_v22 }
0x2a7a   :  { %6805 = vtanh.f32 %v4963_v3 }
0x2a80   :  { %v6806_v30 = vpop.eup %6805 }
0x2a81   :  { %4971 = vrot.lane.b32.xlu1 %v6806_v30, %s7023_s1 }
0x2a8f   :  { %v4960_v47 = vpop.permute.xlu0 %4959 }
0x2a90   :  { %v4964_v9 = vadd.f32 %v4960_v47, %v8539_v31 }
0x2a92   :  { %6807 = vtanh.f32 %v4964_v9 }
0x2a98   :  { %v6808_v2 = vpop.eup %6807 }
0x2a99   :  { %4973 = vrot.lane.b32.xlu2 %v6808_v2, %s7023_s1 }
0x2af3   :  { %v4972_v51 = vpop.permute.xlu1 %4971  ;;  %v4974_v10 = vpop.permute.xlu2 %4973 }
0x2af4   :  { %v4977_v49 = vmul.f32 %v4972_v51, %v4967_v59  ;;  %v4978_v32 = vmul.f32 %v4974_v10, %v4968_v27 }
0x2af6   :  { %v8609_v20 = vadd.f32 %v4985_v12, %v4977_v49  ;;  %v4988_v57 = vadd.f32 %v4986_v23, %v4978_v32 }
0x2af8   :  { %v4989_v8 = vpack.c.bf16 %v8609_v20, %v8609_v20  ;;  %v4990_v38 = vpack.c.bf16 %v4988_v57, %v4988_v57  ;;  %v5101_v53 = vrot.slane %v4988_v57, 7 }
0x2afa   :  { %v4993_v45 = vunpack.c.l.b16 %v4989_v8  ;;  %v4994_v21 = vunpack.c.l.b16 %v4990_v38 }
0x2afc   :  { %v4995_v41 = vrot.slane %v4993_v45, 2  ;;  %v4996_v37 = vrot.slane %v4994_v21, 1  ;;  %v5100_v45 = vrot.slane %v8609_v20, 7 }
0x2afe   :  { %v4997_v19 = vsel %vm8848_vm14, %v4996_v37, %v4995_v41 }
0x2aff   :  { %v4998_v60 = vpack.c.b16 %v4997_v19, %v4997_v19 }
0x2b01   :  { %4999 = vrot.lane.b32.xlu0 %v4998_v60, %s7023_s1 }
0x2b73   :  { %v5000_v62 = vpop.permute.xlu0 %4999 }
0x2b74   :  { %6135 = vmatmul.msk.bf16.vlgmr.msra.gmra.mxu0 %vm127_vm0, %v5000_v62 }
0x2bf1   :  { %v5013_v13 = vpop.f32.mrf.mxu0 }
0x2bf2   :  { %v5019_v36 = vrot.slane %v5013_v13, 6  ;;  %v5062_v33 = vadd.f32 %v5013_v13, %v8569_v35  ;;  %v5018_v29 = vrot.slane %v5013_v13, 5 }
0x2bf4   :  { %v5023_v6 = vadd.f32 %v5019_v36, %v8539_v31  ;;  %v5064_v56 = vrot.slane %v5062_v33, 5  ;;  %v5065_v18 = vrot.slane %v5062_v33, 6  ;;  %v5022_v52 = vadd.f32 %v5018_v29, %v8532_v22 }
0x2bf6   :  { %v6137_v25 = vmul.f32 -1.442695, %v5023_v6  ;;  %5068 = vrot.lane.b32.xlu2 %v5065_v18, %s7022_s30  ;;  %5066 = vrot.lane.b32.xlu1 %v5064_v56, %s7022_s30  ;;  %v6136_v0 = vmul.f32 -1.442695, %v5022_v52 }
0x2bf8   :  { %6809 = vpow2.f32 %v6137_v25 }
0x2bf9   :  { %v5015_v42 = vpop.f32.mrf.mxu0 }
0x2bfe   :  { %v6810_v55 = vpop.eup %6809 }
0x2bff   :  { %v5031_v28 = vadd.f32 1.0, %v6810_v55 }
0x2c01   :  { %6811 = vrcp.f32 %v5031_v28  ;;  %v5058_v43 = vand.u32 2147483648, %v5031_v28  ;;  %v5056_v1 = vand.u32 2147483647, %v5031_v28  ;;  %vm5052_vm2 = vweird.f32 %v5031_v28 }
0x2c02   :  { %6813 = vpow2.f32 %v6136_v0 }
0x2c03   :  { %v5059_v24 = vor.u32 1.1754944e-38, %v5058_v43  ;;  %vm5057_vm11 = vcmp.eq.f32.partialorder %v5056_v1, 8.507059e+37 }
0x2c07   :  { %v6812_v58 = vpop.eup %6811 }
0x2c08   :  { %v5048_v50 = vmul.f32 %v6812_v58, %v5031_v28  ;;  %vm5053_vm1 = vweird.f32 %v6812_v58  ;;  %v6814_v15 = vpop.eup %6813 }
0x2c09   :  { %vm5054_vm5 = vmor %vm5052_vm2, %vm5053_vm1  ;;  %v5030_v40 = vadd.f32 1.0, %v6814_v15 }
0x2c0a   :  { %v5049_v61 = vsub.f32 1.0, %v5048_v50  ;;  %v8635_v50 = vpop.f32.mrf.mxu1 }
0x2c0b   :  { %6815 = vrcp.f32 %v5030_v40  ;;  %v5043_v44 = vand.u32 2147483648, %v5030_v40  ;;  %vm5037_vm4 = vweird.f32 %v5030_v40  ;;  %v5041_v63 = vand.u32 2147483647, %v5030_v40 }
0x2c0c   :  { %v5050_v17 = vmul.f32 %v6812_v58, %v5049_v61 }
0x2c0d   :  { %v5044_v27 = vor.u32 1.1754944e-38, %v5043_v44  ;;  %vm5042_vm7 = vcmp.eq.f32.partialorder %v5041_v63, 8.507059e+37 }
0x2c0e   :  { %v5051_v46 = vadd.f32 %v6812_v58, %v5050_v17 }
0x2c10   :  { %v5055_v48 = vsel %vm5054_vm5, %v6812_v58, %v5051_v46  ;;  %vm8850_vm5 = vmmov %vm8849_vm9 }
0x2c11   :  { %v5060_v11 = vsel %vm5057_vm11, %v5059_v24, %v5055_v48  ;;  %v6816_v3 = vpop.eup %6815 }
0x2c12   :  { %v5105_v26 = vmul.f32 %v5101_v53, %v5060_v11  ;;  %v5033_v30 = vmul.f32 %v6816_v3, %v5030_v40  ;;  %vm5038_vm15 = vweird.f32 %v6816_v3  ;;  %v5087_v41 = vsub.f32 1.0, %v5060_v11 }
0x2c13   :  { %vm5039_vm13 = vmor %vm5037_vm4, %vm5038_vm15 }
0x2c14   :  { %v5034_v47 = vsub.f32 1.0, %v5033_v30 }
0x2c16   :  { %v5035_v9 = vmul.f32 %v6816_v3, %v5034_v47 }
0x2c18   :  { %v5036_v2 = vadd.f32 %v6816_v3, %v5035_v9 }
0x2c1a   :  { %v5040_v59 = vsel %vm5039_vm13, %v6816_v3, %v5036_v2 }
0x2c1b   :  { %v5045_v10 = vsel %vm5042_vm7, %v5044_v27, %v5040_v59 }
0x2c1c   :  { %v5086_v21 = vsub.f32 1.0, %v5045_v10  ;;  %v5104_v60 = vmul.f32 %v5100_v45, %v5045_v10 }
0x2c50   :  { %v5069_v7 = vpop.permute.xlu2 %5068 }
0x2c51   :  { %v5073_v34 = vmul.f32 %v5069_v7, %v5060_v11 }
0x2c53   :  { %5078 = vrot.lane.b32.xlu1 %v5073_v34, %s7022_s30 }
0x2c68   :  { %v5067_v51 = vpop.permute.xlu1 %5066 }
0x2c69   :  { %v5072_v12 = vmul.f32 %v5067_v51, %v5045_v10 }
0x2c6b   :  { %5076 = vrot.lane.b32.xlu0 %v5072_v12, %s7022_s30 }
0x2cc5   :  { %v5079_v49 = vpop.permute.xlu1 %5078 }
0x2cc6   :  { %v5083_v23 = vadd.f32 %v5079_v49, %v8539_v31 }
0x2cc8   :  { %6817 = vtanh.f32 %v5083_v23 }
0x2cce   :  { %v6818_v32 = vpop.eup %6817 }
0x2ccf   :  { %5092 = vrot.lane.b32.xlu0 %v6818_v32, %s7023_s1 }
0x2cdd   :  { %v5077_v57 = vpop.permute.xlu0 %5076 }
0x2cde   :  { %v5082_v8 = vadd.f32 %v5077_v57, %v8532_v22 }
0x2ce0   :  { %6819 = vtanh.f32 %v5082_v8 }
0x2ce6   :  { %v6820_v38 = vpop.eup %6819 }
0x2ce7   :  { %5090 = vrot.lane.b32.xlu2 %v6820_v38, %s7023_s1 }
0x2d41   :  { %v5091_v37 = vpop.permute.xlu2 %5090  ;;  %v5093_v19 = vpop.permute.xlu0 %5092 }
0x2d42   :  { %v5096_v62 = vmul.f32 %v5091_v37, %v5086_v21  ;;  %v5097_v13 = vmul.f32 %v5093_v19, %v5087_v41 }
0x2d44   :  { %v5106_v36 = vadd.f32 %v5104_v60, %v5096_v62  ;;  %v8628_v33 = vadd.f32 %v5105_v26, %v5097_v13 }
0x2d46   :  { %v5108_v6 = vpack.c.bf16 %v5106_v36, %v5106_v36  ;;  %v5109_v56 = vpack.c.bf16 %v8628_v33, %v8628_v33  ;;  %v5219_v30 = vrot.slane %v5106_v36, 7 }
0x2d48   :  { %v5112_v18 = vunpack.c.l.b16 %v5108_v6  ;;  %v5113_v25 = vunpack.c.l.b16 %v5109_v56 }
0x2d4a   :  { %v5114_v42 = vrot.slane %v5112_v18, 3  ;;  %v5115_v55 = vrot.slane %v5113_v25, 2  ;;  %v5220_v25 = vrot.slane %v8628_v33, 7 }
0x2d4c   :  { %v5116_v20 = vsel %vm8849_vm9, %v5115_v55, %v5114_v42 }
0x2d4d   :  { %v5117_v28 = vpack.c.b16 %v5116_v20, %v5116_v20 }
0x2d4f   :  { %5118 = vrot.lane.b32.xlu1 %v5117_v28, %s7023_s1 }
0x2dc1   :  { %v5119_v58 = vpop.permute.xlu1 %5118 }
0x2dc2   :  { %6138 = vmatmul.msk.bf16.vlgmr.msra.gmra.mxu1 %vm127_vm0, %v5119_v58 }
0x2e3f   :  { %v5132_v61 = vpop.f32.mrf.mxu1 }
0x2e40   :  { %v5137_v43 = vrot.slane %v5132_v61, 4  ;;  %v5181_v17 = vadd.f32 %v5132_v61, %v8569_v35  ;;  %v5138_v44 = vrot.slane %v5132_v61, 5 }
0x2e42   :  { %v5141_v1 = vadd.f32 %v5137_v43, %v8532_v22  ;;  %v5183_v46 = vrot.slane %v5181_v17, 4  ;;  %v5184_v24 = vrot.slane %v5181_v17, 5  ;;  %v5142_v63 = vadd.f32 %v5138_v44, %v8539_v31 }
0x2e44   :  { %v6139_v53 = vmul.f32 -1.442695, %v5141_v1  ;;  %5187 = vrot.lane.b32.xlu0 %v5184_v24, %s7022_s30  ;;  %5185 = vrot.lane.b32.xlu2 %v5183_v46, %s7022_s30  ;;  %v6140_v59 = vmul.f32 -1.442695, %v5142_v63 }
0x2e46   :  { %6821 = vpow2.f32 %v6139_v53 }
0x2e47   :  { %v5134_v48 = vpop.f32.mrf.mxu1 }
0x2e4c   :  { %v6822_v11 = vpop.eup %6821 }
0x2e4d   :  { %v5149_v26 = vadd.f32 1.0, %v6822_v11 }
0x2e4f   :  { %6823 = vrcp.f32 %v5149_v26  ;;  %v5162_v15 = vand.u32 2147483648, %v5149_v26  ;;  %v5160_v7 = vand.u32 2147483647, %v5149_v26  ;;  %vm5156_vm6 = vweird.f32 %v5149_v26 }
0x2e50   :  { %6825 = vpow2.f32 %v6140_v59 }
0x2e51   :  { %v5163_v3 = vor.u32 1.1754944e-38, %v5162_v15  ;;  %vm5161_vm10 = vcmp.eq.f32.partialorder %v5160_v7, 8.507059e+37 }
0x2e55   :  { %v6824_v29 = vpop.eup %6823 }
0x2e56   :  { %v5152_v52 = vmul.f32 %v6824_v29, %v5149_v26  ;;  %vm5157_vm12 = vweird.f32 %v6824_v29  ;;  %v6826_v27 = vpop.eup %6825 }
0x2e57   :  { %vm5158_vm8 = vmor %vm5156_vm6, %vm5157_vm12  ;;  %v5150_v51 = vadd.f32 1.0, %v6826_v27 }
0x2e58   :  { %v5153_v0 = vsub.f32 1.0, %v5152_v52 }
0x2e59   :  { %6827 = vrcp.f32 %v5150_v51  ;;  %v5177_v38 = vand.u32 2147483648, %v5150_v51  ;;  %vm5171_vm14 = vweird.f32 %v5150_v51  ;;  %v5175_v45 = vand.u32 2147483647, %v5150_v51 }
0x2e5a   :  { %v5154_v40 = vmul.f32 %v6824_v29, %v5153_v0 }
0x2e5b   :  { %v5178_v41 = vor.u32 1.1754944e-38, %v5177_v38  ;;  %vm5176_vm2 = vcmp.eq.f32.partialorder %v5175_v45, 8.507059e+37 }
0x2e5c   :  { %v5155_v34 = vadd.f32 %v6824_v29, %v5154_v40 }
0x2e5e   :  { %v5159_v47 = vsel %vm5158_vm8, %v6824_v29, %v5155_v34  ;;  %vm8851_vm8 = vmmov %vm8850_vm5 }
0x2e5f   :  { %v5164_v9 = vsel %vm5161_vm10, %v5163_v3, %v5159_v47  ;;  %v6828_v49 = vpop.eup %6827 }
0x2e60   :  { %v5223_v2 = vmul.f32 %v5219_v30, %v5164_v9  ;;  %v5167_v23 = vmul.f32 %v6828_v49, %v5150_v51  ;;  %vm5172_vm3 = vweird.f32 %v6828_v49  ;;  %v5205_v55 = vsub.f32 1.0, %v5164_v9 }
0x2e61   :  { %vm5173_vm1 = vmor %vm5171_vm14, %vm5172_vm3 }
0x2e62   :  { %v5168_v32 = vsub.f32 1.0, %v5167_v23 }
0x2e64   :  { %v5169_v57 = vmul.f32 %v6828_v49, %v5168_v32 }
0x2e66   :  { %v5170_v8 = vadd.f32 %v6828_v49, %v5169_v57 }
0x2e68   :  { %v5174_v21 = vsel %vm5173_vm1, %v6828_v49, %v5170_v8 }
0x2e69   :  { %v5179_v19 = vsel %vm5176_vm2, %v5178_v41, %v5174_v21 }
0x2e6a   :  { %v5206_v42 = vsub.f32 1.0, %v5179_v19  ;;  %v5224_v58 = vmul.f32 %v5220_v25, %v5179_v19 }
0x2e9e   :  { %v5186_v10 = vpop.permute.xlu2 %5185 }
0x2e9f   :  { %v5191_v12 = vmul.f32 %v5186_v10, %v5164_v9 }
0x2ea1   :  { %5195 = vrot.lane.b32.xlu1 %v5191_v12, %s7022_s30 }
0x2eb6   :  { %v5188_v37 = vpop.permute.xlu0 %5187 }
0x2eb7   :  { %v5192_v60 = vmul.f32 %v5188_v37, %v5179_v19 }
0x2eb9   :  { %5197 = vrot.lane.b32.xlu2 %v5192_v60, %s7022_s30 }
0x2f13   :  { %v5198_v62 = vpop.permute.xlu2 %5197  ;;  %v5196_v13 = vpop.permute.xlu1 %5195 }
0x2f14   :  { %v5202_v36 = vadd.f32 %v5198_v62, %v8539_v31  ;;  %v5201_v6 = vadd.f32 %v5196_v13, %v8532_v22 }
0x2f16   :  { %6829 = vtanh.f32 %v5202_v36 }
0x2f17   :  { %6831 = vtanh.f32 %v5201_v6 }
0x2f1c   :  { %v6830_v56 = vpop.eup %6829 }
0x2f1d   :  { %v6832_v18 = vpop.eup %6831  ;;  %5211 = vrot.lane.b32.xlu1 %v6830_v56, %s7023_s1 }
0x2f1e   :  { %5209 = vrot.lane.b32.xlu0 %v6832_v18, %s7023_s1 }
0x2f8f   :  { %v5212_v20 = vpop.permute.xlu1 %5211 }
0x2f90   :  { %v5210_v28 = vpop.permute.xlu0 %5209  ;;  %v5216_v61 = vmul.f32 %v5212_v20, %v5206_v42 }
0x2f91   :  { %v5215_v43 = vmul.f32 %v5210_v28, %v5205_v55 }
0x2f92   :  { %v8649_v17 = vadd.f32 %v5224_v58, %v5216_v61 }
0x2f93   :  { %v8651_v1 = vadd.f32 %v5223_v2, %v5215_v43 }
0x2f94   :  { %v5228_v46 = vpack.c.bf16 %v8649_v17, %v8649_v17 }
0x2f95   :  { %v5227_v24 = vpack.c.bf16 %v8651_v1, %v8651_v1 }
0x2f96   :  { %v5232_v53 = vunpack.c.l.b16 %v5228_v46 }
0x2f97   :  { %v5231_v48 = vunpack.c.l.b16 %v5227_v24 }
0x2f98   :  { %v5234_v33 = vrot.slane %v5232_v53, 3  ;;  %v5338_v53 = vrot.slane %v8651_v1, 7 }
0x2f99   :  { %v5233_v11 = vrot.slane %v5231_v48, 4  ;;  %v5339_v48 = vrot.slane %v8649_v17, 7 }
0x2f9b   :  { %v5235_v26 = vsel %vm8850_vm5, %v5234_v33, %v5233_v11 }
0x2f9c   :  { %v5236_v29 = vpack.c.b16 %v5235_v26, %v5235_v26 }
0x2f9e   :  { %5237 = vrot.lane.b32.xlu2 %v5236_v29, %s7023_s1 }
0x2ff8   :  { %v5238_v52 = vpop.permute.xlu2 %5237 }
0x2ff9   :  { %6141 = vmatmul.msk.bf16.vlgmr.msrb.gmra.mxu2 %vm127_vm0, %v5238_v52 }
0x307c   :  { %v5251_v0 = vpop.f32.mrf.mxu2 }
0x307d   :  { %v5300_v15 = vadd.f32 %v5251_v0, %v8569_v35  ;;  %v5256_v3 = vrot.slane %v5251_v0, 3  ;;  %v5257_v30 = vrot.slane %v5251_v0, 4 }
0x307f   :  { %v5302_v40 = vrot.slane %v5300_v15, 3  ;;  %v5303_v7 = vrot.slane %v5300_v15, 4  ;;  %v5260_v47 = vadd.f32 %v5256_v3, %v8532_v22  ;;  %v5261_v9 = vadd.f32 %v5257_v30, %v8539_v31 }
0x3081   :  { %5306 = vrot.lane.b32.xlu1 %v5303_v7, %s7022_s30  ;;  %5304 = vrot.lane.b32.xlu0 %v5302_v40, %s7022_s30  ;;  %v6142_v2 = vmul.f32 -1.442695, %v5260_v47  ;;  %v6143_v44 = vmul.f32 -1.442695, %v5261_v9 }
0x3083   :  { %6833 = vpow2.f32 %v6142_v2 }
0x3084   :  { %v5253_v34 = vpop.f32.mrf.mxu2  ;;  %6835 = vpow2.f32 %v6143_v44 }
0x3089   :  { %v6834_v63 = vpop.eup %6833 }
0x308a   :  { %v6836_v59 = vpop.eup %6835  ;;  %v5268_v27 = vadd.f32 1.0, %v6834_v63 }
0x308b   :  { %v5269_v51 = vadd.f32 1.0, %v6836_v59 }
0x308c   :  { %6837 = vrcp.f32 %v5268_v27  ;;  %vm5275_vm4 = vweird.f32 %v5268_v27  ;;  %v5281_v37 = vand.u32 2147483648, %v5268_v27  ;;  %v5279_v60 = vand.u32 2147483647, %v5268_v27 }
0x308d   :  { %6839 = vrcp.f32 %v5269_v51  ;;  %v5296_v41 = vand.u32 2147483648, %v5269_v51  ;;  %vm5290_vm13 = vweird.f32 %v5269_v51  ;;  %v5294_v19 = vand.u32 2147483647, %v5269_v51 }
0x308e   :  { %v5282_v6 = vor.u32 1.1754944e-38, %v5281_v37  ;;  %vm5280_vm6 = vcmp.eq.f32.partialorder %v5279_v60, 8.507059e+37 }
0x308f   :  { %v5297_v36 = vor.u32 1.1754944e-38, %v5296_v41  ;;  %vm5295_vm12 = vcmp.eq.f32.partialorder %v5294_v19, 8.507059e+37 }
0x3092   :  { %v6838_v10 = vpop.eup %6837 }
0x3093   :  { %v6840_v12 = vpop.eup %6839  ;;  %v5271_v23 = vmul.f32 %v6838_v10, %v5268_v27  ;;  %vm5276_vm11 = vweird.f32 %v6838_v10 }
0x3094   :  { %v5286_v49 = vmul.f32 %v6840_v12, %v5269_v51  ;;  %vm5291_vm15 = vweird.f32 %v6840_v12  ;;  %vm5277_vm7 = vmor %vm5275_vm4, %vm5276_vm11 }
0x3095   :  { %v5272_v57 = vsub.f32 1.0, %v5271_v23  ;;  %vm5292_vm9 = vmor %vm5290_vm13, %vm5291_vm15 }
0x3096   :  { %v5287_v32 = vsub.f32 1.0, %v5286_v49  ;;  %vm8852_vm4 = vmmov %vm8851_vm8 }
0x3097   :  { %v5273_v38 = vmul.f32 %v6838_v10, %v5272_v57 }
0x3098   :  { %v5288_v8 = vmul.f32 %v6840_v12, %v5287_v32 }
0x3099   :  { %v5274_v21 = vadd.f32 %v6838_v10, %v5273_v38 }
0x309a   :  { %v5289_v45 = vadd.f32 %v6840_v12, %v5288_v8 }
0x309b   :  { %v5278_v13 = vsel %vm5277_vm7, %v6838_v10, %v5274_v21 }
0x309c   :  { %v5293_v62 = vsel %vm5292_vm9, %v6840_v12, %v5289_v45  ;;  %v5283_v42 = vsel %vm5280_vm6, %v5282_v6, %v5278_v13 }
0x309d   :  { %v5298_v18 = vsel %vm5295_vm12, %v5297_v36, %v5293_v62  ;;  %v5324_v33 = vsub.f32 1.0, %v5283_v42  ;;  %v5342_v52 = vmul.f32 %v5338_v53, %v5283_v42 }
0x309e   :  { %v5325_v11 = vsub.f32 1.0, %v5298_v18  ;;  %v5343_v15 = vmul.f32 %v5339_v48, %v5298_v18 }
0x30f3   :  { %v5307_v56 = vpop.permute.xlu1 %5306  ;;  %v5305_v25 = vpop.permute.xlu0 %5304 }
0x30f4   :  { %v5311_v55 = vmul.f32 %v5307_v56, %v5298_v18  ;;  %v5310_v20 = vmul.f32 %v5305_v25, %v5283_v42 }
0x30f6   :  { %5316 = vrot.lane.b32.xlu0 %v5311_v55, %s7022_s30  ;;  %5314 = vrot.lane.b32.xlu2 %v5310_v20, %s7022_s30 }
0x3150   :  { %v5315_v28 = vpop.permute.xlu2 %5314 }
0x3151   :  { %v5320_v58 = vadd.f32 %v5315_v28, %v8532_v22 }
0x3153   :  { %6841 = vtanh.f32 %v5320_v58 }
0x3159   :  { %v6842_v61 = vpop.eup %6841 }
0x315a   :  { %5328 = vrot.lane.b32.xlu1 %v6842_v61, %s7023_s1 }
0x3168   :  { %v5317_v43 = vpop.permute.xlu0 %5316 }
0x3169   :  { %v5321_v46 = vadd.f32 %v5317_v43, %v8539_v31 }
0x316b   :  { %6843 = vtanh.f32 %v5321_v46 }
0x3171   :  { %v6844_v24 = vpop.eup %6843 }
0x3172   :  { %5330 = vrot.lane.b32.xlu2 %v6844_v24, %s7023_s1 }
0x31cc   :  { %v5329_v26 = vpop.permute.xlu1 %5328  ;;  %v5331_v29 = vpop.permute.xlu2 %5330 }
0x31cd   :  { %v5334_v0 = vmul.f32 %v5329_v26, %v5324_v33  ;;  %v5335_v40 = vmul.f32 %v5331_v29, %v5325_v11 }
0x31cf   :  { %v8673_v7 = vadd.f32 %v5342_v52, %v5334_v0  ;;  %v5345_v34 = vadd.f32 %v5343_v15, %v5335_v40 }
0x31d1   :  { %v5346_v3 = vpack.c.bf16 %v8673_v7, %v8673_v7  ;;  %v5347_v30 = vpack.c.bf16 %v5345_v34, %v5345_v34  ;;  %v5458_v13 = vrot.slane %v5345_v34, 7 }
0x31d3   :  { %v5350_v47 = vunpack.c.l.b16 %v5346_v3  ;;  %v5351_v9 = vunpack.c.l.b16 %v5347_v30  ;;  %v6885_v3 = vld [vmem:[%s8795_s5 + $0x2] ss:$0 sm:$0xff] }
0x31d5   :  { %v5352_v1 = vrot.slane %v5350_v47, 5  ;;  %v5353_v2 = vrot.slane %v5351_v9, 4 }
0x31d7   :  { %v5354_v17 = vsel %vm8851_vm8, %v5353_v2, %v5352_v1  ;;  %v5457_v1 = vrot.slane %v8673_v7, 7 }
0x31d8   :  { %v5355_v44 = vpack.c.b16 %v5354_v17, %v5354_v17 }
0x31da   :  { %5356 = vrot.lane.b32.xlu0 %v5355_v44, %s7023_s1 }
0x324c   :  { %v5357_v63 = vpop.permute.xlu0 %5356 }
0x324d   :  { %6144 = vmatmul.msk.bf16.vlgmr.msrb.gmra.mxu3 %vm127_vm0, %v5357_v63 }
0x32d0   :  { %v5370_v59 = vpop.f32.mrf.mxu3 }
0x32d1   :  { %v5376_v27 = vrot.slane %v5370_v59, 3  ;;  %v5419_v51 = vadd.f32 %v5370_v59, %v8569_v35  ;;  %v5375_v18 = vrot.slane %v5370_v59, 2 }
0x32d3   :  { %v5380_v10 = vadd.f32 %v5376_v27, %v8539_v31  ;;  %v5421_v12 = vrot.slane %v5419_v51, 2  ;;  %v5422_v49 = vrot.slane %v5419_v51, 3  ;;  %v5379_v25 = vadd.f32 %v5375_v18, %v8532_v22 }
0x32d5   :  { %v6146_v23 = vmul.f32 -1.442695, %v5380_v10  ;;  %5425 = vrot.lane.b32.xlu2 %v5422_v49, %s7022_s30  ;;  %5423 = vrot.lane.b32.xlu1 %v5421_v12, %s7022_s30  ;;  %v6145_v42 = vmul.f32 -1.442695, %v5379_v25 }
0x32d7   :  { %6845 = vpow2.f32 %v6146_v23 }
0x32d8   :  { %v5372_v32 = vpop.f32.mrf.mxu3 }
0x32dd   :  { %v6846_v57 = vpop.eup %6845 }
0x32de   :  { %v5388_v8 = vadd.f32 1.0, %v6846_v57 }
0x32e0   :  { %6847 = vrcp.f32 %v5388_v8  ;;  %v5415_v41 = vand.u32 2147483648, %v5388_v8  ;;  %v5413_v19 = vand.u32 2147483647, %v5388_v8  ;;  %vm5409_vm3 = vweird.f32 %v5388_v8 }
0x32e1   :  { %6849 = vpow2.f32 %v6145_v42 }
0x32e2   :  { %v5416_v62 = vor.u32 1.1754944e-38, %v5415_v41  ;;  %vm5414_vm1 = vcmp.eq.f32.partialorder %v5413_v19, 8.507059e+37 }
0x32e6   :  { %v6848_v38 = vpop.eup %6847 }
0x32e7   :  { %v5405_v45 = vmul.f32 %v6848_v38, %v5388_v8  ;;  %vm5410_vm10 = vweird.f32 %v6848_v38  ;;  %v6850_v55 = vpop.eup %6849 }
0x32e8   :  { %vm5411_vm14 = vmor %vm5409_vm3, %vm5410_vm10  ;;  %v5387_v20 = vadd.f32 1.0, %v6850_v55 }
0x32e9   :  { %v5406_v21 = vsub.f32 1.0, %v5405_v45 }
0x32ea   :  { %6851 = vrcp.f32 %v5387_v20  ;;  %v5400_v48 = vand.u32 2147483648, %v5387_v20  ;;  %vm5394_vm5 = vweird.f32 %v5387_v20  ;;  %v5398_v33 = vand.u32 2147483647, %v5387_v20 }
0x32eb   :  { %v5407_v37 = vmul.f32 %v6848_v38, %v5406_v21 }
0x32ec   :  { %v5401_v26 = vor.u32 1.1754944e-38, %v5400_v48  ;;  %vm5399_vm15 = vcmp.eq.f32.partialorder %v5398_v33, 8.507059e+37 }
0x32ed   :  { %v5408_v60 = vadd.f32 %v6848_v38, %v5407_v37 }
0x32ef   :  { %v5412_v36 = vsel %vm5411_vm14, %v6848_v38, %v5408_v60 }
0x32f0   :  { %v5417_v6 = vsel %vm5414_vm1, %v5416_v62, %v5412_v36  ;;  %v6852_v61 = vpop.eup %6851 }
0x32f1   :  { %v5462_v56 = vmul.f32 %v5458_v13, %v5417_v6  ;;  %v5390_v43 = vmul.f32 %v6852_v61, %v5387_v20  ;;  %vm5395_vm2 = vweird.f32 %v6852_v61  ;;  %v5444_v17 = vsub.f32 1.0, %v5417_v6 }
0x32f2   :  { %vm5396_vm11 = vmor %vm5394_vm5, %vm5395_vm2 }
0x32f3   :  { %v5391_v46 = vsub.f32 1.0, %v5390_v43 }
0x32f5   :  { %v5392_v24 = vmul.f32 %v6852_v61, %v5391_v46 }
0x32f7   :  { %v5393_v53 = vadd.f32 %v6852_v61, %v5392_v24 }
0x32f9   :  { %v5397_v11 = vsel %vm5396_vm11, %v6852_v61, %v5393_v53 }
0x32fa   :  { %v5402_v52 = vsel %vm5399_vm15, %v5401_v26, %v5397_v11 }
0x32fb   :  { %v5443_v2 = vsub.f32 1.0, %v5402_v52  ;;  %v5461_v59 = vmul.f32 %v5457_v1, %v5402_v52  ;;  %v4646_v1 = vadd.f32 %v8635_v50, %v8594_v16 }
0x332f   :  { %v5426_v28 = vpop.permute.xlu2 %5425 }
0x3330   :  { %v5430_v58 = vmul.f32 %v5426_v28, %v5417_v6 }
0x3332   :  { %5435 = vrot.lane.b32.xlu1 %v5430_v58, %s7022_s30 }
0x3347   :  { %v5424_v29 = vpop.permute.xlu1 %5423 }
0x3348   :  { %v5429_v0 = vmul.f32 %v5424_v29, %v5402_v52 }
0x334a   :  { %5433 = vrot.lane.b32.xlu0 %v5429_v0, %s7022_s30 }
0x33a4   :  { %v5436_v15 = vpop.permute.xlu1 %5435 }
0x33a5   :  { %v5440_v40 = vadd.f32 %v5436_v15, %v8539_v31 }
0x33a7   :  { %6853 = vtanh.f32 %v5440_v40 }
0x33ad   :  { %v6854_v34 = vpop.eup %6853 }
0x33ae   :  { %5449 = vrot.lane.b32.xlu0 %v6854_v34, %s7023_s1 }
0x33b6   :  { %5625 = vrot.lane.b32.xlu0 %v6885_v3, %s7022_s30 }
0x33bc   :  { %v5434_v30 = vpop.permute.xlu0 %5433 }
0x33bd   :  { %v5439_v47 = vadd.f32 %v5434_v30, %v8532_v22 }
0x33bf   :  { %6855 = vtanh.f32 %v5439_v47 }
0x33c5   :  { %v6856_v9 = vpop.eup %6855 }
0x33c6   :  { %5447 = vrot.lane.b32.xlu2 %v6856_v9, %s7023_s1 }
0x3420   :  { %v5448_v44 = vpop.permute.xlu2 %5447  ;;  %v5450_v63 = vpop.permute.xlu0 %5449 }
0x3421   :  { %v5453_v27 = vmul.f32 %v5448_v44, %v5443_v2  ;;  %v5454_v51 = vmul.f32 %v5450_v63, %v5444_v17 }
0x3423   :  { %v8696_v10 = vadd.f32 %v5461_v59, %v5453_v27  ;;  %v5464_v12 = vadd.f32 %v5462_v56, %v5454_v51  ;;  %v4658_v59 = vadd.f32 %v4652_v4, %v4646_v1 }
0x3425   :  { %v5465_v49 = vpack.c.bf16 %v8696_v10, %v8696_v10  ;;  %v5466_v23 = vpack.c.bf16 %v5464_v12, %v5464_v12  ;;  %v5577_v46 = vrot.slane %v5464_v12, 7 }
0x3427   :  { %v5469_v32 = vunpack.c.l.b16 %v5465_v49  ;;  %v5470_v57 = vunpack.c.l.b16 %v5466_v23 }
0x3428   :  { %v5626_v8 = vpop.permute.xlu0 %5625 }
0x3429   :  { %v5471_v38 = vrot.slane %v5469_v32, 6  ;;  %v5472_v45 = vrot.slane %v5470_v57, 5  ;;  %v5629_v7 = vmul.f32 %v5626_v8, %v8549_v14  ;;  %v5628_v3 = vmul.f32 %v5626_v8, %v8545_v5 }
0x342b   :  { %5634 = vrot.lane.b32.xlu0 %v5629_v7, %s7022_s30  ;;  %v5473_v21 = vsel %vm8852_vm4, %v5472_v45, %v5471_v38  ;;  %v6151_v7 = vmul.f32 -1.442695, %v4658_v59 }
0x342c   :  { %v5474_v41 = vpack.c.b16 %v5473_v21, %v5473_v21 }
0x342e   :  { %5475 = vrot.lane.b32.xlu1 %v5474_v41, %s7023_s1 }
0x349d   :  { %v5635_v44 = vpop.permute.xlu0 %5634 }
0x349e   :  { %v5639_v5 = vadd.f32 %v5635_v44, %v4658_v59 }
0x34a0   :  { %v5476_v37 = vpop.permute.xlu1 %5475 }
0x34a1   :  { %6147 = vmatmul.msk.bf16.vlgmr.msrb.gmra.mxu0 %vm127_vm0, %v5476_v37 }
0x351e   :  { %v5489_v19 = vpop.f32.mrf.mxu0 }
0x351f   :  { %v5495_v60 = vrot.slane %v5489_v19, 2  ;;  %v5538_v62 = vadd.f32 %v5489_v19, %v8569_v35  ;;  %v5494_v33 = vrot.slane %v5489_v19, 1 }
0x3521   :  { %v5499_v13 = vadd.f32 %v5495_v60, %v8539_v31  ;;  %v5540_v36 = vrot.slane %v5538_v62, 1  ;;  %v5541_v6 = vrot.slane %v5538_v62, 2  ;;  %v5498_v11 = vadd.f32 %v5494_v33, %v8532_v22 }
0x3523   :  { %v6149_v56 = vmul.f32 -1.442695, %v5499_v13  ;;  %5544 = vrot.lane.b32.xlu2 %v5541_v6, %s7022_s30  ;;  %5542 = vrot.lane.b32.xlu1 %v5540_v36, %s7022_s30  ;;  %v6148_v26 = vmul.f32 -1.442695, %v5498_v11 }
0x3525   :  { %6857 = vpow2.f32 %v6149_v56 }
0x3526   :  { %v5491_v14 = vpop.f32.mrf.mxu0 }
0x352b   :  { %v6858_v18 = vpop.eup %6857 }
0x352c   :  { %v5507_v25 = vadd.f32 1.0, %v6858_v18 }
0x352e   :  { %6859 = vrcp.f32 %v5507_v25  ;;  %v5534_v28 = vand.u32 2147483648, %v5507_v25  ;;  %v5532_v35 = vand.u32 2147483647, %v5507_v25  ;;  %vm5528_vm7 = vweird.f32 %v5507_v25 }
0x352f   :  { %6861 = vpow2.f32 %v6148_v26 }
0x3530   :  { %v5535_v43 = vor.u32 1.1754944e-38, %v5534_v28  ;;  %vm5533_vm12 = vcmp.eq.f32.partialorder %v5532_v35, 8.507059e+37 }
0x3534   :  { %v6860_v42 = vpop.eup %6859 }
0x3535   :  { %v5524_v55 = vmul.f32 %v6860_v42, %v5507_v25  ;;  %vm5529_vm13 = vweird.f32 %v6860_v42  ;;  %v6862_v29 = vpop.eup %6861 }
0x3536   :  { %vm5530_vm9 = vmor %vm5528_vm7, %vm5529_vm13  ;;  %v5506_v52 = vadd.f32 1.0, %v6862_v29  ;;  %vm8853_vm7 = vcmask 523264  }
0x3537   :  { %v5525_v20 = vsub.f32 1.0, %v5524_v55 }
0x3538   :  { %6863 = vrcp.f32 %v5506_v52  ;;  %v5519_v2 = vand.u32 2147483648, %v5506_v52  ;;  %vm5513_vm8 = vweird.f32 %v5506_v52  ;;  %v5517_v17 = vand.u32 2147483647, %v5506_v52 }
0x3539   :  { %v5526_v58 = vmul.f32 %v6860_v42, %v5525_v20  ;;  %6865 = vtanh.f32 %v5639_v5 }
0x353a   :  { %v5520_v27 = vor.u32 1.1754944e-38, %v5519_v2  ;;  %vm5518_vm3 = vcmp.eq.f32.partialorder %v5517_v17, 8.507059e+37  ;;  %v5576_v2 = vrot.slane %v8696_v10, 7  ;;  %v6241_v10 = vld [vmem:[%s8796_s6 + $0x10] sm:$0xff] }
0x353b   :  { %v5527_v61 = vadd.f32 %v6860_v42, %v5526_v58 }
0x353d   :  { %v5531_v24 = vsel %vm5530_vm9, %v6860_v42, %v5527_v61 }
0x353e   :  { %v8709_v53 = vsel %vm5533_vm12, %v5535_v43, %v5531_v24  ;;  %v6864_v40 = vpop.eup %6863 }
0x353f   :  { %v8712_v48 = vmul.f32 %v5577_v46, %v8709_v53  ;;  %v5509_v34 = vmul.f32 %v6864_v40, %v5506_v52  ;;  %vm5514_vm6 = vweird.f32 %v6864_v40  ;;  %v6866_v16 = vpop.eup %6865  ;;  %v5563_v35 = vsub.f32 1.0, %v8709_v53 }
0x3540   :  { %vm5515_vm10 = vmor %vm5513_vm8, %vm5514_vm6 }
0x3541   :  { %v5510_v30 = vsub.f32 1.0, %v5509_v34 }
0x3543   :  { %v5511_v47 = vmul.f32 %v6864_v40, %v5510_v30 }
0x3545   :  { %v5512_v9 = vadd.f32 %v6864_v40, %v5511_v47 }
0x3547   :  { %v5516_v63 = vsel %vm5515_vm10, %v6864_v40, %v5512_v9 }
0x3548   :  { %v8723_v12 = vsel %vm5518_vm3, %v5520_v27, %v5516_v63 }
0x3549   :  { %v5562_v17 = vsub.f32 1.0, %v8723_v12 }
0x357d   :  { %v5545_v0 = vpop.permute.xlu2 %5544 }
0x357e   :  { %v5549_v15 = vmul.f32 %v5545_v0, %v8709_v53 }
0x3580   :  { %5554 = vrot.lane.b32.xlu2 %v5549_v15, %s7022_s30 }
0x3588   :  { %5632 = vrot.lane.b32.xlu2 %v5628_v3, %s7022_s30 }
0x3595   :  { %v5543_v51 = vpop.permute.xlu1 %5542 }
0x3596   :  { %v5548_v49 = vmul.f32 %v5543_v51, %v8723_v12  ;;  %v6242_v51 = vld [vmem:[%s8796_s6 + $0x18] sm:$0xff] }
0x3597   :  { %5730 = vmatpush.bf16.msrb.mxu1 %v6242_v51 }
0x3598   :  { %5552 = vrot.lane.b32.xlu1 %v5548_v49, %s7022_s30  ;;  %v6239_v49 = vld [vmem:[%s8796_s6] sm:$0xff] }
0x359b   :  { %5731 = vmatpush.bf16.msrb.mxu1 %v6241_v10 }
0x35a0   :  { %5648 = vrot.lane.b32.xlu1 %v6866_v16, %s7023_s1  ;;  %v6250_v16 = vld [vmem:[%s8798_s8 + $0x38] sm:$0xff] }
0x35a1   :  { %5809 = vmatpush.bf16.msra.mxu2 %v6250_v16 }
0x35da   :  { %v5555_v50 = vpop.permute.xlu2 %5554 }
0x35db   :  { %v5559_v23 = vadd.f32 %v5555_v50, %v8539_v31  ;;  %v6150_v31 = vmul.f32 -1.442695, %v8536_v54  ;;  %v6249_v50 = vld [vmem:[%s8798_s8 + $0x30] sm:$0xff] }
0x35dc   :  { %5810 = vmatpush.bf16.msra.mxu2 %v6249_v50 }
0x35dd   :  { %6867 = vtanh.f32 %v5559_v23  ;;  %v6248_v23 = vld [vmem:[%s8798_s8 + $0x28] sm:$0xff] }
0x35e0   :  { %5811 = vmatpush.bf16.msra.mxu2 %v6248_v23 }
0x35e2   :  { %v5633_v39 = vpop.permute.xlu2 %5632 }
0x35e3   :  { %v6868_v4 = vpop.eup %6867  ;;  %v5638_v32 = vadd.f32 %v5633_v39, %v8536_v54  ;;  %v6247_v39 = vld [vmem:[%s8798_s8 + $0x20] sm:$0xff] }
0x35e4   :  { %5568 = vrot.lane.b32.xlu0 %v6868_v4, %s7023_s1  ;;  %5812 = vmatpush.bf16.msra.mxu2 %v6247_v39  ;;  %v6246_v4 = vld [vmem:[%s8798_s8 + $0x18] sm:$0xff] }
0x35e5   :  { %6869 = vtanh.f32 %v5638_v32 }
0x35e8   :  { %5813 = vmatpush.bf16.msra.mxu2 %v6246_v4 }
0x35eb   :  { %v6870_v57 = vpop.eup %6869 }
0x35ec   :  { %5646 = vrot.lane.b32.xlu0 %v6870_v57, %s7023_s1  ;;  %v6245_v57 = vld [vmem:[%s8798_s8 + $0x10] sm:$0xff] }
0x35ed   :  { %5814 = vmatpush.bf16.msra.mxu2 %v6245_v57 }
0x360a   :  { %v5553_v8 = vpop.permute.xlu1 %5552 }
0x360b   :  { %v5558_v38 = vadd.f32 %v5553_v8, %v8532_v22 }
0x360d   :  { %6871 = vtanh.f32 %v5558_v38 }
0x360e   :  { %6873 = vpow2.f32 %v6151_v7 }
0x360f   :  { %6875 = vpow2.f32 %v6150_v31 }
0x3612   :  { %v5649_v43 = vpop.permute.xlu1 %5648 }
0x3613   :  { %v6872_v45 = vpop.eup %6871 }
0x3614   :  { %5566 = vrot.lane.b32.xlu2 %v6872_v45, %s7023_s1  ;;  %v6874_v21 = vpop.eup %6873 }
0x3615   :  { %v5593_v41 = vadd.f32 1.0, %v6874_v21  ;;  %v6876_v37 = vpop.eup %6875 }
0x3616   :  { %v5592_v19 = vadd.f32 1.0, %v6876_v37 }
0x3617   :  { %6877 = vrcp.f32 %v5593_v41  ;;  %v5620_v18 = vand.u32 2147483648, %v5593_v41  ;;  %vm5614_vm1 = vweird.f32 %v5593_v41  ;;  %v5618_v25 = vand.u32 2147483647, %v5593_v41 }
0x3618   :  { %6879 = vrcp.f32 %v5592_v19  ;;  %v5605_v58 = vand.u32 2147483648, %v5592_v19  ;;  %vm5599_vm15 = vweird.f32 %v5592_v19  ;;  %v5603_v61 = vand.u32 2147483647, %v5592_v19 }
0x3619   :  { %v5621_v55 = vor.u32 1.1754944e-38, %v5620_v18  ;;  %vm5619_vm5 = vcmp.eq.f32.partialorder %v5618_v25, 8.507059e+37 }
0x361a   :  { %v5606_v26 = vor.u32 1.1754944e-38, %v5605_v58  ;;  %vm5604_vm13 = vcmp.eq.f32.partialorder %v5603_v61, 8.507059e+37 }
0x361d   :  { %v6878_v60 = vpop.eup %6877 }
0x361e   :  { %v5610_v62 = vmul.f32 %v6878_v60, %v5593_v41  ;;  %v6880_v13 = vpop.eup %6879  ;;  %vm5615_vm14 = vweird.f32 %v6878_v60 }
0x361f   :  { %v5595_v22 = vmul.f32 %v6880_v13, %v5592_v19  ;;  %vm5616_vm2 = vmor %vm5614_vm1, %vm5615_vm14  ;;  %vm5600_vm11 = vweird.f32 %v6880_v13 }
0x3620   :  { %v5611_v36 = vsub.f32 1.0, %v5610_v62  ;;  %vm5601_vm4 = vmor %vm5599_vm15, %vm5600_vm11 }
0x3621   :  { %v5596_v56 = vsub.f32 1.0, %v5595_v22  ;;  %v6244_v22 = vld [vmem:[%s8798_s8 + $0x8] sm:$0xff] }
0x3622   :  { %v5612_v6 = vmul.f32 %v6878_v60, %v5611_v36  ;;  %5815 = vmatpush.bf16.msra.mxu2 %v6244_v22 }
0x3623   :  { %v5597_v54 = vmul.f32 %v6880_v13, %v5596_v56  ;;  %v6275_v56 = vld [vmem:[%s8797_s7] ss:$0 sm:$0xff] }
0x3624   :  { %v5613_v14 = vadd.f32 %v6878_v60, %v5612_v6  ;;  %v6243_v6 = vld [vmem:[%s8798_s8] sm:$0xff]  ;;  %s5831_s8 = sshll.u32 %s8800_s10, 4  ;;  %s5832_s8 = int_to_ptr.hbm [resolvable:$true] %s5831_s8 }
0x3625   :  { %v5598_v20 = vadd.f32 %v6880_v13, %v5597_v54 }
0x3626   :  { %v5617_v42 = vsel %vm5616_vm2, %v6878_v60, %v5613_v14  ;;  %5816 = vmatpush.bf16.msra.mxu2 %v6243_v6 }
0x3627   :  { %v5622_v28 = vsel %vm5619_vm5, %v5621_v55, %v5617_v42  ;;  %v5602_v11 = vsel %vm5601_vm4, %v6880_v13, %v5598_v20  ;;  %v6276_v55 = vld [vmem:[%s8799_s9] ss:$0 sm:$0xff] }
0x3628   :  { %v5643_v24 = vsub.f32 1.0, %v5622_v28  ;;  %v5607_v0 = vsel %vm5604_vm13, %v5606_v26, %v5602_v11  ;;  %v5655_v15 = vmul.f32 0.0, %v5622_v28 }
0x3629   :  { %v5642_v34 = vsub.f32 1.0, %v5607_v0  ;;  %v5654_v30 = vmul.f32 0.0, %v5607_v0 }
0x362a   :  { %v5653_v29 = vmul.f32 %v5649_v43, %v5643_v24 }
0x362c   :  { %v5657_v40 = vadd.f32 %v5655_v15, %v5653_v29 }
0x362e   :  { %v5669_v47 = vrot.slane %v5657_v40, 7 }
0x3656   :  { %v5569_v46 = vpop.permute.xlu0 %5568 }
0x3657   :  { %v5573_v33 = vmul.f32 %v5569_v46, %v5563_v35 }
0x3659   :  { %v5583_v52 = vadd.f32 %v8712_v48, %v5573_v33  ;;  %v5580_v48 = vmul.f32 %v5576_v2, %v8723_v12  ;;  %v6240_v12 = vld [vmem:[%s8796_s6 + $0x8] sm:$0xff] }
0x365a   :  { %5732 = vmatpush.bf16.msrb.mxu1 %v6240_v12 }
0x365b   :  { %v5660_v59 = vrot.slane %v5583_v52, 7 }
0x365e   :  { %v5647_v3 = vpop.permute.xlu0 %5646  ;;  %5733 = vmatpush.bf16.msrb.mxu1 %v6239_v49 }
0x365f   :  { %v5652_v53 = vmul.f32 %v5647_v3, %v5642_v34 }
0x3661   :  { %v5656_v9 = vadd.f32 %v5654_v30, %v5652_v53 }
0x3663   :  { %v6267_v1 = vpack.i.bf16 %v5669_v47, %v5656_v9 }
0x3665   :  { %6268 = vrot.lane.b32.xlu2 %v6267_v1, %s7020_s13 }
0x366e   :  { %v5567_v44 = vpop.permute.xlu2 %5566 }
0x366f   :  { %v5572_v63 = vmul.f32 %v5567_v44, %v5562_v17 }
0x3671   :  { %v5582_v27 = vadd.f32 %v5580_v48, %v5572_v63 }
0x3673   :  { %v6262_v5 = vpack.i.bf16 %v5660_v59, %v5582_v27 }
0x3675   :  { %6263 = vrot.lane.b32.xlu1 %v6262_v5, %s7023_s1 }
0x36bf   :  { %v6269_v32 = vpop.permute.xlu2 %6268 }
0x36c0   :  { %v6271_v38 = vunpack.i.h.bf16 %v6269_v32  ;;  %v6270_v45 = vunpack.i.l.bf16 %v6269_v32 }
0x36e7   :  { %v6264_v8 = vpop.permute.xlu1 %6263 }
0x36e8   :  { %v6266_v7 = vunpack.i.h.bf16 %v6264_v8  ;;  %v6265_v31 = vunpack.i.l.bf16 %v6264_v8 }
0x36ea   :  { %v5676_v21 = vsel %vm127_vm0, %v6265_v31, %v6270_v45  ;;  %v5677_v41 = vsel %vm127_vm0, %v6266_v7, %v6271_v38  ;;  %vm5822_vm0 = vcmask 9216  }
0x36eb   :  { %v5678_v37 = vpack.c.bf16 %v5677_v41, %v5676_v21 }
0x36ed   :  { %v5692_v19 = vshrl.u32 %v5678_v37, 16  ;;  %v5695_v60 = vshll.u32 %v5678_v37, 16 }
0x36ef   :  { %v5694_v62 = vrot.slane %v5692_v19, 3  ;;  %v5697_v13 = vrot.slane %v5695_v60, 4 }
0x36f1   :  { %v5698_v36 = vor.u32 %v5697_v13, %v5694_v62 }
0x36f3   :  { %6168 = vmatmul.msk.bf16.vlgmr.msrb.gmra.mxu1 %vm8853_vm7, %v5698_v36 }
0x3770   :  { %v5735_v14 = vpop.f32.mrf.mxu1 }
0x3771   :  { %v5736_v18 = vadd.f32 %v6275_v56, %v5735_v14 }
0x3773   :  { %v5739_v25 = vmax.f32 %v5736_v18, 0.0 }
0x3775   :  { %v5740_v54 = vpack.c.bf16 %v5739_v25, %v5739_v25 }
0x3777   :  { %5817 = vmatmul.bf16.vlgmr.msra.gmra.mxu2 %v5740_v54 }
0x3778   :  { %v5737_v42 = vpop.f32.mrf.mxu1 }
0x37fa   :  { %v5818_v20 = vpop.f32.mrf.mxu2 }
0x37fb   :  { %v5819_v28 = vadd.f32 %v6276_v55, %v5818_v20 }
0x37fd   :  { %5823 = vst.msk [vmem:[#allocation10] sm:$0x3] %vm5822_vm0, %v5819_v28 }
0x37fe   :  { %5834 = dma.vmem_to_hbm [thread:$0]  %s5830_s24, 32, %s5832_s8, [#allocation4]  }
0x3802   :  { %v5820_v58 = vpop.f32.mrf.mxu2 }
0x3803   :  { %7012 = dma.done.wait [#allocation4], 32  }
0x3804   :  { %7013 = vsyncadd [#allocation4], 4294967264 }
0x3805   :  { %5839 = vsyncpa [#allocation3], 1 }
0x3806   :  { %5840 = vsyncpa [#allocation6], 1 }
0x3807   :  { %5841 = vsyncpa [#allocation9], 1 }
0x3808   :  { %5842 = vsyncpa [#allocation4], 1 }

</bundles_post_ra>
